<compile_context>
chip_gen: v5e
topology: v5e:2x2
jax: 0.10.0
libtpu: 0.0.40
codegen_flags: <defaults>
</compile_context>

<pallas_src>
import functools

import jax
import jax.numpy as jnp
from jax import lax
from jax.experimental import pallas as pl
from jax.experimental.pallas import tpu as pltpu


def _iprm_kernel(tgt_ref, h_ref, w_ref, out_ref, m_sc, s_sc, t_sc, *, beta):
    vi = pl.program_id(1)
    nv = pl.num_programs(1)
    tile_v = w_ref.shape[-1]

    @pl.when(vi == 0)
    def _init():
        m_sc[...] = jnp.full_like(m_sc, -jnp.inf)
        s_sc[...] = jnp.zeros_like(s_sc)
        t_sc[...] = jnp.zeros_like(t_sc)

    # Both heads in one batched MXU op: bf16 (2, tm, d) @ (2, d, tv) -> f32 (2, tm, tv).
    logits = jnp.einsum(
        "bmd,bdv->bmv", h_ref[...], w_ref[...],
        preferred_element_type=jnp.float32,
    )

    # Online (streaming) logsumexp across vocab tiles.
    m_prev = m_sc[...]
    m_new = jnp.maximum(m_prev, jnp.max(logits, axis=-1, keepdims=True))
    s_sc[...] = (jnp.exp(m_prev - m_new) * s_sc[...]
                 + jnp.sum(jnp.exp(logits - m_new), axis=-1, keepdims=True))
    m_sc[...] = m_new

    # Gather logits[target] within this vocab tile via a lane-iota one-hot.
    tgt = tgt_ref[...]                                    # (tm, 1) int32; -1 == masked/pad
    col = vi * tile_v + lax.broadcasted_iota(jnp.int32, logits.shape, 2)
    t_sc[...] += jnp.sum(
        jnp.where(col == tgt[None, :, :], logits, 0.0), axis=-1, keepdims=True
    )

    @pl.when(vi == nv - 1)
    def _finalize():
        lse = m_sc[...] + jnp.log(s_sc[...])              # (2, tm, 1)
        lp = t_sc[...] - lse                              # (2, tm, 1) log p(target)
        reward = beta * (lp[0] - lp[1])                   # (tm, 1)
        reward = jnp.where(tgt >= 0, reward, 0.0)         # masked_fill(~mask, 0)
        # Broadcast over 128 lanes -> unmasked full-vreg stores; wrapper reads lane 0.
        out_ref[...] = jnp.broadcast_to(reward, out_ref.shape)


def implicit_rewards_pallas(h_model, h_refm, w_model, w_refm, target, *,
                            beta, tile_m=256, tile_v=None):
    """h_model/h_refm: (M, d) f32; w_model/w_refm: (d, V) f32; target: (M,) int32."""
    M, d = h_model.shape
    V = w_model.shape[1]

    if tile_v is None:
        tile_v = V if V <= 2048 else 2048
    if V % tile_v != 0:
        tile_v = V  # fall back to a single vocab tile

    M_pad = tile_m * pl.cdiv(M, tile_m)
    pad = M_pad - M

    # Stack both heads so the kernel issues one batched MXU op per grid step.
    h = jnp.stack([h_model, h_refm]).astype(jnp.bfloat16)        # (2, M, d)
    if pad:
        h = jnp.pad(h, ((0, 0), (0, pad), (0, 0)))
    w = jnp.stack([w_model, w_refm]).astype(jnp.bfloat16)        # (2, d, V)
    tgt2d = jnp.pad(target.astype(jnp.int32), (0, pad),
                    constant_values=-1).reshape(M_pad, 1)

    num_m = M_pad // tile_m
    num_v = V // tile_v

    # VMEM budget (double-buffered input/output tiles + scratch), with headroom,
    # capped safely below v7x's 64 MiB physical VMEM.
    block_bytes = (2 * (2 * tile_m * d * 2)          # h tile (bf16), 2 buffers
                   + 2 * (2 * d * tile_v * 2)        # w tile (bf16), 2 buffers
                   + 2 * (tile_m * 128 * 4)          # target tile (lane-padded)
                   + 2 * (tile_m * 128 * 4)          # out tile
                   + 3 * (2 * tile_m * 128 * 4))     # scratch (lane-padded)
    vmem_limit = int(min(max(4 * block_bytes, 32 * 1024 * 1024), 56 * 1024 * 1024))

    grid_spec = pltpu.PrefetchScalarGridSpec(
        num_scalar_prefetch=0,
        grid=(num_m, num_v),                                   # vocab (reduction) axis last
        in_specs=[
            pl.BlockSpec((tile_m, 1), lambda i, v: (i, 0)),        # target ids
            pl.BlockSpec((2, tile_m, d), lambda i, v: (0, i, 0)),  # hidden, both heads
            pl.BlockSpec((2, d, tile_v), lambda i, v: (0, 0, v)),  # vocab proj tiles
        ],
        out_specs=pl.BlockSpec((tile_m, 128), lambda i, v: (i, 0)),
        scratch_shapes=[pltpu.VMEM((2, tile_m, 1), jnp.float32)] * 3,  # m, s, tgt-logit
    )

    out = pl.pallas_call(
        functools.partial(_iprm_kernel, beta=beta),
        out_shape=jax.ShapeDtypeStruct((M_pad, 128), jnp.float32),
        grid_spec=grid_spec,
        compiler_params=pltpu.CompilerParams(
            dimension_semantics=("parallel", "arbitrary"),
            vmem_limit_bytes=vmem_limit,
        ),
    )(tgt2d, h, w)
    return out[:M, 0]


class ImplicitPRM:
    """JAX/Pallas port of palm_rlhf_pytorch ImplicitPRM with synthetic LM heads."""

    def __init__(self, vocab=256, dim=32, beta=0.1, key=jax.random.PRNGKey(0),
                 tile_m=256, tile_v=None):
        k1, k2, k3, k4 = jax.random.split(key, 4)
        scale_e = 1.0 / jnp.sqrt(dim)
        # model params
        self.embed_model = jax.random.normal(k1, (vocab, dim), jnp.float32) * scale_e
        self.proj_model = jax.random.normal(k2, (dim, vocab), jnp.float32) * scale_e
        # ref model params (a deepcopy analogue would give identically-zero rewards;
        # independent deterministic init keeps the rewards non-trivial)
        self.embed_ref = jax.random.normal(k3, (vocab, dim), jnp.float32) * scale_e
        self.proj_ref = jax.random.normal(k4, (dim, vocab), jnp.float32) * scale_e
        self.beta = beta
        self.dim = dim
        self.vocab = vocab
        self.tile_m = tile_m
        self.tile_v = tile_v

    def __call__(self, seq, labels=None):
        # seq: (b, n) int32 token ids; negative target positions are masked out
        b, n = seq.shape
        source_seq, target_seq = seq[:, :-1], seq[:, 1:]
        mask = target_seq >= 0

        src = jnp.maximum(source_seq, 0)  # safe embedding lookup
        # TODO(synk): the embedding gather could be fused into the kernel via
        # scalar-prefetched token ids + pl.Element row-gather BlockSpecs; kept in
        # the wrapper (XLA gather) since the synthetic LM head here is tiny.
        h_model = self.embed_model[src].reshape(b * (n - 1), self.dim)
        h_ref = self.embed_ref[src].reshape(b * (n - 1), self.dim)
        tgt_flat = target_seq.reshape(b * (n - 1))

        rewards = implicit_rewards_pallas(
            h_model, h_ref, self.proj_model, self.proj_ref, tgt_flat,
            beta=self.beta, tile_m=self.tile_m, tile_v=self.tile_v,
        ).reshape(b, n - 1)

        if labels is None:
            return rewards

        labels = labels.reshape(b, 1)
        loss = labels * jax.nn.log_sigmoid(rewards) + (1.0 - labels) * jax.nn.log_sigmoid(-rewards)
        # loss[mask].mean()
        return jnp.sum(jnp.where(mask, loss, 0.0)) / jnp.sum(mask)


def _reference_rewards(prm, seq):
    """Pure-JAX reference (same bf16 matmul / f32 softmax numerics as the kernel)."""
    b, n = seq.shape
    source_seq, target_seq = seq[:, :-1], seq[:, 1:]
    mask = target_seq >= 0
    src = jnp.maximum(source_seq, 0)
    tgt = jnp.maximum(target_seq, 0)

    def logprob(embed, proj):
        h = embed[src].astype(jnp.bfloat16)
        logits = jnp.einsum("bnd,dv->bnv", h, proj.astype(jnp.bfloat16),
                            preferred_element_type=jnp.float32)
        logp = jax.nn.log_softmax(logits, axis=-1)
        return jnp.take_along_axis(logp, tgt[..., None], axis=-1)[..., 0]

    r = prm.beta * (logprob(prm.embed_model, prm.proj_model)
                    - logprob(prm.embed_ref, prm.proj_ref))
    return jnp.where(mask, r, 0.0)


if __name__ == "__main__":
    key = jax.random.PRNGKey(0)
    k_seq, k_params = jax.random.split(key)

    # --- small test (single M tile, single vocab tile) ---
    vocab, dim = 256, 32
    b, n = 2, 9  # -> b*(n-1) = 16 token rows (padded to tile_m inside the wrapper)

    seq = jax.random.randint(k_seq, (b, n), 0, vocab, dtype=jnp.int32)
    seq = seq.at[1, -1].set(-1)  # masked target position

    prm = ImplicitPRM(vocab=vocab, dim=dim, beta=0.1, key=k_params)

    rewards = jax.block_until_ready(prm(seq))
    ref = _reference_rewards(prm, seq)
    assert rewards.shape == (b, n - 1)
    assert jnp.allclose(rewards, ref, atol=1e-3, rtol=1e-3), "mismatch vs reference"

    labels = jnp.array([1.0, 0.0], dtype=jnp.float32)
    loss = jax.block_until_ready(prm(seq, labels))
    assert jnp.isfinite(loss)

    # --- multi-tile test: several M tiles and vocab tiles (online logsumexp path) ---
    vocab2, dim2 = 512, 64
    b2, n2 = 4, 129  # -> 512 token rows
    k_seq2, k_params2 = jax.random.split(jax.random.PRNGKey(1))
    seq2 = jax.random.randint(k_seq2, (b2, n2), 0, vocab2, dtype=jnp.int32)
    seq2 = seq2.at[1, -1].set(-1)
    seq2 = seq2.at[2, -1].set(-1)

    prm2 = ImplicitPRM(vocab=vocab2, dim=dim2, beta=0.1, key=k_params2,
                       tile_m=128, tile_v=256)
    r2 = jax.block_until_ready(prm2(seq2))
    ref2 = _reference_rewards(prm2, seq2)
    assert jnp.allclose(r2, ref2, atol=1e-3, rtol=1e-3), "multi-tile mismatch vs reference"

    print("KERNEL_OK")
</pallas_src>

<mosaic_0001>
module attributes {stable_mosaic.version = 11 : i64} {
  func.func @_iprm_kernel(%arg0: i32, %arg1: i32, %arg2: memref<256x1xi32, #tpu.memory_space<vmem>>, %arg3: memref<2x256x32xbf16, #tpu.memory_space<vmem>>, %arg4: memref<2x32x256xbf16, #tpu.memory_space<vmem>>, %arg5: memref<256x128xf32, #tpu.memory_space<vmem>>, %arg6: memref<2x256x1xf32, #tpu.memory_space<vmem>>, %arg7: memref<2x256x1xf32, #tpu.memory_space<vmem>>, %arg8: memref<2x256x1xf32, #tpu.memory_space<vmem>>) attributes {dimension_semantics = [#tpu.dimension_semantics<parallel>, #tpu.dimension_semantics<arbitrary>], iteration_bounds = array<i64: 1, 1>, scalar_prefetch = 0 : i64, scratch_operands = 3 : i64, tpu.core_type = #tpu.core_type<tc>, window_params = [{transform_indices = @transform_0, window_bounds = array<i64: 256, 1>}, {transform_indices = @transform_1, window_bounds = array<i64: 2, 256, 32>}, {transform_indices = @transform_2, window_bounds = array<i64: 2, 32, 256>}, {transform_indices = @transform_3, window_bounds = array<i64: 256, 128>}]} {
    %c0_i32 = arith.constant 0 : i32
    %0 = arith.cmpi eq, %arg1, %c0_i32 : i32
    %1 = arith.extui %0 : i1 to i32
    %c0_i32_0 = arith.constant 0 : i32
    %2 = arith.cmpi ne, %1, %c0_i32_0 : i32
    scf.if %2 {
      %cst_32 = arith.constant 0xFF800000 : f32
      %40 = vector.broadcast %cst_32 : f32 to vector<2x256x1xf32>
      %c0_33 = arith.constant 0 : index
      %c0_34 = arith.constant 0 : index
      %c0_35 = arith.constant 0 : index
      %41 = vector.load %arg6[%c0_33, %c0_34, %c0_35] : memref<2x256x1xf32, #tpu.memory_space<vmem>>, vector<2x256x1xf32>
      tpu.vector_store %arg6[%c0_33, %c0_34, %c0_35], %40 {strides = array<i32>} : memref<2x256x1xf32, #tpu.memory_space<vmem>>, vector<2x256x1xf32>,
      %cst_36 = arith.constant 0.000000e+00 : f32
      %42 = vector.broadcast %cst_36 : f32 to vector<2x256x1xf32>
      %c0_37 = arith.constant 0 : index
      %c0_38 = arith.constant 0 : index
      %c0_39 = arith.constant 0 : index
      %43 = vector.load %arg7[%c0_37, %c0_38, %c0_39] : memref<2x256x1xf32, #tpu.memory_space<vmem>>, vector<2x256x1xf32>
      tpu.vector_store %arg7[%c0_37, %c0_38, %c0_39], %42 {strides = array<i32>} : memref<2x256x1xf32, #tpu.memory_space<vmem>>, vector<2x256x1xf32>,
      %cst_40 = arith.constant 0.000000e+00 : f32
      %44 = vector.broadcast %cst_40 : f32 to vector<2x256x1xf32>
      %c0_41 = arith.constant 0 : index
      %c0_42 = arith.constant 0 : index
      %c0_43 = arith.constant 0 : index
      %45 = vector.load %arg8[%c0_41, %c0_42, %c0_43] : memref<2x256x1xf32, #tpu.memory_space<vmem>>, vector<2x256x1xf32>
      tpu.vector_store %arg8[%c0_41, %c0_42, %c0_43], %44 {strides = array<i32>} : memref<2x256x1xf32, #tpu.memory_space<vmem>>, vector<2x256x1xf32>,
    } else {
    }
    %c0 = arith.constant 0 : index
    %c0_1 = arith.constant 0 : index
    %c0_2 = arith.constant 0 : index
    %3 = vector.load %arg3[%c0, %c0_1, %c0_2] : memref<2x256x32xbf16, #tpu.memory_space<vmem>>, vector<2x256x32xbf16>
    %c0_3 = arith.constant 0 : index
    %c0_4 = arith.constant 0 : index
    %c0_5 = arith.constant 0 : index
    %4 = vector.load %arg4[%c0_3, %c0_4, %c0_5] : memref<2x32x256xbf16, #tpu.memory_space<vmem>>, vector<2x32x256xbf16>
    "tpu.trace_start"() <{level = 10 : i32, message = "bmd,bdv->bmv"}> : () -> ()
    %cst = arith.constant dense<0.000000e+00> : vector<2x256x256xf32>
    %5 = tpu.matmul %3, %4, %cst {dimension_numbers = #tpu.dot_dimension_numbers<[2], [1], [1], [2], [0, 0, 0, 1, 1, 2], [0], [0]>} : vector<2x256x32xbf16>, vector<2x32x256xbf16>, vector<2x256x256xf32> -> vector<2x256x256xf32>
    "tpu.trace_stop"() : () -> ()
    %c0_6 = arith.constant 0 : index
    %c0_7 = arith.constant 0 : index
    %c0_8 = arith.constant 0 : index
    %6 = vector.load %arg6[%c0_6, %c0_7, %c0_8] : memref<2x256x1xf32, #tpu.memory_space<vmem>>, vector<2x256x1xf32>
    %cst_9 = arith.constant dense<0xFF800000> : vector<2x256xf32>
    %7 = vector.multi_reduction <maximumf>, %5, %cst_9 [2] : vector<2x256x256xf32> to vector<2x256xf32>
    %8 = vector.shape_cast %7 : vector<2x256xf32> to vector<2x256x1xf32>
    %9 = arith.maximumf %6, %8 : vector<2x256x1xf32>
    %10 = arith.subf %6, %9 : vector<2x256x1xf32>
    %11 = math.exp %10 : vector<2x256x1xf32>
    %c0_10 = arith.constant 0 : index
    %c0_11 = arith.constant 0 : index
    %c0_12 = arith.constant 0 : index
    %12 = vector.load %arg7[%c0_10, %c0_11, %c0_12] : memref<2x256x1xf32, #tpu.memory_space<vmem>>, vector<2x256x1xf32>
    %13 = arith.mulf %11, %12 : vector<2x256x1xf32>
    %14 = vector.broadcast %9 : vector<2x256x1xf32> to vector<2x256x256xf32>
    %15 = arith.subf %5, %14 : vector<2x256x256xf32>
    %16 = math.exp %15 : vector<2x256x256xf32>
    %cst_13 = arith.constant dense<0.000000e+00> : vector<2x256xf32>
    %17 = vector.multi_reduction <add>, %16, %cst_13 [2] : vector<2x256x256xf32> to vector<2x256xf32>
    %18 = vector.shape_cast %17 : vector<2x256xf32> to vector<2x256x1xf32>
    %19 = arith.addf %13, %18 : vector<2x256x1xf32>
    %c0_14 = arith.constant 0 : index
    %c0_15 = arith.constant 0 : index
    %c0_16 = arith.constant 0 : index
    %20 = vector.load %arg7[%c0_14, %c0_15, %c0_16] : memref<2x256x1xf32, #tpu.memory_space<vmem>>, vector<2x256x1xf32>
    tpu.vector_store %arg7[%c0_14, %c0_15, %c0_16], %19 {strides = array<i32>} : memref<2x256x1xf32, #tpu.memory_space<vmem>>, vector<2x256x1xf32>,
    %c0_17 = arith.constant 0 : index
    %c0_18 = arith.constant 0 : index
    %c0_19 = arith.constant 0 : index
    %21 = vector.load %arg6[%c0_17, %c0_18, %c0_19] : memref<2x256x1xf32, #tpu.memory_space<vmem>>, vector<2x256x1xf32>
    tpu.vector_store %arg6[%c0_17, %c0_18, %c0_19], %9 {strides = array<i32>} : memref<2x256x1xf32, #tpu.memory_space<vmem>>, vector<2x256x1xf32>,
    %c0_20 = arith.constant 0 : index
    %c0_21 = arith.constant 0 : index
    %22 = vector.load %arg2[%c0_20, %c0_21] : memref<256x1xi32, #tpu.memory_space<vmem>>, vector<256x1xi32>
    %c256_i32 = arith.constant 256 : i32
    %23 = arith.muli %arg1, %c256_i32 : i32
    %24 = tpu.iota {dimensions = array<i32: 2>} : vector<2x256x256xi32>
    %25 = vector.broadcast %23 : i32 to vector<2x256x256xi32>
    %26 = arith.addi %25, %24 : vector<2x256x256xi32>
    %c0_22 = arith.constant 0 : index
    %c0_23 = arith.constant 0 : index
    %c0_24 = arith.constant 0 : index
    %27 = vector.load %arg8[%c0_22, %c0_23, %c0_24] : memref<2x256x1xf32, #tpu.memory_space<vmem>>, vector<2x256x1xf32>
    %28 = vector.shape_cast %22 : vector<256x1xi32> to vector<1x256x1xi32>
    %29 = vector.broadcast %28 : vector<1x256x1xi32> to vector<2x256x256xi32>
    %30 = arith.cmpi eq, %26, %29 : vector<2x256x256xi32>
    %cst_25 = arith.constant 0.000000e+00 : f32
    %31 = vector.broadcast %cst_25 : f32 to vector<2x256x256xf32>
    %32 = arith.select %30, %5, %31 : vector<2x256x256xi1>, vector<2x256x256xf32>
    %cst_26 = arith.constant dense<0.000000e+00> : vector<2x256xf32>
    %33 = vector.multi_reduction <add>, %32, %cst_26 [2] : vector<2x256x256xf32> to vector<2x256xf32>
    %34 = vector.shape_cast %33 : vector<2x256xf32> to vector<2x256x1xf32>
    %35 = arith.addf %27, %34 : vector<2x256x1xf32>
    %c0_27 = arith.constant 0 : index
    %c0_28 = arith.constant 0 : index
    %c0_29 = arith.constant 0 : index
    %36 = vector.load %arg8[%c0_27, %c0_28, %c0_29] : memref<2x256x1xf32, #tpu.memory_space<vmem>>, vector<2x256x1xf32>
    tpu.vector_store %arg8[%c0_27, %c0_28, %c0_29], %35 {strides = array<i32>} : memref<2x256x1xf32, #tpu.memory_space<vmem>>, vector<2x256x1xf32>,
    %c0_i32_30 = arith.constant 0 : i32
    %37 = arith.cmpi eq, %arg1, %c0_i32_30 : i32
    %38 = arith.extui %37 : i1 to i32
    %c0_i32_31 = arith.constant 0 : i32
    %39 = arith.cmpi ne, %38, %c0_i32_31 : i32
    scf.if %39 {
      %c0_32 = arith.constant 0 : index
      %c0_33 = arith.constant 0 : index
      %c0_34 = arith.constant 0 : index
      %40 = vector.load %arg6[%c0_32, %c0_33, %c0_34] : memref<2x256x1xf32, #tpu.memory_space<vmem>>, vector<2x256x1xf32>
      %c0_35 = arith.constant 0 : index
      %c0_36 = arith.constant 0 : index
      %c0_37 = arith.constant 0 : index
      %41 = vector.load %arg7[%c0_35, %c0_36, %c0_37] : memref<2x256x1xf32, #tpu.memory_space<vmem>>, vector<2x256x1xf32>
      %42 = math.log %41 : vector<2x256x1xf32>
      %43 = arith.addf %40, %42 : vector<2x256x1xf32>
      %c0_38 = arith.constant 0 : index
      %c0_39 = arith.constant 0 : index
      %c0_40 = arith.constant 0 : index
      %44 = vector.load %arg8[%c0_38, %c0_39, %c0_40] : memref<2x256x1xf32, #tpu.memory_space<vmem>>, vector<2x256x1xf32>
      %45 = arith.subf %44, %43 : vector<2x256x1xf32>
      %46 = vector.extract_strided_slice %45 {offsets = [0, 0, 0], sizes = [1, 256, 1], strides = [1, 1, 1]} : vector<2x256x1xf32> to vector<1x256x1xf32>
      %47 = vector.shape_cast %46 : vector<1x256x1xf32> to vector<256x1xf32>
      %48 = vector.extract_strided_slice %45 {offsets = [1, 0, 0], sizes = [1, 256, 1], strides = [1, 1, 1]} : vector<2x256x1xf32> to vector<1x256x1xf32>
      %49 = vector.shape_cast %48 : vector<1x256x1xf32> to vector<256x1xf32>
      %50 = arith.subf %47, %49 : vector<256x1xf32>
      %cst_41 = arith.constant 1.000000e-01 : f32
      %51 = vector.broadcast %cst_41 : f32 to vector<256x1xf32>
      %52 = arith.mulf %51, %50 : vector<256x1xf32>
      %c0_i32_42 = arith.constant 0 : i32
      %53 = vector.broadcast %c0_i32_42 : i32 to vector<256x1xi32>
      %54 = arith.cmpi sge, %22, %53 : vector<256x1xi32>
      %cst_43 = arith.constant 0.000000e+00 : f32
      %55 = vector.broadcast %cst_43 : f32 to vector<256x1xf32>
      %56 = arith.select %54, %52, %55 : vector<256x1xi1>, vector<256x1xf32>
      %57 = vector.shape_cast %56 : vector<256x1xf32> to vector<256x1xf32>
      %58 = vector.broadcast %57 : vector<256x1xf32> to vector<256x128xf32>
      %c0_44 = arith.constant 0 : index
      %c0_45 = arith.constant 0 : index
      %59 = vector.load %arg5[%c0_44, %c0_45] : memref<256x128xf32, #tpu.memory_space<vmem>>, vector<256x128xf32>
      tpu.vector_store %arg5[%c0_44, %c0_45], %58 {strides = array<i32>} : memref<256x128xf32, #tpu.memory_space<vmem>>, vector<256x128xf32>,
    } else {
    }
    return
  }
  func.func @transform_0(%arg0: i32, %arg1: i32) -> (i32, i32) {
    %c0_i32 = arith.constant 0 : i32
    %c0_i32_0 = arith.constant 0 : i32
    return %arg0, %c0_i32 : i32, i32
  }
  func.func @transform_1(%arg0: i32, %arg1: i32) -> (i32, i32, i32) {
    %c0_i32 = arith.constant 0 : i32
    %c0_i32_0 = arith.constant 0 : i32
    %c0_i32_1 = arith.constant 0 : i32
    return %c0_i32, %arg0, %c0_i32_0 : i32, i32, i32
  }
  func.func @transform_2(%arg0: i32, %arg1: i32) -> (i32, i32, i32) {
    %c0_i32 = arith.constant 0 : i32
    %c0_i32_0 = arith.constant 0 : i32
    %c0_i32_1 = arith.constant 0 : i32
    return %c0_i32, %c0_i32_0, %arg1 : i32, i32, i32
  }
  func.func @transform_3(%arg0: i32, %arg1: i32) -> (i32, i32) {
    %c0_i32 = arith.constant 0 : i32
    %c0_i32_0 = arith.constant 0 : i32
    return %arg0, %c0_i32 : i32, i32
  }
}

</mosaic_0001>

<bundles_post_ra>
// kernel: tpu_custom_call.1
= control target key start
LH: loop header
LB: loop body
LE: loop exit
PB: predicated region body
PF: predicated region fallthrough
CT: control target
= control target key end

     0   :  { %v5010_v25 = vmov 0   ;;  %vm385_vm0 = vcmask 261120   ;;  %s8253_s0 = inlined_call_operand.vmem [shape: s32[256,1], index: 0, kind: input, shape index: {}]   ;;  %s8254_s1 = inlined_call_operand.vmem [shape: bf16[2,256,32], index: 1, kind: input, shape index: {}]   ;;  %s8255_s2 = inlined_call_operand.vmem [shape: bf16[2,32,256], index: 2, kind: input, shape index: {}]   ;;  %s8256_s3 = inlined_call_operand.hbm [shape: f32[256,128], index: 3, kind: output, shape index: {}]  }
   0x1   :  { %v4241_v0 = vld [vmem:[%s8255_s2 + $0x10] sm:$0xf]  ;;  %v4426_v1 = vld [vmem:[%s8255_s2 + $0x14] sm:$0xf0]  ;;  %v4425_v2 = vld [vmem:[%s8255_s2 + $0x14] sm:$0xf]  ;;  %4437 = vset.pattern.permute.xlu1 %v5010_v25  ;;  %4439 = vset.pattern.permute.xlu0 %v5010_v25 }
   0x2   :  { %v4242_v3 = vor.u32 %v4426_v1, %v4241_v0  ;;  %v4243_v4 = vld [vmem:[%s8255_s2 + $0x18] sm:$0xf0]  ;;  %v4353_v5 = vld [vmem:[%s8255_s2 + $0x30] sm:$0xf]  ;;  %v4430_v6 = vld [vmem:[%s8255_s2 + $0x34] sm:$0xf0] }
   0x3   :  { %v4246_v7 = vor.u32 %v4425_v2, %v4243_v4  ;;  %v4354_v8 = vor.u32 %v4430_v6, %v4353_v5  ;;  %v4429_v9 = vld [vmem:[%s8255_s2 + $0x34] sm:$0xf]  ;;  %v4355_v10 = vld [vmem:[%s8255_s2 + $0x38] sm:$0xf0]  ;;  %v4233_v11 = vld [vmem:[%s8255_s2] sm:$0xf] }
   0x4   :  { %440 = vmatpush.bf16.msra.mxu0 %v4242_v3  ;;  %v4358_v12 = vor.u32 %v4429_v9, %v4355_v10  ;;  %v4424_v13 = vld [vmem:[%s8255_s2 + $0x4] sm:$0xf0]  ;;  %v4423_v14 = vld [vmem:[%s8255_s2 + $0x4] sm:$0xf]  ;;  %v4235_v15 = vld [vmem:[%s8255_s2 + $0x8] sm:$0xf0] }
   0x5   :  { %529 = vmatpush.bf16.msra.mxu1 %v4246_v7  ;;  %766 = vmatpush.bf16.msra.mxu2 %v4354_v8  ;;  %v4234_v16 = vor.u32 %v4424_v13, %v4233_v11  ;;  %v4238_v17 = vor.u32 %v4423_v14, %v4235_v15  ;;  %v4345_v18 = vld [vmem:[%s8255_s2 + $0x20] sm:$0xf]  ;;  %v4428_v19 = vld [vmem:[%s8255_s2 + $0x24] sm:$0xf0]  ;;  %v4427_v20 = vld [vmem:[%s8255_s2 + $0x24] sm:$0xf] }
   0x6   :  { %855 = vmatpush.bf16.msra.mxu3 %v4358_v12  ;;  %v4346_v21 = vor.u32 %v4428_v19, %v4345_v18  ;;  %v4347_v22 = vld [vmem:[%s8255_s2 + $0x28] sm:$0xf0]  ;;  %v4391_v24 = vld [vmem:[%s8254_s1] sm:$0xff]  ;;  %v2669_v28 = vld [vmem:[%s8253_s0 + $0x10] sm:$0xff] }
   0x7   :  { %v4350_v23 = vor.u32 %v4427_v20, %v4347_v22  ;;  %v2667_v26 = vld [vmem:[%s8253_s0] sm:$0xff] }
   0x8   :  { %441 = vmatpush.bf16.msra.mxu0 %v4234_v16  ;;  %v4407_v27 = vld [vmem:[%s8254_s1 + $0x80] sm:$0xff]  ;;  %2771 = vperm.xlu1 %4437, %v2667_v26  }
   0x9   :  { %8 = vsyncpa [#allocation6], 0  ;;  %530 = vmatpush.bf16.msra.mxu1 %v4238_v17  ;;  %767 = vmatpush.bf16.msra.mxu2 %v4346_v21  ;;  %v2670_v29 = vld [vmem:[%s8253_s0 + $0x18] sm:$0xff]  ;;  %v2668_v30 = vld [vmem:[%s8253_s0 + $0x8] sm:$0xff]  ;;  %v2700_v7 = vlaneseq  ;;  %vm20_vm11 = vcmask 7168   ;;  %s4155_s11 = sshll.u32 %s8256_s3, 4  ;;  %s4156_s11 = int_to_ptr.hbm [resolvable:$true] %s4155_s11 }
   0xa   :  { %856 = vmatpush.bf16.msra.mxu3 %v4350_v23  ;;  %2777 = vperm.xlu0 %4439, %v2669_v28   ;;  %v2671_v31 = vld [vmem:[%s8253_s0 + $0x20] sm:$0xff]  ;;  %v4392_v32 = vld [vmem:[%s8254_s1 + $0x8] sm:$0xff]  ;;  %v4393_v34 = vld [vmem:[%s8254_s1 + $0x10] sm:$0xff]  ;;  %s5014_s12 = smov 128   ;;  %s5015_s13 = smov 8  }
   0xb   :  { %4247 = vmatmul.msk.bf16.vlgmr.msra.gmra.mxu0 %vm385_vm0, %v4391_v24  ;;  %4438 = vset.pattern.permute.xlu2 %v5010_v25  ;;  %v4408_v33 = vld [vmem:[%s8254_s1 + $0x88] sm:$0xff]  ;;  %v4409_v35 = vld [vmem:[%s8254_s1 + $0x90] sm:$0xff]  ;;  %v4394_v36 = vld [vmem:[%s8254_s1 + $0x18] sm:$0xff]  ;;  %v5241_v11 = vand.u32 127, %v2700_v7 }
   0xc   :  { %4263 = vmatmul.msk.bf16.vlgmr.msra.gmra.mxu1 %vm385_vm0, %v4391_v24  ;;  %4359 = vmatmul.msk.bf16.vlgmr.msra.gmra.mxu2 %vm385_vm0, %v4407_v27  ;;  %v4410_v37 = vld [vmem:[%s8254_s1 + $0x98] sm:$0xff]  ;;  %v4395_v38 = vld [vmem:[%s8254_s1 + $0x20] sm:$0xff]  ;;  %v4396_v40 = vld [vmem:[%s8254_s1 + $0x28] sm:$0xff] }
   0xd   :  { %4375 = vmatmul.msk.bf16.vlgmr.msra.gmra.mxu3 %vm385_vm0, %v4407_v27  ;;  %2774 = vperm.xlu2 %4438, %v2668_v30   ;;  %v4411_v39 = vld [vmem:[%s8254_s1 + $0xa0] sm:$0xff]  ;;  %v4412_v41 = vld [vmem:[%s8254_s1 + $0xa8] sm:$0xff]  ;;  %v4397_v42 = vld [vmem:[%s8254_s1 + $0x30] sm:$0xff]  ;;  %8668 = vst [vmem:[#allocation19_spill] sm:$0xff] %v5241_v11  ;;  %v5252_v16 = vadd.s32 128, %v5241_v11 }
   0xe   :  { %v4413_v43 = vld [vmem:[%s8254_s1 + $0xb0] sm:$0xff]  ;;  %v4398_v44 = vld [vmem:[%s8254_s1 + $0x38] sm:$0xff]  ;;  %v4399_v61 = vld [vmem:[%s8254_s1 + $0x40] sm:$0xff] }
   0xf   :  { %v4414_v45 = vld [vmem:[%s8254_s1 + $0xb8] sm:$0xff]  ;;  %v4415_v62 = vld [vmem:[%s8254_s1 + $0xc0] sm:$0xff]  ;;  %8670 = vst [vmem:[#allocation21_spill] sm:$0xff] %v5252_v16 }
  0x10   :  { %2780 = vperm.xlu1 %4437, %v2670_v29  }
  0x12   :  { %2783 = vperm.xlu0 %4439, %v2671_v31  }
  0x1b   :  { %4248 = vmatmul.msk.bf16.gmra.mxu0 %vm385_vm0, %v4392_v32 }
  0x1c   :  { %4264 = vmatmul.msk.bf16.gmra.mxu1 %vm385_vm0, %v4392_v32  ;;  %4360 = vmatmul.msk.bf16.gmra.mxu2 %vm385_vm0, %v4408_v33 }
  0x1d   :  { %4376 = vmatmul.msk.bf16.gmra.mxu3 %vm385_vm0, %v4408_v33 }
  0x2b   :  { %4249 = vmatmul.msk.bf16.gmra.mxu0 %vm385_vm0, %v4393_v34 }
  0x2c   :  { %4265 = vmatmul.msk.bf16.gmra.mxu1 %vm385_vm0, %v4393_v34  ;;  %4361 = vmatmul.msk.bf16.gmra.mxu2 %vm385_vm0, %v4409_v35 }
  0x2d   :  { %4377 = vmatmul.msk.bf16.gmra.mxu3 %vm385_vm0, %v4409_v35 }
  0x3b   :  { %4250 = vmatmul.msk.bf16.gmra.mxu0 %vm385_vm0, %v4394_v36 }
  0x3c   :  { %4266 = vmatmul.msk.bf16.gmra.mxu1 %vm385_vm0, %v4394_v36  ;;  %4362 = vmatmul.msk.bf16.gmra.mxu2 %vm385_vm0, %v4410_v37 }
  0x3d   :  { %4378 = vmatmul.msk.bf16.gmra.mxu3 %vm385_vm0, %v4410_v37 }
  0x4b   :  { %4251 = vmatmul.msk.bf16.gmra.mxu0 %vm385_vm0, %v4395_v38 }
  0x4c   :  { %4267 = vmatmul.msk.bf16.gmra.mxu1 %vm385_vm0, %v4395_v38  ;;  %4363 = vmatmul.msk.bf16.gmra.mxu2 %vm385_vm0, %v4411_v39 }
  0x4d   :  { %4379 = vmatmul.msk.bf16.gmra.mxu3 %vm385_vm0, %v4411_v39 }
  0x5b   :  { %4252 = vmatmul.msk.bf16.gmra.mxu0 %vm385_vm0, %v4396_v40 }
  0x5c   :  { %4268 = vmatmul.msk.bf16.gmra.mxu1 %vm385_vm0, %v4396_v40  ;;  %4364 = vmatmul.msk.bf16.gmra.mxu2 %vm385_vm0, %v4412_v41 }
  0x5d   :  { %4380 = vmatmul.msk.bf16.gmra.mxu3 %vm385_vm0, %v4412_v41 }
  0x67   :  { %v5288_v30 = vpop.permute.xlu2 %2774 }
  0x68   :  { %8678 = vst [vmem:[#allocation29_spill] sm:$0xff] %v5288_v30  ;;  %vm2868_vm3 = vcmp.eq.s32.totalorder %v5241_v11, %v5288_v30  ;;  %vm2869_vm4 = vcmp.eq.s32.totalorder %v5252_v16, %v5288_v30 }
  0x6b   :  { %4253 = vmatmul.msk.bf16.gmra.mxu0 %vm385_vm0, %v4397_v42 }
  0x6c   :  { %4269 = vmatmul.msk.bf16.gmra.mxu1 %vm385_vm0, %v4397_v42  ;;  %4365 = vmatmul.msk.bf16.gmra.mxu2 %vm385_vm0, %v4413_v43 }
  0x6d   :  { %4381 = vmatmul.msk.bf16.gmra.mxu3 %vm385_vm0, %v4413_v43 }
  0x7a   :  { %v5258_v19 = vpop.permute.xlu1 %2771 }
  0x7b   :  { %4254 = vmatmul.msk.bf16.gmra.mxu0 %vm385_vm0, %v4398_v44  ;;  %8672 = vst [vmem:[#allocation23_spill] sm:$0xff] %v5258_v19  ;;  %vm2866_vm1 = vcmp.eq.s32.totalorder %v5241_v11, %v5258_v19  ;;  %vm8656_vm2 = vcmp.eq.s32.totalorder %v5252_v16, %v5258_v19 }
  0x7c   :  { %4270 = vmatmul.msk.bf16.gmra.mxu1 %vm385_vm0, %v4398_v44  ;;  %4366 = vmatmul.msk.bf16.gmra.mxu2 %vm385_vm0, %v4414_v45  ;;  %v5304_v36 = vpop.permute.xlu0 %2777 }
  0x7d   :  { %4382 = vmatmul.msk.bf16.gmra.mxu3 %vm385_vm0, %v4414_v45  ;;  %8683 = vst [vmem:[#allocation34_spill] sm:$0xff] %v5304_v36  ;;  %vm2870_vm5 = vcmp.eq.s32.totalorder %v5241_v11, %v5304_v36  ;;  %vm2871_vm6 = vcmp.eq.s32.totalorder %v5252_v16, %v5304_v36  ;;  %v4416_v36 = vld [vmem:[%s8254_s1 + $0xc8] sm:$0xff] }
  0x88   :  { %v5179_v46 = vpop.f32.mrf.mxu0 }
  0x89   :  { %8657 = vst [vmem:[#allocation8_spill] sm:$0xff] %v5179_v46  ;;  %v5181_v47 = vpop.f32.mrf.mxu1 }
  0x8a   :  { %8658 = vst [vmem:[#allocation9_spill] sm:$0xff] %v5181_v47  ;;  %v1002_v48 = vmax.f32 %v5179_v46, %v5181_v47 }
  0x8b   :  { %4255 = vmatmul.msk.bf16.gmra.mxu0 %vm385_vm0, %v4399_v61 }
  0x8c   :  { %1003 = vmax.xlane.f32.xlu0 %v1002_v48  ;;  %4271 = vmatmul.msk.bf16.gmra.mxu1 %vm385_vm0, %v4399_v61 }
  0x8d   :  { %4367 = vmatmul.msk.bf16.gmra.mxu2 %vm385_vm0, %v4415_v62  ;;  %4383 = vmatmul.msk.bf16.gmra.mxu3 %vm385_vm0, %v4415_v62 }
  0x8f   :  { %v5185_v49 = vpop.f32.mrf.mxu2 }
  0x90   :  { %v5187_v50 = vpop.f32.mrf.mxu3  ;;  %v5189_v51 = vpop.f32.mrf.mxu0  ;;  %v2994_v21 = vsel %vm2866_vm1, %v5185_v49, 0.0 }
  0x91   :  { %8659 = vst [vmem:[#allocation10_spill] sm:$0xff] %v5189_v51  ;;  %v5191_v52 = vpop.f32.mrf.mxu1  ;;  %v1098_v53 = vmax.f32 %v5185_v49, %v5187_v50  ;;  %v2995_v22 = vsel %vm8656_vm2, %v5187_v50, 0.0 }
  0x92   :  { %8660 = vst [vmem:[#allocation11_spill] sm:$0xff] %v5191_v52  ;;  %v1005_v54 = vmax.f32 %v5189_v51, %v5191_v52  ;;  %v5286_v29 = vadd.f32 %v2995_v22, %v2994_v21 }
  0x93   :  { %1099 = vmax.xlane.f32.xlu2 %v1098_v53 }
  0x94   :  { %1006 = vmax.xlane.f32.xlu0 %v1005_v54  ;;  %8677 = vst [vmem:[#allocation28_spill] sm:$0xff] %v5286_v29 }
  0x97   :  { %v5197_v55 = vpop.f32.mrf.mxu2 }
  0x98   :  { %v5199_v56 = vpop.f32.mrf.mxu3  ;;  %v5201_v57 = vpop.f32.mrf.mxu0  ;;  %v2996_v38 = vsel %vm2868_vm3, %v5197_v55, 0.0 }
  0x99   :  { %8661 = vst [vmem:[#allocation12_spill] sm:$0xff] %v5201_v57  ;;  %v5203_v58 = vpop.f32.mrf.mxu1  ;;  %v1101_v59 = vmax.f32 %v5197_v55, %v5199_v56  ;;  %v2997_v39 = vsel %vm2869_vm4, %v5199_v56, 0.0 }
  0x9a   :  { %8662 = vst [vmem:[#allocation13_spill] sm:$0xff] %v5203_v58  ;;  %v1008_v60 = vmax.f32 %v5201_v57, %v5203_v58  ;;  %v5316_v40 = vadd.f32 %v2997_v39, %v2996_v38 }
  0x9c   :  { %1102 = vmax.xlane.f32.xlu0 %v1101_v59  ;;  %1009 = vmax.xlane.f32.xlu1 %v1008_v60  ;;  %8684 = vst [vmem:[#allocation35_spill] sm:$0xff] %v5316_v40  ;;  %v5344_v60 = vpop.permute.xlu1 %2780 }
  0x9d   :  { %8690 = vst [vmem:[#allocation41_spill] sm:$0xff] %v5344_v60  ;;  %vm8649_vm7 = vcmp.eq.s32.totalorder %v5241_v11, %v5344_v60  ;;  %vm8640_vm8 = vcmp.eq.s32.totalorder %v5252_v16, %v5344_v60  ;;  %4368 = vmatmul.msk.bf16.gmra.mxu2 %vm385_vm0, %v4416_v36  ;;  %4384 = vmatmul.msk.bf16.gmra.mxu3 %vm385_vm0, %v4416_v36 }
  0x9f   :  { %v5219_v63 = vpop.f32.mrf.mxu2 }
  0xa0   :  { %v5221_v0 = vpop.f32.mrf.mxu3  ;;  %v5223_v1 = vpop.f32.mrf.mxu0  ;;  %v2998_v42 = vsel %vm2870_vm5, %v5219_v63, 0.0 }
  0xa1   :  { %8663 = vst [vmem:[#allocation14_spill] sm:$0xff] %v5223_v1  ;;  %v5225_v2 = vpop.f32.mrf.mxu1  ;;  %v1104_v3 = vmax.f32 %v5219_v63, %v5221_v0  ;;  %v2999_v43 = vsel %vm2871_vm6, %v5221_v0, 0.0 }
  0xa2   :  { %8664 = vst [vmem:[#allocation15_spill] sm:$0xff] %v5225_v2  ;;  %v1011_v10 = vmax.f32 %v5223_v1, %v5225_v2  ;;  %v5342_v59 = vadd.f32 %v2999_v43, %v2998_v42 }
  0xa4   :  { %1105 = vmax.xlane.f32.xlu1 %v1104_v3  ;;  %8689 = vst [vmem:[#allocation40_spill] sm:$0xff] %v5342_v59 }
  0xa7   :  { %v5229_v4 = vpop.f32.mrf.mxu2 }
  0xa8   :  { %v5231_v5 = vpop.f32.mrf.mxu3  ;;  %v5233_v6 = vpop.f32.mrf.mxu0 }
  0xa9   :  { %8665 = vst [vmem:[#allocation16_spill] sm:$0xff] %v5231_v5  ;;  %v5235_v8 = vpop.f32.mrf.mxu1  ;;  %v1107_v9 = vmax.f32 %v5229_v4, %v5231_v5  ;;  %v3001_v21 = vsel %vm8640_vm8, %v5231_v5, 0.0 }
  0xaa   :  { %8666 = vst [vmem:[#allocation17_spill] sm:$0xff] %v5233_v6  ;;  %v1014_v13 = vmax.f32 %v5233_v6, %v5235_v8 }
  0xab   :  { %8667 = vst [vmem:[#allocation18_spill] sm:$0xff] %v5235_v8  ;;  %1108 = vmax.xlane.f32.xlu2 %v1107_v9 }
  0xac   :  { %1012 = vmax.xlane.f32.xlu1 %v1011_v10  ;;  %v5360_v10 = vpop.permute.xlu0 %2783 }
  0xad   :  { %8695 = vst [vmem:[#allocation46_spill] sm:$0xff] %v5360_v10  ;;  %vm8653_vm9 = vcmp.eq.s32.totalorder %v5241_v11, %v5360_v10  ;;  %vm8650_vm10 = vcmp.eq.s32.totalorder %v5252_v16, %v5360_v10 }
  0xaf   :  { %v5243_v12 = vpop.f32.mrf.mxu2 }
  0xb0   :  { %v5247_v14 = vpop.f32.mrf.mxu3  ;;  %v5249_v15 = vpop.f32.mrf.mxu0 }
  0xb1   :  { %8669 = vst [vmem:[#allocation20_spill] sm:$0xff] %v5249_v15  ;;  %v5254_v17 = vpop.f32.mrf.mxu1  ;;  %v1110_v18 = vmax.f32 %v5243_v12, %v5247_v14 }
  0xb2   :  { %8671 = vst [vmem:[#allocation22_spill] sm:$0xff] %v5254_v17  ;;  %v1017_v27 = vmax.f32 %v5249_v15, %v5254_v17 }
  0xb3   :  { %1111 = vmax.xlane.f32.xlu0 %v1110_v18  ;;  %1015 = vmax.xlane.f32.xlu2 %v1014_v13  ;;  %v3000_v18 = vsel %vm8649_vm7, %v5229_v4, 0.0 }
  0xb4   :  { %v5372_v22 = vadd.f32 %v3001_v21, %v3000_v18 }
  0xb6   :  { %8696 = vst [vmem:[#allocation47_spill] sm:$0xff] %v5372_v22 }
  0xb7   :  { %v5264_v20 = vpop.f32.mrf.mxu2 }
  0xb8   :  { %8673 = vst [vmem:[#allocation24_spill] sm:$0xff] %v5264_v20  ;;  %v5274_v23 = vpop.f32.mrf.mxu3  ;;  %v5276_v24 = vpop.f32.mrf.mxu0 }
  0xb9   :  { %8674 = vst [vmem:[#allocation25_spill] sm:$0xff] %v5274_v23  ;;  %v5278_v25 = vpop.f32.mrf.mxu1  ;;  %v1113_v26 = vmax.f32 %v5264_v20, %v5274_v23 }
  0xba   :  { %8675 = vst [vmem:[#allocation26_spill] sm:$0xff] %v5276_v24  ;;  %v1020_v28 = vmax.f32 %v5276_v24, %v5278_v25 }
  0xbb   :  { %8676 = vst [vmem:[#allocation27_spill] sm:$0xff] %v5278_v25  ;;  %1114 = vmax.xlane.f32.xlu1 %v1113_v26  ;;  %1018 = vmax.xlane.f32.xlu2 %v1017_v27  ;;  %v3002_v27 = vsel %vm8653_vm9, %v5243_v12, 0.0 }
  0xbc   :  { %1021 = vmax.xlane.f32.xlu0 %v1020_v28  ;;  %v3003_v28 = vsel %vm8650_vm10, %v5247_v14, 0.0 }
  0xbd   :  { %v5398_v43 = vadd.f32 %v3003_v28, %v3002_v27 }
  0xbf   :  { %v5290_v31 = vpop.f32.mrf.mxu2  ;;  %8701 = vst [vmem:[#allocation52_spill] sm:$0xff] %v5398_v43 }
  0xc0   :  { %8679 = vst [vmem:[#allocation30_spill] sm:$0xff] %v5290_v31  ;;  %v5292_v32 = vpop.f32.mrf.mxu3  ;;  %v5294_v33 = vpop.f32.mrf.mxu0 }
  0xc1   :  { %8680 = vst [vmem:[#allocation31_spill] sm:$0xff] %v5292_v32  ;;  %v5300_v34 = vpop.f32.mrf.mxu1  ;;  %v1116_v35 = vmax.f32 %v5290_v31, %v5292_v32 }
  0xc2   :  { %8681 = vst [vmem:[#allocation32_spill] sm:$0xff] %v5294_v33  ;;  %v1023_v37 = vmax.f32 %v5294_v33, %v5300_v34 }
  0xc3   :  { %8682 = vst [vmem:[#allocation33_spill] sm:$0xff] %v5300_v34  ;;  %1117 = vmax.xlane.f32.xlu2 %v1116_v35 }
  0xc4   :  { %1024 = vmax.xlane.f32.xlu1 %v1023_v37 }
  0xc7   :  { %v5322_v41 = vpop.f32.mrf.mxu2 }
  0xc8   :  { %8685 = vst [vmem:[#allocation36_spill] sm:$0xff] %v5322_v41  ;;  %v5332_v44 = vpop.f32.mrf.mxu3  ;;  %v5334_v45 = vpop.f32.mrf.mxu0 }
  0xc9   :  { %8686 = vst [vmem:[#allocation37_spill] sm:$0xff] %v5332_v44  ;;  %v5336_v48 = vpop.f32.mrf.mxu1  ;;  %v1119_v53 = vmax.f32 %v5322_v41, %v5332_v44 }
  0xca   :  { %8687 = vst [vmem:[#allocation38_spill] sm:$0xff] %v5334_v45  ;;  %v1026_v54 = vmax.f32 %v5334_v45, %v5336_v48 }
  0xcb   :  { %8688 = vst [vmem:[#allocation39_spill] sm:$0xff] %v5336_v48  ;;  %1120 = vmax.xlane.f32.xlu0 %v1119_v53 }
  0xcc   :  { %1027 = vmax.xlane.f32.xlu2 %v1026_v54  ;;  %v5011_v54 = vmov -inf  }
  0xcd   :  { %21 = vst.msk [vmem:[#allocation2] sm:$0xff] %vm20_vm11, %v5011_v54 }
  0xce   :  { %22 = vst.msk [vmem:[#allocation2 + $0x8] sm:$0xff] %vm20_vm11, %v5011_v54 }
  0xcf   :  { %v5346_v61 = vpop.f32.mrf.mxu2  ;;  %23 = vst.msk [vmem:[#allocation2 + $0x10] sm:$0xff] %vm20_vm11, %v5011_v54 }
  0xd0   :  { %8691 = vst [vmem:[#allocation42_spill] sm:$0xff] %v5346_v61  ;;  %v5348_v62 = vpop.f32.mrf.mxu3  ;;  %v5350_v3 = vpop.f32.mrf.mxu0 }
  0xd1   :  { %8692 = vst [vmem:[#allocation43_spill] sm:$0xff] %v5348_v62  ;;  %v5356_v7 = vpop.f32.mrf.mxu1  ;;  %v1122_v9 = vmax.f32 %v5346_v61, %v5348_v62 }
  0xd2   :  { %8693 = vst [vmem:[#allocation44_spill] sm:$0xff] %v5350_v3  ;;  %v1029_v13 = vmax.f32 %v5350_v3, %v5356_v7 }
  0xd3   :  { %8694 = vst [vmem:[#allocation45_spill] sm:$0xff] %v5356_v7  ;;  %1123 = vmax.xlane.f32.xlu1 %v1122_v9  ;;  %v4400_v9 = vld [vmem:[%s8254_s1 + $0x48] sm:$0xff] }
  0xd4   :  { %1030 = vmax.xlane.f32.xlu0 %v1029_v13  ;;  %4256 = vmatmul.msk.bf16.gmra.mxu0 %vm385_vm0, %v4400_v9  ;;  %24 = vst.msk [vmem:[#allocation2 + $0x18] sm:$0xff] %vm20_vm11, %v5011_v54  ;;  %v5516_v16 = vld [vmem:[#allocation2] sm:$0xff] }
  0xd5   :  { %4272 = vmatmul.msk.bf16.gmra.mxu1 %vm385_vm0, %v4400_v9  ;;  %25 = vst.msk [vmem:[#allocation2 + $0x20] sm:$0xff] %vm20_vm11, %v5011_v54 }
  0xd6   :  { %26 = vst.msk [vmem:[#allocation2 + $0x28] sm:$0xff] %vm20_vm11, %v5011_v54 }
  0xd7   :  { %v5378_v26 = vpop.f32.mrf.mxu2  ;;  %27 = vst.msk [vmem:[#allocation2 + $0x30] sm:$0xff] %vm20_vm11, %v5011_v54 }
  0xd8   :  { %8697 = vst [vmem:[#allocation48_spill] sm:$0xff] %v5378_v26  ;;  %v5388_v35 = vpop.f32.mrf.mxu3  ;;  %v5390_v37 = vpop.f32.mrf.mxu0 }
  0xd9   :  { %8698 = vst [vmem:[#allocation49_spill] sm:$0xff] %v5388_v35  ;;  %v5392_v38 = vpop.f32.mrf.mxu1  ;;  %v1125_v39 = vmax.f32 %v5378_v26, %v5388_v35 }
  0xda   :  { %8699 = vst [vmem:[#allocation50_spill] sm:$0xff] %v5390_v37  ;;  %v1032_v42 = vmax.f32 %v5390_v37, %v5392_v38 }
  0xdb   :  { %8700 = vst [vmem:[#allocation51_spill] sm:$0xff] %v5392_v38  ;;  %1126 = vmax.xlane.f32.xlu2 %v1125_v39 }
  0xdc   :  { %1033 = vmax.xlane.f32.xlu1 %v1032_v42  ;;  %28 = vst.msk [vmem:[#allocation2 + $0x38] sm:$0xff] %vm20_vm11, %v5011_v54 }
  0xdd   :  { %29 = vst.msk [vmem:[#allocation2 + $0x40] sm:$0xff] %vm20_vm11, %v5011_v54 }
  0xde   :  { %30 = vst.msk [vmem:[#allocation2 + $0x48] sm:$0xff] %vm20_vm11, %v5011_v54 }
  0xdf   :  { %v5400_v53 = vpop.f32.mrf.mxu2  ;;  %31 = vst.msk [vmem:[#allocation2 + $0x50] sm:$0xff] %vm20_vm11, %v5011_v54 }
  0xe0   :  { %8702 = vst [vmem:[#allocation53_spill] sm:$0xff] %v5400_v53  ;;  %v5407_v13 = vpop.f32.mrf.mxu3  ;;  %v5409_v18 = vpop.f32.mrf.mxu0 }
  0xe1   :  { %8703 = vst [vmem:[#allocation54_spill] sm:$0xff] %v5407_v13  ;;  %v5413_v21 = vpop.f32.mrf.mxu1  ;;  %v1128_v27 = vmax.f32 %v5400_v53, %v5407_v13 }
  0xe2   :  { %8704 = vst [vmem:[#allocation55_spill] sm:$0xff] %v5409_v18  ;;  %v1035_v28 = vmax.f32 %v5409_v18, %v5413_v21 }
  0xe3   :  { %8705 = vst [vmem:[#allocation56_spill] sm:$0xff] %v5413_v21  ;;  %1129 = vmax.xlane.f32.xlu0 %v1128_v27 }
  0xe4   :  { %1036 = vmax.xlane.f32.xlu2 %v1035_v28  ;;  %32 = vst.msk [vmem:[#allocation2 + $0x58] sm:$0xff] %vm20_vm11, %v5011_v54 }
  0xe5   :  { %33 = vst.msk [vmem:[#allocation2 + $0x60] sm:$0xff] %vm20_vm11, %v5011_v54 }
  0xe6   :  { %34 = vst.msk [vmem:[#allocation2 + $0x68] sm:$0xff] %vm20_vm11, %v5011_v54 }
  0xe7   :  { %v5433_v39 = vpop.f32.mrf.mxu2  ;;  %35 = vst.msk [vmem:[#allocation2 + $0x70] sm:$0xff] %vm20_vm11, %v5011_v54 }
  0xe8   :  { %8706 = vst [vmem:[#allocation57_spill] sm:$0xff] %v5433_v39  ;;  %v5437_v42 = vpop.f32.mrf.mxu3  ;;  %v5439_v9 = vpop.f32.mrf.mxu0 }
  0xe9   :  { %8707 = vst [vmem:[#allocation58_spill] sm:$0xff] %v5437_v42  ;;  %v5443_v27 = vpop.f32.mrf.mxu1  ;;  %v1131_v28 = vmax.f32 %v5433_v39, %v5437_v42 }
  0xea   :  { %8708 = vst [vmem:[#allocation59_spill] sm:$0xff] %v5439_v9  ;;  %v1038_v43 = vmax.f32 %v5439_v9, %v5443_v27  ;;  %v5012_v9 = vmov 0.0  }
  0xeb   :  { %8709 = vst [vmem:[#allocation60_spill] sm:$0xff] %v5443_v27  ;;  %1132 = vmax.xlane.f32.xlu1 %v1131_v28 }
  0xec   :  { %1039 = vmax.xlane.f32.xlu0 %v1038_v43  ;;  %36 = vst.msk [vmem:[#allocation2 + $0x78] sm:$0xff] %vm20_vm11, %v5011_v54 }
  0xed   :  { %37 = vst.msk [vmem:[#allocation2 + $0x80] sm:$0xff] %vm20_vm11, %v5011_v54 }
  0xee   :  { %38 = vst.msk [vmem:[#allocation2 + $0x88] sm:$0xff] %vm20_vm11, %v5011_v54 }
  0xef   :  { %v5461_v40 = vpop.f32.mrf.mxu2  ;;  %39 = vst.msk [vmem:[#allocation2 + $0x90] sm:$0xff] %vm20_vm11, %v5011_v54 }
  0xf0   :  { %8710 = vst [vmem:[#allocation61_spill] sm:$0xff] %v5461_v40  ;;  %v5465_v59 = vpop.f32.mrf.mxu3  ;;  %v5467_v28 = vpop.f32.mrf.mxu0 }
  0xf1   :  { %8711 = vst [vmem:[#allocation62_spill] sm:$0xff] %v5465_v59  ;;  %v5471_v43 = vpop.f32.mrf.mxu1  ;;  %v1134_v22 = vmax.f32 %v5461_v40, %v5465_v59 }
  0xf2   :  { %8712 = vst [vmem:[#allocation63_spill] sm:$0xff] %v5467_v28  ;;  %v1041_v29 = vmax.f32 %v5467_v28, %v5471_v43 }
  0xf3   :  { %8713 = vst [vmem:[#allocation64_spill] sm:$0xff] %v5471_v43  ;;  %1135 = vmax.xlane.f32.xlu2 %v1134_v22 }
  0xf4   :  { %40 = vst.msk [vmem:[#allocation2 + $0x98] sm:$0xff] %vm20_vm11, %v5011_v54  ;;  %1042 = vmax.xlane.f32.xlu1 %v1041_v29 }
  0xf5   :  { %41 = vst.msk [vmem:[#allocation2 + $0xa0] sm:$0xff] %vm20_vm11, %v5011_v54 }
  0xf6   :  { %42 = vst.msk [vmem:[#allocation2 + $0xa8] sm:$0xff] %vm20_vm11, %v5011_v54 }
  0xf7   :  { %43 = vst.msk [vmem:[#allocation2 + $0xb0] sm:$0xff] %vm20_vm11, %v5011_v54  ;;  %v5489_v60 = vpop.f32.mrf.mxu2 }
  0xf8   :  { %44 = vst.msk [vmem:[#allocation2 + $0xb8] sm:$0xff] %vm20_vm11, %v5011_v54  ;;  %v5493_v10 = vpop.f32.mrf.mxu3  ;;  %v5495_v22 = vpop.f32.mrf.mxu0 }
  0xf9   :  { %8714 = vst [vmem:[#allocation65_spill] sm:$0xff] %v5489_v60  ;;  %v5499_v29 = vpop.f32.mrf.mxu1  ;;  %v1137_v19 = vmax.f32 %v5489_v60, %v5493_v10  ;;  %v5650_v60 = vld [vmem:[#allocation2 + $0x18] sm:$0xff] }
  0xfa   :  { %45 = vst.msk [vmem:[#allocation2 + $0xc0] sm:$0xff] %vm20_vm11, %v5011_v54  ;;  %v1044_v30 = vmax.f32 %v5495_v22, %v5499_v29 }
  0xfb   :  { %8715 = vst [vmem:[#allocation66_spill] sm:$0xff] %v5493_v10  ;;  %1138 = vmax.xlane.f32.xlu0 %v1137_v19 }
  0xfc   :  { %8716 = vst [vmem:[#allocation67_spill] sm:$0xff] %v5495_v22  ;;  %1045 = vmax.xlane.f32.xlu2 %v1044_v30 }
  0xfd   :  { %46 = vst.msk [vmem:[#allocation2 + $0xc8] sm:$0xff] %vm20_vm11, %v5011_v54 }
  0xfe   :  { %8717 = vst [vmem:[#allocation68_spill] sm:$0xff] %v5499_v29 }
  0xff   :  { %47 = vst.msk [vmem:[#allocation2 + $0xd0] sm:$0xff] %vm20_vm11, %v5011_v54  ;;  %v5524_v19 = vpop.f32.mrf.mxu2  ;;  %v1004_v11 = vpop.xlane.xlu0 %1003 }
 0x100   :  { %48 = vst.msk [vmem:[#allocation2 + $0xd8] sm:$0xff] %vm20_vm11, %v5011_v54  ;;  %v5528_v30 = vpop.f32.mrf.mxu3  ;;  %v5531_v29 = vmax.f32 %v5516_v16, %v1004_v11  ;;  %v5535_v22 = vpop.f32.mrf.mxu0 }
 0x101   :  { %49 = vst.msk [vmem:[#allocation2 + $0xe0] sm:$0xff] %vm20_vm11, %v5011_v54  ;;  %v5539_v36 = vpop.f32.mrf.mxu1  ;;  %v1140_v43 = vmax.f32 %v5524_v19, %v5528_v30 }
 0x102   :  { %50 = vst.msk [vmem:[#allocation2 + $0xe8] sm:$0xff] %vm20_vm11, %v5011_v54  ;;  %v1047_v11 = vmax.f32 %v5535_v22, %v5539_v36 }
 0x103   :  { %8718 = vst [vmem:[#allocation69_spill] sm:$0xff] %v5516_v16  ;;  %1141 = vmax.xlane.f32.xlu1 %v1140_v43  ;;  %v6203_v16 = vld [vmem:[#allocation2 + $0x80] sm:$0xff] }
 0x104   :  { %51 = vst.msk [vmem:[#allocation2 + $0xf0] sm:$0xff] %vm20_vm11, %v5011_v54  ;;  %1048 = vmax.xlane.f32.xlu0 %v1047_v11 }
 0x105   :  { %52 = vst.msk [vmem:[#allocation2 + $0xf8] sm:$0xff] %vm20_vm11, %v5011_v54 }
 0x106   :  { %8719 = vst [vmem:[#allocation70_spill] sm:$0xff] %v5524_v19  ;;  %v1100_v28 = vpop.xlane.xlu2 %1099 }
 0x107   :  { %53 = vst.msk [vmem:[#allocation2 + $0x100] sm:$0xff] %vm20_vm11, %v5011_v54  ;;  %v5566_v59 = vpop.f32.mrf.mxu2  ;;  %v1007_v11 = vpop.xlane.xlu0 %1006 }
 0x108   :  { %8720 = vst [vmem:[#allocation71_spill] sm:$0xff] %v5528_v30  ;;  %v5555_v30 = vld [vmem:[#allocation2 + $0x8] sm:$0xff]  ;;  %v5570_v40 = vpop.f32.mrf.mxu3 }
 0x109   :  { %8721 = vst [vmem:[#allocation72_spill] sm:$0xff] %v5531_v29 }
 0x10a   :  { %54 = vst.msk [vmem:[#allocation2 + $0x108] sm:$0xff] %vm20_vm11, %v5011_v54 }
 0x10b   :  { %8722 = vst [vmem:[#allocation73_spill] sm:$0xff] %v5535_v22 }
 0x10c   :  { %55 = vst.msk [vmem:[#allocation2 + $0x110] sm:$0xff] %vm20_vm11, %v5011_v54 }
 0x10d   :  { %8723 = vst [vmem:[#allocation74_spill] sm:$0xff] %v5539_v36  ;;  %v5573_v36 = vmax.f32 %v5555_v30, %v1007_v11  ;;  %v4417_v11 = vld [vmem:[%s8254_s1 + $0xd0] sm:$0xff] }
 0x10e   :  { %2603 = vst.msk [vmem:[#allocation2] sm:$0xff] %vm20_vm11, %v5531_v29  ;;  %v5559_v19 = vld [vmem:[#allocation2 + $0x100] sm:$0xff]  ;;  %4369 = vmatmul.msk.bf16.gmra.mxu2 %vm385_vm0, %v4417_v11  ;;  %4385 = vmatmul.msk.bf16.gmra.mxu3 %vm385_vm0, %v4417_v11  ;;  %v5634_v11 = vld [vmem:[#allocation2 + $0x10] sm:$0xff] }
 0x10f   :  { %56 = vst.msk [vmem:[#allocation2 + $0x118] sm:$0xff] %vm20_vm11, %v5011_v54  ;;  %v5564_v43 = vmax.f32 %v5559_v19, %v1100_v28  ;;  %v1143_v28 = vmax.f32 %v5566_v59, %v5570_v40  ;;  %v1103_v42 = vpop.xlane.xlu0 %1102 }
 0x110   :  { %57 = vst.msk [vmem:[#allocation2 + $0x120] sm:$0xff] %vm20_vm11, %v5011_v54  ;;  %v5757_v33 = vpop.f32.mrf.mxu2 }
 0x111   :  { %58 = vst.msk [vmem:[#allocation2 + $0x128] sm:$0xff] %vm20_vm11, %v5011_v54  ;;  %1144 = vmax.xlane.f32.xlu2 %v1143_v28  ;;  %v5594_v22 = vld [vmem:[#allocation2 + $0x108] sm:$0xff]  ;;  %v1010_v28 = vpop.xlane.xlu1 %1009 }
 0x112   :  { %8724 = vst [vmem:[#allocation75_spill] sm:$0xff] %v5555_v30  ;;  %v5648_v18 = vmax.f32 %v5634_v11, %v1010_v28  ;;  %v6280_v30 = vld [vmem:[#allocation2 + $0x98] sm:$0xff] }
 0x113   :  { %59 = vst.msk [vmem:[#allocation2 + $0x130] sm:$0xff] %vm20_vm11, %v5011_v54 }
 0x114   :  { %8725 = vst [vmem:[#allocation76_spill] sm:$0xff] %v5559_v19 }
 0x115   :  { %60 = vst.msk [vmem:[#allocation2 + $0x138] sm:$0xff] %vm20_vm11, %v5011_v54 }
 0x116   :  { %8726 = vst [vmem:[#allocation77_spill] sm:$0xff] %v5564_v43  ;;  %v5643_v21 = vld [vmem:[#allocation2 + $0x118] sm:$0xff] }
 0x117   :  { %8727 = vst [vmem:[#allocation78_spill] sm:$0xff] %v5566_v59  ;;  %v5639_v59 = vld [vmem:[#allocation2 + $0x110] sm:$0xff]  ;;  %v5673_v28 = vld [vmem:[#allocation2 + $0x120] sm:$0xff] }
 0x118   :  { %61 = vst.msk [vmem:[#allocation2 + $0x140] sm:$0xff] %vm20_vm11, %v5011_v54 }
 0x119   :  { %8728 = vst [vmem:[#allocation79_spill] sm:$0xff] %v5570_v40  ;;  %v5605_v40 = vmax.f32 %v5594_v22, %v1103_v42  ;;  %v1106_v42 = vpop.xlane.xlu1 %1105 }
 0x11a   :  { %8729 = vst [vmem:[#allocation80_spill] sm:$0xff] %v5573_v36  ;;  %v5655_v38 = vmax.f32 %v5639_v59, %v1106_v42 }
 0x11b   :  { %62 = vst.msk [vmem:[#allocation2 + $0x148] sm:$0xff] %vm20_vm11, %v5011_v54  ;;  %1745 = vperm.xlu0 %4439, %v5605_v40  }
 0x11c   :  { %63 = vst.msk [vmem:[#allocation2 + $0x150] sm:$0xff] %vm20_vm11, %v5011_v54  ;;  %1580 = vperm.xlu1 %4437, %v5531_v29  }
 0x11d   :  { %64 = vst.msk [vmem:[#allocation2 + $0x158] sm:$0xff] %vm20_vm11, %v5011_v54 }
 0x11e   :  { %65 = vst.msk [vmem:[#allocation2 + $0x160] sm:$0xff] %vm20_vm11, %v5011_v54  ;;  %v1109_v39 = vpop.xlane.xlu2 %1108 }
 0x11f   :  { %66 = vst.msk [vmem:[#allocation2 + $0x168] sm:$0xff] %vm20_vm11, %v5011_v54  ;;  %v5660_v37 = vmax.f32 %v5643_v21, %v1109_v39  ;;  %v5675_v39 = vld [vmem:[#allocation2 + $0x20] sm:$0xff] }
 0x120   :  { %67 = vst.msk [vmem:[#allocation2 + $0x170] sm:$0xff] %vm20_vm11, %v5011_v54 }
 0x121   :  { %68 = vst.msk [vmem:[#allocation2 + $0x178] sm:$0xff] %vm20_vm11, %v5011_v54  ;;  %v1013_v10 = vpop.xlane.xlu1 %1012 }
 0x122   :  { %69 = vst.msk [vmem:[#allocation2 + $0x180] sm:$0xff] %vm20_vm11, %v5011_v54 }
 0x123   :  { %70 = vst.msk [vmem:[#allocation2 + $0x188] sm:$0xff] %vm20_vm11, %v5011_v54 }
 0x124   :  { %71 = vst.msk [vmem:[#allocation2 + $0x190] sm:$0xff] %vm20_vm11, %v5011_v54  ;;  %1740 = vperm.xlu1 %4437, %v5564_v43  }
 0x125   :  { %72 = vst.msk [vmem:[#allocation2 + $0x198] sm:$0xff] %vm20_vm11, %v5011_v54 }
 0x126   :  { %73 = vst.msk [vmem:[#allocation2 + $0x1a0] sm:$0xff] %vm20_vm11, %v5011_v54  ;;  %v1112_v42 = vpop.xlane.xlu0 %1111  ;;  %v1016_v35 = vpop.xlane.xlu2 %1015 }
 0x127   :  { %74 = vst.msk [vmem:[#allocation2 + $0x1a8] sm:$0xff] %vm20_vm11, %v5011_v54  ;;  %v5685_v26 = vmax.f32 %v5673_v28, %v1112_v42  ;;  %v5688_v27 = vmax.f32 %v5675_v39, %v1016_v35  ;;  %v5702_v35 = vld [vmem:[#allocation2 + $0x128] sm:$0xff] }
 0x128   :  { %75 = vst.msk [vmem:[#allocation2 + $0x1b0] sm:$0xff] %vm20_vm11, %v5011_v54  ;;  %v5704_v42 = vld [vmem:[#allocation2 + $0x28] sm:$0xff] }
 0x129   :  { %76 = vst.msk [vmem:[#allocation2 + $0x1b8] sm:$0xff] %vm20_vm11, %v5011_v54  ;;  %1585 = vperm.xlu2 %4438, %v5573_v36  }
 0x12a   :  { %77 = vst.msk [vmem:[#allocation2 + $0x1c0] sm:$0xff] %vm20_vm11, %v5011_v54 }
 0x12b   :  { %78 = vst.msk [vmem:[#allocation2 + $0x1c8] sm:$0xff] %vm20_vm11, %v5011_v54 }
 0x12c   :  { %79 = vst.msk [vmem:[#allocation2 + $0x1d0] sm:$0xff] %vm20_vm11, %v5011_v54 }
 0x12d   :  { %80 = vst.msk [vmem:[#allocation2 + $0x1d8] sm:$0xff] %vm20_vm11, %v5011_v54 }
 0x12e   :  { %81 = vst.msk [vmem:[#allocation2 + $0x1e0] sm:$0xff] %vm20_vm11, %v5011_v54  ;;  %v1115_v62 = vpop.xlane.xlu1 %1114  ;;  %v1019_v61 = vpop.xlane.xlu2 %1018 }
 0x12f   :  { %82 = vst.msk [vmem:[#allocation2 + $0x1e8] sm:$0xff] %vm20_vm11, %v5011_v54  ;;  %v5715_v48 = vmax.f32 %v5702_v35, %v1115_v62  ;;  %v5718_v45 = vmax.f32 %v5704_v42, %v1019_v61  ;;  %v1022_v13 = vpop.xlane.xlu0 %1021  ;;  %v5733_v61 = vld [vmem:[#allocation2 + $0x130] sm:$0xff]  ;;  %v5737_v62 = vld [vmem:[#allocation2 + $0x38] sm:$0xff] }
 0x130   :  { %8730 = vst [vmem:[#allocation81_spill] sm:$0xff] %v5639_v59 }
 0x131   :  { %83 = vst.msk [vmem:[#allocation2 + $0x1f0] sm:$0xff] %vm20_vm11, %v5011_v54 }
 0x132   :  { %8731 = vst [vmem:[#allocation82_spill] sm:$0xff] %v5643_v21 }
 0x133   :  { %84 = vst.msk [vmem:[#allocation2 + $0x1f8] sm:$0xff] %vm20_vm11, %v5011_v54  ;;  %v5665_v54 = vmax.f32 %v5650_v60, %v1013_v10  ;;  %v4401_v10 = vld [vmem:[%s8254_s1 + $0x50] sm:$0xff] }
 0x134   :  { %8732 = vst [vmem:[#allocation83_spill] sm:$0xff] %v5650_v60  ;;  %4257 = vmatmul.msk.bf16.gmra.mxu0 %vm385_vm0, %v4401_v10  ;;  %4273 = vmatmul.msk.bf16.gmra.mxu1 %vm385_vm0, %v4401_v10  ;;  %v5708_v10 = vld [vmem:[#allocation2 + $0x30] sm:$0xff] }
 0x135   :  { %2635 = vst.msk [vmem:[#allocation2 + $0x100] sm:$0xff] %vm20_vm11, %v5564_v43  ;;  %v5723_v53 = vmax.f32 %v5708_v10, %v1022_v13 }
 0x136   :  { %8733 = vst [vmem:[#allocation84_spill] sm:$0xff] %v5655_v38  ;;  %v1118_v13 = vpop.xlane.xlu2 %1117 }
 0x137   :  { %2604 = vst.msk [vmem:[#allocation2 + $0x8] sm:$0xff] %vm20_vm11, %v5573_v36 }
 0x138   :  { %8734 = vst [vmem:[#allocation85_spill] sm:$0xff] %v5660_v37 }
 0x139   :  { %2636 = vst.msk [vmem:[#allocation2 + $0x108] sm:$0xff] %vm20_vm11, %v5605_v40 }
 0x13a   :  { %8735 = vst [vmem:[#allocation86_spill] sm:$0xff] %v5665_v54 }
 0x13b   :  { %2605 = vst.msk [vmem:[#allocation2 + $0x10] sm:$0xff] %vm20_vm11, %v5648_v18 }
 0x13c   :  { %2637 = vst.msk [vmem:[#allocation2 + $0x110] sm:$0xff] %vm20_vm11, %v5655_v38 }
 0x13d   :  { %8736 = vst [vmem:[#allocation87_spill] sm:$0xff] %v5673_v28 }
 0x13e   :  { %8737 = vst [vmem:[#allocation88_spill] sm:$0xff] %v5675_v39  ;;  %v5771_v39 = vld [vmem:[#allocation2 + $0x40] sm:$0xff]  ;;  %v1121_v32 = vpop.xlane.xlu0 %1120 }
 0x13f   :  { %2638 = vst.msk [vmem:[#allocation2 + $0x118] sm:$0xff] %vm20_vm11, %v5660_v37  ;;  %v1028_v3 = vpop.xlane.xlu2 %1027 }
 0x140   :  { %2606 = vst.msk [vmem:[#allocation2 + $0x18] sm:$0xff] %vm20_vm11, %v5665_v54 }
 0x141   :  { %8738 = vst [vmem:[#allocation89_spill] sm:$0xff] %v5685_v26 }
 0x142   :  { %8739 = vst [vmem:[#allocation90_spill] sm:$0xff] %v5688_v27 }
 0x143   :  { %118 = vst.msk [vmem:[#allocation3 + $0x108] sm:$0xff] %vm20_vm11, %v5012_v9 }
 0x144   :  { %85 = vst.msk [vmem:[#allocation3] sm:$0xff] %vm20_vm11, %v5012_v9 }
 0x145   :  { %2639 = vst.msk [vmem:[#allocation2 + $0x120] sm:$0xff] %vm20_vm11, %v5685_v26 }
 0x146   :  { %2607 = vst.msk [vmem:[#allocation2 + $0x20] sm:$0xff] %vm20_vm11, %v5688_v27 }
 0x147   :  { %86 = vst.msk [vmem:[#allocation3 + $0x8] sm:$0xff] %vm20_vm11, %v5012_v9 }
 0x148   :  { %8740 = vst [vmem:[#allocation91_spill] sm:$0xff] %v5702_v35  ;;  %v5744_v35 = vmax.f32 %v5733_v61, %v1118_v13  ;;  %v5759_v13 = vpop.f32.mrf.mxu3 }
 0x149   :  { %8741 = vst [vmem:[#allocation92_spill] sm:$0xff] %v5704_v42  ;;  %v1025_v42 = vpop.xlane.xlu1 %1024  ;;  %v1146_v31 = vmax.f32 %v5757_v33, %v5759_v13 }
 0x14a   :  { %87 = vst.msk [vmem:[#allocation3 + $0x10] sm:$0xff] %vm20_vm11, %v5012_v9  ;;  %v5749_v34 = vmax.f32 %v5737_v62, %v1025_v42  ;;  %v5765_v42 = vld [vmem:[#allocation2 + $0x138] sm:$0xff] }
 0x14b   :  { %8742 = vst [vmem:[#allocation93_spill] sm:$0xff] %v5708_v10  ;;  %v5780_v7 = vmax.f32 %v5765_v42, %v1121_v32  ;;  %v5785_v10 = vmax.f32 %v5771_v39, %v1028_v3  ;;  %1147 = vmax.xlane.f32.xlu0 %v1146_v31  ;;  %v5795_v32 = vld [vmem:[#allocation2 + $0x140] sm:$0xff]  ;;  %v5799_v3 = vld [vmem:[#allocation2 + $0x48] sm:$0xff] }
 0x14c   :  { %88 = vst.msk [vmem:[#allocation3 + $0x18] sm:$0xff] %vm20_vm11, %v5012_v9 }
 0x14d   :  { %89 = vst.msk [vmem:[#allocation3 + $0x20] sm:$0xff] %vm20_vm11, %v5012_v9 }
 0x14e   :  { %8743 = vst [vmem:[#allocation94_spill] sm:$0xff] %v5715_v48  ;;  %v1127_v60 = vpop.xlane.xlu2 %1126 }
 0x14f   :  { %8744 = vst [vmem:[#allocation95_spill] sm:$0xff] %v5718_v45 }
 0x150   :  { %90 = vst.msk [vmem:[#allocation3 + $0x28] sm:$0xff] %vm20_vm11, %v5012_v9 }
 0x151   :  { %8745 = vst [vmem:[#allocation96_spill] sm:$0xff] %v5723_v53 }
 0x152   :  { %91 = vst.msk [vmem:[#allocation3 + $0x30] sm:$0xff] %vm20_vm11, %v5012_v9 }
 0x153   :  { %2640 = vst.msk [vmem:[#allocation2 + $0x128] sm:$0xff] %vm20_vm11, %v5715_v48 }
 0x154   :  { %2608 = vst.msk [vmem:[#allocation2 + $0x28] sm:$0xff] %vm20_vm11, %v5718_v45 }
 0x155   :  { %2609 = vst.msk [vmem:[#allocation2 + $0x30] sm:$0xff] %vm20_vm11, %v5723_v53 }
 0x156   :  { %8746 = vst [vmem:[#allocation97_spill] sm:$0xff] %v5733_v61  ;;  %v5763_v61 = vpop.f32.mrf.mxu0 }
 0x157   :  { %92 = vst.msk [vmem:[#allocation3 + $0x38] sm:$0xff] %vm20_vm11, %v5012_v9 }
 0x158   :  { %8747 = vst [vmem:[#allocation98_spill] sm:$0xff] %v5737_v62  ;;  %v5769_v62 = vpop.f32.mrf.mxu1 }
 0x159   :  { %93 = vst.msk [vmem:[#allocation3 + $0x40] sm:$0xff] %vm20_vm11, %v5012_v9 }
 0x15a   :  { %94 = vst.msk [vmem:[#allocation3 + $0x48] sm:$0xff] %vm20_vm11, %v5012_v9 }
 0x15b   :  { %8748 = vst [vmem:[#allocation99_spill] sm:$0xff] %v5744_v35 }
 0x15c   :  { %95 = vst.msk [vmem:[#allocation3 + $0x50] sm:$0xff] %vm20_vm11, %v5012_v9 }
 0x15d   :  { %8749 = vst [vmem:[#allocation100_spill] sm:$0xff] %v5749_v34 }
 0x15e   :  { %96 = vst.msk [vmem:[#allocation3 + $0x58] sm:$0xff] %vm20_vm11, %v5012_v9 }
 0x15f   :  { %2641 = vst.msk [vmem:[#allocation2 + $0x130] sm:$0xff] %vm20_vm11, %v5744_v35  ;;  %1590 = vperm.xlu0 %4439, %v5648_v18  }
 0x160   :  { %2610 = vst.msk [vmem:[#allocation2 + $0x38] sm:$0xff] %vm20_vm11, %v5749_v34  ;;  %v5807_v31 = vpop.f32.mrf.mxu1 }
 0x161   :  { %8750 = vst [vmem:[#allocation101_spill] sm:$0xff] %v5757_v33  ;;  %v1124_v33 = vpop.xlane.xlu1 %1123 }
 0x162   :  { %8751 = vst [vmem:[#allocation102_spill] sm:$0xff] %v5759_v13  ;;  %v5803_v13 = vpop.f32.mrf.mxu0 }
 0x163   :  { %97 = vst.msk [vmem:[#allocation3 + $0x60] sm:$0xff] %vm20_vm11, %v5012_v9 }
 0x164   :  { %8752 = vst [vmem:[#allocation103_spill] sm:$0xff] %v5763_v61 }
 0x165   :  { %8753 = vst [vmem:[#allocation104_spill] sm:$0xff] %v5765_v42  ;;  %v1031_v42 = vpop.xlane.xlu0 %1030 }
 0x166   :  { %98 = vst.msk [vmem:[#allocation3 + $0x68] sm:$0xff] %vm20_vm11, %v5012_v9  ;;  %v5815_v21 = vmax.f32 %v5799_v3, %v1031_v42  ;;  %v1050_v42 = vmax.f32 %v5763_v61, %v5769_v62 }
 0x167   :  { %8754 = vst [vmem:[#allocation105_spill] sm:$0xff] %v5769_v62 }
 0x168   :  { %8755 = vst [vmem:[#allocation106_spill] sm:$0xff] %v5771_v39  ;;  %v5810_v39 = vmax.f32 %v5795_v32, %v1124_v33  ;;  %v1053_v33 = vmax.f32 %v5803_v13, %v5807_v31  ;;  %1051 = vmax.xlane.f32.xlu1 %v1050_v42  ;;  %v5861_v42 = vld [vmem:[#allocation2 + $0x150] sm:$0xff]  ;;  %v6002_v41 = vpop.f32.mrf.mxu1 }
 0x169   :  { %99 = vst.msk [vmem:[#allocation3 + $0x70] sm:$0xff] %vm20_vm11, %v5012_v9  ;;  %v1034_v62 = vpop.xlane.xlu1 %1033 }
 0x16a   :  { %100 = vst.msk [vmem:[#allocation3 + $0x78] sm:$0xff] %vm20_vm11, %v5012_v9  ;;  %1054 = vmax.xlane.f32.xlu2 %v1053_v33  ;;  %v6004_v17 = vpop.f32.mrf.mxu0 }
 0x16b   :  { %8756 = vst [vmem:[#allocation107_spill] sm:$0xff] %v5780_v7 }
 0x16c   :  { %101 = vst.msk [vmem:[#allocation3 + $0x80] sm:$0xff] %vm20_vm11, %v5012_v9 }
 0x16d   :  { %8757 = vst [vmem:[#allocation108_spill] sm:$0xff] %v5785_v10 }
 0x16e   :  { %102 = vst.msk [vmem:[#allocation3 + $0x88] sm:$0xff] %vm20_vm11, %v5012_v9 }
 0x16f   :  { %2642 = vst.msk [vmem:[#allocation2 + $0x138] sm:$0xff] %vm20_vm11, %v5780_v7 }
 0x170   :  { %2611 = vst.msk [vmem:[#allocation2 + $0x40] sm:$0xff] %vm20_vm11, %v5785_v10 }
 0x171   :  { %103 = vst.msk [vmem:[#allocation3 + $0x90] sm:$0xff] %vm20_vm11, %v5012_v9 }
 0x172   :  { %8758 = vst [vmem:[#allocation109_spill] sm:$0xff] %v5795_v32  ;;  %v5827_v32 = vld [vmem:[#allocation2 + $0x148] sm:$0xff] }
 0x173   :  { %104 = vst.msk [vmem:[#allocation3 + $0x98] sm:$0xff] %vm20_vm11, %v5012_v9  ;;  %v5842_v33 = vmax.f32 %v5827_v32, %v1127_v60 }
 0x174   :  { %8759 = vst [vmem:[#allocation110_spill] sm:$0xff] %v5799_v3  ;;  %v5833_v3 = vld [vmem:[#allocation2 + $0x50] sm:$0xff] }
 0x175   :  { %105 = vst.msk [vmem:[#allocation3 + $0xa0] sm:$0xff] %vm20_vm11, %v5012_v9  ;;  %v5849_v61 = vmax.f32 %v5833_v3, %v1034_v62  ;;  %v5865_v62 = vld [vmem:[#allocation2 + $0x58] sm:$0xff] }
 0x176   :  { %8760 = vst [vmem:[#allocation111_spill] sm:$0xff] %v5803_v13  ;;  %v5844_v13 = vpop.f32.mrf.mxu3 }
 0x177   :  { %106 = vst.msk [vmem:[#allocation3 + $0xa8] sm:$0xff] %vm20_vm11, %v5012_v9 }
 0x178   :  { %8761 = vst [vmem:[#allocation112_spill] sm:$0xff] %v5807_v31  ;;  %v5837_v31 = vpop.f32.mrf.mxu2 }
 0x179   :  { %8762 = vst [vmem:[#allocation113_spill] sm:$0xff] %v5810_v39  ;;  %v1149_v60 = vmax.f32 %v5837_v31, %v5844_v13 }
 0x17a   :  { %107 = vst.msk [vmem:[#allocation3 + $0xb0] sm:$0xff] %vm20_vm11, %v5012_v9 }
 0x17b   :  { %8763 = vst [vmem:[#allocation114_spill] sm:$0xff] %v5815_v21  ;;  %1150 = vmax.xlane.f32.xlu1 %v1149_v60 }
 0x17c   :  { %108 = vst.msk [vmem:[#allocation3 + $0xb8] sm:$0xff] %vm20_vm11, %v5012_v9 }
 0x17d   :  { %2643 = vst.msk [vmem:[#allocation2 + $0x140] sm:$0xff] %vm20_vm11, %v5810_v39 }
 0x17e   :  { %2612 = vst.msk [vmem:[#allocation2 + $0x48] sm:$0xff] %vm20_vm11, %v5815_v21 }
 0x17f   :  { %109 = vst.msk [vmem:[#allocation3 + $0xc0] sm:$0xff] %vm20_vm11, %v5012_v9 }
 0x180   :  { %8764 = vst [vmem:[#allocation115_spill] sm:$0xff] %v5827_v32  ;;  %v1130_v32 = vpop.xlane.xlu0 %1129 }
 0x181   :  { %110 = vst.msk [vmem:[#allocation3 + $0xc8] sm:$0xff] %vm20_vm11, %v5012_v9 }
 0x182   :  { %8765 = vst [vmem:[#allocation116_spill] sm:$0xff] %v5833_v3  ;;  %v4402_v3 = vld [vmem:[%s8254_s1 + $0x58] sm:$0xff]  ;;  %1750 = vperm.xlu2 %4438, %v5655_v38  }
 0x183   :  { %111 = vst.msk [vmem:[#allocation3 + $0xd0] sm:$0xff] %vm20_vm11, %v5012_v9  ;;  %4258 = vmatmul.msk.bf16.gmra.mxu0 %vm385_vm0, %v4402_v3  ;;  %4274 = vmatmul.msk.bf16.gmra.mxu1 %vm385_vm0, %v4402_v3  ;;  %v5897_v3 = vld [vmem:[#allocation2 + $0x60] sm:$0xff] }
 0x184   :  { %8766 = vst [vmem:[#allocation117_spill] sm:$0xff] %v5837_v31  ;;  %v1037_v31 = vpop.xlane.xlu2 %1036 }
 0x185   :  { %112 = vst.msk [vmem:[#allocation3 + $0xd8] sm:$0xff] %vm20_vm11, %v5012_v9  ;;  %v5883_v23 = vmax.f32 %v5865_v62, %v1037_v31  ;;  %v1133_v31 = vpop.xlane.xlu1 %1132 }
 0x186   :  { %8767 = vst [vmem:[#allocation118_spill] sm:$0xff] %v5842_v33 }
 0x187   :  { %8768 = vst [vmem:[#allocation119_spill] sm:$0xff] %v5844_v13  ;;  %v5876_v13 = vmax.f32 %v5861_v42, %v1130_v32  ;;  %v5893_v32 = vld [vmem:[#allocation2 + $0x158] sm:$0xff] }
 0x188   :  { %113 = vst.msk [vmem:[#allocation3 + $0xe0] sm:$0xff] %vm20_vm11, %v5012_v9  ;;  %v5904_v60 = vmax.f32 %v5893_v32, %v1133_v31  ;;  %v5920_v31 = vld [vmem:[#allocation2 + $0x160] sm:$0xff] }
 0x189   :  { %8769 = vst [vmem:[#allocation120_spill] sm:$0xff] %v5849_v61 }
 0x18a   :  { %114 = vst.msk [vmem:[#allocation3 + $0xe8] sm:$0xff] %vm20_vm11, %v5012_v9  ;;  %1595 = vperm.xlu2 %4438, %v5665_v54  }
 0x18b   :  { %2644 = vst.msk [vmem:[#allocation2 + $0x148] sm:$0xff] %vm20_vm11, %v5842_v33 }
 0x18c   :  { %2613 = vst.msk [vmem:[#allocation2 + $0x50] sm:$0xff] %vm20_vm11, %v5849_v61 }
 0x18d   :  { %115 = vst.msk [vmem:[#allocation3 + $0xf0] sm:$0xff] %vm20_vm11, %v5012_v9  ;;  %v1043_v59 = vpop.xlane.xlu1 %1042 }
 0x18e   :  { %8770 = vst [vmem:[#allocation121_spill] sm:$0xff] %v5861_v42 }
 0x18f   :  { %116 = vst.msk [vmem:[#allocation3 + $0xf8] sm:$0xff] %vm20_vm11, %v5012_v9 }
 0x190   :  { %8771 = vst [vmem:[#allocation122_spill] sm:$0xff] %v5865_v62  ;;  %v1040_v62 = vpop.xlane.xlu0 %1039 }
 0x191   :  { %117 = vst.msk [vmem:[#allocation3 + $0x100] sm:$0xff] %vm20_vm11, %v5012_v9  ;;  %v5909_v42 = vmax.f32 %v5897_v3, %v1040_v62  ;;  %v5924_v62 = vld [vmem:[#allocation2 + $0x68] sm:$0xff] }
 0x192   :  { %119 = vst.msk [vmem:[#allocation3 + $0x110] sm:$0xff] %vm20_vm11, %v5012_v9  ;;  %v5941_v38 = vmax.f32 %v5924_v62, %v1043_v59  ;;  %v5956_v59 = vld [vmem:[#allocation2 + $0x70] sm:$0xff] }
 0x193   :  { %8772 = vst [vmem:[#allocation123_spill] sm:$0xff] %v5876_v13 }
 0x194   :  { %120 = vst.msk [vmem:[#allocation3 + $0x118] sm:$0xff] %vm20_vm11, %v5012_v9  ;;  %1755 = vperm.xlu1 %4437, %v5660_v37  }
 0x195   :  { %8773 = vst [vmem:[#allocation124_spill] sm:$0xff] %v5883_v23 }
 0x196   :  { %121 = vst.msk [vmem:[#allocation3 + $0x120] sm:$0xff] %vm20_vm11, %v5012_v9 }
 0x197   :  { %2645 = vst.msk [vmem:[#allocation2 + $0x150] sm:$0xff] %vm20_vm11, %v5876_v13 }
 0x198   :  { %2614 = vst.msk [vmem:[#allocation2 + $0x58] sm:$0xff] %vm20_vm11, %v5883_v23 }
 0x199   :  { %122 = vst.msk [vmem:[#allocation3 + $0x128] sm:$0xff] %vm20_vm11, %v5012_v9 }
 0x19a   :  { %8774 = vst [vmem:[#allocation125_spill] sm:$0xff] %v5893_v32  ;;  %v4418_v32 = vld [vmem:[%s8254_s1 + $0xd8] sm:$0xff] }
 0x19b   :  { %123 = vst.msk [vmem:[#allocation3 + $0x130] sm:$0xff] %vm20_vm11, %v5012_v9  ;;  %4370 = vmatmul.msk.bf16.gmra.mxu2 %vm385_vm0, %v4418_v32  ;;  %4386 = vmatmul.msk.bf16.gmra.mxu3 %vm385_vm0, %v4418_v32  ;;  %v5952_v32 = vld [vmem:[#allocation2 + $0x168] sm:$0xff] }
 0x19c   :  { %8775 = vst [vmem:[#allocation126_spill] sm:$0xff] %v5897_v3  ;;  %v1136_v3 = vpop.xlane.xlu2 %1135  ;;  %1600 = vperm.xlu1 %4437, %v5688_v27  }
 0x19d   :  { %124 = vst.msk [vmem:[#allocation3 + $0x138] sm:$0xff] %vm20_vm11, %v5012_v9  ;;  %v5934_v20 = vmax.f32 %v5920_v31, %v1136_v3  ;;  %v1139_v3 = vpop.xlane.xlu0 %1138 }
 0x19e   :  { %125 = vst.msk [vmem:[#allocation3 + $0x140] sm:$0xff] %vm20_vm11, %v5012_v9 }
 0x19f   :  { %8776 = vst [vmem:[#allocation127_spill] sm:$0xff] %v5904_v60 }
 0x1a0   :  { %126 = vst.msk [vmem:[#allocation3 + $0x148] sm:$0xff] %vm20_vm11, %v5012_v9 }
 0x1a1   :  { %8777 = vst [vmem:[#allocation128_spill] sm:$0xff] %v5909_v42 }
 0x1a2   :  { %127 = vst.msk [vmem:[#allocation3 + $0x150] sm:$0xff] %vm20_vm11, %v5012_v9 }
 0x1a3   :  { %2646 = vst.msk [vmem:[#allocation2 + $0x158] sm:$0xff] %vm20_vm11, %v5904_v60 }
 0x1a4   :  { %2615 = vst.msk [vmem:[#allocation2 + $0x60] sm:$0xff] %vm20_vm11, %v5909_v42 }
 0x1a5   :  { %128 = vst.msk [vmem:[#allocation3 + $0x158] sm:$0xff] %vm20_vm11, %v5012_v9  ;;  %v1049_v37 = vpop.xlane.xlu0 %1048 }
 0x1a6   :  { %8778 = vst [vmem:[#allocation129_spill] sm:$0xff] %v5920_v31  ;;  %v1046_v31 = vpop.xlane.xlu2 %1045 }
 0x1a7   :  { %129 = vst.msk [vmem:[#allocation3 + $0x160] sm:$0xff] %vm20_vm11, %v5012_v9  ;;  %v5969_v54 = vmax.f32 %v5956_v59, %v1046_v31  ;;  %v1142_v31 = vpop.xlane.xlu1 %1141 }
 0x1a8   :  { %8779 = vst [vmem:[#allocation130_spill] sm:$0xff] %v5924_v62  ;;  %v5963_v62 = vmax.f32 %v5952_v32, %v1139_v3  ;;  %v5979_v3 = vld [vmem:[#allocation2 + $0x170] sm:$0xff] }
 0x1a9   :  { %130 = vst.msk [vmem:[#allocation3 + $0x168] sm:$0xff] %vm20_vm11, %v5012_v9 }
 0x1aa   :  { %131 = vst.msk [vmem:[#allocation3 + $0x170] sm:$0xff] %vm20_vm11, %v5012_v9 }
 0x1ab   :  { %8780 = vst [vmem:[#allocation131_spill] sm:$0xff] %v5934_v20 }
 0x1ac   :  { %132 = vst.msk [vmem:[#allocation3 + $0x178] sm:$0xff] %vm20_vm11, %v5012_v9 }
 0x1ad   :  { %8781 = vst [vmem:[#allocation132_spill] sm:$0xff] %v5941_v38 }
 0x1ae   :  { %133 = vst.msk [vmem:[#allocation3 + $0x180] sm:$0xff] %vm20_vm11, %v5012_v9 }
 0x1af   :  { %2647 = vst.msk [vmem:[#allocation2 + $0x160] sm:$0xff] %vm20_vm11, %v5934_v20 }
 0x1b0   :  { %2616 = vst.msk [vmem:[#allocation2 + $0x68] sm:$0xff] %vm20_vm11, %v5941_v38 }
 0x1b1   :  { %134 = vst.msk [vmem:[#allocation3 + $0x188] sm:$0xff] %vm20_vm11, %v5012_v9 }
 0x1b2   :  { %8782 = vst [vmem:[#allocation133_spill] sm:$0xff] %v5952_v32  ;;  %v5983_v32 = vld [vmem:[#allocation2 + $0x78] sm:$0xff] }
 0x1b3   :  { %135 = vst.msk [vmem:[#allocation3 + $0x190] sm:$0xff] %vm20_vm11, %v5012_v9  ;;  %v5996_v44 = vmax.f32 %v5983_v32, %v1049_v37  ;;  %v1056_v37 = vmax.f32 %v6004_v17, %v6002_v41 }
 0x1b4   :  { %8783 = vst [vmem:[#allocation134_spill] sm:$0xff] %v5956_v59  ;;  %v5990_v59 = vmax.f32 %v5979_v3, %v1142_v31  ;;  %v6010_v31 = vld [vmem:[#allocation2 + $0x178] sm:$0xff] }
 0x1b5   :  { %136 = vst.msk [vmem:[#allocation3 + $0x198] sm:$0xff] %vm20_vm11, %v5012_v9  ;;  %1057 = vmax.xlane.f32.xlu0 %v1056_v37  ;;  %v6059_v37 = vpop.f32.mrf.mxu3 }
 0x1b6   :  { %137 = vst.msk [vmem:[#allocation3 + $0x1a0] sm:$0xff] %vm20_vm11, %v5012_v9 }
 0x1b7   :  { %8784 = vst [vmem:[#allocation135_spill] sm:$0xff] %v5963_v62 }
 0x1b8   :  { %138 = vst.msk [vmem:[#allocation3 + $0x1a8] sm:$0xff] %vm20_vm11, %v5012_v9 }
 0x1b9   :  { %8785 = vst [vmem:[#allocation136_spill] sm:$0xff] %v5969_v54 }
 0x1ba   :  { %139 = vst.msk [vmem:[#allocation3 + $0x1b0] sm:$0xff] %vm20_vm11, %v5012_v9 }
 0x1bb   :  { %2648 = vst.msk [vmem:[#allocation2 + $0x168] sm:$0xff] %vm20_vm11, %v5963_v62 }
 0x1bc   :  { %2617 = vst.msk [vmem:[#allocation2 + $0x70] sm:$0xff] %vm20_vm11, %v5969_v54 }
 0x1bd   :  { %140 = vst.msk [vmem:[#allocation3 + $0x1b8] sm:$0xff] %vm20_vm11, %v5012_v9 }
 0x1be   :  { %8786 = vst [vmem:[#allocation137_spill] sm:$0xff] %v5979_v3  ;;  %v1145_v3 = vpop.xlane.xlu2 %1144 }
 0x1bf   :  { %141 = vst.msk [vmem:[#allocation3 + $0x1c0] sm:$0xff] %vm20_vm11, %v5012_v9 }
 0x1c0   :  { %8787 = vst [vmem:[#allocation138_spill] sm:$0xff] %v5983_v32  ;;  %v6021_v32 = vmax.f32 %v6010_v31, %v1145_v3  ;;  %v6057_v3 = vpop.f32.mrf.mxu2 }
 0x1c1   :  { %142 = vst.msk [vmem:[#allocation3 + $0x1c8] sm:$0xff] %vm20_vm11, %v5012_v9 }
 0x1c2   :  { %143 = vst.msk [vmem:[#allocation3 + $0x1d0] sm:$0xff] %vm20_vm11, %v5012_v9 }
 0x1c3   :  { %8788 = vst [vmem:[#allocation139_spill] sm:$0xff] %v5990_v59 }
 0x1c4   :  { %144 = vst.msk [vmem:[#allocation3 + $0x1d8] sm:$0xff] %vm20_vm11, %v5012_v9 }
 0x1c5   :  { %8789 = vst [vmem:[#allocation140_spill] sm:$0xff] %v5996_v44 }
 0x1c6   :  { %145 = vst.msk [vmem:[#allocation3 + $0x1e0] sm:$0xff] %vm20_vm11, %v5012_v9 }
 0x1c7   :  { %2649 = vst.msk [vmem:[#allocation2 + $0x170] sm:$0xff] %vm20_vm11, %v5990_v59 }
 0x1c8   :  { %8790 = vst [vmem:[#allocation141_spill] sm:$0xff] %v6002_v41  ;;  %v6090_v41 = vpop.f32.mrf.mxu3 }
 0x1c9   :  { %8791 = vst [vmem:[#allocation142_spill] sm:$0xff] %v6004_v17  ;;  %1760 = vperm.xlu0 %4439, %v5685_v26   ;;  %v6177_v26 = vpop.permute.xlu2 %1585 }
 0x1ca   :  { %2618 = vst.msk [vmem:[#allocation2 + $0x78] sm:$0xff] %vm20_vm11, %v5996_v44 }
 0x1cb   :  { %146 = vst.msk [vmem:[#allocation3 + $0x1e8] sm:$0xff] %vm20_vm11, %v5012_v9 }
 0x1cc   :  { %8792 = vst [vmem:[#allocation143_spill] sm:$0xff] %v6010_v31  ;;  %v1152_v31 = vmax.f32 %v6057_v3, %v6059_v37 }
 0x1cd   :  { %147 = vst.msk [vmem:[#allocation3 + $0x1f0] sm:$0xff] %vm20_vm11, %v5012_v9 }
 0x1ce   :  { %148 = vst.msk [vmem:[#allocation3 + $0x1f8] sm:$0xff] %vm20_vm11, %v5012_v9  ;;  %1153 = vmax.xlane.f32.xlu2 %v1152_v31  ;;  %v6088_v31 = vpop.f32.mrf.mxu2 }
 0x1cf   :  { %149 = vst.msk [vmem:[#allocation4] sm:$0xff] %vm20_vm11, %v5012_v9 }
 0x1d0   :  { %8793 = vst [vmem:[#allocation144_spill] sm:$0xff] %v6021_v32  ;;  %v6112_v15 = vpop.f32.mrf.mxu3 }
 0x1d1   :  { %150 = vst.msk [vmem:[#allocation4 + $0x8] sm:$0xff] %vm20_vm11, %v5012_v9 }
 0x1d2   :  { %151 = vst.msk [vmem:[#allocation4 + $0x10] sm:$0xff] %vm20_vm11, %v5012_v9 }
 0x1d3   :  { %2650 = vst.msk [vmem:[#allocation2 + $0x178] sm:$0xff] %vm20_vm11, %v6021_v32 }
 0x1d4   :  { %152 = vst.msk [vmem:[#allocation4 + $0x18] sm:$0xff] %vm20_vm11, %v5012_v9 }
 0x1d5   :  { %153 = vst.msk [vmem:[#allocation4 + $0x20] sm:$0xff] %vm20_vm11, %v5012_v9 }
 0x1d6   :  { %154 = vst.msk [vmem:[#allocation4 + $0x28] sm:$0xff] %vm20_vm11, %v5012_v9  ;;  %v6110_v27 = vpop.f32.mrf.mxu2 }
 0x1d7   :  { %155 = vst.msk [vmem:[#allocation4 + $0x30] sm:$0xff] %vm20_vm11, %v5012_v9 }
 0x1d8   :  { %156 = vst.msk [vmem:[#allocation4 + $0x38] sm:$0xff] %vm20_vm11, %v5012_v9 }
 0x1d9   :  { %157 = vst.msk [vmem:[#allocation4 + $0x40] sm:$0xff] %vm20_vm11, %v5012_v9 }
 0x1da   :  { %158 = vst.msk [vmem:[#allocation4 + $0x48] sm:$0xff] %vm20_vm11, %v5012_v9 }
 0x1db   :  { %159 = vst.msk [vmem:[#allocation4 + $0x50] sm:$0xff] %vm20_vm11, %v5012_v9 }
 0x1dc   :  { %160 = vst.msk [vmem:[#allocation4 + $0x58] sm:$0xff] %vm20_vm11, %v5012_v9 }
 0x1dd   :  { %161 = vst.msk [vmem:[#allocation4 + $0x60] sm:$0xff] %vm20_vm11, %v5012_v9  ;;  %v1055_v29 = vpop.xlane.xlu2 %1054 }
 0x1de   :  { %162 = vst.msk [vmem:[#allocation4 + $0x68] sm:$0xff] %vm20_vm11, %v5012_v9 }
 0x1df   :  { %163 = vst.msk [vmem:[#allocation4 + $0x70] sm:$0xff] %vm20_vm11, %v5012_v9 }
 0x1e0   :  { %164 = vst.msk [vmem:[#allocation4 + $0x78] sm:$0xff] %vm20_vm11, %v5012_v9 }
 0x1e1   :  { %165 = vst.msk [vmem:[#allocation4 + $0x80] sm:$0xff] %vm20_vm11, %v5012_v9 }
 0x1e2   :  { %8794 = vst [vmem:[#allocation145_spill] sm:$0xff] %v6057_v3  ;;  %v6084_v3 = vpop.f32.mrf.mxu1 }
 0x1e3   :  { %8795 = vst [vmem:[#allocation146_spill] sm:$0xff] %v6059_v37  ;;  %v6082_v37 = vpop.f32.mrf.mxu0 }
 0x1e4   :  { %166 = vst.msk [vmem:[#allocation4 + $0x88] sm:$0xff] %vm20_vm11, %v5012_v9  ;;  %v1059_v17 = vmax.f32 %v6082_v37, %v6084_v3 }
 0x1e5   :  { %167 = vst.msk [vmem:[#allocation4 + $0x90] sm:$0xff] %vm20_vm11, %v5012_v9 }
 0x1e6   :  { %168 = vst.msk [vmem:[#allocation4 + $0x98] sm:$0xff] %vm20_vm11, %v5012_v9  ;;  %1060 = vmax.xlane.f32.xlu1 %v1059_v17  ;;  %v4403_v17 = vld [vmem:[%s8254_s1 + $0x60] sm:$0xff]  ;;  %1605 = vperm.xlu2 %4438, %v5718_v45  }
 0x1e7   :  { %169 = vst.msk [vmem:[#allocation4 + $0xa0] sm:$0xff] %vm20_vm11, %v5012_v9  ;;  %4259 = vmatmul.msk.bf16.gmra.mxu0 %vm385_vm0, %v4403_v17  ;;  %4275 = vmatmul.msk.bf16.gmra.mxu1 %vm385_vm0, %v4403_v17  ;;  %v6160_v17 = vld [vmem:[#allocation2 + $0x180] sm:$0xff] }
 0x1e8   :  { %170 = vst.msk [vmem:[#allocation4 + $0xa8] sm:$0xff] %vm20_vm11, %v5012_v9 }
 0x1e9   :  { %171 = vst.msk [vmem:[#allocation4 + $0xb0] sm:$0xff] %vm20_vm11, %v5012_v9 }
 0x1ea   :  { %172 = vst.msk [vmem:[#allocation4 + $0xb8] sm:$0xff] %vm20_vm11, %v5012_v9 }
 0x1eb   :  { %173 = vst.msk [vmem:[#allocation4 + $0xc0] sm:$0xff] %vm20_vm11, %v5012_v9 }
 0x1ec   :  { %174 = vst.msk [vmem:[#allocation4 + $0xc8] sm:$0xff] %vm20_vm11, %v5012_v9 }
 0x1ed   :  { %8796 = vst [vmem:[#allocation147_spill] sm:$0xff] %v6082_v37  ;;  %v6168_v37 = vpop.f32.mrf.mxu1 }
 0x1ee   :  { %8797 = vst [vmem:[#allocation148_spill] sm:$0xff] %v6084_v3  ;;  %v1158_v3 = vmax.f32 %v6110_v27, %v6112_v15 }
 0x1ef   :  { %175 = vst.msk [vmem:[#allocation4 + $0xd0] sm:$0xff] %vm20_vm11, %v5012_v9 }
 0x1f0   :  { %8798 = vst [vmem:[#allocation149_spill] sm:$0xff] %v6088_v31  ;;  %1159 = vmax.xlane.f32.xlu1 %v1158_v3  ;;  %v6150_v3 = vpop.permute.xlu1 %1580 }
 0x1f1   :  { %8799 = vst [vmem:[#allocation150_spill] sm:$0xff] %v6090_v41 }
 0x1f2   :  { %176 = vst.msk [vmem:[#allocation4 + $0xd8] sm:$0xff] %vm20_vm11, %v5012_v9 }
 0x1f3   :  { %177 = vst.msk [vmem:[#allocation4 + $0xe0] sm:$0xff] %vm20_vm11, %v5012_v9 }
 0x1f4   :  { %178 = vst.msk [vmem:[#allocation4 + $0xe8] sm:$0xff] %vm20_vm11, %v5012_v9 }
 0x1f5   :  { %179 = vst.msk [vmem:[#allocation4 + $0xf0] sm:$0xff] %vm20_vm11, %v5012_v9  ;;  %v6205_v8 = vpop.f32.mrf.mxu1 }
 0x1f6   :  { %180 = vst.msk [vmem:[#allocation4 + $0xf8] sm:$0xff] %vm20_vm11, %v5012_v9 }
 0x1f7   :  { %181 = vst.msk [vmem:[#allocation4 + $0x100] sm:$0xff] %vm20_vm11, %v5012_v9 }
 0x1f8   :  { %182 = vst.msk [vmem:[#allocation4 + $0x108] sm:$0xff] %vm20_vm11, %v5012_v9  ;;  %v6183_v43 = vpop.permute.xlu1 %1740 }
 0x1f9   :  { %183 = vst.msk [vmem:[#allocation4 + $0x110] sm:$0xff] %vm20_vm11, %v5012_v9 }
 0x1fa   :  { %8800 = vst [vmem:[#allocation151_spill] sm:$0xff] %v6110_v27  ;;  %v6164_v27 = vpop.f32.mrf.mxu0 }
 0x1fb   :  { %8801 = vst [vmem:[#allocation152_spill] sm:$0xff] %v6112_v15  ;;  %v6143_v15 = vpop.permute.xlu0 %1745 }
 0x1fc   :  { %184 = vst.msk [vmem:[#allocation4 + $0x118] sm:$0xff] %vm20_vm11, %v5012_v9 }
 0x1fd   :  { %185 = vst.msk [vmem:[#allocation4 + $0x120] sm:$0xff] %vm20_vm11, %v5012_v9 }
 0x1fe   :  { %186 = vst.msk [vmem:[#allocation4 + $0x128] sm:$0xff] %vm20_vm11, %v5012_v9 }
 0x1ff   :  { %187 = vst.msk [vmem:[#allocation4 + $0x130] sm:$0xff] %vm20_vm11, %v5012_v9 }
 0x200   :  { %188 = vst.msk [vmem:[#allocation4 + $0x138] sm:$0xff] %vm20_vm11, %v5012_v9 }
 0x201   :  { %189 = vst.msk [vmem:[#allocation4 + $0x140] sm:$0xff] %vm20_vm11, %v5012_v9 }
 0x202   :  { %190 = vst.msk [vmem:[#allocation4 + $0x148] sm:$0xff] %vm20_vm11, %v5012_v9  ;;  %v6199_v19 = vpop.f32.mrf.mxu0 }
 0x203   :  { %191 = vst.msk [vmem:[#allocation4 + $0x150] sm:$0xff] %vm20_vm11, %v5012_v9  ;;  %v1148_v45 = vpop.xlane.xlu0 %1147  ;;  %v1065_v6 = vmax.f32 %v6199_v19, %v6205_v8 }
 0x204   :  { %192 = vst.msk [vmem:[#allocation4 + $0x158] sm:$0xff] %vm20_vm11, %v5012_v9  ;;  %v6173_v28 = vmax.f32 %v6160_v17, %v1148_v45  ;;  %v1155_v45 = vmax.f32 %v6088_v31, %v6090_v41  ;;  %v1052_v31 = vpop.xlane.xlu1 %1051 }
 0x205   :  { %193 = vst.msk [vmem:[#allocation4 + $0x160] sm:$0xff] %vm20_vm11, %v5012_v9 }
 0x206   :  { %194 = vst.msk [vmem:[#allocation4 + $0x168] sm:$0xff] %vm20_vm11, %v5012_v9  ;;  %1156 = vmax.xlane.f32.xlu0 %v1155_v45  ;;  %v6215_v45 = vmax.f32 %v6203_v16, %v1052_v31  ;;  %v4419_v31 = vld [vmem:[%s8254_s1 + $0xe0] sm:$0xff] }
 0x207   :  { %195 = vst.msk [vmem:[#allocation4 + $0x170] sm:$0xff] %vm20_vm11, %v5012_v9  ;;  %4371 = vmatmul.msk.bf16.gmra.mxu2 %vm385_vm0, %v4419_v31  ;;  %4387 = vmatmul.msk.bf16.gmra.mxu3 %vm385_vm0, %v4419_v31 }
 0x208   :  { %196 = vst.msk [vmem:[#allocation4 + $0x178] sm:$0xff] %vm20_vm11, %v5012_v9 }
 0x209   :  { %197 = vst.msk [vmem:[#allocation4 + $0x180] sm:$0xff] %vm20_vm11, %v5012_v9  ;;  %1610 = vperm.xlu1 %4437, %v5723_v53  }
 0x20a   :  { %198 = vst.msk [vmem:[#allocation4 + $0x188] sm:$0xff] %vm20_vm11, %v5012_v9 }
 0x20b   :  { %199 = vst.msk [vmem:[#allocation4 + $0x190] sm:$0xff] %vm20_vm11, %v5012_v9 }
 0x20c   :  { %200 = vst.msk [vmem:[#allocation4 + $0x198] sm:$0xff] %vm20_vm11, %v5012_v9 }
 0x20d   :  { %8802 = vst [vmem:[#allocation153_spill] sm:$0xff] %v6160_v17  ;;  %v6195_v17 = vld [vmem:[#allocation2 + $0x88] sm:$0xff] }
 0x20e   :  { %201 = vst.msk [vmem:[#allocation4 + $0x1a0] sm:$0xff] %vm20_vm11, %v5012_v9  ;;  %v6210_v41 = vmax.f32 %v6195_v17, %v1055_v29  ;;  %1066 = vmax.xlane.f32.xlu0 %v1065_v6  ;;  %v1151_v29 = vpop.xlane.xlu1 %1150  ;;  %v1062_v6 = vmax.f32 %v6164_v27, %v6168_v37 }
 0x20f   :  { %8803 = vst [vmem:[#allocation154_spill] sm:$0xff] %v6164_v27  ;;  %v6254_v27 = vpop.f32.mrf.mxu3 }
 0x210   :  { %202 = vst.msk [vmem:[#allocation4 + $0x1a8] sm:$0xff] %vm20_vm11, %v5012_v9  ;;  %1063 = vmax.xlane.f32.xlu2 %v1062_v6  ;;  %v6252_v6 = vpop.f32.mrf.mxu2 }
 0x211   :  { %8804 = vst [vmem:[#allocation155_spill] sm:$0xff] %v6168_v37  ;;  %1770 = vperm.xlu1 %4437, %v5744_v35   ;;  %v6256_v35 = vpop.permute.xlu2 %1750 }
 0x212   :  { %203 = vst.msk [vmem:[#allocation4 + $0x1b0] sm:$0xff] %vm20_vm11, %v5012_v9 }
 0x213   :  { %8805 = vst [vmem:[#allocation156_spill] sm:$0xff] %v6173_v28 }
 0x214   :  { %204 = vst.msk [vmem:[#allocation4 + $0x1b8] sm:$0xff] %vm20_vm11, %v5012_v9 }
 0x215   :  { %205 = vst.msk [vmem:[#allocation4 + $0x1c0] sm:$0xff] %vm20_vm11, %v5012_v9 }
 0x216   :  { %2651 = vst.msk [vmem:[#allocation2 + $0x180] sm:$0xff] %vm20_vm11, %v6173_v28 }
 0x217   :  { %206 = vst.msk [vmem:[#allocation4 + $0x1c8] sm:$0xff] %vm20_vm11, %v5012_v9 }
 0x218   :  { %207 = vst.msk [vmem:[#allocation4 + $0x1d0] sm:$0xff] %vm20_vm11, %v5012_v9 }
 0x219   :  { %208 = vst.msk [vmem:[#allocation4 + $0x1d8] sm:$0xff] %vm20_vm11, %v5012_v9 }
 0x21a   :  { %209 = vst.msk [vmem:[#allocation4 + $0x1e0] sm:$0xff] %vm20_vm11, %v5012_v9 }
 0x21b   :  { %8806 = vst [vmem:[#allocation157_spill] sm:$0xff] %v6195_v17 }
 0x21c   :  { %210 = vst.msk [vmem:[#allocation4 + $0x1e8] sm:$0xff] %vm20_vm11, %v5012_v9 }
 0x21d   :  { %8807 = vst [vmem:[#allocation158_spill] sm:$0xff] %v6199_v19  ;;  %v6247_v19 = vld [vmem:[#allocation2 + $0x90] sm:$0xff] }
 0x21e   :  { %211 = vst.msk [vmem:[#allocation4 + $0x1f0] sm:$0xff] %vm20_vm11, %v5012_v9 }
 0x21f   :  { %8808 = vst [vmem:[#allocation159_spill] sm:$0xff] %v6203_v16  ;;  %v6238_v16 = vpop.permute.xlu0 %1590 }
 0x220   :  { %8809 = vst [vmem:[#allocation160_spill] sm:$0xff] %v6205_v8 }
 0x221   :  { %212 = vst.msk [vmem:[#allocation4 + $0x1f8] sm:$0xff] %vm20_vm11, %v5012_v9  ;;  %v6222_v9 = vld [vmem:[#allocation2 + $0x188] sm:$0xff] }
 0x222   :  { %2620 = vst.msk [vmem:[#allocation2 + $0x88] sm:$0xff] %vm20_vm11, %v6210_v41  ;;  %v6226_v17 = vmax.f32 %v6222_v9, %v1151_v29  ;;  %1775 = vperm.xlu0 %4439, %v5780_v7   ;;  %v6240_v29 = vpop.f32.mrf.mxu0  ;;  %v6262_v7 = vpop.f32.mrf.mxu3 }
 0x223   :  { %2619 = vst.msk [vmem:[#allocation2 + $0x80] sm:$0xff] %vm20_vm11, %v6215_v45 }
 0x224   :  { %8810 = vst [vmem:[#allocation161_spill] sm:$0xff] %v6222_v9  ;;  %v6242_v9 = vpop.f32.mrf.mxu1 }
 0x225   :  { %2652 = vst.msk [vmem:[#allocation2 + $0x188] sm:$0xff] %vm20_vm11, %v6226_v17  ;;  %v1068_v8 = vmax.f32 %v6240_v29, %v6242_v9 }
 0x226   :  { %8811 = vst [vmem:[#allocation162_spill] sm:$0xff] %v6240_v29  ;;  %v6270_v29 = vld [vmem:[#allocation2 + $0x190] sm:$0xff] }
 0x227   :  { %8812 = vst [vmem:[#allocation163_spill] sm:$0xff] %v6242_v9  ;;  %v6264_v9 = vpop.permute.xlu2 %1595 }
 0x228   :  { %1765 = vperm.xlu2 %4438, %v5715_v48   ;;  %8813 = vst [vmem:[#allocation164_spill] sm:$0xff] %v6247_v19  ;;  %v1058_v31 = vpop.xlane.xlu0 %1057  ;;  %v6260_v48 = vpop.f32.mrf.mxu2 }
 0x229   :  { %v6250_v37 = vmax.f32 %v6247_v19, %v1058_v31  ;;  %8814 = vst [vmem:[#allocation165_spill] sm:$0xff] %v6252_v6  ;;  %v6268_v31 = vpop.permute.xlu1 %1755 }
 0x22a   :  { %8815 = vst [vmem:[#allocation166_spill] sm:$0xff] %v6254_v27 }
 0x22b   :  { %2621 = vst.msk [vmem:[#allocation2 + $0x90] sm:$0xff] %vm20_vm11, %v6250_v37 }
 0x22c   :  { %8816 = vst [vmem:[#allocation167_spill] sm:$0xff] %v6260_v48 }
 0x22d   :  { %8817 = vst [vmem:[#allocation168_spill] sm:$0xff] %v6262_v7 }
 0x22e   :  { %8818 = vst [vmem:[#allocation169_spill] sm:$0xff] %v6270_v29 }
 0x22f   :  { %8821 = vst [vmem:[#allocation172_spill] sm:$0xff] %v6280_v30 }
 0x231   :  { %v6277_v36 = vpop.permute.xlu1 %1600 }
 0x232   :  { %8820 = vst [vmem:[#allocation171_spill] sm:$0xff] %v6277_v36 }
 0x23b   :  { %1069 = vmax.xlane.f32.xlu1 %v1068_v8  ;;  %v1164_v8 = vmax.f32 %v6260_v48, %v6262_v7  ;;  %v6312_v48 = vpop.f32.mrf.mxu2 }
 0x23c   :  { %8825 = vst [vmem:[#allocation176_spill] sm:$0xff] %v6312_v48 }
 0x241   :  { %v1154_v19 = vpop.xlane.xlu2 %1153 }
 0x242   :  { %v6273_v53 = vmax.f32 %v6270_v29, %v1154_v19  ;;  %v6290_v19 = vld [vmem:[#allocation2 + $0x1a0] sm:$0xff]  ;;  %v4404_v29 = vld [vmem:[%s8254_s1 + $0x68] sm:$0xff] }
 0x243   :  { %8822 = vst [vmem:[#allocation173_spill] sm:$0xff] %v6290_v19  ;;  %4260 = vmatmul.msk.bf16.gmra.mxu0 %vm385_vm0, %v4404_v29  ;;  %4276 = vmatmul.msk.bf16.gmra.mxu1 %vm385_vm0, %v4404_v29 }
 0x244   :  { %8819 = vst [vmem:[#allocation170_spill] sm:$0xff] %v6273_v53 }
 0x245   :  { %2653 = vst.msk [vmem:[#allocation2 + $0x190] sm:$0xff] %vm20_vm11, %v6273_v53 }
 0x24c   :  { %1165 = vmax.xlane.f32.xlu0 %v1164_v8  ;;  %v1161_v8 = vmax.f32 %v6252_v6, %v6254_v27  ;;  %v6310_v6 = vld [vmem:[#allocation2 + $0x198] sm:$0xff] }
 0x24d   :  { %8824 = vst [vmem:[#allocation175_spill] sm:$0xff] %v6310_v6 }
 0x251   :  { %1162 = vmax.xlane.f32.xlu2 %v1161_v8  ;;  %v6307_v8 = vpop.permute.xlu0 %1760 }
 0x254   :  { %1620 = vperm.xlu1 %4437, %v5785_v10   ;;  %v6314_v10 = vpop.f32.mrf.mxu3 }
 0x255   :  { %8826 = vst [vmem:[#allocation177_spill] sm:$0xff] %v6314_v10 }
 0x259   :  { %v1061_v25 = vpop.xlane.xlu1 %1060 }
 0x25a   :  { %v6283_v7 = vmax.f32 %v6280_v30, %v1061_v25  ;;  %v4420_v25 = vld [vmem:[%s8254_s1 + $0xe8] sm:$0xff] }
 0x25b   :  { %4372 = vmatmul.msk.bf16.gmra.mxu2 %vm385_vm0, %v4420_v25  ;;  %4388 = vmatmul.msk.bf16.gmra.mxu3 %vm385_vm0, %v4420_v25  ;;  %v6321_v25 = vpop.f32.mrf.mxu1 }
 0x25c   :  { %2622 = vst.msk [vmem:[#allocation2 + $0x98] sm:$0xff] %vm20_vm11, %v6283_v7 }
 0x25d   :  { %8828 = vst [vmem:[#allocation179_spill] sm:$0xff] %v6321_v25 }
 0x260   :  { %1625 = vperm.xlu0 %4439, %v5815_v21   ;;  %v1167_v21 = vmax.f32 %v6312_v48, %v6314_v10  ;;  %v6340_v48 = vpop.permute.xlu2 %1605 }
 0x261   :  { %8832 = vst [vmem:[#allocation183_spill] sm:$0xff] %v6340_v48 }
 0x263   :  { %v1160_v30 = vpop.xlane.xlu1 %1159 }
 0x264   :  { %v6301_v27 = vmax.f32 %v6290_v19, %v1160_v30  ;;  %v6319_v19 = vpop.f32.mrf.mxu0 }
 0x265   :  { %8827 = vst [vmem:[#allocation178_spill] sm:$0xff] %v6319_v19 }
 0x266   :  { %8823 = vst [vmem:[#allocation174_spill] sm:$0xff] %v6301_v27 }
 0x267   :  { %2655 = vst.msk [vmem:[#allocation2 + $0x1a0] sm:$0xff] %vm20_vm11, %v6301_v27 }
 0x269   :  { %1615 = vperm.xlu2 %4438, %v5749_v34   ;;  %v6327_v34 = vld [vmem:[#allocation2 + $0xa8] sm:$0xff] }
 0x26a   :  { %8829 = vst [vmem:[#allocation180_spill] sm:$0xff] %v6327_v34 }
 0x26c   :  { %v6332_v24 = vpop.f32.mrf.mxu0 }
 0x26d   :  { %8830 = vst [vmem:[#allocation181_spill] sm:$0xff] %v6332_v24 }
 0x279   :  { %v1157_v29 = vpop.xlane.xlu0 %1156 }
 0x27a   :  { %v6317_v30 = vmax.f32 %v6310_v6, %v1157_v29  ;;  %v6334_v29 = vpop.f32.mrf.mxu1 }
 0x27b   :  { %8831 = vst [vmem:[#allocation182_spill] sm:$0xff] %v6334_v29  ;;  %v1074_v10 = vmax.f32 %v6332_v24, %v6334_v29  ;;  %v4405_v29 = vld [vmem:[%s8254_s1 + $0x70] sm:$0xff] }
 0x27c   :  { %2654 = vst.msk [vmem:[#allocation2 + $0x198] sm:$0xff] %vm20_vm11, %v6317_v30  ;;  %4261 = vmatmul.msk.bf16.gmra.mxu0 %vm385_vm0, %v4405_v29  ;;  %4277 = vmatmul.msk.bf16.gmra.mxu1 %vm385_vm0, %v4405_v29 }
 0x27e   :  { %1168 = vmax.xlane.f32.xlu1 %v1167_v21  ;;  %v6342_v21 = vld [vmem:[#allocation2 + $0xa0] sm:$0xff] }
 0x27f   :  { %8833 = vst [vmem:[#allocation184_spill] sm:$0xff] %v6342_v21 }
 0x281   :  { %v1067_v27 = vpop.xlane.xlu0 %1066 }
 0x282   :  { %v6330_v36 = vmax.f32 %v6327_v34, %v1067_v27  ;;  %v4421_v27 = vld [vmem:[%s8254_s1 + $0xf0] sm:$0xff] }
 0x283   :  { %v1064_v6 = vpop.xlane.xlu2 %1063  ;;  %4373 = vmatmul.msk.bf16.gmra.mxu2 %vm385_vm0, %v4421_v27  ;;  %4389 = vmatmul.msk.bf16.gmra.mxu3 %vm385_vm0, %v4421_v27  ;;  %v6362_v34 = vld [vmem:[#allocation2 + $0xb0] sm:$0xff] }
 0x284   :  { %2624 = vst.msk [vmem:[#allocation2 + $0xa8] sm:$0xff] %vm20_vm11, %v6330_v36  ;;  %v6345_v5 = vmax.f32 %v6342_v21, %v1064_v6  ;;  %v1071_v6 = vmax.f32 %v6319_v19, %v6321_v25 }
 0x285   :  { %8837 = vst [vmem:[#allocation188_spill] sm:$0xff] %v6362_v34 }
 0x286   :  { %8834 = vst [vmem:[#allocation185_spill] sm:$0xff] %v6345_v5 }
 0x287   :  { %2623 = vst.msk [vmem:[#allocation2 + $0xa0] sm:$0xff] %vm20_vm11, %v6345_v5 }
 0x28a   :  { %1075 = vmax.xlane.f32.xlu0 %v1074_v10  ;;  %v6355_v10 = vpop.permute.xlu1 %1610  ;;  %v6376_v25 = vpop.f32.mrf.mxu2 }
 0x28b   :  { %8835 = vst [vmem:[#allocation186_spill] sm:$0xff] %v6355_v10  ;;  %v6378_v19 = vpop.f32.mrf.mxu3  ;;  %v6400_v48 = vpop.permute.xlu2 %1765  ;;  %v6402_v10 = vld [vmem:[#allocation2 + $0x1a8] sm:$0xff] }
 0x28c   :  { %8840 = vst [vmem:[#allocation191_spill] sm:$0xff] %v6376_v25 }
 0x28d   :  { %8841 = vst [vmem:[#allocation192_spill] sm:$0xff] %v6378_v19 }
 0x28e   :  { %8847 = vst [vmem:[#allocation198_spill] sm:$0xff] %v6402_v10 }
 0x292   :  { %1072 = vmax.xlane.f32.xlu2 %v1071_v6  ;;  %v6360_v21 = vpop.permute.xlu1 %1770 }
 0x293   :  { %8836 = vst [vmem:[#allocation187_spill] sm:$0xff] %v6360_v21  ;;  %v6385_v21 = vld [vmem:[#allocation2 + $0x1b0] sm:$0xff] }
 0x294   :  { %v6374_v6 = vpop.permute.xlu0 %1775  ;;  %8844 = vst [vmem:[#allocation195_spill] sm:$0xff] %v6385_v21 }
 0x295   :  { %8839 = vst [vmem:[#allocation190_spill] sm:$0xff] %v6374_v6  ;;  %v6394_v6 = vpop.f32.mrf.mxu3 }
 0x296   :  { %8846 = vst [vmem:[#allocation197_spill] sm:$0xff] %v6394_v6 }
 0x297   :  { %1785 = vperm.xlu1 %4437, %v5842_v33   ;;  %v6381_v33 = vpop.f32.mrf.mxu0 }
 0x298   :  { %8842 = vst [vmem:[#allocation193_spill] sm:$0xff] %v6381_v33 }
 0x29e   :  { %1790 = vperm.xlu0 %4439, %v5876_v13   ;;  %v6383_v13 = vpop.f32.mrf.mxu1 }
 0x29f   :  { %8843 = vst [vmem:[#allocation194_spill] sm:$0xff] %v6383_v13 }
 0x2aa   :  { %1780 = vperm.xlu2 %4438, %v5810_v39  }
 0x2ae   :  { %v1070_v24 = vpop.xlane.xlu1 %1069 }
 0x2af   :  { %v6370_v27 = vmax.f32 %v6362_v34, %v1070_v24  ;;  %v1077_v24 = vmax.f32 %v6381_v33, %v6383_v13 }
 0x2b1   :  { %8838 = vst [vmem:[#allocation189_spill] sm:$0xff] %v6370_v27 }
 0x2b2   :  { %2625 = vst.msk [vmem:[#allocation2 + $0xb0] sm:$0xff] %vm20_vm11, %v6370_v27  ;;  %v6392_v27 = vpop.f32.mrf.mxu2 }
 0x2b3   :  { %8845 = vst [vmem:[#allocation196_spill] sm:$0xff] %v6392_v27  ;;  %v1173_v39 = vmax.f32 %v6392_v27, %v6394_v6 }
 0x2bf   :  { %v1166_v29 = vpop.xlane.xlu0 %1165 }
 0x2c0   :  { %v6390_v34 = vmax.f32 %v6385_v21, %v1166_v29  ;;  %v6429_v27 = vpop.f32.mrf.mxu0 }
 0x2c1   :  { %1078 = vmax.xlane.f32.xlu1 %v1077_v24  ;;  %v4406_v24 = vld [vmem:[%s8254_s1 + $0x78] sm:$0xff]  ;;  %8853 = vst [vmem:[#allocation204_spill] sm:$0xff] %v6429_v27 }
 0x2c2   :  { %2657 = vst.msk [vmem:[#allocation2 + $0x1b0] sm:$0xff] %vm20_vm11, %v6390_v34  ;;  %4262 = vmatmul.msk.bf16.gmra.mxu0 %vm385_vm0, %v4406_v24  ;;  %4278 = vmatmul.msk.bf16.gmra.mxu1 %vm385_vm0, %v4406_v24  ;;  %v6431_v24 = vpop.f32.mrf.mxu1 }
 0x2c3   :  { %8854 = vst [vmem:[#allocation205_spill] sm:$0xff] %v6431_v24 }
 0x2c4   :  { %v1163_v13 = vpop.xlane.xlu2 %1162 }
 0x2c5   :  { %v6405_v29 = vmax.f32 %v6402_v10, %v1163_v13  ;;  %v6420_v10 = vld [vmem:[#allocation2 + $0x1b8] sm:$0xff] }
 0x2c6   :  { %v6418_v13 = vpop.permute.xlu1 %1620  ;;  %8850 = vst [vmem:[#allocation201_spill] sm:$0xff] %v6420_v10 }
 0x2c7   :  { %8848 = vst [vmem:[#allocation199_spill] sm:$0xff] %v6405_v29 }
 0x2c8   :  { %1174 = vmax.xlane.f32.xlu0 %v1173_v39  ;;  %2656 = vst.msk [vmem:[#allocation2 + $0x1a8] sm:$0xff] %vm20_vm11, %v6405_v29  ;;  %v1170_v39 = vmax.f32 %v6376_v25, %v6378_v19 }
 0x2c9   :  { %8849 = vst [vmem:[#allocation200_spill] sm:$0xff] %v6418_v13 }
 0x2d2   :  { %v6425_v6 = vpop.permute.xlu0 %1625 }
 0x2d3   :  { %1171 = vmax.xlane.f32.xlu2 %v1170_v39  ;;  %8852 = vst [vmem:[#allocation203_spill] sm:$0xff] %v6425_v6  ;;  %v6434_v39 = vld [vmem:[#allocation2 + $0xc0] sm:$0xff] }
 0x2d4   :  { %8855 = vst [vmem:[#allocation206_spill] sm:$0xff] %v6434_v39 }
 0x2da   :  { %1635 = vperm.xlu1 %4437, %v5883_v23  }
 0x2dc   :  { %1640 = vperm.xlu0 %4439, %v5909_v42   ;;  %v6445_v42 = vpop.f32.mrf.mxu1 }
 0x2dd   :  { %8860 = vst [vmem:[#allocation211_spill] sm:$0xff] %v6445_v42 }
 0x2de   :  { %v6436_v25 = vpop.f32.mrf.mxu2  ;;  %v6438_v23 = vpop.f32.mrf.mxu3 }
 0x2df   :  { %8856 = vst [vmem:[#allocation207_spill] sm:$0xff] %v6436_v25 }
 0x2e0   :  { %8857 = vst [vmem:[#allocation208_spill] sm:$0xff] %v6438_v23 }
 0x2eb   :  { %1630 = vperm.xlu2 %4438, %v5849_v61   ;;  %v1176_v61 = vmax.f32 %v6436_v25, %v6438_v23  ;;  %v6475_v25 = vld [vmem:[#allocation2 + $0xc8] sm:$0xff] }
 0x2ec   :  { %8865 = vst [vmem:[#allocation216_spill] sm:$0xff] %v6475_v25 }
 0x2f1   :  { %v1169_v33 = vpop.xlane.xlu1 %1168 }
 0x2f2   :  { %v6423_v21 = vmax.f32 %v6420_v10, %v1169_v33  ;;  %v6443_v10 = vpop.f32.mrf.mxu0 }
 0x2f3   :  { %8859 = vst [vmem:[#allocation210_spill] sm:$0xff] %v6443_v10  ;;  %v1083_v13 = vmax.f32 %v6443_v10, %v6445_v42  ;;  %v6477_v42 = vpop.f32.mrf.mxu2 }
 0x2f4   :  { %8851 = vst [vmem:[#allocation202_spill] sm:$0xff] %v6423_v21 }
 0x2f5   :  { %2658 = vst.msk [vmem:[#allocation2 + $0x1b8] sm:$0xff] %vm20_vm11, %v6423_v21  ;;  %v4422_v21 = vld [vmem:[%s8254_s1 + $0xf8] sm:$0xff] }
 0x2f6   :  { %4374 = vmatmul.msk.bf16.gmra.mxu2 %vm385_vm0, %v4422_v21  ;;  %4390 = vmatmul.msk.bf16.gmra.mxu3 %vm385_vm0, %v4422_v21  ;;  %v1080_v21 = vmax.f32 %v6429_v27, %v6431_v24  ;;  %8866 = vst [vmem:[#allocation217_spill] sm:$0xff] %v6477_v42 }
 0x2fd   :  { %v1076_v19 = vpop.xlane.xlu0 %1075 }
 0x2fe   :  { %v6441_v33 = vmax.f32 %v6434_v39, %v1076_v19  ;;  %v6458_v19 = vpop.permute.xlu2 %1615  ;;  %v6460_v39 = vld [vmem:[#allocation2 + $0xb8] sm:$0xff] }
 0x2ff   :  { %8861 = vst [vmem:[#allocation212_spill] sm:$0xff] %v6460_v39 }
 0x300   :  { %8858 = vst [vmem:[#allocation209_spill] sm:$0xff] %v6441_v33 }
 0x301   :  { %2627 = vst.msk [vmem:[#allocation2 + $0xc0] sm:$0xff] %vm20_vm11, %v6441_v33 }
 0x304   :  { %1177 = vmax.xlane.f32.xlu1 %v1176_v61 }
 0x306   :  { %1084 = vmax.xlane.f32.xlu0 %v1083_v13  ;;  %v1073_v6 = vpop.xlane.xlu2 %1072  ;;  %v6492_v27 = vpop.f32.mrf.mxu2 }
 0x307   :  { %v6463_v23 = vmax.f32 %v6460_v39, %v1073_v6  ;;  %v6479_v6 = vpop.f32.mrf.mxu3  ;;  %8871 = vst [vmem:[#allocation222_spill] sm:$0xff] %v6492_v27 }
 0x308   :  { %8867 = vst [vmem:[#allocation218_spill] sm:$0xff] %v6479_v6 }
 0x309   :  { %8862 = vst [vmem:[#allocation213_spill] sm:$0xff] %v6463_v23  ;;  %v6471_v61 = vpop.permute.xlu1 %1785 }
 0x30a   :  { %2626 = vst.msk [vmem:[#allocation2 + $0xb8] sm:$0xff] %vm20_vm11, %v6463_v23 }
 0x30b   :  { %8863 = vst [vmem:[#allocation214_spill] sm:$0xff] %v6471_v61  ;;  %v6502_v61 = vpop.f32.mrf.mxu1 }
 0x30c   :  { %8874 = vst [vmem:[#allocation225_spill] sm:$0xff] %v6502_v61 }
 0x310   :  { %v6473_v13 = vpop.permute.xlu0 %1790 }
 0x311   :  { %8864 = vst [vmem:[#allocation215_spill] sm:$0xff] %v6473_v13 }
 0x314   :  { %1081 = vmax.xlane.f32.xlu2 %v1080_v21 }
 0x31a   :  { %1805 = vperm.xlu0 %4439, %v5963_v62   ;;  %v6494_v62 = vpop.f32.mrf.mxu3 }
 0x31b   :  { %8872 = vst [vmem:[#allocation223_spill] sm:$0xff] %v6494_v62 }
 0x31d   :  { %1800 = vperm.xlu1 %4437, %v5934_v20   ;;  %v6486_v20 = vld [vmem:[#allocation2 + $0x1c8] sm:$0xff] }
 0x31e   :  { %8869 = vst [vmem:[#allocation220_spill] sm:$0xff] %v6486_v20 }
 0x32c   :  { %1795 = vperm.xlu2 %4438, %v5904_v60  }
 0x334   :  { %v1079_v39 = vpop.xlane.xlu1 %1078 }
 0x335   :  { %v6482_v10 = vmax.f32 %v6475_v25, %v1079_v39  ;;  %v1182_v39 = vmax.f32 %v6492_v27, %v6494_v62  ;;  %v6500_v25 = vpop.f32.mrf.mxu0  ;;  %v6525_v62 = vpop.f32.mrf.mxu1 }
 0x336   :  { %8873 = vst [vmem:[#allocation224_spill] sm:$0xff] %v6500_v25  ;;  %v1086_v60 = vmax.f32 %v6500_v25, %v6502_v61 }
 0x337   :  { %8868 = vst [vmem:[#allocation219_spill] sm:$0xff] %v6482_v10 }
 0x338   :  { %2628 = vst.msk [vmem:[#allocation2 + $0xc8] sm:$0xff] %vm20_vm11, %v6482_v10 }
 0x339   :  { %8880 = vst [vmem:[#allocation231_spill] sm:$0xff] %v6525_v62 }
 0x33b   :  { %v1175_v21 = vpop.xlane.xlu0 %1174 }
 0x33c   :  { %v6490_v24 = vmax.f32 %v6486_v20, %v1175_v21  ;;  %v6506_v21 = vpop.permute.xlu2 %1780  ;;  %v6508_v20 = vld [vmem:[#allocation2 + $0x1c0] sm:$0xff] }
 0x33d   :  { %8875 = vst [vmem:[#allocation226_spill] sm:$0xff] %v6508_v20  ;;  %v6523_v25 = vpop.f32.mrf.mxu0 }
 0x33e   :  { %8870 = vst [vmem:[#allocation221_spill] sm:$0xff] %v6490_v24 }
 0x33f   :  { %2660 = vst.msk [vmem:[#allocation2 + $0x1c8] sm:$0xff] %vm20_vm11, %v6490_v24 }
 0x340   :  { %8879 = vst [vmem:[#allocation230_spill] sm:$0xff] %v6523_v25 }
 0x344   :  { %1183 = vmax.xlane.f32.xlu0 %v1182_v39  ;;  %v1179_v39 = vmax.f32 %v6477_v42, %v6479_v6  ;;  %v6540_v42 = vpop.f32.mrf.mxu1 }
 0x345   :  { %8886 = vst [vmem:[#allocation237_spill] sm:$0xff] %v6540_v42 }
 0x346   :  { %v1172_v10 = vpop.xlane.xlu2 %1171 }
 0x347   :  { %1087 = vmax.xlane.f32.xlu1 %v1086_v60  ;;  %v6511_v13 = vmax.f32 %v6508_v20, %v1172_v10  ;;  %v6527_v10 = vld [vmem:[#allocation2 + $0x1d0] sm:$0xff]  ;;  %v6529_v20 = vld [vmem:[#allocation2 + $0xd8] sm:$0xff] }
 0x348   :  { %8881 = vst [vmem:[#allocation232_spill] sm:$0xff] %v6527_v10 }
 0x349   :  { %8876 = vst [vmem:[#allocation227_spill] sm:$0xff] %v6511_v13 }
 0x34a   :  { %2659 = vst.msk [vmem:[#allocation2 + $0x1c0] sm:$0xff] %vm20_vm11, %v6511_v13 }
 0x34b   :  { %8882 = vst [vmem:[#allocation233_spill] sm:$0xff] %v6529_v20 }
 0x34c   :  { %v6519_v60 = vpop.permute.xlu1 %1635 }
 0x34d   :  { %8877 = vst [vmem:[#allocation228_spill] sm:$0xff] %v6519_v60  ;;  %v6556_v60 = vld [vmem:[#allocation2 + $0xd0] sm:$0xff] }
 0x34e   :  { %v6521_v61 = vpop.permute.xlu0 %1640  ;;  %8890 = vst [vmem:[#allocation241_spill] sm:$0xff] %v6556_v60 }
 0x34f   :  { %8878 = vst [vmem:[#allocation229_spill] sm:$0xff] %v6521_v61 }
 0x355   :  { %1180 = vmax.xlane.f32.xlu2 %v1179_v39  ;;  %v6538_v39 = vpop.f32.mrf.mxu0 }
 0x356   :  { %8885 = vst [vmem:[#allocation236_spill] sm:$0xff] %v6538_v39 }
 0x358   :  { %1655 = vperm.xlu0 %4439, %v5996_v44  }
 0x360   :  { %1650 = vperm.xlu1 %4437, %v5969_v54  }
 0x36d   :  { %1645 = vperm.xlu2 %4438, %v5941_v38   ;;  %v6554_v38 = vpop.permute.xlu2 %1630 }
 0x36e   :  { %8889 = vst [vmem:[#allocation240_spill] sm:$0xff] %v6554_v38  ;;  %v6588_v38 = vld [vmem:[#allocation2 + $0xe0] sm:$0xff] }
 0x36f   :  { %8899 = vst [vmem:[#allocation250_spill] sm:$0xff] %v6588_v38 }
 0x377   :  { %v1178_v27 = vpop.xlane.xlu1 %1177 }
 0x378   :  { %v6532_v44 = vmax.f32 %v6527_v10, %v1178_v27  ;;  %v1092_v27 = vmax.f32 %v6538_v39, %v6540_v42  ;;  %v6548_v10 = vpop.f32.mrf.mxu2  ;;  %v6579_v39 = vld [vmem:[#allocation2 + $0x1e0] sm:$0xff] }
 0x379   :  { %v1085_v54 = vpop.xlane.xlu0 %1084  ;;  %8887 = vst [vmem:[#allocation238_spill] sm:$0xff] %v6548_v10 }
 0x37a   :  { %8883 = vst [vmem:[#allocation234_spill] sm:$0xff] %v6532_v44  ;;  %v6535_v6 = vmax.f32 %v6529_v20, %v1085_v54  ;;  %v6550_v54 = vpop.f32.mrf.mxu3 }
 0x37b   :  { %2661 = vst.msk [vmem:[#allocation2 + $0x1d0] sm:$0xff] %vm20_vm11, %v6532_v44  ;;  %v1185_v20 = vmax.f32 %v6548_v10, %v6550_v54 }
 0x37c   :  { %8884 = vst [vmem:[#allocation235_spill] sm:$0xff] %v6535_v6 }
 0x37d   :  { %2630 = vst.msk [vmem:[#allocation2 + $0xd8] sm:$0xff] %vm20_vm11, %v6535_v6 }
 0x37e   :  { %8888 = vst [vmem:[#allocation239_spill] sm:$0xff] %v6550_v54 }
 0x37f   :  { %8895 = vst [vmem:[#allocation246_spill] sm:$0xff] %v6579_v39 }
 0x382   :  { %1093 = vmax.xlane.f32.xlu0 %v1092_v27  ;;  %v1089_v27 = vmax.f32 %v6523_v25, %v6525_v62  ;;  %v6571_v10 = vpop.f32.mrf.mxu3 }
 0x383   :  { %8894 = vst [vmem:[#allocation245_spill] sm:$0xff] %v6571_v10 }
 0x387   :  { %v1082_v44 = vpop.xlane.xlu2 %1081 }
 0x388   :  { %v6559_v61 = vmax.f32 %v6556_v60, %v1082_v44  ;;  %v1964_v44 = vsub.f32 %v5197_v55, %v6143_v15  ;;  %v1965_v60 = vsub.f32 %v5199_v56, %v6143_v15 }
 0x38a   :  { %1186 = vmax.xlane.f32.xlu1 %v1185_v20  ;;  %8891 = vst [vmem:[#allocation242_spill] sm:$0xff] %v6559_v61  ;;  %v6567_v20 = vpop.f32.mrf.mxu2 }
 0x38b   :  { %2629 = vst.msk [vmem:[#allocation2 + $0xd0] sm:$0xff] %vm20_vm11, %v6559_v61 }
 0x38c   :  { %8892 = vst [vmem:[#allocation243_spill] sm:$0xff] %v6567_v20  ;;  %v6569_v54 = vpop.permute.xlu0 %1805 }
 0x38d   :  { %8893 = vst [vmem:[#allocation244_spill] sm:$0xff] %v6569_v54  ;;  %v6586_v54 = vpop.f32.mrf.mxu3 }
 0x38e   :  { %8898 = vst [vmem:[#allocation249_spill] sm:$0xff] %v6586_v54 }
 0x38f   :  { %v6573_v42 = vpop.permute.xlu1 %1800 }
 0x396   :  { %1820 = vperm.xlu0 %4439, %v6173_v28   ;;  %1090 = vmax.xlane.f32.xlu2 %v1089_v27  ;;  %v2158_v27 = vmul.f32 1.442695, %v1964_v44  ;;  %v6584_v28 = vpop.f32.mrf.mxu2 }
 0x397   :  { %8897 = vst [vmem:[#allocation248_spill] sm:$0xff] %v6584_v28  ;;  %v1191_v56 = vmax.f32 %v6584_v28, %v6586_v54  ;;  %v6606_v54 = vpop.permute.xlu2 %1795 }
 0x398   :  { %4440 = vpow2.f32 %v2158_v27  ;;  %v6602_v27 = vpop.f32.mrf.mxu1 }
 0x399   :  { %8902 = vst [vmem:[#allocation253_spill] sm:$0xff] %v6602_v27 }
 0x3a3   :  { %1815 = vperm.xlu1 %4437, %v6021_v32   ;;  %v2160_v32 = vmul.f32 1.442695, %v1965_v60 }
 0x3a5   :  { %4442 = vpow2.f32 %v2160_v32 }
 0x3ae   :  { %1810 = vperm.xlu2 %4438, %v5990_v59  }
 0x3b7   :  { %v1184_v62 = vpop.xlane.xlu0 %1183 }
 0x3b8   :  { %v6582_v25 = vmax.f32 %v6579_v39, %v1184_v62  ;;  %v4441_v62 = vpop.eup %4440  ;;  %v6600_v39 = vpop.f32.mrf.mxu0 }
 0x3b9   :  { %v4443_v60 = vpop.eup %4442  ;;  %8901 = vst [vmem:[#allocation252_spill] sm:$0xff] %v6600_v39  ;;  %v1095_v59 = vmax.f32 %v6600_v39, %v6602_v27 }
 0x3ba   :  { %8896 = vst [vmem:[#allocation247_spill] sm:$0xff] %v6582_v25  ;;  %v1088_v55 = vpop.xlane.xlu1 %1087  ;;  %v2381_v44 = vadd.f32 %v4443_v60, %v4441_v62  ;;  %v1903_v60 = vsub.f32 %v5203_v58, %v6238_v16 }
 0x3bb   :  { %2663 = vst.msk [vmem:[#allocation2 + $0x1e0] sm:$0xff] %vm20_vm11, %v6582_v25  ;;  %v6596_v15 = vmax.f32 %v6588_v38, %v1088_v55  ;;  %v6608_v55 = vld [vmem:[#allocation2 + $0x1d8] sm:$0xff] }
 0x3bc   :  { %8903 = vst [vmem:[#allocation254_spill] sm:$0xff] %v6608_v55 }
 0x3bd   :  { %8900 = vst [vmem:[#allocation251_spill] sm:$0xff] %v6596_v15 }
 0x3be   :  { %2631 = vst.msk [vmem:[#allocation2 + $0xe0] sm:$0xff] %vm20_vm11, %v6596_v15 }
 0x3c0   :  { %1192 = vmax.xlane.f32.xlu0 %v1191_v56  ;;  %v1188_v56 = vmax.f32 %v6567_v20, %v6571_v10  ;;  %v6634_v10 = vld [vmem:[#allocation2 + $0x1e8] sm:$0xff] }
 0x3c1   :  { %8907 = vst [vmem:[#allocation258_spill] sm:$0xff] %v6634_v10 }
 0x3c8   :  { %2382 = vadd.xlane.f32.xlu0 %v2381_v44  ;;  %v1181_v32 = vpop.xlane.xlu2 %1180  ;;  %v6625_v44 = vld [vmem:[#allocation2 + $0xf0] sm:$0xff] }
 0x3c9   :  { %v6611_v38 = vmax.f32 %v6608_v55, %v1181_v32  ;;  %8905 = vst [vmem:[#allocation256_spill] sm:$0xff] %v6625_v44 }
 0x3ca   :  { %v6619_v62 = vpop.permute.xlu0 %1655 }
 0x3cb   :  { %8904 = vst [vmem:[#allocation255_spill] sm:$0xff] %v6611_v38 }
 0x3cc   :  { %2662 = vst.msk [vmem:[#allocation2 + $0x1d8] sm:$0xff] %vm20_vm11, %v6611_v38 }
 0x3cd   :  { %1096 = vmax.xlane.f32.xlu1 %v1095_v59  ;;  %v1902_v59 = vsub.f32 %v5201_v57, %v6238_v16  ;;  %v1900_v16 = vsub.f32 %v5189_v51, %v6177_v26 }
 0x3cf   :  { %v2034_v55 = vmul.f32 1.442695, %v1902_v59  ;;  %v1901_v59 = vsub.f32 %v5191_v52, %v6177_v26 }
 0x3d0   :  { %v6646_v28 = vpop.permute.xlu2 %1645 }
 0x3d1   :  { %4444 = vpow2.f32 %v2034_v55  ;;  %v2032_v55 = vmul.f32 1.442695, %v1901_v59 }
 0x3d2   :  { %v6627_v27 = vpop.permute.xlu1 %1650 }
 0x3d7   :  { %1189 = vmax.xlane.f32.xlu2 %v1188_v56  ;;  %v2036_v56 = vmul.f32 1.442695, %v1903_v60  ;;  %v4445_v60 = vpop.eup %4444 }
 0x3d9   :  { %4446 = vpow2.f32 %v2036_v56 }
 0x3dc   :  { %1670 = vperm.xlu0 %4439, %v6250_v37  }
 0x3df   :  { %v4447_v57 = vpop.eup %4446 }
 0x3e0   :  { %v2288_v56 = vadd.f32 %v4447_v57, %v4445_v60  ;;  %v1962_v60 = vsub.f32 %v5185_v49, %v6183_v43 }
 0x3e6   :  { %1665 = vperm.xlu1 %4437, %v6210_v41  }
 0x3ef   :  { %1660 = vperm.xlu2 %4438, %v6215_v45  }
 0x3f5   :  { %v1094_v32 = vpop.xlane.xlu0 %1093 }
 0x3f6   :  { %v6630_v39 = vmax.f32 %v6625_v44, %v1094_v32  ;;  %v2030_v44 = vmul.f32 1.442695, %v1900_v16  ;;  %v1899_v16 = vsub.f32 %v5181_v47, %v6150_v3 }
 0x3f8   :  { %8906 = vst [vmem:[#allocation257_spill] sm:$0xff] %v6630_v39  ;;  %4448 = vpow2.f32 %v2030_v44  ;;  %v2028_v59 = vmul.f32 1.442695, %v1899_v16 }
 0x3f9   :  { %2633 = vst.msk [vmem:[#allocation2 + $0xf0] sm:$0xff] %vm20_vm11, %v6630_v39  ;;  %4450 = vpow2.f32 %v2032_v55 }
 0x3fd   :  { %v1187_v58 = vpop.xlane.xlu1 %1186 }
 0x3fe   :  { %v6642_v32 = vmax.f32 %v6634_v10, %v1187_v58  ;;  %v4449_v51 = vpop.eup %4448  ;;  %v1898_v58 = vsub.f32 %v5179_v46, %v6150_v3  ;;  %v6652_v10 = vld [vmem:[#allocation2 + $0xe8] sm:$0xff]  ;;  %v2154_v3 = vmul.f32 1.442695, %v1962_v60  ;;  %v6674_v60 = vld [vmem:[#allocation2 + $0x1f8] sm:$0xff] }
 0x3ff   :  { %v4451_v20 = vpop.eup %4450  ;;  %8909 = vst [vmem:[#allocation260_spill] sm:$0xff] %v6652_v10 }
 0x400   :  { %8908 = vst [vmem:[#allocation259_spill] sm:$0xff] %v6642_v32  ;;  %v2285_v26 = vadd.f32 %v4451_v20, %v4449_v51  ;;  %v2026_v52 = vmul.f32 1.442695, %v1898_v58  ;;  %v1963_v51 = vsub.f32 %v5187_v50, %v6183_v43  ;;  %v1970_v50 = vsub.f32 %v5243_v12, %v6307_v8 }
 0x401   :  { %2664 = vst.msk [vmem:[#allocation2 + $0x1e8] sm:$0xff] %vm20_vm11, %v6642_v32  ;;  %v1971_v43 = vsub.f32 %v5247_v14, %v6307_v8 }
 0x402   :  { %4452 = vpow2.f32 %v2026_v52  ;;  %v2156_v20 = vmul.f32 1.442695, %v1963_v51  ;;  %8912 = vst [vmem:[#allocation262_spill] sm:$0xff] %v6674_v60 }
 0x403   :  { %4454 = vpow2.f32 %v2028_v59  ;;  %v8911_v59 = vsub.f32 %v5594_v22, %v5605_v40  ;;  %v1483_v22 = vld [vmem:[#allocation3 + $0x108] sm:$0xff] }
 0x404   :  { %4456 = vpow2.f32 %v2154_v3  ;;  %v2170_v3 = vmul.f32 1.442695, %v1970_v50 }
 0x405   :  { %4458 = vpow2.f32 %v2156_v20 }
 0x406   :  { %2289 = vadd.xlane.f32.xlu0 %v2288_v56 }
 0x408   :  { %v4453_v55 = vpop.eup %4452  ;;  %v6665_v49 = vpop.permute.xlu0 %1820 }
 0x409   :  { %v1091_v57 = vpop.xlane.xlu2 %1090  ;;  %v4455_v56 = vpop.eup %4454 }
 0x40a   :  { %v6655_v44 = vmax.f32 %v6652_v10, %v1091_v57  ;;  %v4457_v52 = vpop.eup %4456  ;;  %v1388_v57 = vmul.f32 1.442695, %v8911_v59  ;;  %v1967_v59 = vsub.f32 %v5221_v0, %v6256_v35 }
 0x40b   :  { %v4459_v58 = vpop.eup %4458 }
 0x40c   :  { %8910 = vst [vmem:[#allocation261_spill] sm:$0xff] %v6655_v44  ;;  %v2378_v16 = vadd.f32 %v4459_v58, %v4457_v52  ;;  %4460 = vpow2.f32 %v1388_v57  ;;  %v6684_v58 = vld [vmem:[#allocation2 + $0xf8] sm:$0xff] }
 0x40d   :  { %2632 = vst.msk [vmem:[#allocation2 + $0xe8] sm:$0xff] %vm20_vm11, %v6655_v44  ;;  %4462 = vpow2.f32 %v2170_v3  ;;  %v2164_v3 = vmul.f32 1.442695, %v1967_v59 }
 0x40e   :  { %8914 = vst [vmem:[#allocation264_spill] sm:$0xff] %v6684_v58 }
 0x410   :  { %2286 = vadd.xlane.f32.xlu1 %v2285_v26  ;;  %v2282_v26 = vadd.f32 %v4455_v56, %v4453_v55  ;;  %v2172_v55 = vmul.f32 1.442695, %v1971_v43 }
 0x411   :  { %v6697_v0 = vpop.permute.xlu2 %1810 }
 0x412   :  { %v4461_v40 = vpop.eup %4460  ;;  %4464 = vpow2.f32 %v2172_v55 }
 0x413   :  { %v1547_v56 = vmul.f32 %v4461_v40, %v1483_v22  ;;  %v4463_v8 = vpop.eup %4462  ;;  %v6699_v40 = vld [vmem:[#allocation2 + $0x1f0] sm:$0xff] }
 0x414   :  { %8916 = vst [vmem:[#allocation266_spill] sm:$0xff] %v6699_v40 }
 0x415   :  { %v6681_v12 = vpop.permute.xlu1 %1815 }
 0x418   :  { %2283 = vadd.xlane.f32.xlu2 %v2282_v26  ;;  %v4465_v52 = vpop.eup %4464 }
 0x419   :  { %v2390_v43 = vadd.f32 %v4465_v52, %v4463_v8  ;;  %v1260_v8 = vsub.f32 %v5634_v11, %v5648_v18  ;;  %v8921_v18 = vld [vmem:[#allocation27_spill] sm:$0xff] }
 0x41a   :  { %1835 = vperm.xlu0 %4439, %v6317_v30  }
 0x41b   :  { %v1326_v59 = vmul.f32 1.442695, %v1260_v8 }
 0x420   :  { %2379 = vadd.xlane.f32.xlu2 %v2378_v16  ;;  %v1966_v16 = vsub.f32 %v5219_v63, %v6256_v35 }
 0x429   :  { %1830 = vperm.xlu1 %4437, %v6273_v53  }
 0x433   :  { %v1193_v51 = vpop.xlane.xlu0 %1192 }
 0x434   :  { %v6677_v20 = vmax.f32 %v6674_v60, %v1193_v51  ;;  %v2162_v51 = vmul.f32 1.442695, %v1966_v16 }
 0x436   :  { %8913 = vst [vmem:[#allocation263_spill] sm:$0xff] %v6677_v20  ;;  %4466 = vpow2.f32 %v2162_v51 }
 0x437   :  { %2666 = vst.msk [vmem:[#allocation2 + $0x1f8] sm:$0xff] %vm20_vm11, %v6677_v20  ;;  %4468 = vpow2.f32 %v2164_v3  ;;  %v8919_v3 = vld [vmem:[#allocation186_spill] sm:$0xff] }
 0x438   :  { %1825 = vperm.xlu2 %4438, %v6226_v17   ;;  %v1911_v11 = vsub.f32 %v8921_v18, %v8919_v3 }
 0x43a   :  { %v2052_v8 = vmul.f32 1.442695, %v1911_v11 }
 0x43b   :  { %v2383_v26 = vpop.xlane.xlu0 %2382 }
 0x43c   :  { %v2507_v14 = vadd.f32 %v2383_v26, %v1547_v56  ;;  %v4467_v55 = vpop.eup %4466  ;;  %v1904_v26 = vsub.f32 %v5223_v1, %v6264_v9 }
 0x43d   :  { %v4469_v63 = vpop.eup %4468 }
 0x43e   :  { %2572 = vst.msk [vmem:[#allocation3 + $0x108] sm:$0xff] %vm20_vm11, %v2507_v14  ;;  %v2384_v35 = vadd.f32 %v4469_v63, %v4467_v55  ;;  %v1905_v14 = vsub.f32 %v5225_v2, %v6264_v9  ;;  %v2038_v52 = vmul.f32 1.442695, %v1904_v26  ;;  %v8920_v55 = vld [vmem:[#allocation26_spill] sm:$0xff] }
 0x43f   :  { %v1910_v63 = vsub.f32 %v8920_v55, %v8919_v3 }
 0x440   :  { %v1097_v57 = vpop.xlane.xlu1 %1096  ;;  %1675 = vperm.xlu2 %4438, %v6283_v7   ;;  %v2040_v16 = vmul.f32 1.442695, %v1905_v14  ;;  %4470 = vpow2.f32 %v2038_v52 }
 0x441   :  { %v6691_v50 = vmax.f32 %v6684_v58, %v1097_v57  ;;  %v1968_v57 = vsub.f32 %v5229_v4, %v6268_v31  ;;  %v2050_v4 = vmul.f32 1.442695, %v1910_v63 }
 0x442   :  { %4472 = vpow2.f32 %v2040_v16  ;;  %v1452_v16 = vld [vmem:[#allocation3 + $0x10] sm:$0xff] }
 0x443   :  { %8915 = vst [vmem:[#allocation265_spill] sm:$0xff] %v6691_v50  ;;  %4474 = vpow2.f32 %v1326_v59  ;;  %v2166_v9 = vmul.f32 1.442695, %v1968_v57 }
 0x444   :  { %2634 = vst.msk [vmem:[#allocation2 + $0xf8] sm:$0xff] %vm20_vm11, %v6691_v50  ;;  %2391 = vadd.xlane.f32.xlu0 %v2390_v43  ;;  %v8918_v43 = vld [vmem:[#allocation16_spill] sm:$0xff] }
 0x445   :  { %v1969_v51 = vsub.f32 %v8918_v43, %v6268_v31  ;;  %4476 = vpow2.f32 %v2166_v9  ;;  %v8922_v43 = vld [vmem:[#allocation75_spill] sm:$0xff] }
 0x44a   :  { %v1190_v22 = vpop.xlane.xlu2 %1189 }
 0x44b   :  { %v6703_v56 = vmax.f32 %v6699_v40, %v1190_v22  ;;  %v4471_v22 = vpop.eup %4470  ;;  %v8923_v40 = vld [vmem:[#allocation80_spill] sm:$0xff] }
 0x44c   :  { %v4473_v14 = vpop.eup %4472  ;;  %v8924_v55 = vsub.f32 %v8922_v43, %v8923_v40 }
 0x44d   :  { %8917 = vst [vmem:[#allocation267_spill] sm:$0xff] %v6703_v56  ;;  %v4475_v31 = vpop.eup %4474  ;;  %v2291_v52 = vadd.f32 %v4473_v14, %v4471_v22  ;;  %v8925_v14 = vld [vmem:[#allocation171_spill] sm:$0xff] }
 0x44e   :  { %2665 = vst.msk [vmem:[#allocation2 + $0x1f0] sm:$0xff] %vm20_vm11, %v6703_v56  ;;  %v6722_v26 = vpop.permute.xlu0 %1670  ;;  %v1324_v59 = vmul.f32 1.442695, %v8924_v55  ;;  %v1516_v57 = vmul.f32 %v4475_v31, %v1452_v16  ;;  %v1451_v55 = vld [vmem:[#allocation3 + $0x8] sm:$0xff] }
 0x453   :  { %2385 = vadd.xlane.f32.xlu1 %v2384_v35  ;;  %v2168_v35 = vmul.f32 1.442695, %v1969_v51  ;;  %v4477_v51 = vpop.eup %4476 }
 0x455   :  { %4478 = vpow2.f32 %v2168_v35 }
 0x456   :  { %4480 = vpow2.f32 %v2050_v4  ;;  %v8926_v4 = vld [vmem:[#allocation17_spill] sm:$0xff] }
 0x457   :  { %4482 = vpow2.f32 %v2052_v8  ;;  %v1906_v8 = vsub.f32 %v8926_v4, %v8925_v14  ;;  %v8944_v4 = vld [vmem:[#allocation81_spill] sm:$0xff] }
 0x458   :  { %1685 = vperm.xlu0 %4439, %v6330_v36   ;;  %4484 = vpow2.f32 %v1324_v59  ;;  %v6727_v9 = vpop.permute.xlu1 %1665 }
 0x45b   :  { %v4479_v18 = vpop.eup %4478 }
 0x45c   :  { %v4481_v63 = vpop.eup %4480  ;;  %v2387_v35 = vadd.f32 %v4479_v18, %v4477_v51  ;;  %v8929_v18 = vld [vmem:[#allocation72_spill] sm:$0xff] }
 0x45d   :  { %v4483_v11 = vpop.eup %4482 }
 0x45e   :  { %v4485_v22 = vpop.eup %4484  ;;  %v2300_v40 = vadd.f32 %v4483_v11, %v4481_v63  ;;  %v6738_v11 = vpop.permute.xlu2 %1660 }
 0x45f   :  { %v1515_v31 = vmul.f32 %v4485_v22, %v1451_v55  ;;  %v8932_v55 = vld [vmem:[#allocation77_spill] sm:$0xff] }
 0x469   :  { %2292 = vadd.xlane.f32.xlu2 %v2291_v52  ;;  %v8927_v52 = vld [vmem:[#allocation18_spill] sm:$0xff] }
 0x46a   :  { %v1907_v16 = vsub.f32 %v8927_v52, %v8925_v14 }
 0x46c   :  { %1680 = vperm.xlu1 %4437, %v6345_v5  }
 0x471   :  { %2388 = vadd.xlane.f32.xlu2 %v2387_v35 }
 0x479   :  { %v2290_v3 = vpop.xlane.xlu0 %2289 }
 0x47a   :  { %v2476_v2 = vadd.f32 %v2290_v3, %v1516_v57  ;;  %v2042_v57 = vmul.f32 1.442695, %v1906_v8  ;;  %v8928_v3 = vld [vmem:[#allocation69_spill] sm:$0xff] }
 0x47b   :  { %v8930_v51 = vsub.f32 %v8928_v3, %v8929_v18  ;;  %v1482_v18 = vld [vmem:[#allocation3 + $0x100] sm:$0xff] }
 0x47c   :  { %2541 = vst.msk [vmem:[#allocation3 + $0x10] sm:$0xff] %vm20_vm11, %v2476_v2  ;;  %v2044_v2 = vmul.f32 1.442695, %v1907_v16  ;;  %4486 = vpow2.f32 %v2042_v57  ;;  %v8934_v16 = vld [vmem:[#allocation174_spill] sm:$0xff] }
 0x47d   :  { %v1322_v35 = vmul.f32 1.442695, %v8930_v51 }
 0x47e   :  { %4488 = vpow2.f32 %v2044_v2 }
 0x47f   :  { %4490 = vpow2.f32 %v1322_v35 }
 0x482   :  { %2301 = vadd.xlane.f32.xlu0 %v2300_v40  ;;  %v4487_v63 = vpop.eup %4486  ;;  %v8931_v40 = vld [vmem:[#allocation76_spill] sm:$0xff] }
 0x483   :  { %v2287_v43 = vpop.xlane.xlu1 %2286  ;;  %v8933_v14 = vsub.f32 %v8931_v40, %v8932_v55 }
 0x484   :  { %v2475_v59 = vadd.f32 %v2287_v43, %v1515_v31  ;;  %v4489_v22 = vpop.eup %4488  ;;  %v1450_v43 = vld [vmem:[#allocation3] sm:$0xff] }
 0x485   :  { %v1386_v1 = vmul.f32 1.442695, %v8933_v14  ;;  %v4491_v31 = vpop.eup %4490  ;;  %v2294_v8 = vadd.f32 %v4489_v22, %v4487_v63  ;;  %v8935_v63 = vld [vmem:[#allocation89_spill] sm:$0xff]  ;;  %v8936_v22 = vld [vmem:[#allocation87_spill] sm:$0xff] }
 0x486   :  { %2540 = vst.msk [vmem:[#allocation3 + $0x8] sm:$0xff] %vm20_vm11, %v2475_v59  ;;  %v1514_v59 = vmul.f32 %v4491_v31, %v1450_v43  ;;  %v1294_v55 = vsub.f32 %v8936_v22, %v8935_v63  ;;  %v8939_v31 = vld [vmem:[#allocation22_spill] sm:$0xff] }
 0x487   :  { %4492 = vpow2.f32 %v1386_v1  ;;  %v8937_v1 = vld [vmem:[#allocation183_spill] sm:$0xff] }
 0x488   :  { %v1394_v14 = vmul.f32 1.442695, %v1294_v55  ;;  %v1909_v43 = vsub.f32 %v8939_v31, %v8937_v1  ;;  %v1486_v55 = vld [vmem:[#allocation3 + $0x120] sm:$0xff] }
 0x489   :  { %1840 = vperm.xlu2 %4438, %v8934_v16   ;;  %v8954_v16 = vld [vmem:[#allocation203_spill] sm:$0xff] }
 0x48a   :  { %4494 = vpow2.f32 %v1394_v14 }
 0x48b   :  { %v2284_v57 = vpop.xlane.xlu2 %2283 }
 0x48c   :  { %v2474_v2 = vadd.f32 %v2284_v57, %v1514_v59  ;;  %v8940_v59 = vld [vmem:[#allocation190_spill] sm:$0xff]  ;;  %v8941_v57 = vld [vmem:[#allocation36_spill] sm:$0xff] }
 0x48d   :  { %v4493_v3 = vpop.eup %4492 }
 0x48e   :  { %2539 = vst.msk [vmem:[#allocation3] sm:$0xff] %vm20_vm11, %v2474_v2  ;;  %v1546_v51 = vmul.f32 %v4493_v3, %v1482_v18  ;;  %v1976_v2 = vsub.f32 %v8941_v57, %v8940_v59  ;;  %v8942_v3 = vld [vmem:[#allocation37_spill] sm:$0xff] }
 0x48f   :  { %v1977_v18 = vsub.f32 %v8942_v3, %v8940_v59 }
 0x490   :  { %v2182_v52 = vmul.f32 1.442695, %v1976_v2  ;;  %v4495_v22 = vpop.eup %4494 }
 0x491   :  { %v2184_v63 = vmul.f32 1.442695, %v1977_v18  ;;  %v1550_v14 = vmul.f32 %v4495_v22, %v1486_v55 }
 0x493   :  { %v2380_v35 = vpop.xlane.xlu2 %2379 }
 0x494   :  { %v2506_v40 = vadd.f32 %v2380_v35, %v1546_v51  ;;  %v2048_v35 = vmul.f32 1.442695, %v1909_v43 }
 0x496   :  { %1850 = vperm.xlu0 %4439, %v6390_v34   ;;  %2295 = vadd.xlane.f32.xlu1 %v2294_v8  ;;  %2571 = vst.msk [vmem:[#allocation3 + $0x100] sm:$0xff] %vm20_vm11, %v2506_v40  ;;  %v8938_v8 = vld [vmem:[#allocation20_spill] sm:$0xff]  ;;  %v6757_v40 = vpop.permute.xlu0 %1835 }
 0x497   :  { %v1908_v58 = vsub.f32 %v8938_v8, %v8937_v1  ;;  %v8943_v1 = vld [vmem:[#allocation84_spill] sm:$0xff] }
 0x498   :  { %v1292_v47 = vsub.f32 %v8944_v4, %v8943_v1  ;;  %v1484_v4 = vld [vmem:[#allocation3 + $0x110] sm:$0xff] }
 0x499   :  { %v2046_v51 = vmul.f32 1.442695, %v1908_v58 }
 0x49a   :  { %v1390_v60 = vmul.f32 1.442695, %v1292_v47 }
 0x49b   :  { %4496 = vpow2.f32 %v2046_v51 }
 0x49c   :  { %4498 = vpow2.f32 %v2048_v35  ;;  %v6763_v35 = vpop.permute.xlu1 %1830 }
 0x49d   :  { %4500 = vpow2.f32 %v2182_v52 }
 0x49e   :  { %4502 = vpow2.f32 %v2184_v63  ;;  %v8945_v63 = vld [vmem:[#allocation24_spill] sm:$0xff] }
 0x49f   :  { %4504 = vpow2.f32 %v1390_v60  ;;  %v1972_v22 = vsub.f32 %v8945_v63, %v6400_v48  ;;  %v8961_v63 = vld [vmem:[#allocation88_spill] sm:$0xff] }
 0x4a1   :  { %v4497_v59 = vpop.eup %4496 }
 0x4a2   :  { %v4499_v43 = vpop.eup %4498 }
 0x4a3   :  { %v4501_v31 = vpop.eup %4500  ;;  %v2297_v18 = vadd.f32 %v4499_v43, %v4497_v59  ;;  %v8947_v43 = vld [vmem:[#allocation86_spill] sm:$0xff] }
 0x4a4   :  { %v4503_v2 = vpop.eup %4502 }
 0x4a5   :  { %v2399_v51 = vadd.f32 %v4503_v2, %v4501_v31  ;;  %v4505_v52 = vpop.eup %4504  ;;  %v8948_v2 = vld [vmem:[#allocation83_spill] sm:$0xff] }
 0x4a6   :  { %v1548_v55 = vmul.f32 %v4505_v52, %v1484_v4  ;;  %v8949_v52 = vld [vmem:[#allocation189_spill] sm:$0xff] }
 0x4af   :  { %1845 = vperm.xlu1 %4437, %v6405_v29   ;;  %v1453_v29 = vld [vmem:[#allocation3 + $0x18] sm:$0xff] }
 0x4b2   :  { %2298 = vadd.xlane.f32.xlu2 %v2297_v18  ;;  %v1261_v18 = vsub.f32 %v8948_v2, %v8947_v43 }
 0x4b4   :  { %v1328_v4 = vmul.f32 1.442695, %v1261_v18  ;;  %v8956_v18 = vld [vmem:[#allocation45_spill] sm:$0xff] }
 0x4b7   :  { %v2392_v46 = vpop.xlane.xlu0 %2391 }
 0x4b8   :  { %v2510_v58 = vadd.f32 %v2392_v46, %v1550_v14  ;;  %v8946_v46 = vld [vmem:[#allocation25_spill] sm:$0xff] }
 0x4b9   :  { %v1973_v47 = vsub.f32 %v8946_v46, %v6400_v48  ;;  %v1456_v46 = vld [vmem:[#allocation3 + $0x30] sm:$0xff] }
 0x4ba   :  { %2575 = vst.msk [vmem:[#allocation3 + $0x120] sm:$0xff] %vm20_vm11, %v2510_v58  ;;  %v2174_v58 = vmul.f32 1.442695, %v1972_v22  ;;  %v8950_v22 = vld [vmem:[#allocation85_spill] sm:$0xff] }
 0x4bb   :  { %v2176_v60 = vmul.f32 1.442695, %v1973_v47 }
 0x4bc   :  { %4506 = vpow2.f32 %v2174_v58  ;;  %v8953_v58 = vld [vmem:[#allocation93_spill] sm:$0xff] }
 0x4bd   :  { %4508 = vpow2.f32 %v2176_v60 }
 0x4be   :  { %4510 = vpow2.f32 %v1328_v4 }
 0x4c0   :  { %2400 = vadd.xlane.f32.xlu0 %v2399_v51  ;;  %v6773_v51 = vpop.permute.xlu2 %1825 }
 0x4c2   :  { %v4507_v31 = vpop.eup %4506 }
 0x4c3   :  { %v4509_v59 = vpop.eup %4508 }
 0x4c4   :  { %v2393_v48 = vadd.f32 %v4509_v59, %v4507_v31  ;;  %v4511_v10 = vpop.eup %4510 }
 0x4c5   :  { %v1517_v2 = vmul.f32 %v4511_v10, %v1453_v29 }
 0x4c6   :  { %v2386_v1 = vpop.xlane.xlu1 %2385 }
 0x4c7   :  { %v2508_v14 = vadd.f32 %v2386_v1, %v1548_v55  ;;  %v8951_v55 = vld [vmem:[#allocation82_spill] sm:$0xff] }
 0x4c8   :  { %v1293_v1 = vsub.f32 %v8951_v55, %v8950_v22  ;;  %v6778_v47 = vpop.permute.xlu2 %1675  ;;  %v8957_v22 = vld [vmem:[#allocation187_spill] sm:$0xff]  ;;  %v8958_v55 = vld [vmem:[#allocation30_spill] sm:$0xff] }
 0x4c9   :  { %2573 = vst.msk [vmem:[#allocation3 + $0x110] sm:$0xff] %vm20_vm11, %v2508_v14  ;;  %v8952_v14 = vld [vmem:[#allocation96_spill] sm:$0xff] }
 0x4ca   :  { %1690 = vperm.xlu2 %4438, %v8949_v52   ;;  %v1264_v60 = vsub.f32 %v8953_v58, %v8952_v14  ;;  %v1392_v8 = vmul.f32 1.442695, %v1293_v1  ;;  %v8955_v52 = vld [vmem:[#allocation44_spill] sm:$0xff]  ;;  %v6788_v5 = vpop.permute.xlu0 %1685  ;;  %v1485_v14 = vld [vmem:[#allocation3 + $0x118] sm:$0xff] }
 0x4cb   :  { %v1916_v31 = vsub.f32 %v8955_v52, %v8954_v16 }
 0x4cc   :  { %v1334_v43 = vmul.f32 1.442695, %v1264_v60  ;;  %4512 = vpow2.f32 %v1392_v8  ;;  %v8959_v8 = vld [vmem:[#allocation31_spill] sm:$0xff] }
 0x4cd   :  { %v1975_v29 = vsub.f32 %v8959_v8, %v8957_v22  ;;  %v2062_v10 = vmul.f32 1.442695, %v1916_v31 }
 0x4ce   :  { %4514 = vpow2.f32 %v1334_v43 }
 0x4cf   :  { %4516 = vpow2.f32 %v2062_v10 }
 0x4d2   :  { %v4513_v1 = vpop.eup %4512 }
 0x4d3   :  { %v1549_v52 = vmul.f32 %v4513_v1, %v1485_v14 }
 0x4d4   :  { %1700 = vperm.xlu0 %4439, %v6441_v33   ;;  %v1974_v33 = vsub.f32 %v8958_v55, %v8957_v22  ;;  %v4515_v60 = vpop.eup %4514 }
 0x4d5   :  { %v4517_v22 = vpop.eup %4516 }
 0x4d6   :  { %v2178_v43 = vmul.f32 1.442695, %v1974_v33 }
 0x4d9   :  { %2394 = vadd.xlane.f32.xlu1 %v2393_v48  ;;  %v1917_v48 = vsub.f32 %v8956_v18, %v8954_v16  ;;  %v2180_v16 = vmul.f32 1.442695, %v1975_v29  ;;  %v1520_v18 = vmul.f32 %v4515_v60, %v1456_v46 }
 0x4db   :  { %v2064_v58 = vmul.f32 1.442695, %v1917_v48  ;;  %v8960_v48 = vld [vmem:[#allocation90_spill] sm:$0xff] }
 0x4dc   :  { %v2293_v59 = vpop.xlane.xlu2 %2292  ;;  %v1262_v33 = vsub.f32 %v8961_v63, %v8960_v48  ;;  %v8963_v63 = vld [vmem:[#allocation33_spill] sm:$0xff] }
 0x4dd   :  { %v2477_v4 = vadd.f32 %v2293_v59, %v1517_v2  ;;  %4518 = vpow2.f32 %v2064_v58 }
 0x4de   :  { %4520 = vpow2.f32 %v2178_v43  ;;  %v1330_v14 = vmul.f32 1.442695, %v1262_v33  ;;  %v6798_v46 = vpop.permute.xlu1 %1680  ;;  %v1454_v43 = vld [vmem:[#allocation3 + $0x20] sm:$0xff] }
 0x4df   :  { %2542 = vst.msk [vmem:[#allocation3 + $0x18] sm:$0xff] %vm20_vm11, %v2477_v4  ;;  %4522 = vpow2.f32 %v2180_v16 }
 0x4e0   :  { %4524 = vpow2.f32 %v1330_v14  ;;  %v8965_v14 = vld [vmem:[#allocation95_spill] sm:$0xff] }
 0x4e3   :  { %v4519_v1 = vpop.eup %4518 }
 0x4e4   :  { %v2389_v2 = vpop.xlane.xlu2 %2388  ;;  %v4521_v29 = vpop.eup %4520 }
 0x4e5   :  { %v2509_v59 = vadd.f32 %v2389_v2, %v1549_v52  ;;  %v4523_v10 = vpop.eup %4522  ;;  %v2309_v52 = vadd.f32 %v4519_v1, %v4517_v22 }
 0x4e6   :  { %v2396_v58 = vadd.f32 %v4523_v10, %v4521_v29  ;;  %v4525_v60 = vpop.eup %4524  ;;  %v8964_v29 = vld [vmem:[#allocation202_spill] sm:$0xff] }
 0x4e7   :  { %2574 = vst.msk [vmem:[#allocation3 + $0x118] sm:$0xff] %vm20_vm11, %v2509_v59  ;;  %v1518_v2 = vmul.f32 %v4525_v60, %v1454_v43  ;;  %v1913_v59 = vsub.f32 %v8963_v63, %v6458_v19  ;;  %v8968_v60 = vld [vmem:[#allocation104_spill] sm:$0xff] }
 0x4e9   :  { %v2056_v22 = vmul.f32 1.442695, %v1913_v59  ;;  %v8969_v59 = vld [vmem:[#allocation215_spill] sm:$0xff] }
 0x4ec   :  { %v6815_v63 = vpop.permute.xlu2 %1840 }
 0x4f2   :  { %1695 = vperm.xlu1 %4437, %v6463_v23  }
 0x4f3   :  { %2397 = vadd.xlane.f32.xlu2 %v2396_v58 }
 0x4f5   :  { %v2302_v4 = vpop.xlane.xlu0 %2301 }
 0x4f6   :  { %v2480_v31 = vadd.f32 %v2302_v4, %v1520_v18  ;;  %v8962_v18 = vld [vmem:[#allocation32_spill] sm:$0xff] }
 0x4f7   :  { %v1912_v16 = vsub.f32 %v8962_v18, %v6458_v19  ;;  %v8967_v19 = vld [vmem:[#allocation107_spill] sm:$0xff]  ;;  %v8973_v18 = vld [vmem:[#allocation38_spill] sm:$0xff] }
 0x4f8   :  { %2545 = vst.msk [vmem:[#allocation3 + $0x30] sm:$0xff] %vm20_vm11, %v2480_v31  ;;  %v1297_v43 = vsub.f32 %v8968_v60, %v8967_v19  ;;  %v8974_v60 = vld [vmem:[#allocation39_spill] sm:$0xff] }
 0x4f9   :  { %v2054_v48 = vmul.f32 1.442695, %v1912_v16 }
 0x4fb   :  { %4526 = vpow2.f32 %v2054_v48  ;;  %v8971_v48 = vld [vmem:[#allocation54_spill] sm:$0xff] }
 0x4fc   :  { %4528 = vpow2.f32 %v2056_v22  ;;  %v1983_v22 = vsub.f32 %v8971_v48, %v8969_v59 }
 0x4fe   :  { %2310 = vadd.xlane.f32.xlu0 %v2309_v52  ;;  %v8966_v52 = vld [vmem:[#allocation92_spill] sm:$0xff] }
 0x4ff   :  { %v1263_v58 = vsub.f32 %v8966_v52, %v8965_v14  ;;  %v8972_v52 = vld [vmem:[#allocation200_spill] sm:$0xff] }
 0x500   :  { %v1914_v19 = vsub.f32 %v8973_v18, %v8972_v52 }
 0x501   :  { %v4527_v33 = vpop.eup %4526  ;;  %v1332_v16 = vmul.f32 1.442695, %v1263_v58 }
 0x502   :  { %v4529_v1 = vpop.eup %4528 }
 0x503   :  { %v2303_v10 = vadd.f32 %v4529_v1, %v4527_v33  ;;  %4530 = vpow2.f32 %v1332_v16  ;;  %v1455_v16 = vld [vmem:[#allocation3 + $0x28] sm:$0xff] }
 0x508   :  { %v6817_v33 = vpop.permute.xlu0 %1850 }
 0x509   :  { %v2296_v4 = vpop.xlane.xlu1 %2295  ;;  %v4531_v14 = vpop.eup %4530 }
 0x50a   :  { %v2478_v31 = vadd.f32 %v2296_v4, %v1518_v2  ;;  %v1400_v2 = vmul.f32 1.442695, %v1297_v43  ;;  %v8970_v4 = vld [vmem:[#allocation53_spill] sm:$0xff]  ;;  %v1915_v43 = vsub.f32 %v8974_v60, %v8972_v52  ;;  %v8976_v52 = vld [vmem:[#allocation91_spill] sm:$0xff] }
 0x50b   :  { %1855 = vperm.xlu2 %4438, %v8964_v29   ;;  %v1489_v29 = vld [vmem:[#allocation3 + $0x138] sm:$0xff] }
 0x50c   :  { %2543 = vst.msk [vmem:[#allocation3 + $0x20] sm:$0xff] %vm20_vm11, %v2478_v31  ;;  %v1982_v31 = vsub.f32 %v8970_v4, %v8969_v59  ;;  %4532 = vpow2.f32 %v1400_v2  ;;  %v2058_v2 = vmul.f32 1.442695, %v1914_v19  ;;  %v1519_v59 = vmul.f32 %v4531_v14, %v1455_v16  ;;  %v8977_v16 = vld [vmem:[#allocation42_spill] sm:$0xff] }
 0x50e   :  { %v2194_v1 = vmul.f32 1.442695, %v1982_v31 }
 0x510   :  { %4534 = vpow2.f32 %v2194_v1 }
 0x512   :  { %1865 = vperm.xlu0 %4439, %v6490_v24   ;;  %v4533_v58 = vpop.eup %4532  ;;  %v2060_v24 = vmul.f32 1.442695, %v1915_v43  ;;  %v1487_v43 = vld [vmem:[#allocation3 + $0x128] sm:$0xff] }
 0x513   :  { %v1553_v23 = vmul.f32 %v4533_v58, %v1489_v29 }
 0x516   :  { %v4535_v55 = vpop.eup %4534 }
 0x51c   :  { %2304 = vadd.xlane.f32.xlu1 %v2303_v10  ;;  %v2196_v10 = vmul.f32 1.442695, %v1983_v22 }
 0x51e   :  { %4536 = vpow2.f32 %v2196_v10  ;;  %v8975_v10 = vld [vmem:[#allocation94_spill] sm:$0xff] }
 0x51f   :  { %4538 = vpow2.f32 %v2058_v2  ;;  %v1295_v14 = vsub.f32 %v8976_v52, %v8975_v10  ;;  %v8979_v52 = vld [vmem:[#allocation219_spill] sm:$0xff] }
 0x520   :  { %4540 = vpow2.f32 %v2060_v24  ;;  %v1978_v24 = vsub.f32 %v8977_v16, %v6506_v21 }
 0x521   :  { %v1396_v58 = vmul.f32 1.442695, %v1295_v14 }
 0x523   :  { %4542 = vpow2.f32 %v1396_v58  ;;  %v8981_v58 = vld [vmem:[#allocation110_spill] sm:$0xff] }
 0x524   :  { %v4537_v18 = vpop.eup %4536 }
 0x525   :  { %v2299_v53 = vpop.xlane.xlu2 %2298  ;;  %v2408_v1 = vadd.f32 %v4537_v18, %v4535_v55  ;;  %v4539_v29 = vpop.eup %4538  ;;  %v8978_v55 = vld [vmem:[#allocation43_spill] sm:$0xff] }
 0x526   :  { %v2479_v31 = vadd.f32 %v2299_v53, %v1519_v59  ;;  %v4541_v19 = vpop.eup %4540  ;;  %v1979_v18 = vsub.f32 %v8978_v55, %v6506_v21  ;;  %v8982_v21 = vld [vmem:[#allocation99_spill] sm:$0xff] }
 0x527   :  { %v2306_v53 = vadd.f32 %v4541_v19, %v4539_v29  ;;  %v8980_v19 = vld [vmem:[#allocation114_spill] sm:$0xff] }
 0x528   :  { %2544 = vst.msk [vmem:[#allocation3 + $0x28] sm:$0xff] %vm20_vm11, %v2479_v31 }
 0x533   :  { %v2401_v8 = vpop.xlane.xlu0 %2400 }
 0x534   :  { %v2513_v22 = vadd.f32 %v2401_v8, %v1553_v23  ;;  %2307 = vadd.xlane.f32.xlu2 %v2306_v53  ;;  %v6828_v23 = vpop.permute.xlu1 %1845  ;;  %v4543_v8 = vpop.eup %4542  ;;  %v1267_v53 = vsub.f32 %v8981_v58, %v8980_v19  ;;  %v1459_v19 = vld [vmem:[#allocation3 + $0x48] sm:$0xff]  ;;  %v8987_v58 = vld [vmem:[#allocation214_spill] sm:$0xff] }
 0x535   :  { %1860 = vperm.xlu1 %4437, %v6511_v13   ;;  %v1551_v2 = vmul.f32 %v4543_v8, %v1487_v43  ;;  %v8983_v8 = vld [vmem:[#allocation97_spill] sm:$0xff]  ;;  %v6847_v13 = vpop.permute.xlu2 %1690 }
 0x536   :  { %2578 = vst.msk [vmem:[#allocation3 + $0x138] sm:$0xff] %vm20_vm11, %v2513_v22  ;;  %v2186_v22 = vmul.f32 1.442695, %v1978_v24  ;;  %v1296_v43 = vsub.f32 %v8983_v8, %v8982_v21  ;;  %v1340_v24 = vmul.f32 1.442695, %v1267_v53  ;;  %v8988_v53 = vld [vmem:[#allocation48_spill] sm:$0xff] }
 0x537   :  { %v1980_v21 = vsub.f32 %v8988_v53, %v8987_v58  ;;  %v1458_v53 = vld [vmem:[#allocation3 + $0x40] sm:$0xff] }
 0x538   :  { %4544 = vpow2.f32 %v2186_v22 }
 0x53c   :  { %2409 = vadd.xlane.f32.xlu0 %v2408_v1  ;;  %v2188_v1 = vmul.f32 1.442695, %v1979_v18  ;;  %v8986_v18 = vld [vmem:[#allocation60_spill] sm:$0xff] }
 0x53e   :  { %4546 = vpow2.f32 %v2188_v1  ;;  %v4545_v10 = vpop.eup %4544 }
 0x53f   :  { %4548 = vpow2.f32 %v1340_v24 }
 0x544   :  { %v4547_v14 = vpop.eup %4546 }
 0x545   :  { %v2402_v29 = vadd.f32 %v4547_v14, %v4545_v10 }
 0x546   :  { %v6845_v1 = vpop.permute.xlu0 %1700 }
 0x54c   :  { %v2395_v59 = vpop.xlane.xlu1 %2394  ;;  %1705 = vperm.xlu2 %4438, %v8979_v52  }
 0x54d   :  { %v2511_v31 = vadd.f32 %v2395_v59, %v1551_v2  ;;  %v1398_v2 = vmul.f32 1.442695, %v1296_v43  ;;  %v8984_v59 = vld [vmem:[#allocation229_spill] sm:$0xff] }
 0x54e   :  { %v1923_v22 = vsub.f32 %v8986_v18, %v8984_v59  ;;  %v8989_v43 = vld [vmem:[#allocation49_spill] sm:$0xff] }
 0x54f   :  { %2576 = vst.msk [vmem:[#allocation3 + $0x128] sm:$0xff] %vm20_vm11, %v2511_v31  ;;  %v8985_v31 = vld [vmem:[#allocation59_spill] sm:$0xff]  ;;  %4550 = vpow2.f32 %v1398_v2  ;;  %v1981_v24 = vsub.f32 %v8989_v43, %v8987_v58  ;;  %v2190_v2 = vmul.f32 1.442695, %v1980_v21 }
 0x550   :  { %1715 = vperm.xlu0 %4439, %v6535_v6   ;;  %v1922_v60 = vsub.f32 %v8985_v31, %v8984_v59  ;;  %v2076_v14 = vmul.f32 1.442695, %v1923_v22  ;;  %v1488_v59 = vld [vmem:[#allocation3 + $0x130] sm:$0xff] }
 0x551   :  { %v2192_v6 = vmul.f32 1.442695, %v1981_v24  ;;  %v1457_v24 = vld [vmem:[#allocation3 + $0x38] sm:$0xff] }
 0x552   :  { %v2074_v10 = vmul.f32 1.442695, %v1922_v60 }
 0x554   :  { %4552 = vpow2.f32 %v2074_v10 }
 0x555   :  { %4554 = vpow2.f32 %v2076_v14 }
 0x556   :  { %4556 = vpow2.f32 %v2190_v2 }
 0x557   :  { %4558 = vpow2.f32 %v2192_v6  ;;  %v8992_v6 = vld [vmem:[#allocation240_spill] sm:$0xff] }
 0x55f   :  { %2403 = vadd.xlane.f32.xlu1 %v2402_v29  ;;  %v4549_v29 = vpop.eup %4548 }
 0x560   :  { %v4551_v8 = vpop.eup %4550  ;;  %v1523_v31 = vmul.f32 %v4549_v29, %v1459_v19 }
 0x561   :  { %v1552_v60 = vmul.f32 %v4551_v8, %v1488_v59  ;;  %v4553_v22 = vpop.eup %4552 }
 0x562   :  { %v4555_v10 = vpop.eup %4554 }
 0x563   :  { %v2318_v14 = vadd.f32 %v4555_v10, %v4553_v22  ;;  %v4557_v29 = vpop.eup %4556 }
 0x564   :  { %v4559_v19 = vpop.eup %4558 }
 0x565   :  { %v2405_v21 = vadd.f32 %v4559_v19, %v4557_v29  ;;  %v8995_v19 = vld [vmem:[#allocation234_spill] sm:$0xff] }
 0x566   :  { %v2398_v55 = vpop.xlane.xlu2 %2397 }
 0x567   :  { %v2512_v16 = vadd.f32 %v2398_v55, %v1552_v60  ;;  %v8994_v60 = vld [vmem:[#allocation51_spill] sm:$0xff] }
 0x568   :  { %v1919_v22 = vsub.f32 %v8994_v60, %v8992_v6 }
 0x569   :  { %2577 = vst.msk [vmem:[#allocation3 + $0x130] sm:$0xff] %vm20_vm11, %v2512_v16  ;;  %v8993_v16 = vld [vmem:[#allocation50_spill] sm:$0xff] }
 0x56a   :  { %v1918_v59 = vsub.f32 %v8993_v16, %v8992_v6  ;;  %v2068_v29 = vmul.f32 1.442695, %v1919_v22  ;;  %v9002_v22 = vld [vmem:[#allocation66_spill] sm:$0xff] }
 0x571   :  { %v2311_v18 = vpop.xlane.xlu0 %2310 }
 0x572   :  { %v2483_v52 = vadd.f32 %v2311_v18, %v1523_v31  ;;  %v8990_v31 = vld [vmem:[#allocation100_spill] sm:$0xff]  ;;  %v8991_v18 = vld [vmem:[#allocation98_spill] sm:$0xff] }
 0x573   :  { %v1265_v58 = vsub.f32 %v8991_v18, %v8990_v31  ;;  %v2066_v31 = vmul.f32 1.442695, %v1918_v59  ;;  %v9001_v59 = vld [vmem:[#allocation65_spill] sm:$0xff] }
 0x574   :  { %2548 = vst.msk [vmem:[#allocation3 + $0x48] sm:$0xff] %vm20_vm11, %v2483_v52  ;;  %v6858_v52 = vpop.permute.xlu1 %1695 }
 0x575   :  { %v1336_v8 = vmul.f32 1.442695, %v1265_v58  ;;  %2406 = vadd.xlane.f32.xlu2 %v2405_v21  ;;  %v8996_v58 = vld [vmem:[#allocation123_spill] sm:$0xff]  ;;  %v8997_v21 = vld [vmem:[#allocation121_spill] sm:$0xff] }
 0x577   :  { %4560 = vpow2.f32 %v1336_v8  ;;  %v1300_v8 = vsub.f32 %v8997_v21, %v8996_v58  ;;  %v1492_v21 = vld [vmem:[#allocation3 + $0x150] sm:$0xff] }
 0x578   :  { %1710 = vperm.xlu1 %4437, %v6559_v61   ;;  %4562 = vpow2.f32 %v2066_v31 }
 0x579   :  { %4564 = vpow2.f32 %v2068_v29  ;;  %v1406_v16 = vmul.f32 1.442695, %v1300_v8  ;;  %v9003_v8 = vld [vmem:[#allocation228_spill] sm:$0xff] }
 0x57a   :  { %2319 = vadd.xlane.f32.xlu0 %v2318_v14 }
 0x57b   :  { %4566 = vpow2.f32 %v1406_v16 }
 0x57d   :  { %v4561_v55 = vpop.eup %4560 }
 0x57e   :  { %v1521_v2 = vmul.f32 %v4561_v55, %v1457_v24  ;;  %v4563_v18 = vpop.eup %4562  ;;  %v8998_v24 = vld [vmem:[#allocation108_spill] sm:$0xff] }
 0x57f   :  { %v4565_v61 = vpop.eup %4564 }
 0x580   :  { %v2312_v55 = vadd.f32 %v4565_v61, %v4563_v18  ;;  %v6877_v61 = vpop.permute.xlu2 %1855 }
 0x581   :  { %v4567_v58 = vpop.eup %4566 }
 0x584   :  { %v6875_v29 = vpop.permute.xlu0 %1865 }
 0x58d   :  { %1870 = vperm.xlu2 %4438, %v8995_v19  }
 0x58e   :  { %1880 = vperm.xlu0 %4439, %v6582_v25   ;;  %v8999_v25 = vld [vmem:[#allocation106_spill] sm:$0xff] }
 0x58f   :  { %v2305_v10 = vpop.xlane.xlu1 %2304  ;;  %v1266_v6 = vsub.f32 %v8999_v25, %v8998_v24  ;;  %v1556_v25 = vmul.f32 %v4567_v58, %v1492_v21 }
 0x590   :  { %v2481_v14 = vadd.f32 %v2305_v10, %v1521_v2  ;;  %v9000_v2 = vld [vmem:[#allocation244_spill] sm:$0xff] }
 0x591   :  { %v1988_v10 = vsub.f32 %v9001_v59, %v9000_v2  ;;  %v1338_v31 = vmul.f32 1.442695, %v1266_v6  ;;  %v9005_v6 = vld [vmem:[#allocation56_spill] sm:$0xff] }
 0x592   :  { %2546 = vst.msk [vmem:[#allocation3 + $0x38] sm:$0xff] %vm20_vm11, %v2481_v14  ;;  %v1989_v14 = vsub.f32 %v9002_v22, %v9000_v2  ;;  %v1921_v2 = vsub.f32 %v9005_v6, %v9003_v8 }
 0x593   :  { %v2206_v60 = vmul.f32 1.442695, %v1988_v10  ;;  %4568 = vpow2.f32 %v1338_v31 }
 0x594   :  { %v2208_v19 = vmul.f32 1.442695, %v1989_v14 }
 0x595   :  { %4570 = vpow2.f32 %v2206_v60 }
 0x596   :  { %4572 = vpow2.f32 %v2208_v19  ;;  %v2072_v19 = vmul.f32 1.442695, %v1921_v2 }
 0x599   :  { %v4569_v43 = vpop.eup %4568 }
 0x59a   :  { %v1522_v60 = vmul.f32 %v4569_v43, %v1458_v53 }
 0x59b   :  { %v4571_v10 = vpop.eup %4570 }
 0x59c   :  { %v4573_v14 = vpop.eup %4572 }
 0x59d   :  { %v2417_v58 = vadd.f32 %v4573_v14, %v4571_v10  ;;  %v9009_v14 = vld [vmem:[#allocation58_spill] sm:$0xff] }
 0x5a2   :  { %2313 = vadd.xlane.f32.xlu1 %v2312_v55  ;;  %v9004_v55 = vld [vmem:[#allocation55_spill] sm:$0xff] }
 0x5a3   :  { %v1920_v16 = vsub.f32 %v9004_v55, %v9003_v8  ;;  %v9007_v8 = vld [vmem:[#allocation109_spill] sm:$0xff]  ;;  %v1462_v55 = vld [vmem:[#allocation3 + $0x60] sm:$0xff] }
 0x5a5   :  { %v2070_v31 = vmul.f32 1.442695, %v1920_v16 }
 0x5a7   :  { %v2308_v22 = vpop.xlane.xlu2 %2307  ;;  %4574 = vpow2.f32 %v2070_v31  ;;  %v6888_v53 = vpop.permute.xlu1 %1860  ;;  %v1985_v31 = vsub.f32 %v9009_v14, %v6606_v54 }
 0x5a8   :  { %v2482_v59 = vadd.f32 %v2308_v22, %v1522_v60  ;;  %4576 = vpow2.f32 %v2072_v19  ;;  %v1490_v22 = vld [vmem:[#allocation3 + $0x140] sm:$0xff] }
 0x5aa   :  { %2547 = vst.msk [vmem:[#allocation3 + $0x40] sm:$0xff] %vm20_vm11, %v2482_v59  ;;  %v9008_v59 = vld [vmem:[#allocation57_spill] sm:$0xff] }
 0x5ab   :  { %v1984_v2 = vsub.f32 %v9008_v59, %v6606_v54  ;;  %v9013_v54 = vld [vmem:[#allocation74_spill] sm:$0xff] }
 0x5ad   :  { %v4575_v21 = vpop.eup %4574 }
 0x5af   :  { %v2410_v18 = vpop.xlane.xlu0 %2409 }
 0x5b0   :  { %v2516_v24 = vadd.f32 %v2410_v18, %v1556_v25  ;;  %v4577_v25 = vpop.eup %4576  ;;  %v9006_v18 = vld [vmem:[#allocation113_spill] sm:$0xff] }
 0x5b1   :  { %v1298_v6 = vsub.f32 %v9007_v8, %v9006_v18 }
 0x5b2   :  { %2581 = vst.msk [vmem:[#allocation3 + $0x150] sm:$0xff] %vm20_vm11, %v2516_v24  ;;  %v2315_v24 = vadd.f32 %v4577_v25, %v4575_v21  ;;  %v9010_v21 = vld [vmem:[#allocation128_spill] sm:$0xff]  ;;  %v9011_v25 = vld [vmem:[#allocation126_spill] sm:$0xff] }
 0x5b3   :  { %v1402_v16 = vmul.f32 1.442695, %v1298_v6  ;;  %v2200_v6 = vmul.f32 1.442695, %v1985_v31  ;;  %v1270_v18 = vsub.f32 %v9011_v25, %v9010_v21 }
 0x5b5   :  { %4578 = vpow2.f32 %v1402_v16  ;;  %v1346_v8 = vmul.f32 1.442695, %v1270_v18 }
 0x5b6   :  { %2316 = vadd.xlane.f32.xlu2 %v2315_v24 }
 0x5b8   :  { %2418 = vadd.xlane.f32.xlu0 %v2417_v58  ;;  %v2198_v58 = vmul.f32 1.442695, %v1984_v2  ;;  %v1929_v2 = vsub.f32 %v9013_v54, %v6619_v62 }
 0x5ba   :  { %4580 = vpow2.f32 %v2198_v58 }
 0x5bb   :  { %1875 = vperm.xlu1 %4437, %v6611_v38   ;;  %v4579_v43 = vpop.eup %4578  ;;  %4582 = vpow2.f32 %v2200_v6  ;;  %v2088_v6 = vmul.f32 1.442695, %v1929_v2  ;;  %v6907_v38 = vpop.permute.xlu2 %1705  ;;  %v9017_v2 = vld [vmem:[#allocation62_spill] sm:$0xff] }
 0x5bc   :  { %v1554_v10 = vmul.f32 %v4579_v43, %v1490_v22  ;;  %v9012_v43 = vld [vmem:[#allocation73_spill] sm:$0xff]  ;;  %4584 = vpow2.f32 %v1346_v8 }
 0x5bd   :  { %v1928_v22 = vsub.f32 %v9012_v43, %v6619_v62 }
 0x5bf   :  { %v2086_v21 = vmul.f32 1.442695, %v1928_v22 }
 0x5c0   :  { %v4581_v24 = vpop.eup %4580 }
 0x5c1   :  { %v4583_v16 = vpop.eup %4582  ;;  %4586 = vpow2.f32 %v2086_v21 }
 0x5c2   :  { %v6905_v58 = vpop.permute.xlu0 %1715  ;;  %v4585_v18 = vpop.eup %4584  ;;  %4588 = vpow2.f32 %v2088_v6 }
 0x5c3   :  { %v1526_v43 = vmul.f32 %v4585_v18, %v1462_v55 }
 0x5c7   :  { %v4587_v54 = vpop.eup %4586 }
 0x5cc   :  { %1730 = vperm.xlu0 %4439, %v6630_v39   ;;  %v9019_v39 = vld [vmem:[#allocation116_spill] sm:$0xff] }
 0x5ce   :  { %1720 = vperm.xlu2 %4438, %v6596_v15   ;;  %v9018_v15 = vld [vmem:[#allocation120_spill] sm:$0xff] }
 0x5d2   :  { %v2404_v60 = vpop.xlane.xlu1 %2403 }
 0x5d3   :  { %v2514_v19 = vadd.f32 %v2404_v60, %v1554_v10  ;;  %v9014_v10 = vld [vmem:[#allocation118_spill] sm:$0xff]  ;;  %v9015_v60 = vld [vmem:[#allocation115_spill] sm:$0xff] }
 0x5d4   :  { %v1299_v31 = vsub.f32 %v9015_v60, %v9014_v10  ;;  %v1987_v60 = vsub.f32 %v9017_v2, %v6573_v42 }
 0x5d5   :  { %2579 = vst.msk [vmem:[#allocation3 + $0x140] sm:$0xff] %vm20_vm11, %v2514_v19  ;;  %v2411_v19 = vadd.f32 %v4583_v16, %v4581_v24  ;;  %v4589_v24 = vpop.eup %4588  ;;  %v9016_v16 = vld [vmem:[#allocation61_spill] sm:$0xff] }
 0x5d6   :  { %v1404_v25 = vmul.f32 1.442695, %v1299_v31  ;;  %v1986_v22 = vsub.f32 %v9016_v16, %v6573_v42  ;;  %v1491_v31 = vld [vmem:[#allocation3 + $0x148] sm:$0xff]  ;;  %v2204_v55 = vmul.f32 1.442695, %v1987_v60  ;;  %v1268_v42 = vsub.f32 %v9019_v39, %v9018_v15  ;;  %v9020_v60 = vld [vmem:[#allocation63_spill] sm:$0xff] }
 0x5d7   :  { %v9023_v39 = vld [vmem:[#allocation133_spill] sm:$0xff] }
 0x5d8   :  { %4590 = vpow2.f32 %v1404_v25  ;;  %v2202_v21 = vmul.f32 1.442695, %v1986_v22 }
 0x5da   :  { %4592 = vpow2.f32 %v2202_v21  ;;  %v9021_v21 = vld [vmem:[#allocation64_spill] sm:$0xff] }
 0x5db   :  { %4594 = vpow2.f32 %v2204_v55 }
 0x5de   :  { %v4591_v10 = vpop.eup %4590 }
 0x5df   :  { %v1555_v6 = vmul.f32 %v4591_v10, %v1491_v31  ;;  %v1460_v10 = vld [vmem:[#allocation3 + $0x50] sm:$0xff]  ;;  %v1924_v31 = vsub.f32 %v9020_v60, %v6646_v28 }
 0x5e5   :  { %2412 = vadd.xlane.f32.xlu1 %v2411_v19  ;;  %v2327_v19 = vadd.f32 %v4589_v24, %v4587_v54  ;;  %v1342_v54 = vmul.f32 1.442695, %v1268_v42  ;;  %v9024_v42 = vld [vmem:[#allocation101_spill] sm:$0xff] }
 0x5e7   :  { %4596 = vpow2.f32 %v1342_v54  ;;  %v1994_v54 = vsub.f32 %v9024_v42, %v6665_v49 }
 0x5e8   :  { %v2407_v25 = vpop.xlane.xlu2 %2406 }
 0x5e9   :  { %v2515_v18 = vadd.f32 %v2407_v25, %v1555_v6  ;;  %v1925_v6 = vsub.f32 %v9021_v21, %v6646_v28  ;;  %v9025_v28 = vld [vmem:[#allocation102_spill] sm:$0xff]  ;;  %v1495_v21 = vld [vmem:[#allocation3 + $0x168] sm:$0xff] }
 0x5ea   :  { %v6919_v24 = vpop.permute.xlu1 %1710 }
 0x5eb   :  { %2580 = vst.msk [vmem:[#allocation3 + $0x148] sm:$0xff] %vm20_vm11, %v2515_v18  ;;  %v9022_v18 = vld [vmem:[#allocation135_spill] sm:$0xff] }
 0x5ec   :  { %v1303_v15 = vsub.f32 %v9023_v39, %v9022_v18  ;;  %v9026_v18 = vld [vmem:[#allocation124_spill] sm:$0xff] }
 0x5ed   :  { %v2320_v8 = vpop.xlane.xlu0 %2319 }
 0x5ee   :  { %v2486_v62 = vadd.f32 %v2320_v8, %v1526_v43  ;;  %v4593_v43 = vpop.eup %4592 }
 0x5ef   :  { %v4595_v8 = vpop.eup %4594 }
 0x5f0   :  { %2551 = vst.msk [vmem:[#allocation3 + $0x60] sm:$0xff] %vm20_vm11, %v2486_v62  ;;  %v2414_v62 = vadd.f32 %v4595_v8, %v4593_v43  ;;  %v4597_v22 = vpop.eup %4596  ;;  %v2078_v43 = vmul.f32 1.442695, %v1924_v31  ;;  %v2080_v8 = vmul.f32 1.442695, %v1925_v6 }
 0x5f1   :  { %v2218_v31 = vmul.f32 1.442695, %v1994_v54  ;;  %v6938_v54 = vpop.permute.xlu2 %1870 }
 0x5f2   :  { %4598 = vpow2.f32 %v2078_v43 }
 0x5f3   :  { %4600 = vpow2.f32 %v2080_v8 }
 0x5f6   :  { %2328 = vadd.xlane.f32.xlu0 %v2327_v19  ;;  %v1524_v19 = vmul.f32 %v4597_v22, %v1460_v10  ;;  %v1995_v22 = vsub.f32 %v9025_v28, %v6665_v49 }
 0x5f7   :  { %2415 = vadd.xlane.f32.xlu2 %v2414_v62  ;;  %v1412_v62 = vmul.f32 1.442695, %v1303_v15 }
 0x5f8   :  { %v4599_v10 = vpop.eup %4598  ;;  %v2220_v39 = vmul.f32 1.442695, %v1995_v22 }
 0x5f9   :  { %4602 = vpow2.f32 %v1412_v62 }
 0x5fa   :  { %4604 = vpow2.f32 %v2218_v31 }
 0x5fb   :  { %4606 = vpow2.f32 %v2220_v39 }
 0x5fe   :  { %1725 = vperm.xlu1 %4437, %v6655_v44   ;;  %v1465_v44 = vld [vmem:[#allocation3 + $0x78] sm:$0xff] }
 0x60a   :  { %1895 = vperm.xlu0 %4439, %v6677_v20  }
 0x60f   :  { %1885 = vperm.xlu2 %4438, %v6642_v32  }
 0x615   :  { %v2314_v55 = vpop.xlane.xlu1 %2313 }
 0x616   :  { %v2484_v25 = vadd.f32 %v2314_v55, %v1524_v19  ;;  %v6933_v19 = vpop.permute.xlu0 %1880  ;;  %v4601_v55 = vpop.eup %4600 }
 0x617   :  { %v4603_v15 = vpop.eup %4602  ;;  %v2321_v43 = vadd.f32 %v4601_v55, %v4599_v10  ;;  %v9029_v55 = vld [vmem:[#allocation68_spill] sm:$0xff] }
 0x618   :  { %2549 = vst.msk [vmem:[#allocation3 + $0x50] sm:$0xff] %vm20_vm11, %v2484_v25  ;;  %v9027_v25 = vld [vmem:[#allocation122_spill] sm:$0xff]  ;;  %v1559_v62 = vmul.f32 %v4603_v15, %v1495_v21  ;;  %v4605_v49 = vpop.eup %4604  ;;  %v1927_v31 = vsub.f32 %v9029_v55, %v6627_v27 }
 0x619   :  { %v1269_v6 = vsub.f32 %v9027_v25, %v9026_v18  ;;  %v4607_v20 = vpop.eup %4606  ;;  %v9028_v18 = vld [vmem:[#allocation67_spill] sm:$0xff] }
 0x61a   :  { %v1926_v22 = vsub.f32 %v9028_v18, %v6627_v27  ;;  %v2426_v25 = vadd.f32 %v4607_v20, %v4605_v49  ;;  %v2674_v27 = vld [vmem:[%s8253_s0 + $0x38] sm:$0xff]  ;;  %v9031_v49 = vld [vmem:[#allocation125_spill] sm:$0xff] }
 0x61b   :  { %v1344_v8 = vmul.f32 1.442695, %v1269_v6  ;;  %v1461_v6 = vld [vmem:[#allocation3 + $0x58] sm:$0xff] }
 0x61c   :  { %v2082_v21 = vmul.f32 1.442695, %v1926_v22 }
 0x61d   :  { %4608 = vpow2.f32 %v1344_v8 }
 0x61e   :  { %4610 = vpow2.f32 %v2082_v21  ;;  %v9032_v21 = vld [vmem:[#allocation140_spill] sm:$0xff] }
 0x623   :  { %v4609_v10 = vpop.eup %4608 }
 0x624   :  { %v1525_v39 = vmul.f32 %v4609_v10, %v1461_v6  ;;  %v1493_v6 = vld [vmem:[#allocation3 + $0x158] sm:$0xff] }
 0x628   :  { %2322 = vadd.xlane.f32.xlu1 %v2321_v43 }
 0x629   :  { %v2317_v15 = vpop.xlane.xlu2 %2316 }
 0x62a   :  { %v2485_v43 = vadd.f32 %v2317_v15, %v1525_v39  ;;  %v9033_v39 = vld [vmem:[#allocation138_spill] sm:$0xff] }
 0x62b   :  { %v2419_v60 = vpop.xlane.xlu0 %2418  ;;  %v9034_v15 = vld [vmem:[#allocation70_spill] sm:$0xff] }
 0x62c   :  { %v2519_v32 = vadd.f32 %v2419_v60, %v1559_v62  ;;  %v2084_v60 = vmul.f32 1.442695, %v1927_v31  ;;  %2550 = vst.msk [vmem:[#allocation3 + $0x58] sm:$0xff] %vm20_vm11, %v2485_v43  ;;  %v9030_v62 = vld [vmem:[#allocation127_spill] sm:$0xff]  ;;  %v1990_v43 = vsub.f32 %v9034_v15, %v6697_v0 }
 0x62d   :  { %v1301_v22 = vsub.f32 %v9031_v49, %v9030_v62  ;;  %v6951_v10 = vpop.permute.xlu1 %1875 }
 0x62e   :  { %2584 = vst.msk [vmem:[#allocation3 + $0x168] sm:$0xff] %vm20_vm11, %v2519_v32  ;;  %4612 = vpow2.f32 %v2084_v60  ;;  %v4611_v32 = vpop.eup %4610  ;;  %v1273_v60 = vsub.f32 %v9033_v39, %v9032_v21  ;;  %v9037_v21 = vld [vmem:[#allocation141_spill] sm:$0xff] }
 0x62f   :  { %v1935_v39 = vsub.f32 %v9037_v21, %v6722_v26 }
 0x630   :  { %v1352_v62 = vmul.f32 1.442695, %v1273_v60 }
 0x634   :  { %2427 = vadd.xlane.f32.xlu0 %v2426_v25  ;;  %v4613_v8 = vpop.eup %4612  ;;  %v1408_v25 = vmul.f32 1.442695, %v1301_v22  ;;  %v9036_v22 = vld [vmem:[#allocation142_spill] sm:$0xff] }
 0x635   :  { %v2324_v20 = vadd.f32 %v4613_v8, %v4611_v32  ;;  %v9035_v8 = vld [vmem:[#allocation71_spill] sm:$0xff] }
 0x636   :  { %4614 = vpow2.f32 %v1408_v25  ;;  %v1934_v25 = vsub.f32 %v9036_v22, %v6722_v26  ;;  %v9040_v22 = vld [vmem:[#allocation131_spill] sm:$0xff] }
 0x637   :  { %4616 = vpow2.f32 %v1352_v62 }
 0x638   :  { %2325 = vadd.xlane.f32.xlu2 %v2324_v20  ;;  %v1991_v20 = vsub.f32 %v9035_v8, %v6697_v0 }
 0x63a   :  { %v2212_v49 = vmul.f32 1.442695, %v1991_v20 }
 0x63c   :  { %v4615_v31 = vpop.eup %4614 }
 0x63d   :  { %v1557_v32 = vmul.f32 %v4615_v31, %v1493_v6  ;;  %v9038_v31 = vld [vmem:[#allocation103_spill] sm:$0xff]  ;;  %v4617_v20 = vpop.eup %4616 }
 0x63e   :  { %v1930_v0 = vsub.f32 %v9038_v31, %v6738_v11  ;;  %v6969_v60 = vpop.permute.xlu0 %1730 }
 0x641   :  { %1890 = vperm.xlu1 %4437, %v6703_v56  }
 0x648   :  { %2792 = vperm.xlu0 %4439, %v2674_v27   ;;  %v2210_v27 = vmul.f32 1.442695, %v1990_v43  ;;  %v2100_v43 = vmul.f32 1.442695, %v1935_v39 }
 0x64a   :  { %4618 = vpow2.f32 %v2210_v27  ;;  %v9042_v27 = vld [vmem:[#allocation149_spill] sm:$0xff] }
 0x64b   :  { %4620 = vpow2.f32 %v2212_v49  ;;  %v2000_v21 = vsub.f32 %v9042_v27, %v6757_v40 }
 0x64d   :  { %v2230_v31 = vmul.f32 1.442695, %v2000_v21  ;;  %v9044_v21 = vld [vmem:[#allocation78_spill] sm:$0xff] }
 0x650   :  { %1735 = vperm.xlu2 %4438, %v6691_v50   ;;  %v9041_v50 = vld [vmem:[#allocation129_spill] sm:$0xff]  ;;  %v4619_v26 = vpop.eup %4618 }
 0x651   :  { %v1302_v62 = vsub.f32 %v9041_v50, %v9040_v22  ;;  %v4621_v49 = vpop.eup %4620 }
 0x652   :  { %v2420_v50 = vadd.f32 %v4621_v49, %v4619_v26  ;;  %v1494_v26 = vld [vmem:[#allocation3 + $0x160] sm:$0xff] }
 0x653   :  { %v1410_v39 = vmul.f32 1.442695, %v1302_v62  ;;  %v9045_v62 = vld [vmem:[#allocation79_spill] sm:$0xff] }
 0x658   :  { %v2413_v56 = vpop.xlane.xlu1 %2412 }
 0x659   :  { %v2517_v55 = vadd.f32 %v2413_v56, %v1557_v32  ;;  %v9039_v56 = vld [vmem:[#allocation105_spill] sm:$0xff]  ;;  %v2090_v32 = vmul.f32 1.442695, %v1930_v0 }
 0x65a   :  { %v1931_v6 = vsub.f32 %v9039_v56, %v6738_v11  ;;  %v9043_v11 = vld [vmem:[#allocation150_spill] sm:$0xff] }
 0x65b   :  { %2582 = vst.msk [vmem:[#allocation3 + $0x158] sm:$0xff] %vm20_vm11, %v2517_v55  ;;  %v2098_v55 = vmul.f32 1.442695, %v1934_v25  ;;  %v2001_v56 = vsub.f32 %v9043_v11, %v6757_v40  ;;  %v1529_v25 = vmul.f32 %v4617_v20, %v1465_v44  ;;  %v6978_v40 = vpop.permute.xlu2 %1720  ;;  %v1992_v20 = vsub.f32 %v9044_v21, %v6681_v12 }
 0x65c   :  { %v2092_v18 = vmul.f32 1.442695, %v1931_v6 }
 0x65d   :  { %4622 = vpow2.f32 %v2098_v55  ;;  %v2232_v22 = vmul.f32 1.442695, %v2001_v56 }
 0x65e   :  { %4624 = vpow2.f32 %v2100_v43 }
 0x65f   :  { %4626 = vpow2.f32 %v2090_v32 }
 0x660   :  { %4628 = vpow2.f32 %v2092_v18 }
 0x661   :  { %4630 = vpow2.f32 %v1410_v39 }
 0x662   :  { %4632 = vpow2.f32 %v2230_v31 }
 0x663   :  { %v4623_v6 = vpop.eup %4622  ;;  %4634 = vpow2.f32 %v2232_v22 }
 0x664   :  { %v4625_v55 = vpop.eup %4624 }
 0x665   :  { %v4627_v15 = vpop.eup %4626  ;;  %v2336_v44 = vadd.f32 %v4625_v55, %v4623_v6  ;;  %v9047_v55 = vld [vmem:[#allocation112_spill] sm:$0xff] }
 0x666   :  { %v4629_v43 = vpop.eup %4628 }
 0x667   :  { %v2330_v18 = vadd.f32 %v4629_v43, %v4627_v15  ;;  %v4631_v32 = vpop.eup %4630  ;;  %v9046_v15 = vld [vmem:[#allocation111_spill] sm:$0xff] }
 0x668   :  { %v4633_v56 = vpop.eup %4632  ;;  %v1558_v31 = vmul.f32 %v4631_v32, %v1494_v26  ;;  %v1932_v6 = vsub.f32 %v9046_v15, %v6727_v9  ;;  %v9048_v26 = vld [vmem:[#allocation132_spill] sm:$0xff] }
 0x669   :  { %v2329_v0 = vpop.xlane.xlu0 %2328  ;;  %v4635_v49 = vpop.eup %4634 }
 0x66a   :  { %v2489_v8 = vadd.f32 %v2329_v0, %v1529_v25  ;;  %v2214_v25 = vmul.f32 1.442695, %v1992_v20  ;;  %v2416_v0 = vpop.xlane.xlu2 %2415  ;;  %v2094_v43 = vmul.f32 1.442695, %v1932_v6  ;;  %v9051_v6 = vld [vmem:[#allocation153_spill] sm:$0xff] }
 0x66b   :  { %2421 = vadd.xlane.f32.xlu1 %v2420_v50  ;;  %v2435_v50 = vadd.f32 %v4635_v49, %v4633_v56  ;;  %v2518_v22 = vadd.f32 %v2416_v0, %v1558_v31  ;;  %v9049_v49 = vld [vmem:[#allocation130_spill] sm:$0xff] }
 0x66c   :  { %2554 = vst.msk [vmem:[#allocation3 + $0x78] sm:$0xff] %vm20_vm11, %v2489_v8  ;;  %v1993_v8 = vsub.f32 %v9045_v62, %v6681_v12  ;;  %4636 = vpow2.f32 %v2214_v25  ;;  %v1933_v12 = vsub.f32 %v9047_v55, %v6727_v9  ;;  %v1271_v25 = vsub.f32 %v9049_v49, %v9048_v26  ;;  %v2673_v31 = vld [vmem:[%s8253_s0 + $0x30] sm:$0xff] }
 0x66d   :  { %2583 = vst.msk [vmem:[#allocation3 + $0x160] sm:$0xff] %vm20_vm11, %v2518_v22  ;;  %v2677_v9 = vld [vmem:[%s8253_s0 + $0x50] sm:$0xff]  ;;  %v9050_v22 = vld [vmem:[#allocation156_spill] sm:$0xff] }
 0x66e   :  { %v2216_v39 = vmul.f32 1.442695, %v1993_v8  ;;  %v1348_v0 = vmul.f32 1.442695, %v1271_v25 }
 0x670   :  { %4638 = vpow2.f32 %v2216_v39 }
 0x671   :  { %4640 = vpow2.f32 %v2094_v43 }
 0x672   :  { %2337 = vadd.xlane.f32.xlu0 %v2336_v44  ;;  %v2096_v44 = vmul.f32 1.442695, %v1933_v12  ;;  %v1306_v12 = vsub.f32 %v9051_v6, %v9050_v22  ;;  %v2672_v6 = vld [vmem:[%s8253_s0 + $0x28] sm:$0xff] }
 0x673   :  { %2331 = vadd.xlane.f32.xlu1 %v2330_v18  ;;  %v4637_v18 = vpop.eup %4636 }
 0x674   :  { %4642 = vpow2.f32 %v2096_v44  ;;  %v1463_v44 = vld [vmem:[#allocation3 + $0x68] sm:$0xff] }
 0x675   :  { %4644 = vpow2.f32 %v1348_v0  ;;  %v9054_v0 = vld [vmem:[#allocation158_spill] sm:$0xff] }
 0x676   :  { %v4639_v20 = vpop.eup %4638  ;;  %v1940_v22 = vsub.f32 %v9054_v0, %v6788_v5  ;;  %v9058_v0 = vld [vmem:[#allocation147_spill] sm:$0xff] }
 0x677   :  { %v2423_v32 = vadd.f32 %v4639_v20, %v4637_v18  ;;  %v4641_v56 = vpop.eup %4640  ;;  %v1418_v18 = vmul.f32 1.442695, %v1306_v12  ;;  %v9055_v12 = vld [vmem:[#allocation160_spill] sm:$0xff]  ;;  %v1936_v62 = vsub.f32 %v9058_v0, %v6778_v47 }
 0x679   :  { %2424 = vadd.xlane.f32.xlu2 %v2423_v32  ;;  %4646 = vpow2.f32 %v1418_v18 }
 0x67a   :  { %2436 = vadd.xlane.f32.xlu0 %v2435_v50  ;;  %v4643_v8 = vpop.eup %4642  ;;  %v6997_v50 = vpop.permute.xlu1 %1725 }
 0x67b   :  { %v2333_v39 = vadd.f32 %v4643_v8, %v4641_v56  ;;  %v4645_v43 = vpop.eup %4644  ;;  %v9052_v56 = vld [vmem:[#allocation117_spill] sm:$0xff] }
 0x67c   :  { %v1527_v20 = vmul.f32 %v4645_v43, %v1463_v44  ;;  %v7001_v49 = vpop.permute.xlu0 %1895  ;;  %v1996_v8 = vsub.f32 %v9052_v56, %v6773_v51  ;;  %v1941_v43 = vsub.f32 %v9055_v12, %v6788_v5  ;;  %v9059_v5 = vld [vmem:[#allocation148_spill] sm:$0xff] }
 0x67e   :  { %v2222_v44 = vmul.f32 1.442695, %v1996_v8  ;;  %v2112_v56 = vmul.f32 1.442695, %v1941_v43  ;;  %v1937_v8 = vsub.f32 %v9059_v5, %v6778_v47  ;;  %v9062_v5 = vld [vmem:[#allocation145_spill] sm:$0xff] }
 0x67f   :  { %v4647_v25 = vpop.eup %4646 }
 0x680   :  { %4648 = vpow2.f32 %v2222_v44 }
 0x681   :  { %2334 = vadd.xlane.f32.xlu2 %v2333_v39  ;;  %v1498_v39 = vld [vmem:[#allocation3 + $0x180] sm:$0xff] }
 0x682   :  { %v1562_v18 = vmul.f32 %v4647_v25, %v1498_v39  ;;  %v9060_v25 = vld [vmem:[#allocation167_spill] sm:$0xff]  ;;  %v9061_v39 = vld [vmem:[#allocation168_spill] sm:$0xff] }
 0x686   :  { %v4649_v43 = vpop.eup %4648 }
 0x68c   :  { %2789 = vperm.xlu1 %4437, %v2673_v31   ;;  %v9053_v31 = vld [vmem:[#allocation119_spill] sm:$0xff] }
 0x68e   :  { %2801 = vperm.xlu0 %4439, %v2677_v9   ;;  %v1997_v9 = vsub.f32 %v9053_v31, %v6773_v51  ;;  %v2110_v51 = vmul.f32 1.442695, %v1940_v22  ;;  %v2102_v22 = vmul.f32 1.442695, %v1936_v62 }
 0x690   :  { %v2224_v55 = vmul.f32 1.442695, %v1997_v9  ;;  %v2006_v9 = vsub.f32 %v9060_v25, %v6817_v33 }
 0x692   :  { %4650 = vpow2.f32 %v2224_v55  ;;  %v2242_v44 = vmul.f32 1.442695, %v2006_v9 }
 0x693   :  { %4652 = vpow2.f32 %v2110_v51 }
 0x694   :  { %4654 = vpow2.f32 %v2112_v56 }
 0x699   :  { %2786 = vperm.xlu2 %4438, %v2672_v6   ;;  %v2104_v6 = vmul.f32 1.442695, %v1937_v8 }
 0x69b   :  { %v2323_v32 = vpop.xlane.xlu1 %2322 }
 0x69c   :  { %v2487_v26 = vadd.f32 %v2323_v32, %v1527_v20  ;;  %v9056_v20 = vld [vmem:[#allocation136_spill] sm:$0xff]  ;;  %v9057_v32 = vld [vmem:[#allocation134_spill] sm:$0xff] }
 0x69e   :  { %2552 = vst.msk [vmem:[#allocation3 + $0x68] sm:$0xff] %vm20_vm11, %v2487_v26  ;;  %v1272_v26 = vsub.f32 %v9057_v32, %v9056_v20  ;;  %v7026_v20 = vpop.permute.xlu2 %1885 }
 0x6a0   :  { %v1350_v21 = vmul.f32 1.442695, %v1272_v26  ;;  %v1464_v26 = vld [vmem:[#allocation3 + $0x70] sm:$0xff] }
 0x6a2   :  { %4656 = vpow2.f32 %v1350_v21 }
 0x6a3   :  { %4658 = vpow2.f32 %v2102_v22  ;;  %v1998_v22 = vsub.f32 %v9062_v5, %v6763_v35 }
 0x6a4   :  { %4660 = vpow2.f32 %v2104_v6  ;;  %v9063_v6 = vld [vmem:[#allocation146_spill] sm:$0xff] }
 0x6a5   :  { %4662 = vpow2.f32 %v2242_v44  ;;  %v1999_v44 = vsub.f32 %v9063_v6, %v6763_v35  ;;  %v9066_v35 = vld [vmem:[#allocation139_spill] sm:$0xff] }
 0x6a7   :  { %v2428_v15 = vpop.xlane.xlu0 %2427 }
 0x6a8   :  { %v2522_v31 = vadd.f32 %v2428_v15, %v1562_v18  ;;  %v2007_v15 = vsub.f32 %v9061_v39, %v6817_v33  ;;  %v4651_v18 = vpop.eup %4650 }
 0x6a9   :  { %v4653_v55 = vpop.eup %4652  ;;  %v2429_v56 = vadd.f32 %v4651_v18, %v4649_v43 }
 0x6aa   :  { %2587 = vst.msk [vmem:[#allocation3 + $0x180] sm:$0xff] %vm20_vm11, %v2522_v31  ;;  %v2244_v31 = vmul.f32 1.442695, %v2007_v15  ;;  %v4655_v47 = vpop.eup %4654 }
 0x6ab   :  { %v4657_v32 = vpop.eup %4656  ;;  %v2345_v51 = vadd.f32 %v4655_v47, %v4653_v55  ;;  %v2326_v8 = vpop.xlane.xlu2 %2325  ;;  %v2228_v55 = vmul.f32 1.442695, %v1999_v44  ;;  %v9064_v47 = vld [vmem:[#allocation154_spill] sm:$0xff] }
 0x6ac   :  { %4664 = vpow2.f32 %v2244_v31  ;;  %v4659_v33 = vpop.eup %4658  ;;  %v1528_v21 = vmul.f32 %v4657_v32, %v1464_v26  ;;  %v2226_v31 = vmul.f32 1.442695, %v1998_v22  ;;  %v1938_v32 = vsub.f32 %v9064_v47, %v6798_v46  ;;  %v2680_v22 = vld [vmem:[%s8253_s0 + $0x68] sm:$0xff] }
 0x6ad   :  { %v4661_v62 = vpop.eup %4660 }
 0x6ae   :  { %v4663_v9 = vpop.eup %4662  ;;  %v2488_v15 = vadd.f32 %v2326_v8, %v1528_v21  ;;  %v2339_v43 = vadd.f32 %v4661_v62, %v4659_v33  ;;  %4666 = vpow2.f32 %v2226_v31  ;;  %v9067_v33 = vld [vmem:[#allocation137_spill] sm:$0xff]  ;;  %v9069_v31 = vld [vmem:[#allocation159_spill] sm:$0xff] }
 0x6af   :  { %4668 = vpow2.f32 %v2228_v55  ;;  %v1274_v55 = vsub.f32 %v9069_v31, %v6215_v45 }
 0x6b0   :  { %2553 = vst.msk [vmem:[#allocation3 + $0x70] sm:$0xff] %vm20_vm11, %v2488_v15 }
 0x6b2   :  { %v4665_v12 = vpop.eup %4664 }
 0x6b3   :  { %v2444_v18 = vadd.f32 %v4665_v12, %v4663_v9  ;;  %v1304_v12 = vsub.f32 %v9067_v33, %v9066_v35  ;;  %v1496_v33 = vld [vmem:[#allocation3 + $0x170] sm:$0xff] }
 0x6b4   :  { %v4667_v8 = vpop.eup %4666 }
 0x6b5   :  { %v4669_v15 = vpop.eup %4668  ;;  %v1414_v9 = vmul.f32 1.442695, %v1304_v12 }
 0x6b6   :  { %2430 = vadd.xlane.f32.xlu1 %v2429_v56  ;;  %v9065_v56 = vld [vmem:[#allocation155_spill] sm:$0xff]  ;;  %v2432_v62 = vadd.f32 %v4669_v15, %v4667_v8  ;;  %v1354_v8 = vmul.f32 1.442695, %v1274_v55 }
 0x6b7   :  { %v1939_v26 = vsub.f32 %v9065_v56, %v6798_v46  ;;  %v9068_v46 = vld [vmem:[#allocation164_spill] sm:$0xff]  ;;  %v9076_v56 = vld [vmem:[#allocation181_spill] sm:$0xff] }
 0x6b8   :  { %2346 = vadd.xlane.f32.xlu0 %v2345_v51  ;;  %v2106_v51 = vmul.f32 1.442695, %v1938_v32  ;;  %v2676_v32 = vld [vmem:[%s8253_s0 + $0x48] sm:$0xff]  ;;  %v1946_v47 = vsub.f32 %v9076_v56, %v6845_v1 }
 0x6b9   :  { %v2108_v21 = vmul.f32 1.442695, %v1939_v26 }
 0x6ba   :  { %4670 = vpow2.f32 %v2106_v51  ;;  %v7053_v12 = vpop.permute.xlu0 %2792 }
 0x6bb   :  { %4672 = vpow2.f32 %v2108_v21  ;;  %v7049_v21 = vpop.permute.xlu1 %1890 }
 0x6bc   :  { %4674 = vpow2.f32 %v1414_v9 }
 0x6be   :  { %2340 = vadd.xlane.f32.xlu1 %v2339_v43 }
 0x6c0   :  { %2445 = vadd.xlane.f32.xlu0 %v2444_v18  ;;  %v4671_v44 = vpop.eup %4670  ;;  %v1276_v18 = vsub.f32 %v9068_v46, %v6250_v37  ;;  %v9070_v37 = vld [vmem:[#allocation175_spill] sm:$0xff]  ;;  %v9072_v46 = vld [vmem:[#allocation21_spill] sm:$0xff] }
 0x6c1   :  { %v4673_v43 = vpop.eup %4672  ;;  %v1309_v35 = vsub.f32 %v9070_v37, %v6317_v30  ;;  %vm8638_vm13 = vcmp.eq.s32.totalorder %v9072_v46, %v7053_v12  ;;  %v1466_v30 = vld [vmem:[#allocation3 + $0x80] sm:$0xff] }
 0x6c2   :  { %2433 = vadd.xlane.f32.xlu2 %v2432_v62  ;;  %v2342_v26 = vadd.f32 %v4673_v43, %v4671_v44  ;;  %v1358_v51 = vmul.f32 1.442695, %v1276_v18  ;;  %v4675_v15 = vpop.eup %4674  ;;  %v9071_v43 = vld [vmem:[#allocation19_spill] sm:$0xff]  ;;  %v1468_v18 = vld [vmem:[#allocation3 + $0x90] sm:$0xff] }
 0x6c3   :  { %v1560_v45 = vmul.f32 %v4675_v15, %v1496_v33  ;;  %v1424_v62 = vmul.f32 1.442695, %v1309_v35  ;;  %vm8639_vm12 = vcmp.eq.s32.totalorder %v9071_v43, %v7053_v12  ;;  %v9074_v33 = vld [vmem:[#allocation144_spill] sm:$0xff] }
 0x6c4   :  { %4676 = vpow2.f32 %v1358_v51  ;;  %v3008_v55 = vsel %vm8639_vm12, %v8941_v57, 0.0  ;;  %v1501_v57 = vld [vmem:[#allocation3 + $0x198] sm:$0xff] }
 0x6c5   :  { %4678 = vpow2.f32 %v1354_v8 }
 0x6c6   :  { %4680 = vpow2.f32 %v1424_v62 }
 0x6ca   :  { %2343 = vadd.xlane.f32.xlu2 %v2342_v26  ;;  %v4677_v44 = vpop.eup %4676 }
 0x6cb   :  { %v4679_v31 = vpop.eup %4678  ;;  %v1532_v26 = vmul.f32 %v4677_v44, %v1468_v18 }
 0x6cc   :  { %v1530_v15 = vmul.f32 %v4679_v31, %v1466_v30 }
 0x6d4   :  { %2810 = vperm.xlu0 %4439, %v2680_v22  }
 0x6d7   :  { %2798 = vperm.xlu1 %4437, %v2676_v32   ;;  %v3009_v32 = vsel %vm8638_vm13, %v8942_v3, 0.0  ;;  %v9077_v3 = vld [vmem:[#allocation182_spill] sm:$0xff] }
 0x6d8   :  { %v7068_v35 = vadd.f32 %v3009_v32, %v3008_v55  ;;  %v1947_v44 = vsub.f32 %v9077_v3, %v6845_v1  ;;  %v2675_v55 = vld [vmem:[%s8253_s0 + $0x40] sm:$0xff]  ;;  %v9078_v32 = vld [vmem:[#allocation151_spill] sm:$0xff]  ;;  %v9080_v1 = vld [vmem:[#allocation157_spill] sm:$0xff] }
 0x6da   :  { %9073 = vst [vmem:[#allocation16_spill] sm:$0xff] %v7068_v35 }
 0x6de   :  { %v2422_v9 = vpop.xlane.xlu1 %2421 }
 0x6df   :  { %v2520_v22 = vadd.f32 %v2422_v9, %v1560_v45  ;;  %v9075_v45 = vld [vmem:[#allocation143_spill] sm:$0xff] }
 0x6e0   :  { %v1305_v62 = vsub.f32 %v9075_v45, %v9074_v33  ;;  %v2124_v33 = vmul.f32 1.442695, %v1947_v44  ;;  %v1275_v45 = vsub.f32 %v9080_v1, %v6210_v41  ;;  %v1497_v41 = vld [vmem:[#allocation3 + $0x178] sm:$0xff] }
 0x6e1   :  { %2585 = vst.msk [vmem:[#allocation3 + $0x170] sm:$0xff] %vm20_vm11, %v2520_v22  ;;  %v4681_v22 = vpop.eup %4680 }
 0x6e2   :  { %v1416_v18 = vmul.f32 1.442695, %v1305_v62  ;;  %v1565_v31 = vmul.f32 %v4681_v22, %v1501_v57  ;;  %2795 = vperm.xlu2 %4438, %v2675_v55   ;;  %v7090_v57 = vpop.permute.xlu2 %1735  ;;  %v1356_v44 = vmul.f32 1.442695, %v1275_v45 }
 0x6e4   :  { %4682 = vpow2.f32 %v1416_v18 }
 0x6e5   :  { %v2338_v51 = vpop.xlane.xlu0 %2337 }
 0x6e6   :  { %v2492_v8 = vadd.f32 %v2338_v51, %v1532_v26  ;;  %v2332_v37 = vpop.xlane.xlu1 %2331  ;;  %v2002_v26 = vsub.f32 %v9078_v32, %v6815_v63  ;;  %v2122_v51 = vmul.f32 1.442695, %v1946_v47 }
 0x6e7   :  { %v2490_v9 = vadd.f32 %v2332_v37, %v1530_v15  ;;  %v9079_v15 = vld [vmem:[#allocation152_spill] sm:$0xff] }
 0x6e8   :  { %2557 = vst.msk [vmem:[#allocation3 + $0x90] sm:$0xff] %vm20_vm11, %v2492_v8  ;;  %v2003_v37 = vsub.f32 %v9079_v15, %v6815_v63  ;;  %v2234_v62 = vmul.f32 1.442695, %v2002_v26  ;;  %4684 = vpow2.f32 %v2122_v51  ;;  %v9084_v26 = vld [vmem:[#allocation163_spill] sm:$0xff] }
 0x6e9   :  { %2555 = vst.msk [vmem:[#allocation3 + $0x80] sm:$0xff] %vm20_vm11, %v2490_v9  ;;  %v9081_v9 = vld [vmem:[#allocation196_spill] sm:$0xff]  ;;  %4686 = vpow2.f32 %v2124_v33  ;;  %v1943_v51 = vsub.f32 %v9084_v26, %v6847_v13 }
 0x6ea   :  { %v2012_v22 = vsub.f32 %v9081_v9, %v6875_v29  ;;  %v2236_v47 = vmul.f32 1.442695, %v2003_v37  ;;  %v4683_v18 = vpop.eup %4682  ;;  %4688 = vpow2.f32 %v2234_v62 }
 0x6eb   :  { %v1561_v37 = vmul.f32 %v4683_v18, %v1497_v41  ;;  %v2116_v45 = vmul.f32 1.442695, %v1943_v51 }
 0x6ec   :  { %4690 = vpow2.f32 %v2236_v47 }
 0x6ed   :  { %v2437_v30 = vpop.xlane.xlu0 %2436  ;;  %4692 = vpow2.f32 %v1356_v44 }
 0x6ee   :  { %v2525_v8 = vadd.f32 %v2437_v30, %v1565_v31  ;;  %v9082_v31 = vld [vmem:[#allocation197_spill] sm:$0xff]  ;;  %v9083_v30 = vld [vmem:[#allocation162_spill] sm:$0xff]  ;;  %v4685_v35 = vpop.eup %4684 }
 0x6ef   :  { %v2013_v63 = vsub.f32 %v9082_v31, %v6875_v29  ;;  %v1942_v55 = vsub.f32 %v9083_v30, %v6847_v13  ;;  %v4687_v3 = vpop.eup %4686  ;;  %v2425_v29 = vpop.xlane.xlu2 %2424  ;;  %v1467_v13 = vld [vmem:[#allocation3 + $0x88] sm:$0xff] }
 0x6f0   :  { %2590 = vst.msk [vmem:[#allocation3 + $0x198] sm:$0xff] %vm20_vm11, %v2525_v8  ;;  %v2254_v8 = vmul.f32 1.442695, %v2012_v22  ;;  %v2521_v62 = vadd.f32 %v2425_v29, %v1561_v37  ;;  %v4689_v56 = vpop.eup %4688  ;;  %v2354_v15 = vadd.f32 %v4687_v3, %v4685_v35 }
 0x6f1   :  { %v2256_v1 = vmul.f32 1.442695, %v2013_v63  ;;  %v2114_v33 = vmul.f32 1.442695, %v1942_v55 }
 0x6f2   :  { %4694 = vpow2.f32 %v2254_v8  ;;  %v4691_v30 = vpop.eup %4690  ;;  %2586 = vst.msk [vmem:[#allocation3 + $0x178] sm:$0xff] %vm20_vm11, %v2521_v62 }
 0x6f3   :  { %4696 = vpow2.f32 %v2256_v1  ;;  %v4693_v22 = vpop.eup %4692  ;;  %v2438_v44 = vadd.f32 %v4691_v30, %v4689_v56  ;;  %v9086_v1 = vld [vmem:[#allocation165_spill] sm:$0xff] }
 0x6f4   :  { %4698 = vpow2.f32 %v2114_v33  ;;  %v1531_v35 = vmul.f32 %v4693_v22, %v1467_v13  ;;  %v2004_v37 = vsub.f32 %v9086_v1, %v6828_v23  ;;  %v9087_v33 = vld [vmem:[#allocation166_spill] sm:$0xff]  ;;  %v9089_v13 = vld [vmem:[#allocation179_spill] sm:$0xff] }
 0x6f5   :  { %4700 = vpow2.f32 %v2116_v45  ;;  %v2005_v29 = vsub.f32 %v9087_v33, %v6828_v23 }
 0x6f6   :  { %v2238_v45 = vmul.f32 1.442695, %v2004_v37 }
 0x6f7   :  { %v2335_v3 = vpop.xlane.xlu2 %2334  ;;  %v2240_v62 = vmul.f32 1.442695, %v2005_v29 }
 0x6f8   :  { %v4695_v47 = vpop.eup %4694  ;;  %v2491_v8 = vadd.f32 %v2335_v3, %v1531_v35  ;;  %4702 = vpow2.f32 %v2238_v45  ;;  %v9092_v45 = vld [vmem:[#allocation172_spill] sm:$0xff] }
 0x6f9   :  { %v4697_v18 = vpop.eup %4696  ;;  %4704 = vpow2.f32 %v2240_v62  ;;  %v1277_v62 = vsub.f32 %v9092_v45, %v6283_v7 }
 0x6fa   :  { %v4699_v30 = vpop.eup %4698  ;;  %v2453_v41 = vadd.f32 %v4697_v18, %v4695_v47  ;;  %2556 = vst.msk [vmem:[#allocation3 + $0x88] sm:$0xff] %vm20_vm11, %v2491_v8  ;;  %v1945_v47 = vsub.f32 %v9089_v13, %v6858_v52  ;;  %v9091_v8 = vld [vmem:[#allocation180_spill] sm:$0xff] }
 0x6fb   :  { %v4701_v51 = vpop.eup %4700 }
 0x6fc   :  { %v2120_v18 = vmul.f32 1.442695, %v1945_v47 }
 0x6fe   :  { %2355 = vadd.xlane.f32.xlu0 %v2354_v15  ;;  %v4703_v35 = vpop.eup %4702 }
 0x6ff   :  { %v4705_v3 = vpop.eup %4704  ;;  %v7154_v45 = vpop.permute.xlu2 %2786 }
 0x700   :  { %v7099_v63 = vpop.permute.xlu0 %2801  ;;  %v2441_v23 = vadd.f32 %v4705_v3, %v4703_v35  ;;  %v1499_v35 = vld [vmem:[#allocation3 + $0x188] sm:$0xff] }
 0x701   :  { %vm8635_vm14 = vcmp.eq.s32.totalorder %v9071_v43, %v7099_v63  ;;  %vm8634_vm15 = vcmp.eq.s32.totalorder %v9072_v46, %v7099_v63  ;;  %2439 = vadd.xlane.f32.xlu1 %v2438_v44 }
 0x702   :  { %v3014_v15 = vsel %vm8635_vm14, %v8970_v4, 0.0  ;;  %v3015_v56 = vsel %vm8634_vm15, %v8971_v48, 0.0  ;;  %v2348_v4 = vadd.f32 %v4701_v51, %v4699_v30  ;;  %v9088_v48 = vld [vmem:[#allocation178_spill] sm:$0xff]  ;;  %vm2876_vm14 = vcmp.eq.s32.totalorder %v9071_v43, %v7154_v45 }
 0x703   :  { %v7113_v55 = vadd.f32 %v3015_v56, %v3014_v15  ;;  %v1944_v22 = vsub.f32 %v9088_v48, %v6858_v52  ;;  %v2683_v15 = vld [vmem:[%s8253_s0 + $0x80] sm:$0xff]  ;;  %v9090_v56 = vld [vmem:[#allocation161_spill] sm:$0xff] }
 0x704   :  { %v1307_v30 = vsub.f32 %v9090_v56, %v6226_v17  ;;  %v9093_v17 = vld [vmem:[#allocation195_spill] sm:$0xff] }
 0x705   :  { %9085 = vst [vmem:[#allocation186_spill] sm:$0xff] %v7113_v55  ;;  %v2118_v44 = vmul.f32 1.442695, %v1944_v22  ;;  %v2679_v22 = vld [vmem:[%s8253_s0 + $0x60] sm:$0xff]  ;;  %v1312_v47 = vsub.f32 %v9093_v17, %v6390_v34  ;;  %v9095_v56 = vld [vmem:[#allocation31_spill] sm:$0xff] }
 0x706   :  { %2454 = vadd.xlane.f32.xlu0 %v2453_v41  ;;  %v1279_v41 = vsub.f32 %v9091_v8, %v6330_v36  ;;  %v1420_v37 = vmul.f32 1.442695, %v1307_v30  ;;  %v7138_v36 = vpop.permute.xlu1 %2789 }
 0x707   :  { %4706 = vpow2.f32 %v2118_v44  ;;  %v1360_v44 = vmul.f32 1.442695, %v1277_v62  ;;  %vm8637_vm0 = vcmp.eq.s32.totalorder %v9071_v43, %v7138_v36  ;;  %vm8636_vm15 = vcmp.eq.s32.totalorder %v9072_v46, %v7138_v36 }
 0x708   :  { %4708 = vpow2.f32 %v2120_v18  ;;  %v1364_v29 = vmul.f32 1.442695, %v1279_v41  ;;  %v1430_v18 = vmul.f32 1.442695, %v1312_v47  ;;  %v3007_v30 = vsel %vm8636_vm15, %v9095_v56, 0.0  ;;  %v9097_v47 = vld [vmem:[#allocation170_spill] sm:$0xff] }
 0x709   :  { %2349 = vadd.xlane.f32.xlu1 %v2348_v4  ;;  %4710 = vpow2.f32 %v1420_v37  ;;  %vm2877_vm15 = vcmp.eq.s32.totalorder %v9072_v46, %v7154_v45  ;;  %v9192_v45 = vld [vmem:[#allocation38_spill] sm:$0xff] }
 0x70a   :  { %4712 = vpow2.f32 %v1364_v29 }
 0x70b   :  { %2442 = vadd.xlane.f32.xlu2 %v2441_v23  ;;  %v1471_v23 = vld [vmem:[#allocation3 + $0xa8] sm:$0xff]  ;;  %4714 = vpow2.f32 %v1360_v44 }
 0x70c   :  { %4716 = vpow2.f32 %v1430_v18  ;;  %v9098_v44 = vld [vmem:[#allocation169_spill] sm:$0xff] }
 0x70d   :  { %v4707_v52 = vpop.eup %4706  ;;  %v1308_v18 = vsub.f32 %v9098_v44, %v9097_v47 }
 0x70e   :  { %v4709_v51 = vpop.eup %4708 }
 0x70f   :  { %v2351_v4 = vadd.f32 %v4709_v51, %v4707_v52  ;;  %v4711_v7 = vpop.eup %4710 }
 0x710   :  { %v4713_v3 = vpop.eup %4712  ;;  %v1563_v8 = vmul.f32 %v4711_v7, %v1499_v35  ;;  %v1504_v7 = vld [vmem:[#allocation3 + $0x1b0] sm:$0xff] }
 0x711   :  { %v1535_v52 = vmul.f32 %v4713_v3, %v1471_v23  ;;  %v4715_v62 = vpop.eup %4714  ;;  %v9099_v35 = vld [vmem:[#allocation210_spill] sm:$0xff]  ;;  %v9100_v23 = vld [vmem:[#allocation211_spill] sm:$0xff] }
 0x712   :  { %v4717_v17 = vpop.eup %4716  ;;  %v1952_v3 = vsub.f32 %v9099_v35, %v6905_v58 }
 0x713   :  { %2352 = vadd.xlane.f32.xlu2 %v2351_v4 }
 0x714   :  { %v2134_v44 = vmul.f32 1.442695, %v1952_v3  ;;  %v9107_v3 = vld [vmem:[#allocation222_spill] sm:$0xff] }
 0x71a   :  { %2819 = vperm.xlu0 %4439, %v2683_v15   ;;  %v9094_v15 = vld [vmem:[#allocation30_spill] sm:$0xff] }
 0x71b   :  { %v3006_v34 = vsel %vm8637_vm0, %v9094_v15, 0.0  ;;  %v1953_v15 = vsub.f32 %v9100_v23, %v6905_v58  ;;  %v9103_v58 = vld [vmem:[#allocation185_spill] sm:$0xff] }
 0x71c   :  { %v7152_v29 = vadd.f32 %v3007_v30, %v3006_v34  ;;  %v1568_v30 = vmul.f32 %v4717_v17, %v1504_v7  ;;  %v2678_v17 = vld [vmem:[%s8253_s0 + $0x58] sm:$0xff]  ;;  %v9106_v7 = vld [vmem:[#allocation176_spill] sm:$0xff] }
 0x71e   :  { %9096 = vst [vmem:[#allocation75_spill] sm:$0xff] %v7152_v29  ;;  %v2136_v29 = vmul.f32 1.442695, %v1953_v15  ;;  %v2018_v15 = vsub.f32 %v9107_v3, %v6933_v19 }
 0x722   :  { %2807 = vperm.xlu1 %4437, %v2679_v22   ;;  %v1469_v22 = vld [vmem:[#allocation3 + $0x98] sm:$0xff] }
 0x723   :  { %v1533_v34 = vmul.f32 %v4715_v62, %v1469_v22  ;;  %v9104_v62 = vld [vmem:[#allocation184_spill] sm:$0xff] }
 0x724   :  { %v1278_v22 = vsub.f32 %v9104_v62, %v9103_v58  ;;  %v1500_v62 = vld [vmem:[#allocation3 + $0x190] sm:$0xff] }
 0x729   :  { %v2431_v41 = vpop.xlane.xlu1 %2430 }
 0x72a   :  { %v2523_v51 = vadd.f32 %v2431_v41, %v1563_v8  ;;  %v1422_v8 = vmul.f32 1.442695, %v1308_v18  ;;  %v9101_v41 = vld [vmem:[#allocation24_spill] sm:$0xff] }
 0x72b   :  { %v2347_v37 = vpop.xlane.xlu0 %2346  ;;  %2804 = vperm.xlu2 %4438, %v2678_v17  }
 0x72c   :  { %v2495_v4 = vadd.f32 %v2347_v37, %v1535_v52  ;;  %2588 = vst.msk [vmem:[#allocation3 + $0x188] sm:$0xff] %vm20_vm11, %v2523_v51  ;;  %v3004_v52 = vsel %vm2876_vm14, %v9101_v41, 0.0  ;;  %v9102_v51 = vld [vmem:[#allocation25_spill] sm:$0xff]  ;;  %4718 = vpow2.f32 %v1422_v8 }
 0x72d   :  { %v3005_v37 = vsel %vm2877_vm15, %v9102_v51, 0.0  ;;  %4720 = vpow2.f32 %v2134_v44  ;;  %v9109_v41 = vld [vmem:[#allocation177_spill] sm:$0xff] }
 0x72e   :  { %2560 = vst.msk [vmem:[#allocation3 + $0xa8] sm:$0xff] %vm20_vm11, %v2495_v4  ;;  %v7183_v18 = vadd.f32 %v3005_v37, %v3004_v52  ;;  %4722 = vpow2.f32 %v2136_v29  ;;  %v2009_v51 = vsub.f32 %v9109_v41, %v6877_v61  ;;  %v2266_v52 = vmul.f32 1.442695, %v2018_v15  ;;  %v9110_v29 = vld [vmem:[#allocation193_spill] sm:$0xff] }
 0x730   :  { %9105 = vst [vmem:[#allocation80_spill] sm:$0xff] %v7183_v18  ;;  %v2248_v58 = vmul.f32 1.442695, %v2009_v51  ;;  %v1948_v18 = vsub.f32 %v9110_v29, %v6907_v38 }
 0x731   :  { %v2341_v56 = vpop.xlane.xlu1 %2340 }
 0x732   :  { %v2493_v4 = vadd.f32 %v2341_v56, %v1533_v34  ;;  %v2008_v34 = vsub.f32 %v9106_v7, %v6877_v61  ;;  %v9108_v56 = vld [vmem:[#allocation223_spill] sm:$0xff]  ;;  %v4719_v37 = vpop.eup %4718  ;;  %v2126_v51 = vmul.f32 1.442695, %v1948_v18  ;;  %v9113_v18 = vld [vmem:[#allocation66_spill] sm:$0xff] }
 0x733   :  { %v2446_v47 = vpop.xlane.xlu0 %2445  ;;  %v1564_v61 = vmul.f32 %v4719_v37, %v1500_v62  ;;  %v9112_v37 = vld [vmem:[#allocation65_spill] sm:$0xff] }
 0x734   :  { %v2528_v55 = vadd.f32 %v2446_v47, %v1568_v30  ;;  %2558 = vst.msk [vmem:[#allocation3 + $0x98] sm:$0xff] %vm20_vm11, %v2493_v4  ;;  %v2019_v30 = vsub.f32 %v9108_v56, %v6933_v19  ;;  %v2246_v4 = vmul.f32 1.442695, %v2008_v34  ;;  %v4721_v47 = vpop.eup %4720  ;;  %v9111_v19 = vld [vmem:[#allocation194_spill] sm:$0xff] }
 0x735   :  { %v4723_v44 = vpop.eup %4722  ;;  %v2434_v34 = vpop.xlane.xlu2 %2433 }
 0x736   :  { %2593 = vst.msk [vmem:[#allocation3 + $0x1b0] sm:$0xff] %vm20_vm11, %v2528_v55  ;;  %v1362_v55 = vmul.f32 1.442695, %v1278_v22  ;;  %v2268_v8 = vmul.f32 1.442695, %v2019_v30  ;;  %v1949_v22 = vsub.f32 %v9111_v19, %v6907_v38  ;;  %v2363_v17 = vadd.f32 %v4723_v44, %v4721_v47  ;;  %v9130_v19 = vld [vmem:[#allocation220_spill] sm:$0xff] }
 0x737   :  { %v2524_v30 = vadd.f32 %v2434_v34, %v1564_v61 }
 0x738   :  { %4724 = vpow2.f32 %v1362_v55 }
 0x739   :  { %4726 = vpow2.f32 %v2246_v4  ;;  %v2128_v4 = vmul.f32 1.442695, %v1949_v22  ;;  %2589 = vst.msk [vmem:[#allocation3 + $0x190] sm:$0xff] %vm20_vm11, %v2524_v30  ;;  %v9115_v30 = vld [vmem:[#allocation48_spill] sm:$0xff] }
 0x73a   :  { %4728 = vpow2.f32 %v2266_v52 }
 0x73b   :  { %4730 = vpow2.f32 %v2268_v8 }
 0x73c   :  { %4732 = vpow2.f32 %v2248_v58  ;;  %v1470_v58 = vld [vmem:[#allocation3 + $0xa0] sm:$0xff] }
 0x73d   :  { %4734 = vpow2.f32 %v2126_v51 }
 0x73e   :  { %v4725_v15 = vpop.eup %4724  ;;  %4736 = vpow2.f32 %v2128_v4 }
 0x73f   :  { %v4727_v55 = vpop.eup %4726  ;;  %v1534_v61 = vmul.f32 %v4725_v15, %v1470_v58 }
 0x740   :  { %v4729_v23 = vpop.eup %4728 }
 0x741   :  { %v4731_v35 = vpop.eup %4730 }
 0x742   :  { %v4733_v38 = vpop.eup %4732  ;;  %v2462_v22 = vadd.f32 %v4731_v35, %v4729_v23 }
 0x743   :  { %v2447_v34 = vadd.f32 %v4733_v38, %v4727_v55  ;;  %v9119_v55 = vld [vmem:[#allocation192_spill] sm:$0xff] }
 0x744   :  { %2364 = vadd.xlane.f32.xlu0 %v2363_v17  ;;  %v2344_v17 = vpop.xlane.xlu2 %2343  ;;  %v2011_v38 = vsub.f32 %v9119_v55, %v6888_v53 }
 0x745   :  { %v2494_v23 = vadd.f32 %v2344_v17, %v1534_v61 }
 0x746   :  { %v7198_v52 = vpop.permute.xlu0 %2810 }
 0x747   :  { %vm8642_vm0 = vcmp.eq.s32.totalorder %v9071_v43, %v7198_v52  ;;  %vm8641_vm13 = vcmp.eq.s32.totalorder %v9072_v46, %v7198_v52  ;;  %2559 = vst.msk [vmem:[#allocation3 + $0xa0] sm:$0xff] %vm20_vm11, %v2494_v23  ;;  %v9124_v23 = vld [vmem:[#allocation205_spill] sm:$0xff] }
 0x748   :  { %v3020_v8 = vsel %vm8642_vm0, %v9112_v37, 0.0  ;;  %v3021_v47 = vsel %vm8641_vm13, %v9113_v18, 0.0  ;;  %v9116_v37 = vld [vmem:[#allocation49_spill] sm:$0xff]  ;;  %v4735_v18 = vpop.eup %4734 }
 0x749   :  { %v7212_v44 = vadd.f32 %v3021_v47, %v3020_v8  ;;  %v7214_v62 = vpop.permute.xlu1 %2798  ;;  %v9118_v8 = vld [vmem:[#allocation191_spill] sm:$0xff]  ;;  %v4737_v47 = vpop.eup %4736 }
 0x74a   :  { %vm8644_vm12 = vcmp.eq.s32.totalorder %v9071_v43, %v7214_v62  ;;  %vm8643_vm8 = vcmp.eq.s32.totalorder %v9072_v46, %v7214_v62  ;;  %v2010_v15 = vsub.f32 %v9118_v8, %v6888_v53  ;;  %v9121_v53 = vld [vmem:[#allocation43_spill] sm:$0xff] }
 0x74b   :  { %9114 = vst [vmem:[#allocation171_spill] sm:$0xff] %v7212_v44  ;;  %v3012_v51 = vsel %vm8644_vm12, %v9115_v30, 0.0  ;;  %v3013_v4 = vsel %vm8643_vm8, %v9116_v37, 0.0  ;;  %v2252_v30 = vmul.f32 1.442695, %v2011_v38  ;;  %v2357_v37 = vadd.f32 %v4737_v47, %v4735_v18 }
 0x74c   :  { %2463 = vadd.xlane.f32.xlu0 %v2462_v22  ;;  %v7228_v35 = vadd.f32 %v3013_v4, %v3012_v51  ;;  %2448 = vadd.xlane.f32.xlu1 %v2447_v34  ;;  %v2250_v58 = vmul.f32 1.442695, %v2010_v15  ;;  %v7235_v44 = vpop.permute.xlu2 %2795  ;;  %v9120_v22 = vld [vmem:[#allocation42_spill] sm:$0xff]  ;;  %v9122_v34 = vld [vmem:[#allocation204_spill] sm:$0xff]  ;;  %v1951_v15 = vsub.f32 %v9124_v23, %v6919_v24 }
 0x74d   :  { %vm2882_vm13 = vcmp.eq.s32.totalorder %v9071_v43, %v7235_v44  ;;  %vm2883_vm0 = vcmp.eq.s32.totalorder %v9072_v46, %v7235_v44  ;;  %v1950_v51 = vsub.f32 %v9122_v34, %v6919_v24  ;;  %v9129_v34 = vld [vmem:[#allocation221_spill] sm:$0xff] }
 0x74e   :  { %9117 = vst [vmem:[#allocation69_spill] sm:$0xff] %v7228_v35  ;;  %v3010_v61 = vsel %vm2882_vm13, %v9120_v22, 0.0  ;;  %v3011_v17 = vsel %vm2883_vm0, %v9121_v53, 0.0  ;;  %4738 = vpow2.f32 %v2250_v58  ;;  %v2132_v38 = vmul.f32 1.442695, %v1951_v15  ;;  %v2686_v35 = vld [vmem:[%s8253_s0 + $0x98] sm:$0xff] }
 0x74f   :  { %v7251_v4 = vadd.f32 %v3011_v17, %v3010_v61  ;;  %4740 = vpow2.f32 %v2252_v30  ;;  %v2130_v18 = vmul.f32 1.442695, %v1950_v51  ;;  %v9126_v58 = vld [vmem:[#allocation206_spill] sm:$0xff]  ;;  %v9128_v17 = vld [vmem:[#allocation173_spill] sm:$0xff]  ;;  %v1315_v55 = vsub.f32 %v9130_v19, %v9129_v34  ;;  %v1502_v19 = vld [vmem:[#allocation3 + $0x1a0] sm:$0xff] }
 0x750   :  { %v9127_v30 = vld [vmem:[#allocation174_spill] sm:$0xff] }
 0x751   :  { %9123 = vst [vmem:[#allocation72_spill] sm:$0xff] %v7251_v4  ;;  %4742 = vpow2.f32 %v2130_v18  ;;  %v1310_v4 = vsub.f32 %v9128_v17, %v9127_v30  ;;  %v9131_v18 = vld [vmem:[#allocation189_spill] sm:$0xff] }
 0x752   :  { %4744 = vpow2.f32 %v2132_v38  ;;  %v1507_v17 = vld [vmem:[#allocation3 + $0x1c8] sm:$0xff] }
 0x753   :  { %v1426_v23 = vmul.f32 1.442695, %v1310_v4 }
 0x754   :  { %2358 = vadd.xlane.f32.xlu1 %v2357_v37  ;;  %v4739_v47 = vpop.eup %4738  ;;  %v9125_v37 = vld [vmem:[#allocation209_spill] sm:$0xff] }
 0x755   :  { %v4741_v22 = vpop.eup %4740  ;;  %v1282_v53 = vsub.f32 %v9126_v58, %v9125_v37  ;;  %v9132_v37 = vld [vmem:[#allocation188_spill] sm:$0xff] }
 0x756   :  { %v2450_v61 = vadd.f32 %v4741_v22, %v4739_v47  ;;  %v1280_v38 = vsub.f32 %v9132_v37, %v9131_v18  ;;  %v2682_v47 = vld [vmem:[%s8253_s0 + $0x78] sm:$0xff]  ;;  %v1474_v58 = vld [vmem:[#allocation3 + $0xc0] sm:$0xff]  ;;  %v9134_v18 = vld [vmem:[#allocation237_spill] sm:$0xff] }
 0x757   :  { %v1370_v24 = vmul.f32 1.442695, %v1282_v53  ;;  %v4743_v51 = vpop.eup %4742  ;;  %v1959_v37 = vsub.f32 %v9134_v18, %v6969_v60 }
 0x758   :  { %2451 = vadd.xlane.f32.xlu2 %v2450_v61  ;;  %v4745_v15 = vpop.eup %4744  ;;  %v1366_v53 = vmul.f32 1.442695, %v1280_v38 }
 0x759   :  { %4746 = vpow2.f32 %v1370_v24  ;;  %v2360_v8 = vadd.f32 %v4745_v15, %v4743_v51  ;;  %v9133_v24 = vld [vmem:[#allocation236_spill] sm:$0xff] }
 0x75a   :  { %4748 = vpow2.f32 %v1426_v23  ;;  %v1958_v51 = vsub.f32 %v9133_v24, %v6969_v60  ;;  %v2681_v60 = vld [vmem:[%s8253_s0 + $0x70] sm:$0xff] }
 0x75f   :  { %v4747_v22 = vpop.eup %4746 }
 0x760   :  { %2828 = vperm.xlu0 %4439, %v2686_v35   ;;  %2361 = vadd.xlane.f32.xlu2 %v2360_v8  ;;  %v1436_v35 = vmul.f32 1.442695, %v1315_v55  ;;  %v1538_v4 = vmul.f32 %v4747_v22, %v1474_v58  ;;  %v4749_v61 = vpop.eup %4748  ;;  %v1472_v22 = vld [vmem:[#allocation3 + $0xb0] sm:$0xff]  ;;  %v9135_v58 = vld [vmem:[#allocation199_spill] sm:$0xff] }
 0x761   :  { %v1566_v8 = vmul.f32 %v4749_v61, %v1502_v19  ;;  %v2146_v61 = vmul.f32 1.442695, %v1958_v51  ;;  %v2148_v19 = vmul.f32 1.442695, %v1959_v37 }
 0x762   :  { %4750 = vpow2.f32 %v1436_v35 }
 0x763   :  { %4752 = vpow2.f32 %v1366_v53  ;;  %v9136_v53 = vld [vmem:[#allocation198_spill] sm:$0xff] }
 0x764   :  { %4754 = vpow2.f32 %v2146_v61 }
 0x765   :  { %4756 = vpow2.f32 %v2148_v19 }
 0x768   :  { %v4751_v23 = vpop.eup %4750 }
 0x769   :  { %v1571_v38 = vmul.f32 %v4751_v23, %v1507_v17  ;;  %v4753_v35 = vpop.eup %4752  ;;  %v9137_v23 = vld [vmem:[#allocation213_spill] sm:$0xff]  ;;  %v9138_v17 = vld [vmem:[#allocation212_spill] sm:$0xff] }
 0x76a   :  { %v1281_v51 = vsub.f32 %v9138_v17, %v9137_v23 }
 0x76d   :  { %2816 = vperm.xlu1 %4437, %v2682_v47  }
 0x771   :  { %v2356_v30 = vpop.xlane.xlu0 %2355 }
 0x772   :  { %v2498_v34 = vadd.f32 %v2356_v30, %v1538_v4  ;;  %v1311_v4 = vsub.f32 %v9136_v53, %v9135_v58 }
 0x774   :  { %2563 = vst.msk [vmem:[#allocation3 + $0xc0] sm:$0xff] %vm20_vm11, %v2498_v34  ;;  %v2440_v55 = vpop.xlane.xlu1 %2439  ;;  %v1536_v34 = vmul.f32 %v4753_v35, %v1472_v22  ;;  %v9140_v35 = vld [vmem:[#allocation208_spill] sm:$0xff]  ;;  %v1368_v22 = vmul.f32 1.442695, %v1281_v51 }
 0x775   :  { %v2526_v15 = vadd.f32 %v2440_v55, %v1566_v8  ;;  %v1428_v8 = vmul.f32 1.442695, %v1311_v4 }
 0x777   :  { %2591 = vst.msk [vmem:[#allocation3 + $0x1a0] sm:$0xff] %vm20_vm11, %v2526_v15  ;;  %4758 = vpow2.f32 %v1428_v8  ;;  %v9139_v15 = vld [vmem:[#allocation207_spill] sm:$0xff] }
 0x778   :  { %2813 = vperm.xlu2 %4438, %v2681_v60   ;;  %v2014_v37 = vsub.f32 %v9139_v15, %v6938_v54  ;;  %4760 = vpow2.f32 %v1368_v22 }
 0x779   :  { %v2455_v47 = vpop.xlane.xlu0 %2454 }
 0x77a   :  { %v2531_v30 = vadd.f32 %v2455_v47, %v1571_v38  ;;  %v4755_v38 = vpop.eup %4754  ;;  %v2015_v47 = vsub.f32 %v9140_v35, %v6938_v54  ;;  %v2258_v58 = vmul.f32 1.442695, %v2014_v37  ;;  %v9142_v54 = vld [vmem:[#allocation225_spill] sm:$0xff] }
 0x77b   :  { %v1955_v23 = vsub.f32 %v9142_v54, %v6978_v40 }
 0x77c   :  { %2596 = vst.msk [vmem:[#allocation3 + $0x1c8] sm:$0xff] %vm20_vm11, %v2531_v30  ;;  %v2350_v24 = vpop.xlane.xlu1 %2349  ;;  %v2260_v4 = vmul.f32 1.442695, %v2015_v47  ;;  %v1503_v30 = vld [vmem:[#allocation3 + $0x1a8] sm:$0xff]  ;;  %4762 = vpow2.f32 %v2258_v58 }
 0x77d   :  { %v2496_v55 = vadd.f32 %v2350_v24, %v1536_v34  ;;  %v4757_v24 = vpop.eup %4756  ;;  %v9141_v34 = vld [vmem:[#allocation224_spill] sm:$0xff]  ;;  %v2140_v58 = vmul.f32 1.442695, %v1955_v23 }
 0x77e   :  { %v4759_v53 = vpop.eup %4758  ;;  %v2372_v61 = vadd.f32 %v4757_v24, %v4755_v38  ;;  %4764 = vpow2.f32 %v2260_v4  ;;  %v1954_v8 = vsub.f32 %v9141_v34, %v6978_v40  ;;  %v1473_v24 = vld [vmem:[#allocation3 + $0xb8] sm:$0xff] }
 0x77f   :  { %2561 = vst.msk [vmem:[#allocation3 + $0xb0] sm:$0xff] %vm20_vm11, %v2496_v55  ;;  %v1567_v19 = vmul.f32 %v4759_v53, %v1503_v30  ;;  %v2443_v55 = vpop.xlane.xlu2 %2442  ;;  %v4761_v38 = vpop.eup %4760 }
 0x780   :  { %v2138_v47 = vmul.f32 1.442695, %v1954_v8  ;;  %v1537_v4 = vmul.f32 %v4761_v38, %v1473_v24 }
 0x781   :  { %v2527_v17 = vadd.f32 %v2443_v55, %v1567_v19  ;;  %v9144_v19 = vld [vmem:[#allocation217_spill] sm:$0xff] }
 0x782   :  { %v4763_v22 = vpop.eup %4762  ;;  %4766 = vpow2.f32 %v2138_v47  ;;  %v2016_v8 = vsub.f32 %v9144_v19, %v6951_v10 }
 0x783   :  { %2592 = vst.msk [vmem:[#allocation3 + $0x1a8] sm:$0xff] %vm20_vm11, %v2527_v17  ;;  %4768 = vpow2.f32 %v2140_v58  ;;  %v9145_v17 = vld [vmem:[#allocation218_spill] sm:$0xff] }
 0x784   :  { %v4765_v53 = vpop.eup %4764  ;;  %v2262_v24 = vmul.f32 1.442695, %v2016_v8 }
 0x786   :  { %4770 = vpow2.f32 %v2262_v24 }
 0x788   :  { %v4767_v38 = vpop.eup %4766 }
 0x789   :  { %v4769_v47 = vpop.eup %4768 }
 0x78a   :  { %2373 = vadd.xlane.f32.xlu0 %v2372_v61  ;;  %v2353_v61 = vpop.xlane.xlu2 %2352 }
 0x78c   :  { %v7290_v60 = vpop.permute.xlu0 %2819 }
 0x78d   :  { %vm8646_vm8 = vcmp.eq.s32.totalorder %v9071_v43, %v7290_v60  ;;  %vm8645_vm12 = vcmp.eq.s32.totalorder %v9072_v46, %v7290_v60 }
 0x78e   :  { %v3026_v51 = vsel %vm8646_vm8, %v9024_v42, 0.0  ;;  %v3027_v37 = vsel %vm8645_vm12, %v9025_v28, 0.0  ;;  %v2497_v42 = vadd.f32 %v2353_v61, %v1537_v4  ;;  %v2456_v28 = vadd.f32 %v4765_v53, %v4763_v22  ;;  %v2689_v22 = vld [vmem:[%s8253_s0 + $0xb0] sm:$0xff] }
 0x78f   :  { %v7307_v40 = vadd.f32 %v3027_v37, %v3026_v51  ;;  %v2017_v51 = vsub.f32 %v9145_v17, %v6951_v10  ;;  %v2366_v53 = vadd.f32 %v4769_v47, %v4767_v38  ;;  %v9147_v4 = vld [vmem:[#allocation230_spill] sm:$0xff] }
 0x790   :  { %2562 = vst.msk [vmem:[#allocation3 + $0xb8] sm:$0xff] %vm20_vm11, %v2497_v42  ;;  %v1956_v61 = vsub.f32 %v9147_v4, %v6997_v50 }
 0x791   :  { %9143 = vst [vmem:[#allocation76_spill] sm:$0xff] %v7307_v40  ;;  %v2264_v58 = vmul.f32 1.442695, %v2017_v51  ;;  %v9150_v51 = vld [vmem:[#allocation235_spill] sm:$0xff]  ;;  %v9151_v40 = vld [vmem:[#allocation233_spill] sm:$0xff] }
 0x793   :  { %4772 = vpow2.f32 %v2264_v58  ;;  %v9153_v58 = vld [vmem:[#allocation246_spill] sm:$0xff] }
 0x794   :  { %v7309_v30 = vpop.permute.xlu1 %2807 }
 0x795   :  { %vm8647_vm12 = vcmp.eq.s32.totalorder %v9071_v43, %v7309_v30  ;;  %vm8648_vm8 = vcmp.eq.s32.totalorder %v9072_v46, %v7309_v30 }
 0x796   :  { %v3018_v55 = vsel %vm8647_vm12, %v9016_v16, 0.0  ;;  %v3019_v23 = vsel %vm8648_vm8, %v9017_v2, 0.0  ;;  %v7333_v16 = vpop.permute.xlu2 %2804 }
 0x797   :  { %v7328_v37 = vadd.f32 %v3019_v23, %v3018_v55  ;;  %2457 = vadd.xlane.f32.xlu1 %v2456_v28  ;;  %vm2888_vm12 = vcmp.eq.s32.totalorder %v9071_v43, %v7333_v16  ;;  %vm2889_vm8 = vcmp.eq.s32.totalorder %v9072_v46, %v7333_v16  ;;  %v9149_v28 = vld [vmem:[#allocation231_spill] sm:$0xff]  ;;  %v2142_v55 = vmul.f32 1.442695, %v1956_v61  ;;  %v4771_v23 = vpop.eup %4770 }
 0x798   :  { %v3016_v2 = vsel %vm2888_vm12, %v9008_v59, 0.0  ;;  %v3017_v10 = vsel %vm2889_vm8, %v9009_v14, 0.0  ;;  %v1957_v8 = vsub.f32 %v9149_v28, %v6997_v50  ;;  %v9154_v50 = vld [vmem:[#allocation202_spill] sm:$0xff] }
 0x799   :  { %9146 = vst [vmem:[#allocation77_spill] sm:$0xff] %v7328_v37  ;;  %v7349_v42 = vadd.f32 %v3017_v10, %v3016_v2  ;;  %v1285_v37 = vsub.f32 %v9151_v40, %v9150_v51  ;;  %v4773_v14 = vpop.eup %4772  ;;  %4774 = vpow2.f32 %v2142_v55  ;;  %v1477_v40 = vld [vmem:[#allocation3 + $0xd8] sm:$0xff]  ;;  %v9156_v55 = vld [vmem:[#allocation248_spill] sm:$0xff] }
 0x79a   :  { %v2144_v59 = vmul.f32 1.442695, %v1957_v8  ;;  %v2459_v47 = vadd.f32 %v4773_v14, %v4771_v23  ;;  %v9158_v51 = vld [vmem:[#allocation219_spill] sm:$0xff]  ;;  %v9159_v14 = vld [vmem:[#allocation216_spill] sm:$0xff] }
 0x79b   :  { %9148 = vst [vmem:[#allocation89_spill] sm:$0xff] %v7349_v42  ;;  %v1376_v38 = vmul.f32 1.442695, %v1285_v37  ;;  %v2024_v37 = vsub.f32 %v9156_v55, %v7001_v49 }
 0x79c   :  { %4776 = vpow2.f32 %v2144_v59  ;;  %v9157_v59 = vld [vmem:[#allocation249_spill] sm:$0xff] }
 0x79d   :  { %4778 = vpow2.f32 %v1376_v38  ;;  %v2025_v23 = vsub.f32 %v9157_v59, %v7001_v49  ;;  %v1283_v38 = vsub.f32 %v9159_v14, %v9158_v51 }
 0x79e   :  { %2837 = vperm.xlu0 %4439, %v2689_v22   ;;  %v9152_v22 = vld [vmem:[#allocation247_spill] sm:$0xff] }
 0x79f   :  { %2367 = vadd.xlane.f32.xlu1 %v2366_v53  ;;  %v4775_v24 = vpop.eup %4774  ;;  %v1318_v2 = vsub.f32 %v9153_v58, %v9152_v22  ;;  %v9155_v53 = vld [vmem:[#allocation201_spill] sm:$0xff]  ;;  %v2278_v58 = vmul.f32 1.442695, %v2024_v37 }
 0x7a0   :  { %v1313_v61 = vsub.f32 %v9155_v53, %v9154_v50  ;;  %v1510_v53 = vld [vmem:[#allocation3 + $0x1e0] sm:$0xff] }
 0x7a1   :  { %2460 = vadd.xlane.f32.xlu2 %v2459_v47  ;;  %v1442_v8 = vmul.f32 1.442695, %v1318_v2  ;;  %v2280_v2 = vmul.f32 1.442695, %v2025_v23 }
 0x7a2   :  { %v4777_v10 = vpop.eup %4776  ;;  %v1432_v18 = vmul.f32 1.442695, %v1313_v61 }
 0x7a3   :  { %v2369_v42 = vadd.f32 %v4777_v10, %v4775_v24  ;;  %v4779_v28 = vpop.eup %4778  ;;  %4780 = vpow2.f32 %v1442_v8  ;;  %v2685_v24 = vld [vmem:[%s8253_s0 + $0x90] sm:$0xff]  ;;  %v1372_v10 = vmul.f32 1.442695, %v1283_v38  ;;  %v9160_v38 = vld [vmem:[#allocation227_spill] sm:$0xff] }
 0x7a4   :  { %4782 = vpow2.f32 %v1432_v18  ;;  %v1541_v47 = vmul.f32 %v4779_v28, %v1477_v40  ;;  %v1505_v18 = vld [vmem:[#allocation3 + $0x1b8] sm:$0xff] }
 0x7a5   :  { %4784 = vpow2.f32 %v2278_v58  ;;  %v1475_v58 = vld [vmem:[#allocation3 + $0xc8] sm:$0xff] }
 0x7a6   :  { %4786 = vpow2.f32 %v2280_v2 }
 0x7a7   :  { %4788 = vpow2.f32 %v1372_v10 }
 0x7a9   :  { %2370 = vadd.xlane.f32.xlu2 %v2369_v42  ;;  %v4781_v50 = vpop.eup %4780 }
 0x7aa   :  { %v4783_v49 = vpop.eup %4782  ;;  %v1574_v28 = vmul.f32 %v4781_v50, %v1510_v53  ;;  %v2684_v53 = vld [vmem:[%s8253_s0 + $0x88] sm:$0xff] }
 0x7ab   :  { %v1569_v8 = vmul.f32 %v4783_v49, %v1505_v18  ;;  %v4785_v37 = vpop.eup %4784  ;;  %v9162_v18 = vld [vmem:[#allocation242_spill] sm:$0xff] }
 0x7ac   :  { %v4787_v23 = vpop.eup %4786 }
 0x7b7   :  { %v2365_v22 = vpop.xlane.xlu0 %2364 }
 0x7b8   :  { %v2501_v42 = vadd.f32 %v2365_v22, %v1541_v47  ;;  %2825 = vperm.xlu1 %4437, %v2685_v24   ;;  %v9161_v47 = vld [vmem:[#allocation226_spill] sm:$0xff]  ;;  %v4789_v22 = vpop.eup %4788 }
 0x7b9   :  { %v1314_v24 = vsub.f32 %v9161_v47, %v9160_v38  ;;  %v1539_v10 = vmul.f32 %v4789_v22, %v1475_v58  ;;  %v1506_v38 = vld [vmem:[#allocation3 + $0x1c0] sm:$0xff] }
 0x7ba   :  { %2566 = vst.msk [vmem:[#allocation3 + $0xd8] sm:$0xff] %vm20_vm11, %v2501_v42  ;;  %v2471_v42 = vadd.f32 %v4787_v23, %v4785_v37 }
 0x7bb   :  { %v1434_v2 = vmul.f32 1.442695, %v1314_v24 }
 0x7bd   :  { %4790 = vpow2.f32 %v1434_v2 }
 0x7bf   :  { %v2464_v61 = vpop.xlane.xlu0 %2463  ;;  %v2449_v51 = vpop.xlane.xlu1 %2448 }
 0x7c0   :  { %v2534_v40 = vadd.f32 %v2464_v61, %v1574_v28  ;;  %v2529_v14 = vadd.f32 %v2449_v51, %v1569_v8  ;;  %v9163_v28 = vld [vmem:[#allocation241_spill] sm:$0xff] }
 0x7c1   :  { %v1284_v61 = vsub.f32 %v9163_v28, %v9162_v18  ;;  %2822 = vperm.xlu2 %4438, %v2684_v53   ;;  %v9167_v53 = vld [vmem:[#allocation252_spill] sm:$0xff]  ;;  %v9168_v18 = vld [vmem:[#allocation253_spill] sm:$0xff] }
 0x7c2   :  { %2599 = vst.msk [vmem:[#allocation3 + $0x1e0] sm:$0xff] %vm20_vm11, %v2534_v40  ;;  %v9164_v40 = vld [vmem:[#allocation238_spill] sm:$0xff]  ;;  %v1961_v28 = vsub.f32 %v9168_v18, %v7090_v57 }
 0x7c3   :  { %2594 = vst.msk [vmem:[#allocation3 + $0x1b8] sm:$0xff] %vm20_vm11, %v2529_v14  ;;  %v1374_v8 = vmul.f32 1.442695, %v1284_v61  ;;  %v2020_v51 = vsub.f32 %v9164_v40, %v7026_v20  ;;  %v9165_v14 = vld [vmem:[#allocation239_spill] sm:$0xff]  ;;  %v4791_v23 = vpop.eup %4790  ;;  %v1476_v61 = vld [vmem:[#allocation3 + $0xd0] sm:$0xff] }
 0x7c4   :  { %v2021_v37 = vsub.f32 %v9165_v14, %v7026_v20 }
 0x7c5   :  { %4792 = vpow2.f32 %v1374_v8  ;;  %v2270_v24 = vmul.f32 1.442695, %v2020_v51  ;;  %v2152_v51 = vmul.f32 1.442695, %v1961_v28  ;;  %v9171_v28 = vld [vmem:[#allocation78_spill] sm:$0xff] }
 0x7c6   :  { %v2272_v22 = vmul.f32 1.442695, %v2021_v37 }
 0x7c7   :  { %v2359_v50 = vpop.xlane.xlu1 %2358  ;;  %4794 = vpow2.f32 %v2270_v24 }
 0x7c8   :  { %2472 = vadd.xlane.f32.xlu0 %v2471_v42  ;;  %v2499_v49 = vadd.f32 %v2359_v50, %v1539_v10  ;;  %v1570_v42 = vmul.f32 %v4791_v23, %v1506_v38  ;;  %4796 = vpow2.f32 %v2272_v22  ;;  %v9169_v22 = vld [vmem:[#allocation243_spill] sm:$0xff] }
 0x7ca   :  { %2564 = vst.msk [vmem:[#allocation3 + $0xc8] sm:$0xff] %vm20_vm11, %v2499_v49  ;;  %v1960_v49 = vsub.f32 %v9167_v53, %v7090_v57  ;;  %v2022_v57 = vsub.f32 %v9169_v22, %v7049_v21 }
 0x7cb   :  { %v2452_v10 = vpop.xlane.xlu2 %2451 }
 0x7cc   :  { %v2530_v50 = vadd.f32 %v2452_v10, %v1570_v42  ;;  %v2150_v8 = vmul.f32 1.442695, %v1960_v49  ;;  %v9170_v42 = vld [vmem:[#allocation245_spill] sm:$0xff]  ;;  %v2695_v49 = vld [vmem:[%s8253_s0 + $0xe0] sm:$0xff] }
 0x7cd   :  { %v2023_v10 = vsub.f32 %v9170_v42, %v7049_v21  ;;  %v9190_v42 = vld [vmem:[#allocation20_spill] sm:$0xff] }
 0x7ce   :  { %2595 = vst.msk [vmem:[#allocation3 + $0x1c0] sm:$0xff] %vm20_vm11, %v2530_v50  ;;  %4798 = vpow2.f32 %v2150_v8  ;;  %v2274_v8 = vmul.f32 1.442695, %v2022_v57 }
 0x7cf   :  { %4800 = vpow2.f32 %v2152_v51 }
 0x7d0   :  { %4802 = vpow2.f32 %v2274_v8 }
 0x7d2   :  { %v7383_v47 = vpop.permute.xlu0 %2828 }
 0x7d3   :  { %vm8652_vm7 = vcmp.eq.s32.totalorder %v9071_v43, %v7383_v47  ;;  %vm8651_vm10 = vcmp.eq.s32.totalorder %v9072_v46, %v7383_v47  ;;  %v2362_v38 = vpop.xlane.xlu2 %2361 }
 0x7d4   :  { %v3032_v58 = vsel %vm8652_vm7, %v9042_v27, 0.0  ;;  %v3033_v20 = vsel %vm8651_vm10, %v9043_v11, 0.0  ;;  %v4793_v27 = vpop.eup %4792  ;;  %v2692_v11 = vld [vmem:[%s8253_s0 + $0xc8] sm:$0xff] }
 0x7d5   :  { %v7397_v2 = vadd.f32 %v3033_v20, %v3032_v58  ;;  %v1540_v37 = vmul.f32 %v4793_v27, %v1476_v61  ;;  %v4795_v23 = vpop.eup %4794 }
 0x7d6   :  { %v4797_v24 = vpop.eup %4796 }
 0x7d7   :  { %9166 = vst [vmem:[#allocation87_spill] sm:$0xff] %v7397_v2  ;;  %v2500_v58 = vadd.f32 %v2362_v38, %v1540_v37  ;;  %v2465_v50 = vadd.f32 %v4797_v24, %v4795_v23  ;;  %v4799_v51 = vpop.eup %4798  ;;  %v2276_v37 = vmul.f32 1.442695, %v2023_v10  ;;  %v9174_v24 = vld [vmem:[#allocation70_spill] sm:$0xff] }
 0x7d8   :  { %v4801_v38 = vpop.eup %4800 }
 0x7d9   :  { %2565 = vst.msk [vmem:[#allocation3 + $0xd0] sm:$0xff] %vm20_vm11, %v2500_v58  ;;  %4804 = vpow2.f32 %v2276_v37 }
 0x7db   :  { %v7431_v23 = vpop.permute.xlu2 %2813 }
 0x7dc   :  { %2846 = vperm.xlu0 %4439, %v2692_v11   ;;  %v9172_v11 = vld [vmem:[#allocation79_spill] sm:$0xff]  ;;  %vm2894_vm9 = vcmp.eq.s32.totalorder %v9071_v43, %v7431_v23 }
 0x7dd   :  { %v3022_v58 = vsel %vm2894_vm9, %v9174_v24, 0.0  ;;  %v4803_v24 = vpop.eup %4802 }
 0x7df   :  { %v7410_v20 = vpop.permute.xlu1 %2816  ;;  %v4805_v2 = vpop.eup %4804 }
 0x7e0   :  { %vm8654_vm10 = vcmp.eq.s32.totalorder %v9071_v43, %v7410_v20  ;;  %vm8655_vm7 = vcmp.eq.s32.totalorder %v9072_v46, %v7410_v20  ;;  %v2468_v18 = vadd.f32 %v4805_v2, %v4803_v24  ;;  %v2688_v2 = vld [vmem:[%s8253_s0 + $0xa8] sm:$0xff] }
 0x7e1   :  { %v3024_v27 = vsel %vm8654_vm10, %v9171_v28, 0.0  ;;  %v3025_v21 = vsel %vm8655_vm7, %v9172_v11, 0.0  ;;  %vm2895_vm10 = vcmp.eq.s32.totalorder %v9072_v46, %v7431_v23  ;;  %v9175_v28 = vld [vmem:[#allocation71_spill] sm:$0xff]  ;;  %v9178_v11 = vld [vmem:[#allocation256_spill] sm:$0xff] }
 0x7e2   :  { %v7429_v61 = vadd.f32 %v3025_v21, %v3024_v27  ;;  %2466 = vadd.xlane.f32.xlu1 %v2465_v50  ;;  %v3023_v57 = vsel %vm2895_vm10, %v9175_v28, 0.0  ;;  %v2375_v50 = vadd.f32 %v4801_v38, %v4799_v51  ;;  %v9177_v27 = vld [vmem:[#allocation257_spill] sm:$0xff]  ;;  %v9180_v28 = vld [vmem:[#allocation232_spill] sm:$0xff]  ;;  %v1480_v51 = vld [vmem:[#allocation3 + $0xf0] sm:$0xff] }
 0x7e3   :  { %v7445_v10 = vadd.f32 %v3023_v57, %v3022_v58  ;;  %v1288_v21 = vsub.f32 %v9178_v11, %v9177_v27  ;;  %v9179_v58 = vld [vmem:[#allocation234_spill] sm:$0xff] }
 0x7e4   :  { %9173 = vst [vmem:[#allocation183_spill] sm:$0xff] %v7429_v61  ;;  %2855 = vperm.xlu0 %4439, %v2695_v49   ;;  %v2698_v49 = vld [vmem:[%s8253_s0 + $0xf8] sm:$0xff]  ;;  %v1316_v37 = vsub.f32 %v9180_v28, %v9179_v58  ;;  %v1508_v11 = vld [vmem:[#allocation3 + $0x1d0] sm:$0xff] }
 0x7e5   :  { %9176 = vst [vmem:[#allocation190_spill] sm:$0xff] %v7445_v10  ;;  %v1382_v61 = vmul.f32 1.442695, %v1288_v21  ;;  %v2691_v21 = vld [vmem:[%s8253_s0 + $0xc0] sm:$0xff]  ;;  %v9184_v58 = vld [vmem:[#allocation254_spill] sm:$0xff] }
 0x7e6   :  { %v1438_v57 = vmul.f32 1.442695, %v1316_v37 }
 0x7e7   :  { %4806 = vpow2.f32 %v1382_v61 }
 0x7e8   :  { %4808 = vpow2.f32 %v1438_v57 }
 0x7ea   :  { %2376 = vadd.xlane.f32.xlu1 %v2375_v50  ;;  %2469 = vadd.xlane.f32.xlu2 %v2468_v18  ;;  %v9181_v50 = vld [vmem:[#allocation251_spill] sm:$0xff] }
 0x7ec   :  { %2864 = vperm.xlu0 %4439, %v2698_v49   ;;  %v9182_v49 = vld [vmem:[#allocation250_spill] sm:$0xff] }
 0x7ed   :  { %v4807_v8 = vpop.eup %4806  ;;  %v1286_v27 = vsub.f32 %v9182_v49, %v9181_v50  ;;  %v9185_v49 = vld [vmem:[#allocation12_spill] sm:$0xff] }
 0x7ee   :  { %v1544_v38 = vmul.f32 %v4807_v8, %v1480_v51  ;;  %v4809_v61 = vpop.eup %4808  ;;  %v9183_v8 = vld [vmem:[#allocation255_spill] sm:$0xff] }
 0x7ef   :  { %v1378_v18 = vmul.f32 1.442695, %v1286_v27  ;;  %v1317_v28 = vsub.f32 %v9184_v58, %v9183_v8 }
 0x7f1   :  { %4810 = vpow2.f32 %v1378_v18  ;;  %v1440_v57 = vmul.f32 1.442695, %v1317_v28  ;;  %v9187_v18 = vld [vmem:[#allocation13_spill] sm:$0xff] }
 0x7f2   :  { %v9188_v28 = vld [vmem:[#allocation261_spill] sm:$0xff] }
 0x7f3   :  { %4812 = vpow2.f32 %v1440_v57  ;;  %v2697_v57 = vld [vmem:[%s8253_s0 + $0xf0] sm:$0xff] }
 0x7f7   :  { %v4811_v51 = vpop.eup %4810 }
 0x7fd   :  { %v2374_v10 = vpop.xlane.xlu0 %2373 }
 0x7fe   :  { %v2504_v53 = vadd.f32 %v2374_v10, %v1544_v38  ;;  %v1572_v10 = vmul.f32 %v4809_v61, %v1508_v11  ;;  %v1478_v38 = vld [vmem:[#allocation3 + $0xe0] sm:$0xff]  ;;  %v2935_v61 = vsel %vm2871_vm6, %v9187_v18, 0.0  ;;  %v2694_v11 = vld [vmem:[%s8253_s0 + $0xd8] sm:$0xff] }
 0x800   :  { %2569 = vst.msk [vmem:[#allocation3 + $0xf0] sm:$0xff] %vm20_vm11, %v2504_v53  ;;  %v2687_v53 = vld [vmem:[%s8253_s0 + $0xa0] sm:$0xff] }
 0x802   :  { %2831 = vperm.xlu2 %4438, %v2687_v53  }
 0x803   :  { %2834 = vperm.xlu1 %4437, %v2688_v2   ;;  %v2934_v2 = vsel %vm2870_vm5, %v9185_v49, 0.0 }
 0x804   :  { %v3064_v18 = vadd.f32 %v2935_v61, %v2934_v2  ;;  %v2693_v2 = vld [vmem:[%s8253_s0 + $0xd0] sm:$0xff]  ;;  %v4813_v61 = vpop.eup %4812 }
 0x80a   :  { %v2458_v24 = vpop.xlane.xlu1 %2457 }
 0x80b   :  { %v2532_v37 = vadd.f32 %v2458_v24, %v1572_v10  ;;  %2843 = vperm.xlu1 %4437, %v2691_v21   ;;  %v2690_v21 = vld [vmem:[%s8253_s0 + $0xb8] sm:$0xff]  ;;  %v1542_v24 = vmul.f32 %v4811_v51, %v1478_v38  ;;  %v9191_v51 = vld [vmem:[#allocation22_spill] sm:$0xff] }
 0x80c   :  { %2840 = vperm.xlu2 %4438, %v2690_v21   ;;  %v2941_v38 = vsel %vm2877_vm15, %v9191_v51, 0.0  ;;  %vm9226_vm15 = vcmp.eq.s32.totalorder %v9071_v43, %v7053_v12 }
 0x80d   :  { %2597 = vst.msk [vmem:[#allocation3 + $0x1d0] sm:$0xff] %vm20_vm11, %v2532_v37  ;;  %v9189_v37 = vld [vmem:[#allocation260_spill] sm:$0xff] }
 0x80e   :  { %v1287_v49 = vsub.f32 %v9189_v37, %v9188_v28  ;;  %v2696_v37 = vld [vmem:[%s8253_s0 + $0xe8] sm:$0xff] }
 0x810   :  { %v7469_v50 = vpop.permute.xlu0 %2837 }
 0x811   :  { %vm2910_vm7 = vcmp.eq.s32.totalorder %v9071_v43, %v7469_v50  ;;  %vm2911_vm2 = vcmp.eq.s32.totalorder %v9072_v46, %v7469_v50 }
 0x812   :  { %v3038_v53 = vsel %vm2910_vm7, %v9060_v25, 0.0  ;;  %v3039_v10 = vsel %vm2911_vm2, %v9061_v39, 0.0  ;;  %v2368_v58 = vpop.xlane.xlu1 %2367  ;;  %v1380_v25 = vmul.f32 1.442695, %v1287_v49  ;;  %v2940_v39 = vsel %vm2876_vm14, %v9190_v42, 0.0 }
 0x813   :  { %v7497_v8 = vadd.f32 %v3039_v10, %v3038_v53  ;;  %v2502_v27 = vadd.f32 %v2368_v58, %v1542_v24  ;;  %2852 = vperm.xlu1 %4437, %v2694_v11   ;;  %v1509_v11 = vld [vmem:[#allocation3 + $0x1d8] sm:$0xff]  ;;  %v3073_v21 = vadd.f32 %v2941_v38, %v2940_v39  ;;  %v2946_v24 = vsel %vm2882_vm13, %v9192_v45, 0.0 }
 0x814   :  { %4814 = vpow2.f32 %v1380_v25  ;;  %2849 = vperm.xlu2 %4438, %v2693_v2   ;;  %v1573_v42 = vmul.f32 %v4813_v61, %v1509_v11  ;;  %v2461_v53 = vpop.xlane.xlu2 %2460  ;;  %v9193_v58 = vld [vmem:[#allocation39_spill] sm:$0xff]  ;;  %v9197_v11 = vld [vmem:[#allocation56_spill] sm:$0xff] }
 0x815   :  { %2567 = vst.msk [vmem:[#allocation3 + $0xe0] sm:$0xff] %vm20_vm11, %v2502_v27  ;;  %v2947_v28 = vsel %vm2883_vm0, %v9193_v58, 0.0  ;;  %v1479_v27 = vld [vmem:[#allocation3 + $0xe8] sm:$0xff]  ;;  %v9194_v38 = vld [vmem:[#allocation263_spill] sm:$0xff]  ;;  %vm9228_vm0 = vcmp.eq.s32.totalorder %v9072_v46, %v7053_v12  ;;  %v9231_v12 = vld [vmem:[#allocation26_spill] sm:$0xff] }
 0x816   :  { %3065 = vadd.xlane.f32.xlu0 %v3064_v18  ;;  %v2533_v10 = vadd.f32 %v2461_v53, %v1573_v42  ;;  %v3082_v18 = vadd.f32 %v2947_v28, %v2946_v24  ;;  %v9196_v61 = vld [vmem:[#allocation55_spill] sm:$0xff]  ;;  %v9198_v28 = vld [vmem:[#allocation117_spill] sm:$0xff] }
 0x817   :  { %v2952_v44 = vsel %vm2888_vm12, %v9196_v61, 0.0 }
 0x818   :  { %2598 = vst.msk [vmem:[#allocation3 + $0x1d8] sm:$0xff] %vm20_vm11, %v2533_v10 }
 0x81a   :  { %v4815_v49 = vpop.eup %4814 }
 0x81b   :  { %2861 = vperm.xlu1 %4437, %v2697_v57   ;;  %v1543_v25 = vmul.f32 %v4815_v49, %v1479_v27  ;;  %v9195_v57 = vld [vmem:[#allocation262_spill] sm:$0xff]  ;;  %v9199_v49 = vld [vmem:[#allocation119_spill] sm:$0xff] }
 0x81c   :  { %2858 = vperm.xlu2 %4438, %v2696_v37   ;;  %v2371_v39 = vpop.xlane.xlu2 %2370  ;;  %v1321_v2 = vsub.f32 %v9195_v57, %v9194_v38  ;;  %v1513_v57 = vld [vmem:[#allocation3 + $0x1f8] sm:$0xff] }
 0x81d   :  { %v2503_v51 = vadd.f32 %v2371_v39, %v1543_v25  ;;  %v9201_v25 = vld [vmem:[#allocation68_spill] sm:$0xff] }
 0x81e   :  { %3074 = vadd.xlane.f32.xlu0 %v3073_v21  ;;  %v2953_v21 = vsel %vm2889_vm8, %v9197_v11, 0.0  ;;  %v1448_v10 = vmul.f32 1.442695, %v1321_v2  ;;  %v9202_v2 = vld [vmem:[#allocation111_spill] sm:$0xff] }
 0x81f   :  { %2568 = vst.msk [vmem:[#allocation3 + $0xe8] sm:$0xff] %vm20_vm11, %v2503_v51  ;;  %v3091_v53 = vadd.f32 %v2953_v21, %v2952_v44  ;;  %v9203_v44 = vld [vmem:[#allocation112_spill] sm:$0xff] }
 0x820   :  { %4816 = vpow2.f32 %v1448_v10 }
 0x824   :  { %v2823_v58 = vpop.permute.xlu2 %2822 }
 0x825   :  { %vm2900_vm8 = vcmp.eq.s32.totalorder %v9071_v43, %v2823_v58  ;;  %vm2901_vm12 = vcmp.eq.s32.totalorder %v9072_v46, %v2823_v58 }
 0x826   :  { %3083 = vadd.xlane.f32.xlu0 %v3082_v18  ;;  %v3028_v37 = vsel %vm2900_vm8, %v9198_v28, 0.0  ;;  %v3029_v27 = vsel %vm2901_vm12, %v9199_v49, 0.0  ;;  %v9200_v18 = vld [vmem:[#allocation67_spill] sm:$0xff]  ;;  %v4817_v38 = vpop.eup %4816  ;;  %v2964_v61 = vsel %vm2900_vm8, %v9202_v2, 0.0  ;;  %v2965_v11 = vsel %vm2901_vm12, %v9203_v44, 0.0  ;;  %v9214_v44 = vld [vmem:[#allocation46_spill] sm:$0xff] }
 0x827   :  { %v7567_v39 = vadd.f32 %v3029_v27, %v3028_v37  ;;  %v1577_v21 = vmul.f32 %v4817_v38, %v1513_v57  ;;  %v3109_v10 = vadd.f32 %v2965_v11, %v2964_v61  ;;  %v9206_v28 = vld [vmem:[#allocation11_spill] sm:$0xff]  ;;  %v9208_v27 = vld [vmem:[#allocation258_spill] sm:$0xff]  ;;  %v9211_v38 = vld [vmem:[#allocation9_spill] sm:$0xff] }
 0x828   :  { %v2933_v37 = vsel %vm2869_vm4, %v9206_v28, 0.0  ;;  %v9207_v49 = vld [vmem:[#allocation259_spill] sm:$0xff]  ;;  %v9213_v61 = vld [vmem:[#allocation17_spill] sm:$0xff]  ;;  %vm9217_vm4 = vcmp.eq.s32.totalorder %v9072_v46, %v9214_v44 }
 0x82a   :  { %v7539_v42 = vpop.permute.xlu1 %2825 }
 0x82b   :  { %vm2902_vm5 = vcmp.eq.s32.totalorder %v9071_v43, %v7539_v42  ;;  %vm2903_vm6 = vcmp.eq.s32.totalorder %v9072_v46, %v7539_v42 }
 0x82c   :  { %v3030_v45 = vsel %vm2902_vm5, %v9062_v5, 0.0  ;;  %v3031_v16 = vsel %vm2903_vm6, %v9063_v6, 0.0  ;;  %v2958_v5 = vsel %vm2894_vm9, %v9200_v18, 0.0  ;;  %v2959_v6 = vsel %vm2895_vm10, %v9201_v25, 0.0  ;;  %v9209_v25 = vld [vmem:[#allocation8_spill] sm:$0xff] }
 0x82d   :  { %v7553_v24 = vadd.f32 %v3031_v16, %v3030_v45  ;;  %v3100_v51 = vadd.f32 %v2959_v6, %v2958_v5  ;;  %v9204_v16 = vld [vmem:[#allocation10_spill] sm:$0xff]  ;;  %v1319_v18 = vsub.f32 %v9208_v27, %v9207_v49  ;;  %v9210_v6 = vld [vmem:[#allocation23_spill] sm:$0xff]  ;;  %v9221_v49 = vld [vmem:[#allocation41_spill] sm:$0xff] }
 0x82e   :  { %3092 = vadd.xlane.f32.xlu0 %v3091_v53  ;;  %v2932_v58 = vsel %vm2868_vm3, %v9204_v16, 0.0  ;;  %vm9212_vm9 = vcmp.eq.s32.totalorder %v9072_v46, %v9210_v6  ;;  %vm9215_vm3 = vcmp.eq.s32.totalorder %v9071_v43, %v9214_v44  ;;  %v9219_v16 = vld [vmem:[#allocation264_spill] sm:$0xff]  ;;  %vm9222_vm13 = vcmp.eq.s32.totalorder %v9071_v43, %v9221_v49  ;;  %v9223_v6 = vld [vmem:[#allocation15_spill] sm:$0xff] }
 0x82f   :  { %v3061_v5 = vadd.f32 %v2933_v37, %v2932_v58  ;;  %v2931_v57 = vsel %vm9212_vm9, %v9211_v38, 0.0  ;;  %v1444_v2 = vmul.f32 1.442695, %v1319_v18  ;;  %v2938_v11 = vsel %vm9215_vm3, %v9213_v61, 0.0  ;;  %v9220_v37 = vld [vmem:[#allocation14_spill] sm:$0xff]  ;;  %v9225_v38 = vld [vmem:[#allocation32_spill] sm:$0xff] }
 0x830   :  { %v2936_v27 = vsel %vm9222_vm13, %v9220_v37, 0.0  ;;  %vm9224_vm14 = vcmp.eq.s32.totalorder %v9072_v46, %v9221_v49  ;;  %vm9232_vm9 = vcmp.eq.s32.totalorder %v9071_v43, %v7138_v36  ;;  %vm9234_vm3 = vcmp.eq.s32.totalorder %v9072_v46, %v7138_v36 }
 0x831   :  { %4818 = vpow2.f32 %v1444_v2  ;;  %v9227_v2 = vld [vmem:[#allocation33_spill] sm:$0xff]  ;;  %v2942_v49 = vsel %vm9232_vm9, %v9231_v12, 0.0  ;;  %vm9238_vm13 = vcmp.eq.s32.totalorder %v9072_v46, %v7099_v63  ;;  %vm9242_vm9 = vcmp.eq.s32.totalorder %v9072_v46, %v7214_v62  ;;  %v9243_v12 = vld [vmem:[#allocation63_spill] sm:$0xff] }
 0x836   :  { %3101 = vadd.xlane.f32.xlu0 %v3100_v51  ;;  %v2930_v51 = vsel %vm2866_vm1, %v9209_v25, 0.0 }
 0x837   :  { %v4819_v44 = vpop.eup %4818 }
 0x83b   :  { %v2473_v53 = vpop.xlane.xlu0 %2472 }
 0x83c   :  { %v2537_v45 = vadd.f32 %v2473_v53, %v1577_v21  ;;  %v9216_v21 = vld [vmem:[#allocation18_spill] sm:$0xff] }
 0x83d   :  { %v2939_v53 = vsel %vm9217_vm4, %v9216_v21, 0.0  ;;  %vm9236_vm4 = vcmp.eq.s32.totalorder %v9071_v43, %v7099_v63  ;;  %v9239_v63 = vld [vmem:[#allocation44_spill] sm:$0xff] }
 0x83e   :  { %2602 = vst.msk [vmem:[#allocation3 + $0x1f8] sm:$0xff] %vm20_vm11, %v2537_v45  ;;  %3110 = vadd.xlane.f32.xlu0 %v3109_v10  ;;  %v3058_v10 = vadd.f32 %v2931_v57, %v2930_v51  ;;  %v9218_v45 = vld [vmem:[#allocation265_spill] sm:$0xff]  ;;  %v3070_v58 = vadd.f32 %v2939_v53, %v2938_v11  ;;  %v2937_v51 = vsel %vm9224_vm14, %v9223_v6, 0.0  ;;  %v2944_v57 = vsel %vm9226_vm15, %v9225_v38, 0.0  ;;  %v9229_v53 = vld [vmem:[#allocation267_spill] sm:$0xff] }
 0x83f   :  { %v1289_v23 = vsub.f32 %v9219_v16, %v9218_v45  ;;  %v1511_v11 = vld [vmem:[#allocation3 + $0x1e8] sm:$0xff] }
 0x840   :  { %v1575_v16 = vmul.f32 %v4819_v44, %v1511_v11 }
 0x841   :  { %v1384_v18 = vmul.f32 1.442695, %v1289_v23 }
 0x843   :  { %4820 = vpow2.f32 %v1384_v18 }
 0x845   :  { %3062 = vadd.xlane.f32.xlu1 %v3061_v5  ;;  %3059 = vadd.xlane.f32.xlu2 %v3058_v10  ;;  %v9230_v10 = vld [vmem:[#allocation266_spill] sm:$0xff] }
 0x846   :  { %v1320_v45 = vsub.f32 %v9230_v10, %v9229_v53 }
 0x848   :  { %v1446_v6 = vmul.f32 1.442695, %v1320_v45  ;;  %v9241_v45 = vld [vmem:[#allocation45_spill] sm:$0xff] }
 0x84a   :  { %4822 = vpow2.f32 %v1446_v6 }
 0x84d   :  { %3071 = vadd.xlane.f32.xlu1 %v3070_v58 }
 0x84e   :  { %v7600_v28 = vpop.permute.xlu0 %2846 }
 0x84f   :  { %vm2916_vm1 = vcmp.eq.s32.totalorder %v9071_v43, %v7600_v28  ;;  %vm2917_vm10 = vcmp.eq.s32.totalorder %v9072_v46, %v7600_v28 }
 0x850   :  { %v3044_v5 = vsel %vm2916_vm1, %v9081_v9, 0.0  ;;  %v3045_v25 = vsel %vm2917_vm10, %v9082_v31, 0.0  ;;  %v2945_v9 = vsel %vm9228_vm0, %v9227_v2, 0.0  ;;  %v3067_v31 = vadd.f32 %v2937_v51, %v2936_v27  ;;  %v9233_v27 = vld [vmem:[#allocation27_spill] sm:$0xff]  ;;  %v9235_v51 = vld [vmem:[#allocation50_spill] sm:$0xff] }
 0x851   :  { %v7630_v61 = vadd.f32 %v3045_v25, %v3044_v5  ;;  %v3079_v21 = vadd.f32 %v2945_v9, %v2944_v57  ;;  %v2943_v18 = vsel %vm9234_vm3, %v9233_v27, 0.0  ;;  %v2950_v38 = vsel %vm9236_vm4, %v9235_v51, 0.0  ;;  %v9237_v57 = vld [vmem:[#allocation51_spill] sm:$0xff]  ;;  %v9245_v27 = vld [vmem:[#allocation64_spill] sm:$0xff] }
 0x852   :  { %3068 = vadd.xlane.f32.xlu2 %v3067_v31  ;;  %v2951_v36 = vsel %vm9238_vm13, %v9237_v57, 0.0  ;;  %v1481_v9 = vld [vmem:[#allocation3 + $0xf8] sm:$0xff]  ;;  %v3076_v44 = vadd.f32 %v2943_v18, %v2942_v49  ;;  %vm9240_vm0 = vcmp.eq.s32.totalorder %v9071_v43, %v7214_v62  ;;  %vm9244_vm3 = vcmp.eq.s32.totalorder %v9071_v43, %v7198_v52 }
 0x853   :  { %v3088_v11 = vadd.f32 %v2951_v36, %v2950_v38  ;;  %v2948_v10 = vsel %vm9240_vm0, %v9239_v63, 0.0  ;;  %v2956_v49 = vsel %vm9244_vm3, %v9243_v12, 0.0  ;;  %vm9246_vm4 = vcmp.eq.s32.totalorder %v9072_v46, %v7198_v52  ;;  %v9247_v38 = vld [vmem:[#allocation59_spill] sm:$0xff]  ;;  %v9249_v36 = vld [vmem:[#allocation60_spill] sm:$0xff] }
 0x854   :  { %v2957_v62 = vsel %vm9246_vm4, %v9245_v27, 0.0  ;;  %vm9248_vm13 = vcmp.eq.s32.totalorder %v9071_v43, %v7309_v30  ;;  %vm9250_vm0 = vcmp.eq.s32.totalorder %v9072_v46, %v7309_v30  ;;  %vm9254_vm3 = vcmp.eq.s32.totalorder %v9072_v46, %v7290_v60  ;;  %v9256_v63 = vld [vmem:[#allocation148_spill] sm:$0xff] }
 0x855   :  { %3080 = vadd.xlane.f32.xlu1 %v3079_v21  ;;  %v2467_v23 = vpop.xlane.xlu1 %2466  ;;  %v3097_v6 = vadd.f32 %v2957_v62, %v2956_v49  ;;  %v2954_v57 = vsel %vm9248_vm13, %v9247_v38, 0.0  ;;  %v2955_v52 = vsel %vm9250_vm0, %v9249_v36, 0.0  ;;  %vm9255_vm4 = vcmp.eq.s32.totalorder %v9071_v43, %v7383_v47  ;;  %v9263_v49 = vld [vmem:[#allocation155_spill] sm:$0xff]  ;;  %v9264_v62 = vld [vmem:[#allocation152_spill] sm:$0xff] }
 0x856   :  { %v7634_v58 = vpop.permute.xlu0 %2855  ;;  %v2535_v37 = vadd.f32 %v2467_v23, %v1575_v16  ;;  %v2949_v16 = vsel %vm9242_vm9, %v9241_v45, 0.0  ;;  %vm9252_vm9 = vcmp.eq.s32.totalorder %v9071_v43, %v7290_v60  ;;  %v2968_v30 = vsel %vm9255_vm4, %v9058_v0, 0.0  ;;  %v9262_v0 = vld [vmem:[#allocation154_spill] sm:$0xff] }
 0x857   :  { %vm2922_vm8 = vcmp.eq.s32.totalorder %v9071_v43, %v7634_v58  ;;  %vm2923_vm12 = vcmp.eq.s32.totalorder %v9072_v46, %v7634_v58  ;;  %vm9257_vm13 = vcmp.eq.s32.totalorder %v9072_v46, %v7383_v47  ;;  %vm9259_vm0 = vcmp.eq.s32.totalorder %v9071_v43, %v7410_v20 }
 0x858   :  { %v3050_v5 = vsel %vm2922_vm8, %v9107_v3, 0.0  ;;  %v3051_v25 = vsel %vm2923_vm12, %v9108_v56, 0.0  ;;  %2600 = vst.msk [vmem:[#allocation3 + $0x1e8] sm:$0xff] %vm20_vm11, %v2535_v37  ;;  %v4821_v3 = vpop.eup %4820 }
 0x859   :  { %v7665_v2 = vadd.f32 %v3051_v25, %v3050_v5  ;;  %v1545_v56 = vmul.f32 %v4821_v3, %v1481_v9  ;;  %v3085_v5 = vadd.f32 %v2949_v16, %v2948_v10  ;;  %v1512_v25 = vld [vmem:[#allocation3 + $0x1f0] sm:$0xff]  ;;  %v9251_v9 = vld [vmem:[#allocation103_spill] sm:$0xff]  ;;  %v2969_v10 = vsel %vm9257_vm13, %v9256_v63, 0.0  ;;  %v9258_v16 = vld [vmem:[#allocation73_spill] sm:$0xff] }
 0x85a   :  { %3077 = vadd.xlane.f32.xlu2 %v3076_v44  ;;  %v2962_v44 = vsel %vm9252_vm9, %v9251_v9, 0.0  ;;  %v2960_v60 = vsel %vm9259_vm0, %v9258_v16, 0.0  ;;  %vm9261_vm9 = vcmp.eq.s32.totalorder %v9072_v46, %v7410_v20  ;;  %v9270_v16 = vld [vmem:[#allocation191_spill] sm:$0xff] }
 0x85d   :  { %3089 = vadd.xlane.f32.xlu1 %v3088_v11  ;;  %v2377_v31 = vpop.xlane.xlu1 %2376  ;;  %v2470_v51 = vpop.xlane.xlu2 %2469  ;;  %v9253_v11 = vld [vmem:[#allocation105_spill] sm:$0xff] }
 0x85e   :  { %v7667_v21 = vpop.permute.xlu0 %2864  ;;  %v2505_v53 = vadd.f32 %v2377_v31, %v1545_v56  ;;  %v2963_v56 = vsel %vm9254_vm3, %v9253_v11, 0.0  ;;  %v3094_v31 = vadd.f32 %v2955_v52, %v2954_v57  ;;  %v9266_v57 = vld [vmem:[#allocation142_spill] sm:$0xff]  ;;  %v9267_v52 = vld [vmem:[#allocation141_spill] sm:$0xff]  ;;  %v2975_v11 = vsel %vm2911_vm2, %v9084_v26, 0.0 }
 0x85f   :  { %vm2928_vm14 = vcmp.eq.s32.totalorder %v9071_v43, %v7667_v21  ;;  %vm2929_vm15 = vcmp.eq.s32.totalorder %v9072_v46, %v7667_v21  ;;  %v2966_v36 = vsel %vm2902_vm5, %v9266_v57, 0.0  ;;  %v9276_v57 = vld [vmem:[#allocation182_spill] sm:$0xff] }
 0x860   :  { %v3056_v23 = vsel %vm2928_vm14, %v9156_v55, 0.0  ;;  %v3057_v37 = vsel %vm2929_vm15, %v9157_v59, 0.0  ;;  %2570 = vst.msk [vmem:[#allocation3 + $0xf8] sm:$0xff] %vm20_vm11, %v2505_v53  ;;  %v4823_v55 = vpop.eup %4822  ;;  %v3106_v53 = vadd.f32 %v2963_v56, %v2962_v44 }
 0x861   :  { %v7698_v18 = vadd.f32 %v3057_v37, %v3056_v23  ;;  %v1576_v59 = vmul.f32 %v4823_v55, %v1512_v25  ;;  %v9260_v23 = vld [vmem:[#allocation74_spill] sm:$0xff] }
 0x862   :  { %3086 = vadd.xlane.f32.xlu2 %v3085_v5  ;;  %v2961_v37 = vsel %vm9261_vm9, %v9260_v23, 0.0  ;;  %v9271_v23 = vld [vmem:[#allocation192_spill] sm:$0xff] }
 0x863   :  { %v2536_v3 = vadd.f32 %v2470_v51, %v1576_v59  ;;  %v3115_v59 = vadd.f32 %v2969_v10, %v2968_v30  ;;  %v9265_v51 = vld [vmem:[#allocation162_spill] sm:$0xff]  ;;  %v9269_v10 = vld [vmem:[#allocation160_spill] sm:$0xff] }
 0x864   :  { %v2974_v38 = vsel %vm2910_vm7, %v9265_v51, 0.0 }
 0x865   :  { %3098 = vadd.xlane.f32.xlu1 %v3097_v6  ;;  %2601 = vst.msk [vmem:[#allocation3 + $0x1f0] sm:$0xff] %vm20_vm11, %v2536_v3  ;;  %v2832_v45 = vpop.permute.xlu2 %2831  ;;  %v3103_v6 = vadd.f32 %v2961_v37, %v2960_v60  ;;  %v2967_v3 = vsel %vm2903_vm6, %v9267_v52, 0.0  ;;  %v3124_v50 = vadd.f32 %v2975_v11, %v2974_v38  ;;  %v9272_v37 = vld [vmem:[#allocation194_spill] sm:$0xff]  ;;  %v2986_v38 = vsel %vm2922_vm8, %v9141_v34, 0.0 }
 0x866   :  { %vm2906_vm3 = vcmp.eq.s32.totalorder %v9071_v43, %v2832_v45  ;;  %vm2907_vm4 = vcmp.eq.s32.totalorder %v9072_v46, %v2832_v45 }
 0x867   :  { %v2970_v12 = vsel %vm2906_vm3, %v9262_v0, 0.0  ;;  %v2971_v47 = vsel %vm2907_vm4, %v9263_v49, 0.0  ;;  %v3034_v27 = vsel %vm2906_vm3, %v9078_v32, 0.0  ;;  %v3035_v55 = vsel %vm2907_vm4, %v9264_v62, 0.0  ;;  %v9273_v49 = vld [vmem:[#allocation204_spill] sm:$0xff] }
 0x868   :  { %v3118_v5 = vadd.f32 %v2971_v47, %v2970_v12  ;;  %v7739_v25 = vadd.f32 %v3035_v55, %v3034_v27  ;;  %v2981_v0 = vsel %vm2917_vm10, %v9272_v37, 0.0  ;;  %v9274_v27 = vld [vmem:[#allocation205_spill] sm:$0xff] }
 0x86a   :  { %3095 = vadd.xlane.f32.xlu2 %v3094_v31  ;;  %3119 = vadd.xlane.f32.xlu0 %v3118_v5 }
 0x86d   :  { %3107 = vadd.xlane.f32.xlu1 %v3106_v53  ;;  %v2841_v32 = vpop.permute.xlu2 %2840 }
 0x86e   :  { %vm2912_vm7 = vcmp.eq.s32.totalorder %v9071_v43, %v2841_v32  ;;  %vm2913_vm5 = vcmp.eq.s32.totalorder %v9072_v46, %v2841_v32 }
 0x86f   :  { %v2976_v42 = vsel %vm2912_vm7, %v9088_v48, 0.0  ;;  %v2977_v31 = vsel %vm2913_vm5, %v9089_v13, 0.0  ;;  %v3041_v53 = vsel %vm2913_vm5, %v9109_v41, 0.0  ;;  %v2980_v48 = vsel %vm2916_vm1, %v9110_v29, 0.0 }
 0x870   :  { %v3127_v30 = vadd.f32 %v2977_v31, %v2976_v42  ;;  %v3133_v28 = vadd.f32 %v2981_v0, %v2980_v48 }
 0x872   :  { %3104 = vadd.xlane.f32.xlu2 %v3103_v6  ;;  %3128 = vadd.xlane.f32.xlu0 %v3127_v30 }
 0x875   :  { %3116 = vadd.xlane.f32.xlu1 %v3115_v59  ;;  %v2835_v20 = vpop.permute.xlu1 %2834  ;;  %v2850_v13 = vpop.permute.xlu2 %2849 }
 0x876   :  { %vm2908_vm13 = vcmp.eq.s32.totalorder %v9071_v43, %v2835_v20  ;;  %vm2909_vm0 = vcmp.eq.s32.totalorder %v9072_v46, %v2835_v20  ;;  %vm2918_vm1 = vcmp.eq.s32.totalorder %v9071_v43, %v2850_v13  ;;  %vm2919_vm9 = vcmp.eq.s32.totalorder %v9072_v46, %v2850_v13 }
 0x877   :  { %v3036_v9 = vsel %vm2908_vm13, %v9086_v1, 0.0  ;;  %v3037_v44 = vsel %vm2909_vm0, %v9087_v33, 0.0  ;;  %v3040_v1 = vsel %vm2912_vm7, %v9106_v7, 0.0  ;;  %v3112_v33 = vadd.f32 %v2967_v3, %v2966_v36  ;;  %v9268_v7 = vld [vmem:[#allocation158_spill] sm:$0xff] }
 0x878   :  { %v7765_v56 = vadd.f32 %v3037_v44, %v3036_v9  ;;  %v7773_v63 = vadd.f32 %v3041_v53, %v3040_v1  ;;  %v2972_v41 = vsel %vm2908_vm13, %v9268_v7, 0.0  ;;  %v2973_v45 = vsel %vm2909_vm0, %v9269_v10, 0.0  ;;  %v2708_v3 = vld [vmem:[#allocation4 + $0x10] sm:$0xff]  ;;  %v9280_v7 = vld [vmem:[#allocation245_spill] sm:$0xff]  ;;  %v9281_v10 = vld [vmem:[#allocation252_spill] sm:$0xff] }
 0x879   :  { %v2982_v47 = vsel %vm2918_vm1, %v9273_v49, 0.0  ;;  %v2983_v62 = vsel %vm2919_vm9, %v9274_v27, 0.0  ;;  %v3046_v55 = vsel %vm2918_vm1, %v9139_v15, 0.0  ;;  %v3047_v5 = vsel %vm2919_vm9, %v9140_v35, 0.0  ;;  %v9275_v35 = vld [vmem:[#allocation181_spill] sm:$0xff]  ;;  %v9283_v49 = vld [vmem:[#allocation28_spill] sm:$0xff] }
 0x87a   :  { %3113 = vadd.xlane.f32.xlu2 %v3112_v33  ;;  %v3121_v6 = vadd.f32 %v2973_v45, %v2972_v41  ;;  %v3136_v59 = vadd.f32 %v2983_v62, %v2982_v47  ;;  %v7805_v20 = vadd.f32 %v3047_v5, %v3046_v55  ;;  %v2987_v9 = vsel %vm2923_vm12, %v9142_v54, 0.0  ;;  %v2714_v47 = vld [vmem:[#allocation4 + $0x40] sm:$0xff]  ;;  %v9285_v55 = vld [vmem:[#allocation237_spill] sm:$0xff] }
 0x87b   :  { %v3142_v58 = vadd.f32 %v2987_v9, %v2986_v38  ;;  %v2992_v45 = vsel %vm2928_vm14, %v9281_v10, 0.0  ;;  %v9284_v27 = vld [vmem:[#allocation236_spill] sm:$0xff]  ;;  %v2717_v38 = vld [vmem:[#allocation4 + $0x58] sm:$0xff] }
 0x87c   :  { %3137 = vadd.xlane.f32.xlu0 %v3136_v59  ;;  %v9293_v9 = vld [vmem:[#allocation72_spill] sm:$0xff]  ;;  %v2709_v10 = vld [vmem:[#allocation4 + $0x18] sm:$0xff] }
 0x87d   :  { %3125 = vadd.xlane.f32.xlu1 %v3124_v50  ;;  %v2844_v26 = vpop.permute.xlu1 %2843  ;;  %v2859_v15 = vpop.permute.xlu2 %2858 }
 0x87e   :  { %vm2914_vm2 = vcmp.eq.s32.totalorder %v9071_v43, %v2844_v26  ;;  %vm2915_vm6 = vcmp.eq.s32.totalorder %v9072_v46, %v2844_v26  ;;  %vm2924_vm8 = vcmp.eq.s32.totalorder %v9071_v43, %v2859_v15  ;;  %vm2925_vm4 = vcmp.eq.s32.totalorder %v9072_v46, %v2859_v15  ;;  %v9279_v26 = vld [vmem:[#allocation211_spill] sm:$0xff] }
 0x87f   :  { %v3042_v60 = vsel %vm2914_vm2, %v9270_v16, 0.0  ;;  %v3043_v29 = vsel %vm2915_vm6, %v9271_v23, 0.0  ;;  %v2978_v32 = vsel %vm2914_vm2, %v9275_v35, 0.0  ;;  %v2979_v36 = vsel %vm2915_vm6, %v9276_v57, 0.0  ;;  %v9282_v16 = vld [vmem:[#allocation253_spill] sm:$0xff]  ;;  %v2720_v57 = vld [vmem:[#allocation4 + $0x70] sm:$0xff] }
 0x880   :  { %v7797_v12 = vadd.f32 %v3043_v29, %v3042_v60  ;;  %v2988_v42 = vsel %vm2924_vm8, %v9147_v4, 0.0  ;;  %v3052_v1 = vsel %vm2924_vm8, %v9164_v40, 0.0  ;;  %v3130_v53 = vadd.f32 %v2979_v36, %v2978_v32  ;;  %v2711_v4 = vld [vmem:[#allocation4 + $0x28] sm:$0xff]  ;;  %v9278_v40 = vld [vmem:[#allocation210_spill] sm:$0xff]  ;;  %v9289_v32 = vld [vmem:[#allocation35_spill] sm:$0xff] }
 0x881   :  { %v2993_v60 = vsel %vm2929_vm15, %v9282_v16, 0.0 }
 0x882   :  { %3122 = vadd.xlane.f32.xlu2 %v3121_v6 }
 0x885   :  { %3134 = vadd.xlane.f32.xlu1 %v3133_v28  ;;  %v2853_v51 = vpop.permute.xlu1 %2852  ;;  %v9286_v28 = vld [vmem:[#allocation47_spill] sm:$0xff] }
 0x886   :  { %vm2920_vm10 = vcmp.eq.s32.totalorder %v9071_v43, %v2853_v51  ;;  %vm2921_vm3 = vcmp.eq.s32.totalorder %v9072_v46, %v2853_v51  ;;  %v9287_v51 = vld [vmem:[#allocation40_spill] sm:$0xff] }
 0x887   :  { %v3048_v52 = vsel %vm2920_vm10, %v9144_v19, 0.0  ;;  %v3049_v34 = vsel %vm2921_vm3, %v9145_v17, 0.0  ;;  %v9277_v19 = vld [vmem:[#allocation231_spill] sm:$0xff]  ;;  %v3053_v17 = vsel %vm2925_vm4, %v9165_v14, 0.0  ;;  %v2984_v14 = vsel %vm2920_vm10, %v9278_v40, 0.0  ;;  %v2706_v40 = vld [vmem:[#allocation4] sm:$0xff] }
 0x888   :  { %v7829_v44 = vadd.f32 %v3049_v34, %v3048_v52  ;;  %v2989_v31 = vsel %vm2925_vm4, %v9277_v19, 0.0  ;;  %v7837_v30 = vadd.f32 %v3053_v17, %v3052_v1  ;;  %v2985_v48 = vsel %vm2921_vm3, %v9279_v26, 0.0  ;;  %v9291_v34 = vld [vmem:[#allocation69_spill] sm:$0xff]  ;;  %v9295_v1 = vld [vmem:[#allocation16_spill] sm:$0xff] }
 0x889   :  { %v3066_v11 = vpop.xlane.xlu0 %3065  ;;  %v3145_v33 = vadd.f32 %v2989_v31, %v2988_v42  ;;  %v3139_v0 = vadd.f32 %v2985_v48, %v2984_v14  ;;  %v9294_v31 = vld [vmem:[#allocation77_spill] sm:$0xff]  ;;  %v2710_v14 = vld [vmem:[#allocation4 + $0x20] sm:$0xff] }
 0x88a   :  { %v3252_v54 = vadd.f32 %v3066_v11, %v2708_v3  ;;  %3131 = vadd.xlane.f32.xlu2 %v3130_v53  ;;  %v9292_v3 = vld [vmem:[#allocation52_spill] sm:$0xff]  ;;  %v2723_v11 = vld [vmem:[#allocation4 + $0x88] sm:$0xff] }
 0x88b   :  { %3146 = vadd.xlane.f32.xlu0 %v3145_v33  ;;  %v9296_v17 = vld [vmem:[#allocation89_spill] sm:$0xff] }
 0x88c   :  { %3316 = vst.msk [vmem:[#allocation4 + $0x10] sm:$0xff] %vm20_vm11, %v3252_v54  ;;  %v2707_v53 = vld [vmem:[#allocation4 + $0x8] sm:$0xff] }
 0x88d   :  { %3143 = vadd.xlane.f32.xlu1 %v3142_v58  ;;  %v2862_v50 = vpop.permute.xlu1 %2861  ;;  %v9297_v58 = vld [vmem:[#allocation183_spill] sm:$0xff] }
 0x88e   :  { %vm2926_vm12 = vcmp.eq.s32.totalorder %v9071_v43, %v2862_v50  ;;  %vm2927_vm13 = vcmp.eq.s32.totalorder %v9072_v46, %v2862_v50  ;;  %v9288_v43 = vld [vmem:[#allocation75_spill] sm:$0xff]  ;;  %v9290_v46 = vld [vmem:[#allocation80_spill] sm:$0xff]  ;;  %v9298_v50 = vld [vmem:[#allocation186_spill] sm:$0xff] }
 0x88f   :  { %v3054_v13 = vsel %vm2926_vm12, %v9169_v22, 0.0  ;;  %v3055_v41 = vsel %vm2927_vm13, %v9280_v7, 0.0  ;;  %v3151_v22 = vadd.f32 %v2993_v60, %v2992_v45  ;;  %v2990_v62 = vsel %vm2926_vm12, %v9284_v27, 0.0  ;;  %v2713_v45 = vld [vmem:[#allocation4 + $0x38] sm:$0xff] }
 0x890   :  { %v7862_v23 = vadd.f32 %v3055_v41, %v3054_v13  ;;  %v2991_v21 = vsel %vm2927_vm13, %v9285_v55, 0.0  ;;  %v9300_v41 = vld [vmem:[#allocation171_spill] sm:$0xff]  ;;  %v2719_v55 = vld [vmem:[#allocation4 + $0x68] sm:$0xff] }
 0x891   :  { %v3075_v29 = vpop.xlane.xlu0 %3074  ;;  %v3148_v59 = vadd.f32 %v2991_v21, %v2990_v62  ;;  %v9302_v62 = vld [vmem:[#allocation87_spill] sm:$0xff] }
 0x892   :  { %v3255_v37 = vadd.f32 %v3075_v29, %v2711_v4  ;;  %3140 = vadd.xlane.f32.xlu2 %v3139_v0  ;;  %v9299_v4 = vld [vmem:[#allocation190_spill] sm:$0xff]  ;;  %v9301_v0 = vld [vmem:[#allocation76_spill] sm:$0xff] }
 0x893   :  { %3155 = vadd.xlane.f32.xlu0 %v9283_v49 }
 0x894   :  { %3319 = vst.msk [vmem:[#allocation4 + $0x28] sm:$0xff] %vm20_vm11, %v3255_v37 }
 0x895   :  { %3152 = vadd.xlane.f32.xlu1 %v3151_v22  ;;  %v2716_v22 = vld [vmem:[#allocation4 + $0x50] sm:$0xff] }
 0x899   :  { %v3084_v5 = vpop.xlane.xlu0 %3083 }
 0x89a   :  { %v3258_v6 = vadd.f32 %v3084_v5, %v2714_v47  ;;  %3149 = vadd.xlane.f32.xlu2 %v3148_v59  ;;  %v2722_v59 = vld [vmem:[#allocation4 + $0x80] sm:$0xff] }
 0x89b   :  { %3164 = vadd.xlane.f32.xlu0 %v9286_v28 }
 0x89c   :  { %3322 = vst.msk [vmem:[#allocation4 + $0x40] sm:$0xff] %vm20_vm11, %v3258_v6 }
 0x89d   :  { %3161 = vadd.xlane.f32.xlu1 %v9287_v51 }
 0x8a1   :  { %v3093_v15 = vpop.xlane.xlu0 %3092 }
 0x8a2   :  { %v3261_v35 = vadd.f32 %v3093_v15, %v2717_v38  ;;  %3158 = vadd.xlane.f32.xlu2 %v9289_v32  ;;  %v2726_v15 = vld [vmem:[#allocation4 + $0xa0] sm:$0xff] }
 0x8a3   :  { %3173 = vadd.xlane.f32.xlu0 %v9288_v43 }
 0x8a4   :  { %3325 = vst.msk [vmem:[#allocation4 + $0x58] sm:$0xff] %vm20_vm11, %v3261_v35 }
 0x8a5   :  { %3170 = vadd.xlane.f32.xlu1 %v9290_v46 }
 0x8a9   :  { %v3102_v36 = vpop.xlane.xlu0 %3101 }
 0x8aa   :  { %v3264_v52 = vadd.f32 %v3102_v36, %v2720_v57  ;;  %3167 = vadd.xlane.f32.xlu2 %v9292_v3  ;;  %v2728_v36 = vld [vmem:[#allocation4 + $0xb0] sm:$0xff] }
 0x8ab   :  { %3182 = vadd.xlane.f32.xlu0 %v9291_v34 }
 0x8ac   :  { %3328 = vst.msk [vmem:[#allocation4 + $0x70] sm:$0xff] %vm20_vm11, %v3264_v52 }
 0x8ad   :  { %3179 = vadd.xlane.f32.xlu1 %v9293_v9 }
 0x8b1   :  { %v3111_v42 = vpop.xlane.xlu0 %3110 }
 0x8b2   :  { %v3267_v19 = vadd.f32 %v3111_v42, %v2723_v11  ;;  %3176 = vadd.xlane.f32.xlu2 %v9295_v1  ;;  %v2732_v42 = vld [vmem:[#allocation4 + $0xd0] sm:$0xff] }
 0x8b3   :  { %3191 = vadd.xlane.f32.xlu0 %v9294_v31 }
 0x8b4   :  { %3331 = vst.msk [vmem:[#allocation4 + $0x88] sm:$0xff] %vm20_vm11, %v3267_v19  ;;  %v2727_v19 = vld [vmem:[#allocation4 + $0xa8] sm:$0xff] }
 0x8b5   :  { %3188 = vadd.xlane.f32.xlu1 %v9296_v17 }
 0x8b8   :  { %v3063_v33 = vpop.xlane.xlu1 %3062  ;;  %v3060_v26 = vpop.xlane.xlu2 %3059 }
 0x8b9   :  { %v3251_v54 = vadd.f32 %v3063_v33, %v2707_v53  ;;  %v3250_v48 = vadd.f32 %v3060_v26, %v2706_v40  ;;  %v2730_v40 = vld [vmem:[#allocation4 + $0xc0] sm:$0xff] }
 0x8ba   :  { %3185 = vadd.xlane.f32.xlu2 %v9298_v50  ;;  %v3447_v50 = vld [vmem:[#allocation3 + $0x10] sm:$0xff]  ;;  %v3445_v26 = vld [vmem:[#allocation3] sm:$0xff] }
 0x8bb   :  { %3315 = vst.msk [vmem:[#allocation4 + $0x8] sm:$0xff] %vm20_vm11, %v3251_v54  ;;  %3200 = vadd.xlane.f32.xlu0 %v9297_v58  ;;  %v3478_v58 = vld [vmem:[#allocation3 + $0x108] sm:$0xff] }
 0x8bc   :  { %3314 = vst.msk [vmem:[#allocation4] sm:$0xff] %vm20_vm11, %v3250_v48  ;;  %4824 = vlog2.f32 %v3478_v58 }
 0x8bd   :  { %3197 = vadd.xlane.f32.xlu1 %v9299_v4  ;;  %v2735_v4 = vld [vmem:[#allocation4 + $0xe8] sm:$0xff]  ;;  %4826 = vlog2.f32 %v3447_v50 }
 0x8c0   :  { %v3072_v13 = vpop.xlane.xlu1 %3071 }
 0x8c1   :  { %v3254_v7 = vadd.f32 %v3072_v13, %v2710_v14  ;;  %v2734_v14 = vld [vmem:[#allocation4 + $0xe0] sm:$0xff] }
 0x8c2   :  { %3194 = vadd.xlane.f32.xlu2 %v9300_v41 }
 0x8c3   :  { %3318 = vst.msk [vmem:[#allocation4 + $0x20] sm:$0xff] %vm20_vm11, %v3254_v7  ;;  %3209 = vadd.xlane.f32.xlu0 %v7553_v24  ;;  %v2712_v24 = vld [vmem:[#allocation4 + $0x30] sm:$0xff]  ;;  %v3477_v7 = vld [vmem:[#allocation3 + $0x100] sm:$0xff] }
 0x8c4   :  { %v3701_v58 = vld [vmem:[#allocation4] sm:$0xff] }
 0x8c5   :  { %3206 = vadd.xlane.f32.xlu1 %v7567_v39  ;;  %v3069_v16 = vpop.xlane.xlu2 %3068 }
 0x8c6   :  { %v3253_v60 = vadd.f32 %v3069_v16, %v2709_v10  ;;  %v3481_v16 = vld [vmem:[#allocation3 + $0x120] sm:$0xff] }
 0x8c8   :  { %v3081_v29 = vpop.xlane.xlu1 %3080  ;;  %3317 = vst.msk [vmem:[#allocation4 + $0x18] sm:$0xff] %vm20_vm11, %v3253_v60 }
 0x8c9   :  { %v3257_v37 = vadd.f32 %v3081_v29, %v2713_v45  ;;  %v3479_v29 = vld [vmem:[#allocation3 + $0x110] sm:$0xff] }
 0x8ca   :  { %3203 = vadd.xlane.f32.xlu2 %v9301_v0  ;;  %v3480_v0 = vld [vmem:[#allocation3 + $0x118] sm:$0xff] }
 0x8cb   :  { %3321 = vst.msk [vmem:[#allocation4 + $0x38] sm:$0xff] %vm20_vm11, %v3257_v37  ;;  %3218 = vadd.xlane.f32.xlu0 %v7765_v56  ;;  %v2715_v56 = vld [vmem:[#allocation4 + $0x48] sm:$0xff]  ;;  %v3448_v37 = vld [vmem:[#allocation3 + $0x18] sm:$0xff] }
 0x8cd   :  { %3215 = vadd.xlane.f32.xlu1 %v7739_v25  ;;  %v3078_v49 = vpop.xlane.xlu2 %3077 }
 0x8ce   :  { %v3256_v39 = vadd.f32 %v3078_v49, %v2712_v24  ;;  %v4825_v24 = vpop.eup %4824 }
 0x8cf   :  { %v4827_v49 = vpop.eup %4826 }
 0x8d0   :  { %v3090_v47 = vpop.xlane.xlu1 %3089  ;;  %3320 = vst.msk [vmem:[#allocation4 + $0x30] sm:$0xff] %vm20_vm11, %v3256_v39  ;;  %v2738_v39 = vld [vmem:[#allocation4 + $0x100] sm:$0xff] }
 0x8d1   :  { %v3260_v27 = vadd.f32 %v3090_v47, %v2716_v22  ;;  %v3451_v22 = vld [vmem:[#allocation3 + $0x30] sm:$0xff]  ;;  %v2733_v47 = vld [vmem:[#allocation4 + $0xd8] sm:$0xff] }
 0x8d2   :  { %3212 = vadd.xlane.f32.xlu2 %v9302_v62 }
 0x8d3   :  { %3324 = vst.msk [vmem:[#allocation4 + $0x50] sm:$0xff] %vm20_vm11, %v3260_v27  ;;  %3227 = vadd.xlane.f32.xlu0 %v7797_v12  ;;  %v2718_v12 = vld [vmem:[#allocation4 + $0x60] sm:$0xff] }
 0x8d4   :  { %v3449_v27 = vld [vmem:[#allocation3 + $0x20] sm:$0xff] }
 0x8d5   :  { %3224 = vadd.xlane.f32.xlu1 %v7773_v63  ;;  %v3087_v21 = vpop.xlane.xlu2 %3086 }
 0x8d6   :  { %v3259_v25 = vadd.f32 %v3087_v21, %v2715_v56  ;;  %v2737_v56 = vld [vmem:[#allocation4 + $0xf8] sm:$0xff] }
 0x8d8   :  { %v3099_v5 = vpop.xlane.xlu1 %3098  ;;  %3323 = vst.msk [vmem:[#allocation4 + $0x48] sm:$0xff] %vm20_vm11, %v3259_v25 }
 0x8d9   :  { %v3263_v6 = vadd.f32 %v3099_v5, %v2719_v55  ;;  %v3450_v55 = vld [vmem:[#allocation3 + $0x28] sm:$0xff] }
 0x8da   :  { %3221 = vadd.xlane.f32.xlu2 %v7497_v8  ;;  %v2721_v8 = vld [vmem:[#allocation4 + $0x78] sm:$0xff] }
 0x8db   :  { %3327 = vst.msk [vmem:[#allocation4 + $0x68] sm:$0xff] %vm20_vm11, %v3263_v6  ;;  %3236 = vadd.xlane.f32.xlu0 %v7829_v44  ;;  %v3484_v6 = vld [vmem:[#allocation3 + $0x138] sm:$0xff] }
 0x8dd   :  { %3233 = vadd.xlane.f32.xlu1 %v7805_v20  ;;  %v3096_v28 = vpop.xlane.xlu2 %3095  ;;  %v3120_v44 = vpop.xlane.xlu0 %3119  ;;  %v2725_v20 = vld [vmem:[#allocation4 + $0x98] sm:$0xff] }
 0x8de   :  { %v3262_v63 = vadd.f32 %v3096_v28, %v2718_v12  ;;  %v3270_v35 = vadd.f32 %v3120_v44, %v2726_v15 }
 0x8e0   :  { %v3108_v51 = vpop.xlane.xlu1 %3107  ;;  %3326 = vst.msk [vmem:[#allocation4 + $0x60] sm:$0xff] %vm20_vm11, %v3262_v63 }
 0x8e1   :  { %v3266_v38 = vadd.f32 %v3108_v51, %v2722_v59  ;;  %3334 = vst.msk [vmem:[#allocation4 + $0xa0] sm:$0xff] %vm20_vm11, %v3270_v35  ;;  %v3482_v51 = vld [vmem:[#allocation3 + $0x128] sm:$0xff] }
 0x8e2   :  { %3230 = vadd.xlane.f32.xlu2 %v7630_v61  ;;  %v2729_v61 = vld [vmem:[#allocation4 + $0xb8] sm:$0xff] }
 0x8e3   :  { %3330 = vst.msk [vmem:[#allocation4 + $0x80] sm:$0xff] %vm20_vm11, %v3266_v38  ;;  %3245 = vadd.xlane.f32.xlu0 %v7862_v23  ;;  %v2724_v23 = vld [vmem:[#allocation4 + $0x90] sm:$0xff] }
 0x8e5   :  { %3242 = vadd.xlane.f32.xlu1 %v7837_v30  ;;  %v3105_v43 = vpop.xlane.xlu2 %3104  ;;  %v3129_v30 = vpop.xlane.xlu0 %3128 }
 0x8e6   :  { %v3265_v32 = vadd.f32 %v3105_v43, %v2721_v8  ;;  %v3273_v34 = vadd.f32 %v3129_v30, %v2729_v61  ;;  %v3454_v8 = vld [vmem:[#allocation3 + $0x48] sm:$0xff]  ;;  %v3381_v61 = vld [vmem:[#allocation2] sm:$0xff] }
 0x8e8   :  { %v3117_v46 = vpop.xlane.xlu1 %3116  ;;  %3329 = vst.msk [vmem:[#allocation4 + $0x78] sm:$0xff] %vm20_vm11, %v3265_v32 }
 0x8e9   :  { %v3269_v57 = vadd.f32 %v3117_v46, %v2725_v20  ;;  %3337 = vst.msk [vmem:[#allocation4 + $0xb8] sm:$0xff] %vm20_vm11, %v3273_v34  ;;  %v3483_v20 = vld [vmem:[#allocation3 + $0x130] sm:$0xff]  ;;  %v3452_v46 = vld [vmem:[#allocation3 + $0x38] sm:$0xff] }
 0x8ea   :  { %3239 = vadd.xlane.f32.xlu2 %v7665_v2  ;;  %v2731_v2 = vld [vmem:[#allocation4 + $0xc8] sm:$0xff]  ;;  %v2741_v34 = vld [vmem:[#allocation4 + $0x118] sm:$0xff] }
 0x8eb   :  { %3333 = vst.msk [vmem:[#allocation4 + $0x98] sm:$0xff] %vm20_vm11, %v3269_v57 }
 0x8ed   :  { %v3114_v52 = vpop.xlane.xlu2 %3113 }
 0x8ee   :  { %v3268_v3 = vadd.f32 %v3114_v52, %v2724_v23  ;;  %v3413_v23 = vld [vmem:[#allocation2 + $0x100] sm:$0xff] }
 0x8ef   :  { %v3138_v31 = vpop.xlane.xlu0 %3137  ;;  %v7936_v52 = vld [vmem:[%s8253_s0] sm:$0xff] }
 0x8f0   :  { %v3126_v9 = vpop.xlane.xlu1 %3125  ;;  %3332 = vst.msk [vmem:[#allocation4 + $0x90] sm:$0xff] %vm20_vm11, %v3268_v3  ;;  %v3276_v17 = vadd.f32 %v3138_v31, %v2732_v42  ;;  %vm3893_vm14 = vcmp.ge.s32.totalorder %v7936_v52, 0  ;;  %v2736_v3 = vld [vmem:[#allocation4 + $0xf0] sm:$0xff]  ;;  %v3485_v31 = vld [vmem:[#allocation3 + $0x140] sm:$0xff] }
 0x8f1   :  { %v3272_v11 = vadd.f32 %v3126_v9, %v2728_v36  ;;  %v3487_v36 = vld [vmem:[#allocation3 + $0x150] sm:$0xff]  ;;  %v3453_v9 = vld [vmem:[#allocation3 + $0x40] sm:$0xff] }
 0x8f2   :  { %3248 = vadd.xlane.f32.xlu2 %v7698_v18  ;;  %3340 = vst.msk [vmem:[#allocation4 + $0xd0] sm:$0xff] %vm20_vm11, %v3276_v17  ;;  %v3446_v18 = vld [vmem:[#allocation3 + $0x8] sm:$0xff]  ;;  %v2740_v42 = vld [vmem:[#allocation4 + $0x110] sm:$0xff] }
 0x8f3   :  { %3336 = vst.msk [vmem:[#allocation4 + $0xb0] sm:$0xff] %vm20_vm11, %v3272_v11  ;;  %4828 = vlog2.f32 %v3446_v18 }
 0x8f4   :  { %4830 = vlog2.f32 %v3445_v26 }
 0x8f5   :  { %v3123_v1 = vpop.xlane.xlu2 %3122  ;;  %4832 = vlog2.f32 %v3477_v7  ;;  %v3486_v7 = vld [vmem:[#allocation3 + $0x148] sm:$0xff] }
 0x8f6   :  { %v3271_v53 = vadd.f32 %v3123_v1, %v2727_v19  ;;  %4834 = vlog2.f32 %v3481_v16  ;;  %v3514_v19 = vmul.f32 0.6931472, %v4827_v49  ;;  %v3383_v49 = vld [vmem:[#allocation2 + $0x10] sm:$0xff] }
 0x8f7   :  { %4836 = vlog2.f32 %v3479_v29 }
 0x8f8   :  { %v3135_v33 = vpop.xlane.xlu1 %3134  ;;  %3335 = vst.msk [vmem:[#allocation4 + $0xa8] sm:$0xff] %vm20_vm11, %v3271_v53  ;;  %4838 = vlog2.f32 %v3448_v37  ;;  %v3455_v37 = vld [vmem:[#allocation3 + $0x50] sm:$0xff] }
 0x8f9   :  { %v3275_v54 = vadd.f32 %v3135_v33, %v2731_v2  ;;  %v4829_v62 = vpop.eup %4828  ;;  %4840 = vlog2.f32 %v3480_v0  ;;  %v3576_v2 = vmul.f32 0.6931472, %v4825_v24 }
 0x8fa   :  { %v4831_v21 = vpop.eup %4830  ;;  %4842 = vlog2.f32 %v3451_v22  ;;  %v3512_v50 = vmul.f32 0.6931472, %v4829_v62 }
 0x8fb   :  { %3339 = vst.msk [vmem:[#allocation4 + $0xc8] sm:$0xff] %vm20_vm11, %v3275_v54  ;;  %v4833_v12 = vpop.eup %4832  ;;  %4844 = vlog2.f32 %v3449_v27  ;;  %v3510_v43 = vmul.f32 0.6931472, %v4831_v21  ;;  %v3490_v27 = vld [vmem:[#allocation3 + $0x168] sm:$0xff] }
 0x8fc   :  { %v4835_v38 = vpop.eup %4834  ;;  %4846 = vlog2.f32 %v3450_v55  ;;  %v3574_v32 = vmul.f32 0.6931472, %v4833_v12  ;;  %v3384_v55 = vld [vmem:[#allocation2 + $0x18] sm:$0xff] }
 0x8fd   :  { %v3132_v13 = vpop.xlane.xlu2 %3131  ;;  %v4837_v44 = vpop.eup %4836  ;;  %4848 = vlog2.f32 %v3484_v6  ;;  %v3637_v33 = vadd.f32 %v3510_v43, %v3381_v61  ;;  %v2743_v61 = vld [vmem:[#allocation4 + $0x128] sm:$0xff] }
 0x8fe   :  { %v3147_v48 = vpop.xlane.xlu0 %3146  ;;  %v3274_v10 = vadd.f32 %v3132_v13, %v2730_v40  ;;  %v4839_v35 = vpop.eup %4838  ;;  %4850 = vlog2.f32 %v3482_v51  ;;  %v3669_v54 = vadd.f32 %v3574_v32, %v3413_v23  ;;  %v3582_v13 = vmul.f32 0.6931472, %v4835_v38  ;;  %v3385_v51 = vld [vmem:[#allocation2 + $0x20] sm:$0xff] }
 0x8ff   :  { %v3279_v41 = vadd.f32 %v3147_v48, %v2735_v4  ;;  %v4841_v57 = vpop.eup %4840  ;;  %4852 = vlog2.f32 %v3454_v8  ;;  %v3457_v4 = vld [vmem:[#allocation3 + $0x60] sm:$0xff]  ;;  %v3414_v48 = vld [vmem:[#allocation2 + $0x108] sm:$0xff]  ;;  %v3578_v16 = vmul.f32 0.6931472, %v4837_v44  ;;  %v3516_v29 = vmul.f32 0.6931472, %v4839_v35 }
 0x900   :  { %v3144_v45 = vpop.xlane.xlu1 %3143  ;;  %3338 = vst.msk [vmem:[#allocation4 + $0xc0] sm:$0xff] %vm20_vm11, %v3274_v10  ;;  %v4843_v30 = vpop.eup %4842  ;;  %4854 = vlog2.f32 %v3483_v20  ;;  %v3765_v24 = vsub.f32 %v3701_v58, %v3637_v33  ;;  %v3417_v38 = vld [vmem:[#allocation2 + $0x120] sm:$0xff]  ;;  %v2744_v44 = vld [vmem:[#allocation4 + $0x130] sm:$0xff]  ;;  %v2739_v20 = vld [vmem:[#allocation4 + $0x108] sm:$0xff] }
 0x901   :  { %v3278_v60 = vadd.f32 %v3144_v45, %v2734_v14  ;;  %3343 = vst.msk [vmem:[#allocation4 + $0xe8] sm:$0xff] %vm20_vm11, %v3279_v41  ;;  %v4845_v11 = vpop.eup %4844  ;;  %4856 = vlog2.f32 %v3452_v46  ;;  %v7954_v32 = vadd.f32 %v3582_v13, %v3417_v38  ;;  %v3488_v46 = vld [vmem:[#allocation3 + $0x158] sm:$0xff] }
 0x902   :  { %v4847_v1 = vpop.eup %4846  ;;  %4858 = vlog2.f32 %v3487_v36  ;;  %v3518_v21 = vmul.f32 0.6931472, %v4845_v11  ;;  %v7956_v36 = vadd.f32 %v3516_v29, %v3384_v55  ;;  %v3459_v29 = vld [vmem:[#allocation3 + $0x70] sm:$0xff] }
 0x903   :  { %3342 = vst.msk [vmem:[#allocation4 + $0xe0] sm:$0xff] %vm20_vm11, %v3278_v60  ;;  %v4849_v40 = vpop.eup %4848  ;;  %4860 = vlog2.f32 %v3453_v9  ;;  %v3382_v60 = vld [vmem:[#allocation2 + $0x8] sm:$0xff]  ;;  %v3520_v43 = vmul.f32 0.6931472, %v4847_v1  ;;  %v7961_v9 = vld [vmem:[%s8253_s0 + $0x10] sm:$0xff] }
 0x904   :  { %v4851_v41 = vpop.eup %4850  ;;  %4862 = vlog2.f32 %v3485_v31  ;;  %vm3895_vm15 = vcmp.ge.s32.totalorder %v7961_v9, 0  ;;  %v7966_v31 = vadd.f32 %v3518_v21, %v3385_v51  ;;  %v3388_v21 = vld [vmem:[#allocation2 + $0x38] sm:$0xff] }
 0x905   :  { %v3141_v5 = vpop.xlane.xlu2 %3140  ;;  %v7939_v0 = vpop.eup %4852  ;;  %4864 = vlog2.f32 %v3457_v4  ;;  %v3386_v4 = vld [vmem:[#allocation2 + $0x28] sm:$0xff] }
 0x906   :  { %v3156_v25 = vpop.xlane.xlu0 %3155  ;;  %v3277_v28 = vadd.f32 %v3141_v5, %v2733_v47  ;;  %v3580_v47 = vmul.f32 0.6931472, %v4841_v57  ;;  %v7942_v62 = vpop.eup %4854  ;;  %v3456_v5 = vld [vmem:[#allocation3 + $0x58] sm:$0xff]  ;;  %4866 = vlog2.f32 %v3486_v7  ;;  %v7972_v13 = vadd.f32 %v3520_v43, %v3386_v4  ;;  %v3423_v43 = vld [vmem:[#allocation2 + $0x150] sm:$0xff]  ;;  %v3702_v4 = vld [vmem:[#allocation4 + $0x8] sm:$0xff] }
 0x907   :  { %v3282_v59 = vadd.f32 %v3156_v25, %v2738_v39  ;;  %v3415_v39 = vld [vmem:[#allocation2 + $0x110] sm:$0xff]  ;;  %v3522_v25 = vmul.f32 0.6931472, %v4843_v30  ;;  %v4857_v6 = vpop.eup %4856  ;;  %4868 = vlog2.f32 %v3455_v37  ;;  %v3588_v30 = vmul.f32 0.6931472, %v4849_v40  ;;  %v3418_v40 = vld [vmem:[#allocation2 + $0x128] sm:$0xff] }
 0x908   :  { %v3153_v63 = vpop.xlane.xlu1 %3152  ;;  %3341 = vst.msk [vmem:[#allocation4 + $0xd8] sm:$0xff] %vm20_vm11, %v3277_v28  ;;  %v7950_v28 = vadd.f32 %v3512_v50, %v3382_v60  ;;  %v4859_v8 = vpop.eup %4858  ;;  %v7952_v35 = vadd.f32 %v3578_v16, %v3415_v39  ;;  %4870 = vlog2.f32 %v3490_v27  ;;  %v3420_v7 = vld [vmem:[#allocation2 + $0x138] sm:$0xff]  ;;  %v3586_v52 = vmul.f32 0.6931472, %v7942_v62 }
 0x909   :  { %v3281_v15 = vadd.f32 %v3153_v63, %v2737_v56  ;;  %3346 = vst.msk [vmem:[#allocation4 + $0x100] sm:$0xff] %vm20_vm11, %v3282_v59  ;;  %v7945_v56 = vadd.f32 %v3576_v2, %v3414_v48  ;;  %v7948_v59 = vadd.f32 %v3514_v19, %v3383_v49  ;;  %v3416_v63 = vld [vmem:[#allocation2 + $0x118] sm:$0xff]  ;;  %v4861_v57 = vpop.eup %4860  ;;  %4872 = vlog2.f32 %v3456_v5  ;;  %v3703_v48 = vld [vmem:[#allocation4 + $0x10] sm:$0xff] }
 0x90a   :  { %v3584_v19 = vmul.f32 0.6931472, %v4851_v41  ;;  %v7964_v2 = vadd.f32 %v3580_v47, %v3416_v63  ;;  %4874 = vlog2.f32 %v3488_v46  ;;  %v3528_v41 = vmul.f32 0.6931472, %v7939_v0  ;;  %v3419_v0 = vld [vmem:[#allocation2 + $0x130] sm:$0xff]  ;;  %v3389_v63 = vld [vmem:[#allocation2 + $0x40] sm:$0xff] }
 0x90b   :  { %3345 = vst.msk [vmem:[#allocation4 + $0xf8] sm:$0xff] %vm20_vm11, %v3281_v15  ;;  %v3387_v15 = vld [vmem:[#allocation2 + $0x30] sm:$0xff]  ;;  %v3524_v16 = vmul.f32 0.6931472, %v4857_v6  ;;  %v7977_v60 = vadd.f32 %v3588_v30, %v3420_v7  ;;  %v3526_v49 = vmul.f32 0.6931472, %v4861_v57  ;;  %v3767_v27 = vsub.f32 %v3703_v48, %v7948_v59 }
 0x90c   :  { %v7968_v1 = vadd.f32 %v3522_v25, %v3387_v15  ;;  %v3594_v39 = vmul.f32 0.6931472, %v4859_v8  ;;  %v3390_v25 = vld [vmem:[#allocation2 + $0x48] sm:$0xff]  ;;  %v3491_v5 = vld [vmem:[#allocation3 + $0x170] sm:$0xff] }
 0x90d   :  { %v3150_v53 = vpop.xlane.xlu2 %3149  ;;  %v2747_v6 = vld [vmem:[#allocation4 + $0x148] sm:$0xff]  ;;  %v7985_v38 = vadd.f32 %v3528_v41, %v3390_v25 }
 0x90e   :  { %v3165_v17 = vpop.xlane.xlu0 %3164  ;;  %v3280_v14 = vadd.f32 %v3150_v53, %v2736_v3  ;;  %v4863_v3 = vpop.eup %4862  ;;  %v7990_v59 = vld [vmem:[%s8253_s0 + $0x8] sm:$0xff] }
 0x90f   :  { %v3285_v18 = vadd.f32 %v3165_v17, %v2741_v34  ;;  %v3460_v34 = vld [vmem:[#allocation3 + $0x78] sm:$0xff]  ;;  %v3489_v17 = vld [vmem:[#allocation3 + $0x160] sm:$0xff]  ;;  %v4865_v53 = vpop.eup %4864  ;;  %v3590_v55 = vmul.f32 0.6931472, %v4863_v3  ;;  %vm3894_vm0 = vcmp.ge.s32.totalorder %v7990_v59, 0  ;;  %v7995_v3 = vadd.f32 %v3524_v16, %v3388_v21  ;;  %v3706_v7 = vld [vmem:[#allocation4 + $0x28] sm:$0xff] }
 0x910   :  { %v3162_v26 = vpop.xlane.xlu1 %3161  ;;  %v3733_v45 = vld [vmem:[#allocation4 + $0x100] sm:$0xff]  ;;  %3344 = vst.msk [vmem:[#allocation4 + $0xf0] sm:$0xff] %vm20_vm11, %v3280_v14  ;;  %v4867_v14 = vpop.eup %4866  ;;  %4876 = vlog2.f32 %v3460_v34  ;;  %v3534_v15 = vmul.f32 0.6931472, %v4865_v53  ;;  %v3463_v16 = vld [vmem:[#allocation3 + $0x90] sm:$0xff] }
 0x911   :  { %v3284_v10 = vadd.f32 %v3162_v26, %v2740_v42  ;;  %3349 = vst.msk [vmem:[#allocation4 + $0x118] sm:$0xff] %vm20_vm11, %v3285_v18  ;;  %v3797_v22 = vsub.f32 %v3733_v45, %v3669_v54  ;;  %v3458_v18 = vld [vmem:[#allocation3 + $0x68] sm:$0xff]  ;;  %v4869_v45 = vpop.eup %4868  ;;  %4878 = vlog2.f32 %v3489_v17  ;;  %v3592_v51 = vmul.f32 0.6931472, %v4867_v14  ;;  %v3421_v34 = vld [vmem:[#allocation2 + $0x140] sm:$0xff] }
 0x912   :  { %v4871_v37 = vpop.eup %4870  ;;  %4880 = vlog2.f32 %v3458_v18  ;;  %v3530_v46 = vmul.f32 0.6931472, %v4869_v45  ;;  %v7997_v17 = vadd.f32 %v3594_v39, %v3423_v43  ;;  %v3392_v18 = vld [vmem:[#allocation2 + $0x58] sm:$0xff]  ;;  %v3393_v14 = vld [vmem:[#allocation2 + $0x60] sm:$0xff]  ;;  %v8001_v41 = vadd.f32 %v3590_v55, %v3421_v34 }
 0x913   :  { %3348 = vst.msk [vmem:[#allocation4 + $0x110] sm:$0xff] %vm20_vm11, %v3284_v10  ;;  %v3829_v12 = vsub.f32 %v3765_v24, %v3797_v22  ;;  %v3493_v10 = vld [vmem:[#allocation3 + $0x180] sm:$0xff]  ;;  %v7980_v22 = vadd.f32 %v3584_v19, %v3418_v40  ;;  %v4873_v47 = vpop.eup %4872  ;;  %v3600_v57 = vmul.f32 0.6931472, %v4871_v37  ;;  %v3391_v19 = vld [vmem:[#allocation2 + $0x50] sm:$0xff]  ;;  %v7999_v40 = vadd.f32 %v3526_v49, %v3389_v63 }
 0x914   :  { %4882 = vlog2.f32 %v3493_v10  ;;  %v4875_v8 = vpop.eup %4874  ;;  %v8005_v45 = vadd.f32 %v3534_v15, %v3393_v14  ;;  %v8012_v39 = vadd.f32 %v3530_v46, %v3391_v19  ;;  %v3766_v55 = vsub.f32 %v3702_v4, %v7950_v28  ;;  %v2745_v28 = vld [vmem:[#allocation4 + $0x138] sm:$0xff]  ;;  %v3705_v14 = vld [vmem:[#allocation4 + $0x20] sm:$0xff] }
 0x915   :  { %v3861_v23 = vmul.f32 0.1, %v3829_v12  ;;  %v3159_v42 = vpop.xlane.xlu2 %3158  ;;  %v2742_v12 = vld [vmem:[#allocation4 + $0x120] sm:$0xff]  ;;  %4884 = vlog2.f32 %v3459_v29  ;;  %v8003_v10 = vmul.f32 0.6931472, %v4875_v8  ;;  %v3492_v8 = vld [vmem:[#allocation3 + $0x178] sm:$0xff] }
 0x916   :  { %v3174_v11 = vpop.xlane.xlu0 %3173  ;;  %v3283_v54 = vadd.f32 %v3159_v42, %v2739_v20  ;;  %v3422_v42 = vld [vmem:[#allocation2 + $0x148] sm:$0xff]  ;;  %4886 = vlog2.f32 %v3491_v5 }
 0x917   :  { %v3288_v33 = vadd.f32 %v3174_v11, %v2744_v44  ;;  %v3925_v50 = vsel %vm3893_vm14, %v3861_v23, 0.0  ;;  %v2746_v44 = vld [vmem:[#allocation4 + $0x140] sm:$0xff]  ;;  %v3532_v11 = vmul.f32 0.6931472, %v4873_v47  ;;  %4888 = vlog2.f32 %v3463_v16 }
 0x918   :  { %v3171_v58 = vpop.xlane.xlu1 %3170  ;;  %3959 = vperm.xlu1 %4437, %v3925_v50   ;;  %3347 = vst.msk [vmem:[#allocation4 + $0x108] sm:$0xff] %vm20_vm11, %v3283_v54  ;;  %v3736_v49 = vld [vmem:[#allocation4 + $0x118] sm:$0xff] }
 0x919   :  { %v3287_v26 = vadd.f32 %v3171_v58, %v2743_v61  ;;  %3352 = vst.msk [vmem:[#allocation4 + $0x130] sm:$0xff] %vm20_vm11, %v3288_v33  ;;  %v4877_v61 = vpop.eup %4876  ;;  %v8019_v9 = vadd.f32 %v3532_v11, %v3392_v18 }
 0x91a   :  { %v3735_v24 = vld [vmem:[#allocation4 + $0x110] sm:$0xff]  ;;  %v4879_v53 = vpop.eup %4878  ;;  %v3540_v5 = vmul.f32 0.6931472, %v4877_v61 }
 0x91b   :  { %3351 = vst.msk [vmem:[#allocation4 + $0x128] sm:$0xff] %vm20_vm11, %v3287_v26  ;;  %v3799_v62 = vsub.f32 %v3735_v24, %v7952_v35  ;;  %v7993_v35 = vadd.f32 %v3586_v52, %v3419_v0  ;;  %v4881_v26 = vpop.eup %4880  ;;  %v3426_v52 = vld [vmem:[#allocation2 + $0x168] sm:$0xff]  ;;  %v8010_v0 = vadd.f32 %v3592_v51, %v3422_v42  ;;  %v3704_v51 = vld [vmem:[#allocation4 + $0x18] sm:$0xff]  ;;  %v3598_v15 = vmul.f32 0.6931472, %v4879_v53 }
 0x91c   :  { %v4883_v29 = vpop.eup %4882  ;;  %v8014_v47 = vadd.f32 %v3600_v57, %v3426_v52  ;;  %v3536_v46 = vmul.f32 0.6931472, %v4881_v26  ;;  %v8028_v57 = vld [vmem:[%s8253_s0 + $0x18] sm:$0xff]  ;;  %v4957_v42 = vld [vmem:[%s8253_s0 + $0x28] sm:$0xff]  ;;  %v3768_v19 = vsub.f32 %v3704_v51, %v7956_v36  ;;  %v3395_v36 = vld [vmem:[#allocation2 + $0x70] sm:$0xff] }
 0x91d   :  { %v3831_v20 = vsub.f32 %v3767_v27, %v3799_v62  ;;  %v3168_v30 = vpop.xlane.xlu2 %3167  ;;  %v3461_v27 = vld [vmem:[#allocation3 + $0x80] sm:$0xff]  ;;  %v4885_v62 = vpop.eup %4884  ;;  %vm3896_vm7 = vcmp.ge.s32.totalorder %v8028_v57, 0  ;;  %vm3898_vm2 = vcmp.ge.s32.totalorder %v4957_v42, 0  ;;  %v3424_v53 = vld [vmem:[#allocation2 + $0x158] sm:$0xff] }
 0x91e   :  { %v3183_v23 = vpop.xlane.xlu0 %3182  ;;  %v3286_v54 = vadd.f32 %v3168_v30, %v2742_v12  ;;  %v3770_v12 = vsub.f32 %v3706_v7, %v7972_v13  ;;  %4890 = vlog2.f32 %v3461_v27  ;;  %v8034_v13 = vld [vmem:[%s8253_s0 + $0x20] sm:$0xff] }
 0x91f   :  { %v3291_v33 = vadd.f32 %v3183_v23, %v2747_v6  ;;  %v3863_v50 = vmul.f32 0.1, %v3831_v20  ;;  %v3734_v24 = vld [vmem:[#allocation4 + $0x108] sm:$0xff]  ;;  %v3496_v6 = vld [vmem:[#allocation3 + $0x198] sm:$0xff]  ;;  %v2750_v20 = vld [vmem:[#allocation4 + $0x160] sm:$0xff]  ;;  %vm3897_vm5 = vcmp.ge.s32.totalorder %v8034_v13, 0 }
 0x920   :  { %v3180_v58 = vpop.xlane.xlu1 %3179  ;;  %3350 = vst.msk [vmem:[#allocation4 + $0x120] sm:$0xff] %vm20_vm11, %v3286_v54  ;;  %v3798_v21 = vsub.f32 %v3734_v24, %v7945_v56  ;;  %v3800_v56 = vsub.f32 %v3736_v49, %v7964_v2  ;;  %v3538_v23 = vmul.f32 0.6931472, %v4885_v62  ;;  %v3606_v2 = vmul.f32 0.6931472, %v4883_v29  ;;  %v3394_v54 = vld [vmem:[#allocation2 + $0x68] sm:$0xff] }
 0x921   :  { %v3290_v48 = vadd.f32 %v3180_v58, %v2746_v44  ;;  %3355 = vst.msk [vmem:[#allocation4 + $0x148] sm:$0xff] %vm20_vm11, %v3291_v33  ;;  %v3927_v37 = vsel %vm3895_vm15, %v3863_v50, 0.0  ;;  %v4887_v44 = vpop.eup %4886  ;;  %4892 = vlog2.f32 %v3496_v6  ;;  %v3425_v33 = vld [vmem:[#allocation2 + $0x160] sm:$0xff]  ;;  %v3396_v24 = vld [vmem:[#allocation2 + $0x78] sm:$0xff]  ;;  %v8050_v59 = vadd.f32 %v3536_v46, %v3394_v54  ;;  %v3494_v6 = vld [vmem:[#allocation3 + $0x188] sm:$0xff] }
 0x922   :  { %3969 = vperm.xlu2 %4438, %v3927_v37   ;;  %v3738_v25 = vld [vmem:[#allocation4 + $0x128] sm:$0xff]  ;;  %v3830_v43 = vsub.f32 %v3766_v55, %v3798_v21  ;;  %4894 = vlog2.f32 %v3492_v8  ;;  %v3602_v26 = vmul.f32 0.6931472, %v4887_v44  ;;  %v3832_v16 = vsub.f32 %v3768_v19, %v3800_v56  ;;  %v3709_v29 = vld [vmem:[#allocation4 + $0x40] sm:$0xff]  ;;  %v4889_v27 = vpop.eup %4888  ;;  %v3739_v21 = vld [vmem:[#allocation4 + $0x130] sm:$0xff] }
 0x923   :  { %3354 = vst.msk [vmem:[#allocation4 + $0x140] sm:$0xff] %vm20_vm11, %v3290_v48  ;;  %v3802_v63 = vsub.f32 %v3738_v25, %v7980_v22  ;;  %v2749_v22 = vld [vmem:[#allocation4 + $0x158] sm:$0xff]  ;;  %v3462_v48 = vld [vmem:[#allocation3 + $0x88] sm:$0xff]  ;;  %v8044_v37 = vadd.f32 %v8003_v10, %v3424_v53  ;;  %v3429_v49 = vld [vmem:[#allocation2 + $0x180] sm:$0xff]  ;;  %v8048_v25 = vadd.f32 %v3598_v15, %v3425_v33  ;;  %v8062_v46 = vadd.f32 %v3538_v23, %v3395_v36 }
 0x924   :  { %v3862_v11 = vmul.f32 0.1, %v3830_v43  ;;  %v4891_v10 = vpop.eup %4890  ;;  %v3427_v44 = vld [vmem:[#allocation2 + $0x170] sm:$0xff]  ;;  %4896 = vlog2.f32 %v3462_v48  ;;  %v3466_v15 = vld [vmem:[#allocation3 + $0xa8] sm:$0xff]  ;;  %v3546_v53 = vmul.f32 0.6931472, %v4889_v27 }
 0x925   :  { %v3834_v61 = vsub.f32 %v3770_v12, %v3802_v63  ;;  %v3177_v34 = vpop.xlane.xlu2 %3176  ;;  %v8052_v12 = vadd.f32 %v3540_v5, %v3396_v24  ;;  %v3769_v63 = vsub.f32 %v3705_v14, %v7966_v31  ;;  %v3773_v5 = vsub.f32 %v3709_v29, %v7999_v40  ;;  %v3707_v56 = vld [vmem:[#allocation4 + $0x30] sm:$0xff]  ;;  %v4958_v23 = vld [vmem:[%s8253_s0 + $0x40] sm:$0xff]  ;;  %v3708_v48 = vld [vmem:[#allocation4 + $0x38] sm:$0xff] }
 0x926   :  { %v3192_v30 = vpop.xlane.xlu0 %3191  ;;  %v3289_v50 = vadd.f32 %v3177_v34, %v2745_v28  ;;  %v3926_v52 = vsel %vm3894_vm0, %v3862_v11, 0.0  ;;  %4898 = vlog2.f32 %v3494_v6  ;;  %v2752_v11 = vld [vmem:[#allocation4 + $0x170] sm:$0xff]  ;;  %v3542_v19 = vmul.f32 0.6931472, %v4891_v10 }
 0x927   :  { %v3294_v58 = vadd.f32 %v3192_v30, %v2750_v20  ;;  %v3866_v18 = vmul.f32 0.1, %v3834_v61  ;;  %3964 = vperm.xlu0 %4439, %v3926_v52   ;;  %v3737_v55 = vld [vmem:[#allocation4 + $0x120] sm:$0xff]  ;;  %v8057_v20 = vadd.f32 %v3606_v2, %v3429_v49  ;;  %v4893_v28 = vpop.eup %4892  ;;  %v2748_v61 = vld [vmem:[#allocation4 + $0x150] sm:$0xff]  ;;  %v3864_v30 = vmul.f32 0.1, %v3832_v16 }
 0x928   :  { %v3189_v4 = vpop.xlane.xlu1 %3188  ;;  %3353 = vst.msk [vmem:[#allocation4 + $0x138] sm:$0xff] %vm20_vm11, %v3289_v50  ;;  %v3801_v51 = vsub.f32 %v3737_v55, %v7954_v32  ;;  %v4895_v31 = vpop.eup %4894  ;;  %v2753_v32 = vld [vmem:[#allocation4 + $0x178] sm:$0xff]  ;;  %v3803_v2 = vsub.f32 %v3739_v21, %v7993_v35  ;;  %4900 = vlog2.f32 %v3466_v15  ;;  %vm3901_vm6 = vcmp.ge.s32.totalorder %v4958_v23, 0  ;;  %v3499_v52 = vld [vmem:[#allocation3 + $0x1b0] sm:$0xff]  ;;  %v3742_v6 = vld [vmem:[#allocation4 + $0x148] sm:$0xff] }
 0x929   :  { %v3293_v7 = vadd.f32 %v3189_v4, %v2749_v22  ;;  %3358 = vst.msk [vmem:[#allocation4 + $0x160] sm:$0xff] %vm20_vm11, %v3294_v58  ;;  %v3930_v62 = vsel %vm3898_vm2, %v3866_v18, 0.0  ;;  %v8064_v22 = vadd.f32 %v3602_v26, %v3427_v44  ;;  %v3771_v54 = vsub.f32 %v3707_v56, %v7968_v1  ;;  %v3397_v58 = vld [vmem:[#allocation2 + $0x80] sm:$0xff]  ;;  %v3464_v50 = vld [vmem:[#allocation3 + $0x98] sm:$0xff]  ;;  %v3399_v27 = vld [vmem:[#allocation2 + $0x90] sm:$0xff] }
 0x92a   :  { %3984 = vperm.xlu2 %4438, %v3930_v62   ;;  %v3741_v8 = vld [vmem:[#allocation4 + $0x140] sm:$0xff]  ;;  %v3833_v34 = vsub.f32 %v3769_v63, %v3801_v51  ;;  %v3612_v4 = vmul.f32 0.6931472, %v4893_v28  ;;  %v4897_v16 = vpop.eup %4896  ;;  %v3928_v36 = vsel %vm3896_vm7, %v3864_v30, 0.0  ;;  %v3712_v1 = vld [vmem:[#allocation4 + $0x58] sm:$0xff]  ;;  %v8077_v10 = vadd.f32 %v3542_v19, %v3397_v58  ;;  %v3495_v63 = vld [vmem:[#allocation3 + $0x190] sm:$0xff] }
 0x92b   :  { %3357 = vst.msk [vmem:[#allocation4 + $0x158] sm:$0xff] %vm20_vm11, %v3293_v7  ;;  %v3805_v43 = vsub.f32 %v3741_v8, %v8001_v41  ;;  %v3604_v7 = vmul.f32 0.6931472, %v4895_v31  ;;  %v3835_v49 = vsub.f32 %v3771_v54, %v3803_v2  ;;  %v3432_v62 = vld [vmem:[#allocation2 + $0x198] sm:$0xff]  ;;  %v8079_v57 = vadd.f32 %v3546_v53, %v3399_v27  ;;  %v3710_v31 = vld [vmem:[#allocation4 + $0x48] sm:$0xff]  ;;  %v2756_v30 = vld [vmem:[#allocation4 + $0x190] sm:$0xff] }
 0x92c   :  { %v3865_v33 = vmul.f32 0.1, %v3833_v34  ;;  %4902 = vlog2.f32 %v3464_v50  ;;  %v4899_v13 = vpop.eup %4898  ;;  %v3772_v51 = vsub.f32 %v3708_v48, %v7995_v3  ;;  %v3428_v15 = vld [vmem:[#allocation2 + $0x178] sm:$0xff]  ;;  %v8084_v28 = vadd.f32 %v3612_v4, %v3432_v62  ;;  %v2751_v3 = vld [vmem:[#allocation4 + $0x168] sm:$0xff]  ;;  %v4959_v19 = vld [vmem:[%s8253_s0 + $0x30] sm:$0xff] }
 0x92d   :  { %v3837_v42 = vsub.f32 %v3773_v5, %v3805_v43  ;;  %v3186_v41 = vpop.xlane.xlu2 %3185  ;;  %4904 = vlog2.f32 %v3499_v52  ;;  %v3776_v43 = vsub.f32 %v3712_v1, %v8019_v9  ;;  %v3867_v34 = vmul.f32 0.1, %v3835_v49  ;;  %v4960_v9 = vld [vmem:[%s8253_s0 + $0x38] sm:$0xff]  ;;  %v3469_v58 = vld [vmem:[#allocation3 + $0xc0] sm:$0xff]  ;;  %v3398_v48 = vld [vmem:[#allocation2 + $0x88] sm:$0xff] }
 0x92e   :  { %v3201_v40 = vpop.xlane.xlu0 %3200  ;;  %v3292_v18 = vadd.f32 %v3186_v41, %v2748_v61  ;;  %v3929_v24 = vsel %vm3897_vm5, %v3865_v33, 0.0  ;;  %v4901_v5 = vpop.eup %4900  ;;  %v8089_v61 = vadd.f32 %v3604_v7, %v3428_v15  ;;  %v3806_v2 = vsub.f32 %v3742_v6, %v8010_v0  ;;  %v4961_v0 = vld [vmem:[%s8253_s0 + $0x58] sm:$0xff]  ;;  %v3497_v7 = vld [vmem:[#allocation3 + $0x1a0] sm:$0xff]  ;;  %v3715_v49 = vld [vmem:[#allocation4 + $0x70] sm:$0xff] }
 0x92f   :  { %v3297_v35 = vadd.f32 %v3201_v40, %v2753_v32  ;;  %v3869_v26 = vmul.f32 0.1, %v3837_v42  ;;  %3974 = vperm.xlu0 %4439, %v3928_v36   ;;  %3979 = vperm.xlu1 %4437, %v3929_v24   ;;  %v3740_v21 = vld [vmem:[#allocation4 + $0x138] sm:$0xff]  ;;  %v3544_v32 = vmul.f32 0.6931472, %v4897_v16  ;;  %4906 = vlog2.f32 %v3495_v63  ;;  %v2755_v42 = vld [vmem:[#allocation4 + $0x188] sm:$0xff] }
 0x930   :  { %v3198_v14 = vpop.xlane.xlu1 %3197  ;;  %3356 = vst.msk [vmem:[#allocation4 + $0x150] sm:$0xff] %vm20_vm11, %v3292_v18  ;;  %v3804_v8 = vsub.f32 %v3740_v21, %v7977_v60  ;;  %vm3899_vm1 = vcmp.ge.s32.totalorder %v4959_v19, 0  ;;  %vm3900_vm9 = vcmp.ge.s32.totalorder %v4960_v9, 0  ;;  %v3608_v53 = vmul.f32 0.6931472, %v4899_v13  ;;  %v3502_v1 = vld [vmem:[#allocation3 + $0x1c8] sm:$0xff] }
 0x931   :  { %v3296_v29 = vadd.f32 %v3198_v14, %v2752_v11  ;;  %3361 = vst.msk [vmem:[#allocation4 + $0x178] sm:$0xff] %vm20_vm11, %v3297_v35  ;;  %v3933_v55 = vsel %vm3901_vm6, %v3869_v26, 0.0  ;;  %v3465_v11 = vld [vmem:[#allocation3 + $0xa0] sm:$0xff]  ;;  %vm3904_vm10 = vcmp.ge.s32.totalorder %v4961_v0, 0  ;;  %v3774_v23 = vsub.f32 %v3710_v31, %v7985_v38  ;;  %v3711_v26 = vld [vmem:[#allocation4 + $0x50] sm:$0xff]  ;;  %v3430_v38 = vld [vmem:[#allocation2 + $0x188] sm:$0xff] }
 0x932   :  { %3999 = vperm.xlu2 %4438, %v3933_v55   ;;  %v3744_v44 = vld [vmem:[#allocation4 + $0x158] sm:$0xff]  ;;  %v3836_v60 = vsub.f32 %v3772_v51, %v3804_v8  ;;  %v3552_v54 = vmul.f32 0.6931472, %v4901_v5  ;;  %v4903_v50 = vpop.eup %4902  ;;  %4908 = vlog2.f32 %v3465_v11  ;;  %v3745_v55 = vld [vmem:[#allocation4 + $0x160] sm:$0xff]  ;;  %v8106_v21 = vadd.f32 %v3544_v32, %v3398_v48  ;;  %v2759_v32 = vld [vmem:[#allocation4 + $0x1a8] sm:$0xff] }
 0x933   :  { %3360 = vst.msk [vmem:[#allocation4 + $0x170] sm:$0xff] %vm20_vm11, %v3296_v29  ;;  %v3808_v56 = vsub.f32 %v3744_v44, %v8044_v37  ;;  %v4905_v52 = vpop.eup %4904  ;;  %v3931_v29 = vsel %vm3899_vm1, %v3867_v34, 0.0  ;;  %v3838_v24 = vsub.f32 %v3774_v23, %v3806_v2  ;;  %v8108_v6 = vadd.f32 %v3608_v53, %v3430_v38  ;;  %v2758_v2 = vld [vmem:[#allocation4 + $0x1a0] sm:$0xff]  ;;  %v3400_v19 = vld [vmem:[#allocation2 + $0x98] sm:$0xff]  ;;  %v4964_v53 = vld [vmem:[%s8253_s0 + $0x70] sm:$0xff] }
 0x934   :  { %v3868_v33 = vmul.f32 0.1, %v3836_v60  ;;  %4910 = vlog2.f32 %v3469_v58  ;;  %v3775_v13 = vsub.f32 %v3711_v26, %v8012_v39  ;;  %v3548_v44 = vmul.f32 0.6931472, %v4903_v50  ;;  %v3467_v0 = vld [vmem:[#allocation3 + $0xb0] sm:$0xff] }
 0x935   :  { %v3840_v37 = vsub.f32 %v3776_v43, %v3808_v56  ;;  %v3195_v41 = vpop.xlane.xlu2 %3194  ;;  %v4907_v63 = vpop.eup %4906  ;;  %4912 = vlog2.f32 %v3497_v7  ;;  %v3779_v15 = vsub.f32 %v3715_v49, %v8062_v46  ;;  %v3713_v43 = vld [vmem:[#allocation4 + $0x60] sm:$0xff]  ;;  %v3402_v56 = vld [vmem:[#allocation2 + $0xa8] sm:$0xff]  ;;  %v3618_v31 = vmul.f32 0.6931472, %v4905_v52 }
 0x936   :  { %v3210_v40 = vpop.xlane.xlu0 %3209  ;;  %v3295_v35 = vadd.f32 %v3195_v41, %v2751_v3  ;;  %v3932_v36 = vsel %vm3900_vm9, %v3868_v33, 0.0  ;;  %4914 = vlog2.f32 %v3502_v1  ;;  %v3870_v3 = vmul.f32 0.1, %v3838_v24  ;;  %v4962_v46 = vld [vmem:[%s8253_s0 + $0x48] sm:$0xff]  ;;  %v3435_v33 = vld [vmem:[#allocation2 + $0x1b0] sm:$0xff] }
 0x937   :  { %v3300_v4 = vadd.f32 %v3210_v40, %v2756_v30  ;;  %v3872_v14 = vmul.f32 0.1, %v3840_v37  ;;  %3989 = vperm.xlu0 %4439, %v3931_v29   ;;  %3994 = vperm.xlu1 %4437, %v3932_v36   ;;  %v3743_v62 = vld [vmem:[#allocation4 + $0x150] sm:$0xff]  ;;  %v2754_v30 = vld [vmem:[#allocation4 + $0x180] sm:$0xff]  ;;  %v3809_v39 = vsub.f32 %v3745_v55, %v8048_v25  ;;  %vm3902_vm3 = vcmp.ge.s32.totalorder %v4962_v46, 0  ;;  %v3500_v36 = vld [vmem:[#allocation3 + $0x1b8] sm:$0xff] }
 0x938   :  { %v3207_v18 = vpop.xlane.xlu1 %3206  ;;  %3359 = vst.msk [vmem:[#allocation4 + $0x168] sm:$0xff] %vm20_vm11, %v3295_v35  ;;  %v3807_v51 = vsub.f32 %v3743_v62, %v7997_v17  ;;  %v8117_v17 = vadd.f32 %v3552_v54, %v3402_v56  ;;  %v4909_v60 = vpop.eup %4908  ;;  %vm3907_vm4 = vcmp.ge.s32.totalorder %v4964_v53, 0  ;;  %v3777_v40 = vsub.f32 %v3713_v43, %v8005_v45  ;;  %v3714_v35 = vld [vmem:[#allocation4 + $0x68] sm:$0xff]  ;;  %v3431_v29 = vld [vmem:[#allocation2 + $0x190] sm:$0xff]  ;;  %v3748_v1 = vld [vmem:[#allocation4 + $0x178] sm:$0xff] }
 0x939   :  { %v3299_v16 = vadd.f32 %v3207_v18, %v2755_v42  ;;  %3364 = vst.msk [vmem:[#allocation4 + $0x190] sm:$0xff] %vm20_vm11, %v3300_v4  ;;  %v3936_v27 = vsel %vm3904_vm10, %v3872_v14, 0.0  ;;  %v3610_v42 = vmul.f32 0.6931472, %v4907_v63  ;;  %v8129_v41 = vadd.f32 %v3548_v44, %v3400_v19  ;;  %v3468_v18 = vld [vmem:[#allocation3 + $0xb8] sm:$0xff]  ;;  %v2762_v56 = vld [vmem:[#allocation4 + $0x1c0] sm:$0xff] }
 0x93a   :  { %4014 = vperm.xlu2 %4438, %v3936_v27   ;;  %v3747_v8 = vld [vmem:[#allocation4 + $0x170] sm:$0xff]  ;;  %v3839_v34 = vsub.f32 %v3775_v13, %v3807_v51  ;;  %v4911_v23 = vpop.eup %4910  ;;  %v8131_v14 = vadd.f32 %v3618_v31, %v3435_v33  ;;  %v3934_v7 = vsel %vm3902_vm3, %v3870_v3, 0.0  ;;  %v3841_v45 = vsub.f32 %v3777_v40, %v3809_v39  ;;  %v3498_v51 = vld [vmem:[#allocation3 + $0x1a8] sm:$0xff]  ;;  %v2757_v31 = vld [vmem:[#allocation4 + $0x198] sm:$0xff] }
 0x93b   :  { %3363 = vst.msk [vmem:[#allocation4 + $0x188] sm:$0xff] %vm20_vm11, %v3299_v16  ;;  %v3811_v5 = vsub.f32 %v3747_v8, %v8064_v22  ;;  %v4963_v22 = vld [vmem:[%s8253_s0 + $0x50] sm:$0xff]  ;;  %v4913_v26 = vpop.eup %4912  ;;  %v3718_v16 = vld [vmem:[#allocation4 + $0x88] sm:$0xff]  ;;  %v3550_v27 = vmul.f32 0.6931472, %v4909_v60  ;;  %v8137_v62 = vadd.f32 %v3610_v42, %v3431_v29  ;;  %4916 = vlog2.f32 %v3467_v0  ;;  %v2761_v3 = vld [vmem:[#allocation4 + $0x1b8] sm:$0xff] }
 0x93c   :  { %vm3903_vm8 = vcmp.ge.s32.totalorder %v4963_v22, 0  ;;  %v3871_v25 = vmul.f32 0.1, %v3839_v34  ;;  %v4915_v24 = vpop.eup %4914  ;;  %v3778_v55 = vsub.f32 %v3714_v35, %v8050_v59  ;;  %4918 = vlog2.f32 %v3468_v18  ;;  %v4965_v34 = vld [vmem:[%s8253_s0 + $0x60] sm:$0xff]  ;;  %v3471_v0 = vld [vmem:[#allocation3 + $0xd0] sm:$0xff] }
 0x93d   :  { %v3843_v11 = vsub.f32 %v3779_v15, %v3811_v5  ;;  %v3204_v37 = vpop.xlane.xlu2 %3203  ;;  %v3558_v8 = vmul.f32 0.6931472, %v4911_v23  ;;  %v3782_v44 = vsub.f32 %v3718_v16, %v8106_v21  ;;  %v3716_v5 = vld [vmem:[#allocation4 + $0x78] sm:$0xff]  ;;  %v3614_v43 = vmul.f32 0.6931472, %v4913_v26  ;;  %v4966_v21 = vld [vmem:[%s8253_s0 + $0x68] sm:$0xff] }
 0x93e   :  { %v3219_v9 = vpop.xlane.xlu0 %3218  ;;  %v3298_v58 = vadd.f32 %v3204_v37, %v2754_v30  ;;  %v3935_v52 = vsel %vm3903_vm8, %v3871_v25, 0.0  ;;  %4920 = vlog2.f32 %v3500_v36  ;;  %v3812_v59 = vsub.f32 %v3748_v1, %v8089_v61  ;;  %v3401_v39 = vld [vmem:[#allocation2 + $0xa0] sm:$0xff]  ;;  %v4967_v61 = vld [vmem:[%s8253_s0 + $0x88] sm:$0xff]  ;;  %v3503_v18 = vld [vmem:[#allocation3 + $0x1d0] sm:$0xff] }
 0x93f   :  { %v3303_v54 = vadd.f32 %v3219_v9, %v2759_v32  ;;  %v3875_v4 = vmul.f32 0.1, %v3843_v11  ;;  %4004 = vperm.xlu0 %4439, %v3934_v7   ;;  %4009 = vperm.xlu1 %4437, %v3935_v52   ;;  %v3746_v38 = vld [vmem:[#allocation4 + $0x168] sm:$0xff]  ;;  %v3873_v32 = vmul.f32 0.1, %v3841_v45  ;;  %vm3905_vm12 = vcmp.ge.s32.totalorder %v4965_v34, 0 }
 0x940   :  { %v3216_v50 = vpop.xlane.xlu1 %3215  ;;  %3362 = vst.msk [vmem:[#allocation4 + $0x180] sm:$0xff] %vm20_vm11, %v3298_v58  ;;  %v3810_v63 = vsub.f32 %v3746_v38, %v8014_v47  ;;  %v3624_v47 = vmul.f32 0.6931472, %v4915_v24  ;;  %vm3906_vm13 = vcmp.ge.s32.totalorder %v4966_v21, 0  ;;  %4922 = vlog2.f32 %v3498_v51  ;;  %v3405_v42 = vld [vmem:[#allocation2 + $0xc0] sm:$0xff]  ;;  %v3438_v26 = vld [vmem:[#allocation2 + $0x1c8] sm:$0xff] }
 0x941   :  { %v3302_v48 = vadd.f32 %v3216_v50, %v2758_v2  ;;  %3367 = vst.msk [vmem:[#allocation4 + $0x1a8] sm:$0xff] %vm20_vm11, %v3303_v54  ;;  %v3939_v49 = vsel %vm3907_vm4, %v3875_v4, 0.0  ;;  %vm3910_vm14 = vcmp.ge.s32.totalorder %v4967_v61, 0  ;;  %v3780_v22 = vsub.f32 %v3716_v5, %v8052_v12  ;;  %v4917_v19 = vpop.eup %4916  ;;  %v3717_v40 = vld [vmem:[#allocation4 + $0x80] sm:$0xff]  ;;  %v3751_v16 = vld [vmem:[#allocation4 + $0x190] sm:$0xff]  ;;  %v3720_v61 = vld [vmem:[#allocation4 + $0x98] sm:$0xff] }
 0x942   :  { %4029 = vperm.xlu2 %4438, %v3939_v49   ;;  %v3750_v13 = vld [vmem:[#allocation4 + $0x188] sm:$0xff]  ;;  %v3842_v30 = vsub.f32 %v3778_v55, %v3810_v63  ;;  %v3657_v11 = vadd.f32 %v3550_v27, %v3401_v39  ;;  %v3433_v33 = vld [vmem:[#allocation2 + $0x1a0] sm:$0xff]  ;;  %v8156_v23 = vadd.f32 %v3558_v8, %v3405_v42  ;;  %v4919_v54 = vpop.eup %4918  ;;  %v3937_v50 = vsel %vm3905_vm12, %v3873_v32, 0.0  ;;  %v3472_v8 = vld [vmem:[#allocation3 + $0xd8] sm:$0xff] }
 0x943   :  { %3366 = vst.msk [vmem:[#allocation4 + $0x1a0] sm:$0xff] %vm20_vm11, %v3302_v48  ;;  %v3814_v15 = vsub.f32 %v3750_v13, %v8108_v6  ;;  %v3844_v35 = vsub.f32 %v3780_v22, %v3812_v59  ;;  %v3721_v12 = vld [vmem:[#allocation4 + $0xa0] sm:$0xff]  ;;  %v3689_v45 = vadd.f32 %v3614_v43, %v3433_v33  ;;  %v8162_v29 = vadd.f32 %v3624_v47, %v3438_v26  ;;  %v3719_v13 = vld [vmem:[#allocation4 + $0x90] sm:$0xff]  ;;  %v3436_v22 = vld [vmem:[#allocation2 + $0x1b8] sm:$0xff] }
 0x944   :  { %v3874_v46 = vmul.f32 0.1, %v3842_v30  ;;  %v4921_v48 = vpop.eup %4920  ;;  %v3781_v36 = vsub.f32 %v3717_v40, %v8077_v10  ;;  %v8167_v38 = vmul.f32 0.6931472, %v4917_v19  ;;  %4924 = vlog2.f32 %v3471_v0  ;;  %v3501_v1 = vld [vmem:[#allocation3 + $0x1c0] sm:$0xff]  ;;  %v3724_v40 = vld [vmem:[#allocation4 + $0xb8] sm:$0xff] }
 0x945   :  { %v3846_v6 = vsub.f32 %v3782_v44, %v3814_v15  ;;  %v3213_v2 = vpop.xlane.xlu2 %3212  ;;  %v3785_v55 = vsub.f32 %v3721_v12, %v3657_v11  ;;  %v3556_v51 = vmul.f32 0.6931472, %v4919_v54  ;;  %4926 = vlog2.f32 %v3503_v18  ;;  %v2765_v44 = vld [vmem:[#allocation4 + $0x1d8] sm:$0xff]  ;;  %v2760_v15 = vld [vmem:[#allocation4 + $0x1b0] sm:$0xff]  ;;  %v4969_v32 = vld [vmem:[%s8253_s0 + $0x80] sm:$0xff] }
 0x946   :  { %v3228_v60 = vpop.xlane.xlu0 %3227  ;;  %v3301_v37 = vadd.f32 %v3213_v2, %v2757_v31  ;;  %v3938_v4 = vsel %vm3906_vm13, %v3874_v46, 0.0  ;;  %v4923_v27 = vpop.eup %4922  ;;  %v3876_v5 = vmul.f32 0.1, %v3844_v35  ;;  %v3620_v43 = vmul.f32 0.6931472, %v4921_v48  ;;  %v4968_v31 = vld [vmem:[%s8253_s0 + $0x78] sm:$0xff] }
 0x947   :  { %v3306_v9 = vadd.f32 %v3228_v60, %v2762_v56  ;;  %v3878_v53 = vmul.f32 0.1, %v3846_v6  ;;  %4019 = vperm.xlu0 %4439, %v3937_v50   ;;  %4024 = vperm.xlu1 %4437, %v3938_v4   ;;  %v3749_v52 = vld [vmem:[#allocation4 + $0x180] sm:$0xff]  ;;  %v2764_v56 = vld [vmem:[#allocation4 + $0x1d0] sm:$0xff]  ;;  %vm3908_vm15 = vcmp.ge.s32.totalorder %v4968_v31, 0  ;;  %vm3909_vm0 = vcmp.ge.s32.totalorder %v4969_v32, 0 }
 0x948   :  { %v3225_v25 = vpop.xlane.xlu1 %3224  ;;  %3365 = vst.msk [vmem:[#allocation4 + $0x198] sm:$0xff] %vm20_vm11, %v3301_v37  ;;  %v3813_v24 = vsub.f32 %v3749_v52, %v8057_v20  ;;  %v3815_v20 = vsub.f32 %v3751_v16, %v8137_v62  ;;  %4928 = vlog2.f32 %v3501_v1  ;;  %v4970_v62 = vld [vmem:[%s8253_s0 + $0xa0] sm:$0xff]  ;;  %v3783_v34 = vsub.f32 %v3719_v13, %v8079_v57  ;;  %v3470_v6 = vld [vmem:[#allocation3 + $0xc8] sm:$0xff] }
 0x949   :  { %v3305_v58 = vadd.f32 %v3225_v25, %v2761_v3  ;;  %3370 = vst.msk [vmem:[#allocation4 + $0x1c0] sm:$0xff] %vm20_vm11, %v3306_v9  ;;  %v3942_v7 = vsel %vm3910_vm14, %v3878_v53, 0.0  ;;  %vm3913_vm7 = vcmp.ge.s32.totalorder %v4970_v62, 0  ;;  %v3616_v21 = vmul.f32 0.6931472, %v4923_v27  ;;  %v3474_v11 = vld [vmem:[#allocation3 + $0xe8] sm:$0xff] }
 0x94a   :  { %4044 = vperm.xlu2 %4438, %v3942_v7   ;;  %v3753_v49 = vld [vmem:[#allocation4 + $0x1a0] sm:$0xff]  ;;  %v3845_v10 = vsub.f32 %v3781_v36, %v3813_v24  ;;  %4930 = vlog2.f32 %v3472_v8  ;;  %v4925_v42 = vpop.eup %4924  ;;  %v3940_v9 = vsel %vm3908_vm15, %v3876_v5, 0.0  ;;  %v3847_v25 = vsub.f32 %v3783_v34, %v3815_v20  ;;  %v3404_v53 = vld [vmem:[#allocation2 + $0xb8] sm:$0xff]  ;;  %v3506_v57 = vld [vmem:[#allocation3 + $0x1e8] sm:$0xff] }
 0x94b   :  { %3369 = vst.msk [vmem:[#allocation4 + $0x1b8] sm:$0xff] %vm20_vm11, %v3305_v58  ;;  %v3817_v63 = vsub.f32 %v3753_v49, %v3689_v45  ;;  %v4927_v33 = vpop.eup %4926  ;;  %v3660_v58 = vadd.f32 %v3556_v51, %v3404_v53  ;;  %v3692_v50 = vadd.f32 %v3620_v43, %v3436_v22  ;;  %v3434_v4 = vld [vmem:[#allocation2 + $0x1a8] sm:$0xff]  ;;  %4932 = vlog2.f32 %v3470_v6  ;;  %v3504_v7 = vld [vmem:[#allocation3 + $0x1d8] sm:$0xff]  ;;  %v2768_v49 = vld [vmem:[#allocation4 + $0x1f0] sm:$0xff] }
 0x94c   :  { %v3877_v3 = vmul.f32 0.1, %v3845_v10  ;;  %v3754_v35 = vld [vmem:[#allocation4 + $0x1a8] sm:$0xff]  ;;  %v3784_v12 = vsub.f32 %v3720_v61, %v8129_v41  ;;  %v3690_v48 = vadd.f32 %v3616_v21, %v3434_v4  ;;  %4934 = vlog2.f32 %v3474_v11  ;;  %v4971_v51 = vld [vmem:[%s8253_s0 + $0x90] sm:$0xff]  ;;  %v4972_v8 = vld [vmem:[%s8253_s0 + $0x98] sm:$0xff] }
 0x94d   :  { %v3849_v30 = vsub.f32 %v3785_v55, %v3817_v63  ;;  %v3222_v47 = vpop.xlane.xlu2 %3221  ;;  %v3788_v45 = vsub.f32 %v3724_v40, %v3660_v58  ;;  %v3722_v36 = vld [vmem:[#allocation4 + $0xa8] sm:$0xff]  ;;  %v3562_v24 = vmul.f32 0.6931472, %v4925_v42  ;;  %4936 = vlog2.f32 %v3506_v57  ;;  %v4973_v43 = vld [vmem:[%s8253_s0 + $0xb8] sm:$0xff]  ;;  %v3505_v32 = vld [vmem:[#allocation3 + $0x1e0] sm:$0xff] }
 0x94e   :  { %v3237_v59 = vpop.xlane.xlu0 %3236  ;;  %v3304_v60 = vadd.f32 %v3222_v47, %v2760_v15  ;;  %v3941_v37 = vsel %vm3909_vm0, %v3877_v3, 0.0  ;;  %v4929_v52 = vpop.eup %4928  ;;  %v2763_v1 = vld [vmem:[#allocation4 + $0x1c8] sm:$0xff]  ;;  %v3879_v27 = vmul.f32 0.1, %v3847_v25  ;;  %v3818_v63 = vsub.f32 %v3754_v35, %v3690_v48  ;;  %v3403_v15 = vld [vmem:[#allocation2 + $0xb0] sm:$0xff]  ;;  %v3473_v6 = vld [vmem:[#allocation3 + $0xe0] sm:$0xff] }
 0x94f   :  { %v3309_v39 = vadd.f32 %v3237_v59, %v2765_v44  ;;  %v3881_v46 = vmul.f32 0.1, %v3849_v30  ;;  %4034 = vperm.xlu0 %4439, %v3940_v9   ;;  %4039 = vperm.xlu1 %4437, %v3941_v37   ;;  %v3752_v54 = vld [vmem:[#allocation4 + $0x198] sm:$0xff]  ;;  %v3626_v41 = vmul.f32 0.6931472, %v4927_v33  ;;  %vm3911_vm5 = vcmp.ge.s32.totalorder %v4971_v51, 0 }
 0x950   :  { %v3234_v2 = vpop.xlane.xlu1 %3233  ;;  %3368 = vst.msk [vmem:[#allocation4 + $0x1b0] sm:$0xff] %vm20_vm11, %v3304_v60  ;;  %v3816_v18 = vsub.f32 %v3752_v54, %v8084_v28  ;;  %v8189_v13 = vpop.eup %4930  ;;  %v2767_v28 = vld [vmem:[#allocation4 + $0x1e8] sm:$0xff]  ;;  %vm3912_vm2 = vcmp.ge.s32.totalorder %v4972_v8, 0  ;;  %4938 = vlog2.f32 %v3504_v7  ;;  %vm3916_vm6 = vcmp.ge.s32.totalorder %v4973_v43, 0  ;;  %v3723_v21 = vld [vmem:[#allocation4 + $0xb0] sm:$0xff]  ;;  %v3437_v25 = vld [vmem:[#allocation2 + $0x1c0] sm:$0xff] }
 0x951   :  { %v3308_v19 = vadd.f32 %v3234_v2, %v2764_v56  ;;  %3373 = vst.msk [vmem:[#allocation4 + $0x1d8] sm:$0xff] %vm20_vm11, %v3309_v39  ;;  %v3945_v0 = vsel %vm3913_vm7, %v3881_v46, 0.0  ;;  %v3786_v56 = vsub.f32 %v3722_v36, %v8117_v17  ;;  %v3622_v31 = vmul.f32 0.6931472, %v4929_v52  ;;  %v4933_v30 = vpop.eup %4932  ;;  %v3407_v22 = vld [vmem:[#allocation2 + $0xd0] sm:$0xff]  ;;  %v3757_v53 = vld [vmem:[#allocation4 + $0x1c0] sm:$0xff] }
 0x952   :  { %4059 = vperm.xlu2 %4438, %v3945_v0   ;;  %v3756_v26 = vld [vmem:[#allocation4 + $0x1b8] sm:$0xff]  ;;  %v3848_v55 = vsub.f32 %v3784_v12, %v3816_v18  ;;  %v3659_v34 = vadd.f32 %v8167_v38, %v3403_v15  ;;  %v4935_v39 = vpop.eup %4934  ;;  %v3943_v2 = vsel %vm3911_vm5, %v3879_v27, 0.0  ;;  %v3439_v17 = vld [vmem:[#allocation2 + $0x1d0] sm:$0xff]  ;;  %v3663_v9 = vadd.f32 %v3562_v24, %v3407_v22  ;;  %v3725_v35 = vld [vmem:[#allocation4 + $0xc0] sm:$0xff] }
 0x953   :  { %3372 = vst.msk [vmem:[#allocation4 + $0x1d0] sm:$0xff] %vm20_vm11, %v3308_v19  ;;  %v3820_v16 = vsub.f32 %v3756_v26, %v3692_v50  ;;  %v3850_v61 = vsub.f32 %v3786_v56, %v3818_v63  ;;  %v3727_v11 = vld [vmem:[#allocation4 + $0xd0] sm:$0xff]  ;;  %v4937_v42 = vpop.eup %4936  ;;  %v3695_v37 = vadd.f32 %v3626_v41, %v3439_v17  ;;  %4940 = vlog2.f32 %v3505_v32  ;;  %v2766_v26 = vld [vmem:[#allocation4 + $0x1e0] sm:$0xff]  ;;  %v3726_v15 = vld [vmem:[#allocation4 + $0xc8] sm:$0xff] }
 0x954   :  { %v3880_v20 = vmul.f32 0.1, %v3848_v55  ;;  %v3787_v40 = vsub.f32 %v3723_v21, %v3659_v34  ;;  %v3693_v0 = vadd.f32 %v3622_v31, %v3437_v25  ;;  %4942 = vlog2.f32 %v3473_v6  ;;  %v3507_v54 = vld [vmem:[#allocation3 + $0x1f0] sm:$0xff]  ;;  %v3440_v34 = vld [vmem:[#allocation2 + $0x1d8] sm:$0xff] }
 0x955   :  { %v3852_v44 = vsub.f32 %v3788_v45, %v3820_v16  ;;  %v3231_v10 = vpop.xlane.xlu2 %3230  ;;  %v3791_v50 = vsub.f32 %v3727_v11, %v3663_v9  ;;  %v3560_v12 = vmul.f32 0.6931472, %v4933_v30  ;;  %v3568_v18 = vmul.f32 0.6931472, %v4935_v39  ;;  %v3475_v16 = vld [vmem:[#allocation3 + $0xf0] sm:$0xff]  ;;  %v3410_v30 = vld [vmem:[#allocation2 + $0xe8] sm:$0xff] }
 0x956   :  { %v3246_v5 = vpop.xlane.xlu0 %3245  ;;  %v3307_v47 = vadd.f32 %v3231_v10, %v2763_v1  ;;  %v3944_v46 = vsel %vm3912_vm2, %v3880_v20, 0.0  ;;  %v4939_v58 = vpop.eup %4938  ;;  %v3882_v48 = vmul.f32 0.1, %v3850_v61  ;;  %v3821_v52 = vsub.f32 %v3757_v53, %v3693_v0  ;;  %v4975_v36 = vld [vmem:[%s8253_s0 + $0xb0] sm:$0xff]  ;;  %v3476_v10 = vld [vmem:[#allocation3 + $0xf8] sm:$0xff]  ;;  %v3409_v0 = vld [vmem:[#allocation2 + $0xe0] sm:$0xff] }
 0x957   :  { %v3312_v59 = vadd.f32 %v3246_v5, %v2768_v49  ;;  %v3884_v62 = vmul.f32 0.1, %v3852_v44  ;;  %4049 = vperm.xlu0 %4439, %v3943_v2   ;;  %4054 = vperm.xlu1 %4437, %v3944_v46   ;;  %v3755_v38 = vld [vmem:[#allocation4 + $0x1b0] sm:$0xff]  ;;  %v3632_v45 = vmul.f32 0.6931472, %v4937_v42  ;;  %vm3915_vm9 = vcmp.ge.s32.totalorder %v4975_v36, 0 }
 0x958   :  { %v3243_v3 = vpop.xlane.xlu1 %3242  ;;  %3371 = vst.msk [vmem:[#allocation4 + $0x1c8] sm:$0xff] %vm20_vm11, %v3307_v47  ;;  %v3819_v57 = vsub.f32 %v3755_v38, %v8131_v14  ;;  %v4974_v14 = vld [vmem:[%s8253_s0 + $0xa8] sm:$0xff]  ;;  %4944 = vlog2.f32 %v3507_v54  ;;  %v4976_v55 = vld [vmem:[%s8253_s0 + $0xd0] sm:$0xff]  ;;  %v3789_v63 = vsub.f32 %v3725_v35, %v8156_v23  ;;  %v3628_v41 = vmul.f32 0.6931472, %v4939_v58  ;;  %v3760_v21 = vld [vmem:[#allocation4 + $0x1d8] sm:$0xff] }
 0x959   :  { %v3311_v60 = vadd.f32 %v3243_v3, %v2767_v28  ;;  %3376 = vst.msk [vmem:[#allocation4 + $0x1f0] sm:$0xff] %vm20_vm11, %v3312_v59  ;;  %v3948_v19 = vsel %vm3916_vm6, %v3884_v62, 0.0  ;;  %vm3914_vm1 = vcmp.ge.s32.totalorder %v4974_v14, 0  ;;  %v3406_v49 = vld [vmem:[#allocation2 + $0xc8] sm:$0xff]  ;;  %vm3919_vm10 = vcmp.ge.s32.totalorder %v4976_v55, 0  ;;  %v3508_v28 = vld [vmem:[#allocation3 + $0x1f8] sm:$0xff]  ;;  %v4941_v51 = vpop.eup %4940 }
 0x95a   :  { %4074 = vperm.xlu2 %4438, %v3948_v19   ;;  %v3759_v33 = vld [vmem:[#allocation4 + $0x1d0] sm:$0xff]  ;;  %v3851_v7 = vsub.f32 %v3787_v40, %v3819_v57  ;;  %v3564_v5 = vmul.f32 0.6931472, %v8189_v13  ;;  %4946 = vlog2.f32 %v3475_v16  ;;  %v4943_v20 = vpop.eup %4942  ;;  %v3946_v43 = vsel %vm3914_vm1, %v3882_v48, 0.0  ;;  %v3442_v59 = vld [vmem:[#allocation2 + $0x1e8] sm:$0xff]  ;;  %v3408_v17 = vld [vmem:[#allocation2 + $0xd8] sm:$0xff] }
 0x95b   :  { %3375 = vst.msk [vmem:[#allocation4 + $0x1e8] sm:$0xff] %vm20_vm11, %v3311_v60  ;;  %v3823_v4 = vsub.f32 %v3759_v33, %v3695_v37  ;;  %v3853_v31 = vsub.f32 %v3789_v63, %v3821_v52  ;;  %v3662_v32 = vadd.f32 %v3560_v12, %v3406_v49  ;;  %v3730_v23 = vld [vmem:[#allocation4 + $0xe8] sm:$0xff]  ;;  %v3666_v13 = vadd.f32 %v3568_v18, %v3410_v30  ;;  %v3728_v11 = vld [vmem:[#allocation4 + $0xd8] sm:$0xff]  ;;  %v3441_v54 = vld [vmem:[#allocation2 + $0x1e0] sm:$0xff] }
 0x95c   :  { %v3883_v27 = vmul.f32 0.1, %v3851_v7  ;;  %v3698_v62 = vadd.f32 %v3632_v45, %v3442_v59  ;;  %4948 = vlog2.f32 %v3508_v28  ;;  %v3696_v2 = vadd.f32 %v3628_v41, %v3440_v34  ;;  %v2769_v38 = vld [vmem:[#allocation4 + $0x1f8] sm:$0xff]  ;;  %v4978_v57 = vld [vmem:[%s8253_s0 + $0xc8] sm:$0xff]  ;;  %v3729_v12 = vld [vmem:[#allocation4 + $0xe0] sm:$0xff] }
 0x95d   :  { %v3855_v24 = vsub.f32 %v3791_v50, %v3823_v4  ;;  %v3240_v1 = vpop.xlane.xlu2 %3239  ;;  %v3790_v6 = vsub.f32 %v3726_v15, %v3662_v32  ;;  %4950 = vlog2.f32 %v3476_v10  ;;  %v3794_v61 = vsub.f32 %v3730_v23, %v3666_v13  ;;  %v4979_v4 = vld [vmem:[%s8253_s0 + $0xe8] sm:$0xff]  ;;  %v3443_v41 = vld [vmem:[#allocation2 + $0x1f0] sm:$0xff]  ;;  %v4981_v32 = vld [vmem:[%s8253_s0 + $0xd8] sm:$0xff] }
 0x95e   :  { %v3310_v8 = vadd.f32 %v3240_v1, %v2766_v26  ;;  %v3947_v56 = vsel %vm3915_vm9, %v3883_v27, 0.0  ;;  %v4945_v46 = vpop.eup %4944  ;;  %v3566_v42 = vmul.f32 0.6931472, %v4943_v20  ;;  %v3630_v19 = vmul.f32 0.6931472, %v4941_v51  ;;  %v3731_v15 = vld [vmem:[#allocation4 + $0xf0] sm:$0xff] }
 0x95f   :  { %v3887_v44 = vmul.f32 0.1, %v3855_v24  ;;  %4064 = vperm.xlu0 %4439, %v3946_v43   ;;  %4069 = vperm.xlu1 %4437, %v3947_v56   ;;  %v3758_v3 = vld [vmem:[#allocation4 + $0x1c8] sm:$0xff]  ;;  %v3885_v9 = vmul.f32 0.1, %v3853_v31  ;;  %v3664_v25 = vadd.f32 %v3564_v5, %v3408_v17  ;;  %v3824_v53 = vsub.f32 %v3760_v21, %v3696_v2  ;;  %v4980_v43 = vld [vmem:[%s8253_s0 + $0xe0] sm:$0xff] }
 0x960   :  { %3374 = vst.msk [vmem:[#allocation4 + $0x1e0] sm:$0xff] %vm20_vm11, %v3310_v8  ;;  %v3822_v39 = vsub.f32 %v3758_v3, %v8162_v29  ;;  %v4947_v40 = vpop.eup %4946  ;;  %v4977_v29 = vld [vmem:[%s8253_s0 + $0xc0] sm:$0xff]  ;;  %vm3918_vm8 = vcmp.ge.s32.totalorder %v4978_v57, 0  ;;  %vm3922_vm4 = vcmp.ge.s32.totalorder %v4979_v4, 0  ;;  %v3634_v18 = vmul.f32 0.6931472, %v4945_v46 }
 0x961   :  { %v3951_v47 = vsel %vm3919_vm10, %v3887_v44, 0.0  ;;  %vm3917_vm3 = vcmp.ge.s32.totalorder %v4977_v29, 0  ;;  %v3792_v35 = vsub.f32 %v3728_v11, %v3664_v25  ;;  %v3665_v52 = vadd.f32 %v3566_v42, %v3409_v0  ;;  %v3763_v28 = vld [vmem:[#allocation4 + $0x1f0] sm:$0xff]  ;;  %v3412_v23 = vld [vmem:[#allocation2 + $0xf8] sm:$0xff] }
 0x962   :  { %4089 = vperm.xlu2 %4438, %v3951_v47   ;;  %v3762_v60 = vld [vmem:[#allocation4 + $0x1e8] sm:$0xff]  ;;  %v3854_v37 = vsub.f32 %v3790_v6, %v3822_v39  ;;  %v4949_v26 = vpop.eup %4948  ;;  %v3697_v45 = vadd.f32 %v3630_v19, %v3441_v54  ;;  %v3949_v14 = vsel %vm3917_vm3, %v3885_v9, 0.0  ;;  %v3570_v1 = vmul.f32 0.6931472, %v4947_v40  ;;  %v3411_v44 = vld [vmem:[#allocation2 + $0xf0] sm:$0xff]  ;;  %v3444_v47 = vld [vmem:[#allocation2 + $0x1f8] sm:$0xff] }
 0x963   :  { %v3826_v22 = vsub.f32 %v3762_v60, %v3698_v62  ;;  %v4951_v16 = vpop.eup %4950  ;;  %v3856_v24 = vsub.f32 %v3792_v35, %v3824_v53  ;;  %v3793_v55 = vsub.f32 %v3729_v12, %v3665_v52  ;;  %v3699_v51 = vadd.f32 %v3634_v18, %v3443_v41  ;;  %v3732_v3 = vld [vmem:[#allocation4 + $0xf8] sm:$0xff]  ;;  %v4983_v17 = vld [vmem:[%s8253_s0 + $0xf0] sm:$0xff] }
 0x964   :  { %v3886_v50 = vmul.f32 0.1, %v3854_v37  ;;  %v3572_v5 = vmul.f32 0.6931472, %v4951_v16  ;;  %v3636_v10 = vmul.f32 0.6931472, %v4949_v26  ;;  %v3667_v56 = vadd.f32 %v3570_v1, %v3411_v44 }
 0x965   :  { %v3858_v33 = vsub.f32 %v3794_v61, %v3826_v22  ;;  %v3249_v58 = vpop.xlane.xlu2 %3248  ;;  %v3888_v20 = vmul.f32 0.1, %v3856_v24  ;;  %v3827_v31 = vsub.f32 %v3763_v28, %v3699_v51  ;;  %vm3920_vm12 = vcmp.ge.s32.totalorder %v4981_v32, 0  ;;  %v4982_v22 = vld [vmem:[%s8253_s0 + $0xf8] sm:$0xff]  ;;  %s5013_s0 = smov [#allocation5]  }
 0x966   :  { %v3313_v48 = vadd.f32 %v3249_v58, %v2769_v38  ;;  %v3950_v36 = vsel %vm3918_vm8, %v3886_v50, 0.0  ;;  %v3795_v59 = vsub.f32 %v3731_v15, %v3667_v56  ;;  %v3668_v62 = vadd.f32 %v3572_v5, %v3412_v23  ;;  %s4153_s8 = sshll.u32 %s5013_s0, 4  ;;  %s4154_s8 = int_to_ptr.vmem [resolvable:$true] %s4153_s8 }
 0x967   :  { %v3890_v7 = vmul.f32 0.1, %v3858_v33  ;;  %v3761_v49 = vld [vmem:[#allocation4 + $0x1e0] sm:$0xff]  ;;  %4079 = vperm.xlu0 %4439, %v3949_v14   ;;  %4084 = vperm.xlu1 %4437, %v3950_v36   ;;  %v3700_v34 = vadd.f32 %v3636_v10, %v3444_v47  ;;  %v3952_v21 = vsel %vm3920_vm12, %v3888_v20, 0.0  ;;  %vm3924_vm13 = vcmp.ge.s32.totalorder %v4982_v22, 0 }
 0x968   :  { %3377 = vst.msk [vmem:[#allocation4 + $0x1f8] sm:$0xff] %vm20_vm11, %v3313_v48  ;;  %v3825_v63 = vsub.f32 %v3761_v49, %v3697_v45  ;;  %vm3921_vm11 = vcmp.ge.s32.totalorder %v4980_v43, 0  ;;  %v3859_v6 = vsub.f32 %v3795_v59, %v3827_v31  ;;  %v3796_v60 = vsub.f32 %v3732_v3, %v3668_v62 }
 0x969   :  { %v3954_v27 = vsel %vm3922_vm4, %v3890_v7, 0.0  ;;  %vm3923_vm14 = vcmp.ge.s32.totalorder %v4983_v17, 0 }
 0x96a   :  { %4104 = vperm.xlu2 %4438, %v3954_v27   ;;  %v3857_v8 = vsub.f32 %v3793_v55, %v3825_v63  ;;  %v3891_v61 = vmul.f32 0.1, %v3859_v6 }
 0x96c   :  { %v3889_v30 = vmul.f32 0.1, %v3857_v8  ;;  %v3955_v19 = vsel %vm3923_vm14, %v3891_v61, 0.0 }
 0x96e   :  { %v3953_v13 = vsel %vm3921_vm11, %v3889_v30, 0.0 }
 0x96f   :  { %v3764_v39 = vld [vmem:[#allocation4 + $0x1f8] sm:$0xff]  ;;  %4094 = vperm.xlu0 %4439, %v3952_v21   ;;  %4099 = vperm.xlu1 %4437, %v3953_v13  }
 0x970   :  { %v3828_v2 = vsub.f32 %v3764_v39, %v3700_v34 }
 0x972   :  { %v3860_v46 = vsub.f32 %v3796_v60, %v3828_v2 }
 0x974   :  { %v3892_v11 = vmul.f32 0.1, %v3860_v46 }
 0x976   :  { %v3956_v42 = vsel %vm3924_vm13, %v3892_v11, 0.0 }
 0x977   :  { %4109 = vperm.xlu0 %4439, %v3955_v19   ;;  %4114 = vperm.xlu1 %4437, %v3956_v42  }
 0x97c   :  { %v3970_v38 = vpop.permute.xlu2 %3969 }
 0x97d   :  { %4119 = vst [vmem:[#allocation5 + $0x10] sm:$0xff] %v3970_v38 }
 0x984   :  { %v3985_v9 = vpop.permute.xlu2 %3984 }
 0x985   :  { %4122 = vst [vmem:[#allocation5 + $0x28] sm:$0xff] %v3985_v9 }
 0x98a   :  { %v3960_v37 = vpop.permute.xlu1 %3959 }
 0x98b   :  { %4117 = vst [vmem:[#allocation5] sm:$0xff] %v3960_v37 }
 0x98c   :  { %v4000_v25 = vpop.permute.xlu2 %3999 }
 0x98d   :  { %4125 = vst [vmem:[#allocation5 + $0x40] sm:$0xff] %v4000_v25 }
 0x994   :  { %v4015_v53 = vpop.permute.xlu2 %4014 }
 0x995   :  { %4128 = vst [vmem:[#allocation5 + $0x58] sm:$0xff] %v4015_v53 }
 0x999   :  { %v3965_v40 = vpop.permute.xlu0 %3964 }
 0x99a   :  { %4118 = vst [vmem:[#allocation5 + $0x8] sm:$0xff] %v3965_v40 }
 0x99c   :  { %v4030_v29 = vpop.permute.xlu2 %4029 }
 0x99d   :  { %4131 = vst [vmem:[#allocation5 + $0x70] sm:$0xff] %v4030_v29 }
 0x9a1   :  { %v3975_v57 = vpop.permute.xlu0 %3974  ;;  %v3980_v33 = vpop.permute.xlu1 %3979 }
 0x9a2   :  { %4120 = vst [vmem:[#allocation5 + $0x18] sm:$0xff] %v3975_v57 }
 0x9a3   :  { %4121 = vst [vmem:[#allocation5 + $0x20] sm:$0xff] %v3980_v33 }
 0x9a4   :  { %v4045_v0 = vpop.permute.xlu2 %4044 }
 0x9a5   :  { %4134 = vst [vmem:[#allocation5 + $0x88] sm:$0xff] %v4045_v0 }
 0x9a9   :  { %v3990_v54 = vpop.permute.xlu0 %3989  ;;  %v3995_v58 = vpop.permute.xlu1 %3994 }
 0x9aa   :  { %4123 = vst [vmem:[#allocation5 + $0x30] sm:$0xff] %v3990_v54 }
 0x9ab   :  { %4124 = vst [vmem:[#allocation5 + $0x38] sm:$0xff] %v3995_v58 }
 0x9ac   :  { %v4060_v50 = vpop.permute.xlu2 %4059 }
 0x9ad   :  { %4137 = vst [vmem:[#allocation5 + $0xa0] sm:$0xff] %v4060_v50 }
 0x9b1   :  { %v4005_v4 = vpop.permute.xlu0 %4004  ;;  %v4010_v35 = vpop.permute.xlu1 %4009 }
 0x9b2   :  { %4126 = vst [vmem:[#allocation5 + $0x48] sm:$0xff] %v4005_v4 }
 0x9b3   :  { %4127 = vst [vmem:[#allocation5 + $0x50] sm:$0xff] %v4010_v35 }
 0x9b4   :  { %v4075_v12 = vpop.permute.xlu2 %4074 }
 0x9b5   :  { %4140 = vst [vmem:[#allocation5 + $0xb8] sm:$0xff] %v4075_v12 }
 0x9b9   :  { %v4020_v18 = vpop.permute.xlu0 %4019  ;;  %v4025_v26 = vpop.permute.xlu1 %4024 }
 0x9ba   :  { %4129 = vst [vmem:[#allocation5 + $0x60] sm:$0xff] %v4020_v18 }
 0x9bb   :  { %4130 = vst [vmem:[#allocation5 + $0x68] sm:$0xff] %v4025_v26 }
 0x9bc   :  { %v4090_v48 = vpop.permute.xlu2 %4089 }
 0x9bd   :  { %4143 = vst [vmem:[#allocation5 + $0xd0] sm:$0xff] %v4090_v48 }
 0x9c1   :  { %v4035_v7 = vpop.permute.xlu0 %4034  ;;  %v4040_v52 = vpop.permute.xlu1 %4039 }
 0x9c2   :  { %4132 = vst [vmem:[#allocation5 + $0x78] sm:$0xff] %v4035_v7 }
 0x9c3   :  { %4133 = vst [vmem:[#allocation5 + $0x80] sm:$0xff] %v4040_v52 }
 0x9c4   :  { %v4105_v45 = vpop.permute.xlu2 %4104 }
 0x9c5   :  { %4146 = vst [vmem:[#allocation5 + $0xe8] sm:$0xff] %v4105_v45 }
 0x9c9   :  { %v4050_v16 = vpop.permute.xlu0 %4049  ;;  %v4055_v14 = vpop.permute.xlu1 %4054 }
 0x9ca   :  { %4135 = vst [vmem:[#allocation5 + $0x90] sm:$0xff] %v4050_v16 }
 0x9cb   :  { %4136 = vst [vmem:[#allocation5 + $0x98] sm:$0xff] %v4055_v14 }
 0x9d1   :  { %v4065_v36 = vpop.permute.xlu0 %4064  ;;  %v4070_v24 = vpop.permute.xlu1 %4069 }
 0x9d2   :  { %4138 = vst [vmem:[#allocation5 + $0xa8] sm:$0xff] %v4065_v36 }
 0x9d3   :  { %4139 = vst [vmem:[#allocation5 + $0xb0] sm:$0xff] %v4070_v24 }
 0x9d9   :  { %v4080_v49 = vpop.permute.xlu0 %4079  ;;  %v4085_v1 = vpop.permute.xlu1 %4084 }
 0x9da   :  { %4141 = vst [vmem:[#allocation5 + $0xc0] sm:$0xff] %v4080_v49 }
 0x9db   :  { %4142 = vst [vmem:[#allocation5 + $0xc8] sm:$0xff] %v4085_v1 }
 0x9e1   :  { %v4095_v27 = vpop.permute.xlu0 %4094  ;;  %v4100_v55 = vpop.permute.xlu1 %4099 }
 0x9e2   :  { %4144 = vst [vmem:[#allocation5 + $0xd8] sm:$0xff] %v4095_v27 }
 0x9e3   :  { %4145 = vst [vmem:[#allocation5 + $0xe0] sm:$0xff] %v4100_v55 }
 0x9e9   :  { %v4110_v63 = vpop.permute.xlu0 %4109  ;;  %v4115_v41 = vpop.permute.xlu1 %4114 }
 0x9ea   :  { %4147 = vst [vmem:[#allocation5 + $0xf0] sm:$0xff] %v4110_v63 }
 0x9eb   :  { %4148 = vst [vmem:[#allocation5 + $0xf8] sm:$0xff] %v4115_v41 }
 0x9ec   :  { %4161 = dma.vmem_to_hbm [thread:$0]  %s4154_s8, 4096, %s4156_s11, [#allocation6], %s5014_s12, %s5014_s12, %s5015_s13  }
 0x9ed   :  { %5008 = dma.done.wait [#allocation6], 4096  }
 0x9ee   :  { %5009 = vsyncadd [#allocation6], 4294963200 }
 0x9ef   :  { %4166 = vsyncpa [#allocation6], 1 }

</bundles_post_ra>
